<compile_context>
chip_gen: v7x
topology: tpu7x:2x2x1
jax: 0.10.0
libtpu: 0.0.40
codegen_flags: <defaults>
</compile_context>

<pallas_src>
import math

import numpy as np

import jax
import jax.numpy as jnp
from jax.experimental import pallas as pl
from jax.experimental.pallas import tpu as pltpu


def _mapping_kernel(w_ref, p_ref, x_ref, o_ref):
    """One row-tile of the folded sin/cos positional embedding.

    w_ref : (k*C, k*out_c) block-diagonal selection*frequency matrix (f32)
    p_ref : (1,  k*out_c)  per-column phase (0 for sin cols, +pi/2 for cos cols)
    x_ref : (tb, k*C)      folded input rows (k original rows per kernel row)
    o_ref : (tb, k*out_c)  folded output rows
    """
    x = x_ref[...].astype(jnp.float32)
    # Channel replication + per-column frequency on the (otherwise idle) MXU.
    arg = jnp.dot(
        x,
        w_ref[...],
        precision=jax.lax.Precision.HIGHEST,
        preferred_element_type=jnp.float32,
    )
    arg = arg + p_ref[...]
    o_ref[...] = jnp.sin(arg).astype(o_ref.dtype)


def mapping_forward(x, mapping_size, *, logscale=True, block_rows=None,
                    out_dtype=None):
    """Pallas equivalent of Mapping(mapping_size, in_size).forward(x).

    x: (B, C) float array.
    Returns: (B, C * 2 * mapping_size), same column order as the torch module.
    Pass out_dtype=jnp.bfloat16 on HBM-bound v5e/v6e to halve output traffic.
    """
    B, C = x.shape
    n_freqs = int(mapping_size)
    out_c = C * 2 * n_freqs
    out_dtype = jnp.dtype(x.dtype if out_dtype is None else out_dtype)

    # Frequency bands are compile-time Python/numpy constants (jit-safe).
    if logscale:
        freqs = np.asarray([2.0 ** i for i in range(n_freqs)], np.float32)
    else:
        freqs = np.linspace(1.0, 2.0 ** (n_freqs - 1), n_freqs).astype(np.float32)

    # ---- lane-dense fold factor: smallest k with (k * out_c) % 128 == 0.
    k = 128 // math.gcd(out_c, 128)
    kC, kO = k * C, k * out_c

    # Per-output-column frequency / phase inside one original row.
    # Column layout: [sin(f0 x) | cos(f0 x) | sin(f1 x) | cos(f1 x) | ...],
    # each block C wide (matches the torch loop order exactly).
    coef_row = np.repeat(freqs, 2 * C)                              # (out_c,)
    phase_row = np.tile(
        np.concatenate([np.zeros(C, np.float32),
                        np.full(C, np.pi / 2.0, np.float32)]),
        n_freqs)                                                    # (out_c,)

    # Block-diagonal selection * frequency matrix: arg = x_fold @ W + phase.
    j = np.arange(out_c)
    W = np.zeros((kC, kO), np.float32)
    for q in range(k):
        W[q * C + (j % C), q * out_c + j] = coef_row
    phase = np.tile(phase_row, k)[None, :].astype(np.float32)       # (1, kO)

    # Pad the batch to a multiple of the fold factor, then fold (contiguous
    # reshape -> free; the padded rows are sliced off at the end).
    Bp = -(-B // k) * k
    xf = x if Bp == B else jnp.pad(x, ((0, Bp - B), (0, 0)))
    R = Bp // k
    xf = xf.reshape(R, kC)

    # ---- row tile (in folded rows): as large as a conservative VMEM budget
    # allows (accounts for input + f32 intermediate + output per row).
    in_item = jnp.dtype(x.dtype).itemsize
    out_item = out_dtype.itemsize
    if block_rows is None:
        bytes_per_row = in_item * kC + 4 * kO + out_item * kO
        tb = (6 << 20) // max(bytes_per_row, 1)       # ~6 MiB in+tmp+out tile
        tb = max(8, min(tb, 2048))
    else:
        tb = int(block_rows)
    tb = min(tb, R)
    if tb < R:
        tb = max(8, (tb // 8) * 8)                    # sublane-aligned tile
    if block_rows is None:
        # v7x megacore + pipeline depth: keep >= 4 grid steps when there are
        # enough folded rows (>= 2 per TensorCore), >= 2 when possible.
        if R >= 32:
            min_steps = 4
        elif R >= 16:
            min_steps = 2
        else:
            min_steps = 1
        if min_steps > 1:
            cap = max(8, ((-(-R // min_steps)) // 8) * 8)
            tb = min(tb, cap)

    grid = (pl.cdiv(R, tb),)

    cost = pl.CostEstimate(
        flops=int(2 * R * kC * kO),
        transcendentals=int(R * kO),
        bytes_accessed=int(in_item * Bp * C + 4 * (W.size + phase.size)
                           + out_item * R * kO),
    )

    out = pl.pallas_call(
        _mapping_kernel,
        out_shape=jax.ShapeDtypeStruct((R, kO), out_dtype),
        grid_spec=pltpu.PrefetchScalarGridSpec(
            num_scalar_prefetch=0,
            grid=grid,
            in_specs=[
                pl.BlockSpec((kC, kO), lambda i: (0, 0)),   # W: DMA'd once
                pl.BlockSpec((1, kO), lambda i: (0, 0)),    # phase: DMA'd once
                pl.BlockSpec((tb, kC), lambda i: (i, 0)),   # folded input rows
            ],
            out_specs=pl.BlockSpec((tb, kO), lambda i: (i, 0)),
        ),
        compiler_params=pltpu.CompilerParams(
            dimension_semantics=("parallel",),
        ),
        cost_estimate=cost,
    )(jnp.asarray(W), jnp.asarray(phase), xf)

    out = out.reshape(Bp, out_c)                       # contiguous unfold: free
    if Bp != B:
        out = out[:B]
    return out


def mapping_reference(x, mapping_size, logscale=True):
    """Pure-JAX reference matching the PyTorch forward exactly."""
    n_freqs = int(mapping_size)
    if logscale:
        freqs = [2.0 ** i for i in range(n_freqs)]
    else:
        freqs = [float(f) for f in np.linspace(1.0, 2.0 ** (n_freqs - 1), n_freqs)]
    xf = x.astype(jnp.float32)
    cols = []
    for f in freqs:
        cols.append(jnp.sin(f * xf))
        cols.append(jnp.cos(f * xf))
    return jnp.concatenate(cols, axis=-1).astype(x.dtype)


if __name__ == "__main__":
    key = jax.random.PRNGKey(0)
    k1, k2, k3 = jax.random.split(key, 3)

    # 1) NeRF-typical: xyz coords in [-1, 1], 10 log-spaced frequencies.
    #    out_c = 60 -> fold factor 32 -> 1920-lane (fully dense) output rows.
    B, C, N = 256, 3, 10
    x = jax.random.uniform(k1, (B, C), jnp.float32, minval=-1.0, maxval=1.0)
    out = jax.block_until_ready(mapping_forward(x, N, logscale=True))
    ref = mapping_reference(x, N, logscale=True)
    assert out.shape == (B, C * 2 * N), out.shape
    assert jnp.allclose(out, ref, atol=2e-4, rtol=0.0), \
        float(jnp.max(jnp.abs(out - ref)))

    # 2) Linear (non-log) frequency bands + row count that leaves a partial
    #    last grid block (exercises Pallas boundary masking).
    B2, C2, N2 = 100, 4, 4
    x2 = jax.random.uniform(k2, (B2, C2), jnp.float32, minval=-1.0, maxval=1.0)
    out2 = jax.block_until_ready(mapping_forward(x2, N2, logscale=False))
    ref2 = mapping_reference(x2, N2, logscale=False)
    assert out2.shape == (B2, C2 * 2 * N2), out2.shape
    assert jnp.allclose(out2, ref2, atol=2e-4, rtol=0.0), \
        float(jnp.max(jnp.abs(out2 - ref2)))

    # 3) Batch not a multiple of the fold factor (padding path), multi-step
    #    grid, and the bf16 store recommended for HBM-bound v5e/v6e.
    B3, C3, N3 = 1000, 3, 10
    x3 = jax.random.uniform(k3, (B3, C3), jnp.float32, minval=-1.0, maxval=1.0)
    out3 = jax.block_until_ready(
        mapping_forward(x3, N3, logscale=True, out_dtype=jnp.bfloat16,
                        block_rows=8))
    ref3 = mapping_reference(x3, N3, logscale=True)
    assert out3.shape == (B3, C3 * 2 * N3), out3.shape
    assert jnp.allclose(out3.astype(jnp.float32), ref3, atol=8e-3, rtol=0.0), \
        float(jnp.max(jnp.abs(out3.astype(jnp.float32) - ref3)))

    print("KERNEL_OK")
</pallas_src>

<mosaic_0001>
module attributes {stable_mosaic.version = 11 : i64} {
  func.func @_mapping_kernel(%arg0: i32, %arg1: memref<96x1920xf32, #tpu.memory_space<vmem>>, %arg2: memref<1x1920xf32, #tpu.memory_space<vmem>>, %arg3: memref<8x96xf32, #tpu.memory_space<vmem>>, %arg4: memref<8x1920xf32, #tpu.memory_space<vmem>>) attributes {dimension_semantics = [#tpu.dimension_semantics<parallel>], iteration_bounds = array<i64: 1>, scalar_prefetch = 0 : i64, scratch_operands = 0 : i64, tpu.core_type = #tpu.core_type<tc>, window_params = [{pipeline_mode = #tpu.pipeline_mode<synchronous>, transform_indices = @transform_0, window_bounds = array<i64: 96, 1920>}, {pipeline_mode = #tpu.pipeline_mode<synchronous>, transform_indices = @transform_1, window_bounds = array<i64: 1, 1920>}, {transform_indices = @transform_2, window_bounds = array<i64: 8, 96>}, {transform_indices = @transform_3, window_bounds = array<i64: 8, 1920>}]} {
    %c0 = arith.constant 0 : index
    %c0_0 = arith.constant 0 : index
    %0 = vector.load %arg3[%c0, %c0_0] : memref<8x96xf32, #tpu.memory_space<vmem>>, vector<8x96xf32>
    %c0_1 = arith.constant 0 : index
    %c0_2 = arith.constant 0 : index
    %1 = vector.load %arg1[%c0_1, %c0_2] : memref<96x1920xf32, #tpu.memory_space<vmem>>, vector<96x1920xf32>
    %cst = arith.constant dense<0.000000e+00> : vector<8x1920xf32>
    %2 = tpu.matmul %0, %1, %cst {dimension_numbers = #tpu.dot_dimension_numbers<[1], [0], [0], [1], [0, 0, 1, 1], [], []>, precision = #tpu.contract_precision<fp32>} : vector<8x96xf32>, vector<96x1920xf32>, vector<8x1920xf32> -> vector<8x1920xf32>
    %c0_3 = arith.constant 0 : index
    %c0_4 = arith.constant 0 : index
    %3 = vector.load %arg2[%c0_3, %c0_4] : memref<1x1920xf32, #tpu.memory_space<vmem>>, vector<1x1920xf32>
    %4 = vector.broadcast %3 : vector<1x1920xf32> to vector<8x1920xf32>
    %5 = arith.addf %2, %4 : vector<8x1920xf32>
    %6 = math.sin %5 : vector<8x1920xf32>
    %c0_5 = arith.constant 0 : index
    %c0_6 = arith.constant 0 : index
    %7 = vector.load %arg4[%c0_5, %c0_6] : memref<8x1920xf32, #tpu.memory_space<vmem>>, vector<8x1920xf32>
    tpu.vector_store %arg4[%c0_5, %c0_6], %6 {strides = array<i32>} : memref<8x1920xf32, #tpu.memory_space<vmem>>, vector<8x1920xf32>,
    return
  }
  func.func @transform_0(%arg0: i32) -> (i32, i32) {
    %c0_i32 = arith.constant 0 : i32
    %c0_i32_0 = arith.constant 0 : i32
    %c0_i32_1 = arith.constant 0 : i32
    return %c0_i32, %c0_i32_0 : i32, i32
  }
  func.func @transform_1(%arg0: i32) -> (i32, i32) {
    %c0_i32 = arith.constant 0 : i32
    %c0_i32_0 = arith.constant 0 : i32
    %c0_i32_1 = arith.constant 0 : i32
    return %c0_i32, %c0_i32_0 : i32, i32
  }
  func.func @transform_2(%arg0: i32) -> (i32, i32) {
    %c0_i32 = arith.constant 0 : i32
    %c0_i32_0 = arith.constant 0 : i32
    return %arg0, %c0_i32 : i32, i32
  }
  func.func @transform_3(%arg0: i32) -> (i32, i32) {
    %c0_i32 = arith.constant 0 : i32
    %c0_i32_0 = arith.constant 0 : i32
    return %arg0, %c0_i32 : i32, i32
  }
}

</mosaic_0001>

<bundles_post_ra>
// kernel: tpu_custom_call.1
= control target key start
LH: loop header
LB: loop body
LE: loop exit
PB: predicated region body
PF: predicated region fallthrough
CT: control target
= control target key end

     0   :  { %8 = vsyncpa [#allocation3], 0  ;;  %s13716_s0 = inlined_call_operand.hbm [shape: f32[96,1920], index: 0, kind: input, shape index: {}]   ;;  %s13717_s1 = inlined_call_operand.hbm [shape: f32[1,1920], index: 1, kind: input, shape index: {}]   ;;  %s13718_s2 = inlined_call_operand.hbm [shape: f32[8,96], index: 2, kind: input, shape index: {}]   ;;  %s13719_s3 = inlined_call_operand.hbm [shape: f32[8,1920], index: 3, kind: output, shape index: {}]  }
   0x1   :  { %9 = vsyncpa [#allocation6], 0 }
   0x2   :  { %10 = vsyncpa [#allocation4], 0  ;;  %s9494_s12 = smov [#allocation5]   ;;  %s9495_s14 = smov [#allocation2]  }
   0x3   :  { %s29_s13 = sshll.u32 %s9494_s12, 4  ;;  %s16_s15 = sshll.u32 %s9495_s14, 4  ;;  %s30_s13 = int_to_ptr.vmem [resolvable:$true] %s29_s13  ;;  %s9529_s15 = int_to_ptr.vmem [resolvable:$true] %s16_s15 }
   0x4   :  { %s9400_s18 = scalar_lea.hbm %s13717_s1, 240 }
   0x5   :  { %p9401_p0 = scmp.ne.s32.totalorder %s13717_s1, %s9400_s18  ;;  %p9404_p1 = scmp.lt.u32.totalorder %s9400_s18, %s13717_s1 }
   0x7   :  { %p9406_p2 = pnand %p9404_p1, %p9401_p0 }
   0x9   :  { %9409 = shalt.err (!%p9406_p2)
}
   0xa   :  { %s9410_s23 = scalar_lea.vmem %s30_s13, 240  ;;  %s9414_s24 = scalar_lea.vmem %s30_s13, 256 }
   0xb   :  { %p9411_p3 = scmp.ne.s32.totalorder %s30_s13, %s9410_s23  ;;  %p9415_p4 = scmp.lt.s32.totalorder %s30_s13, %s30_s13 }
   0xc   :  { %p9416_p5 = scmp.lt.s32.totalorder %s9414_s24, %s9410_s23 }
   0xe   :  { %p9417_p6 = por %p9416_p5, %p9415_p4 }
  0x10   :  { %p9418_p7 = pnand %p9417_p6, %p9411_p3 }
  0x12   :  { %9421 = shalt.err (!%p9418_p7)
}
  0x13   :  { %32 = dma.hbm_to_vmem [thread:$0]  %s13717_s1, 240, %s30_s13, [#allocation6]  }
  0x14   :  { %s9422_s29 = scalar_lea.hbm %s13716_s0, 23040 }
  0x15   :  { %p9423_p8 = scmp.ne.s32.totalorder %s13716_s0, %s9422_s29  ;;  %p9426_p9 = scmp.lt.u32.totalorder %s9422_s29, %s13716_s0 }
  0x17   :  { %p9428_p10 = pnand %p9426_p9, %p9423_p8 }
  0x19   :  { %9431 = shalt.err (!%p9428_p10)
}
  0x1a   :  { %s9432_s7 = scalar_lea.vmem %s9529_s15, 23040  ;;  %p9437_p12 = scmp.lt.s32.totalorder %s9529_s15, %s9529_s15 }
  0x1b   :  { %p9433_p11 = scmp.ne.s32.totalorder %s9529_s15, %s9432_s7  ;;  %p9438_p13 = scmp.lt.s32.totalorder %s9432_s7, %s9432_s7 }
  0x1d   :  { %p9439_p0 = por %p9438_p13, %p9437_p12 }
  0x1f   :  { %p9440_p1 = pnand %p9439_p0, %p9433_p11 }
  0x21   :  { %9443 = shalt.err (!%p9440_p1)
}
  0x22   :  { %s9496_s1 = smov 1920   ;;  %s9497_s8 = smov 120  }
  0x23   :  { %22 = dma.hbm_to_vmem [thread:$0]  %s13716_s0, 23040, %s9529_s15, [#allocation3], %s9496_s1, %s9496_s1, %s9497_s8  }
  0x24   :  { %s9498_s11 = smov [#allocation7]   ;;  %s9444_s16 = scalar_lea.hbm %s13718_s2, 128 }
  0x25   :  { %s39_s12 = sshll.u32 %s9498_s11, 4  ;;  %p9445_p2 = scmp.ne.s32.totalorder %s13718_s2, %s9444_s16  ;;  %s40_s12 = int_to_ptr.vmem [resolvable:$true] %s39_s12 }
  0x26   :  { %p9448_p3 = scmp.lt.u32.totalorder %s9444_s16, %s13718_s2 }
  0x28   :  { %p9450_p4 = pnand %p9448_p3, %p9445_p2 }
  0x2a   :  { %9453 = shalt.err (!%p9450_p4)
}
  0x2b   :  { %s9454_s21 = scalar_lea.vmem %s40_s12, 128  ;;  %p9459_p6 = scmp.lt.s32.totalorder %s40_s12, %s40_s12 }
  0x2c   :  { %p9455_p5 = scmp.ne.s32.totalorder %s40_s12, %s9454_s21  ;;  %p9460_p7 = scmp.lt.s32.totalorder %s9454_s21, %s9454_s21 }
  0x2e   :  { %p9461_p8 = por %p9460_p7, %p9459_p6 }
  0x30   :  { %p9462_p9 = pnand %p9461_p8, %p9455_p5 }
  0x32   :  { %9465 = shalt.err (!%p9462_p9)
}
  0x33   :  { %42 = dma.hbm_to_vmem [thread:$0]  %s13718_s2, 128, %s40_s12, [#allocation6]  }
  0x34   :  { %9488 = dma.done.wait [#allocation3], 23040  }
  0x35   :  { %9489 = vsyncadd [#allocation3], 4294944256 }
  0x36   :  { %9490 = dma.done.wait [#allocation6], 368  }
  0x37   :  { %9491 = vsyncadd [#allocation6], 4294966928  ;;  %v13720_v0 = vmov 0.0   ;;  %v54_v1 = vld [vmem:[#allocation2 + $0x8] sm:$0xff]  ;;  %v69_v2 = vld [vmem:[#allocation2 + $0x80] sm:$0xff]  ;;  %vm312_vm0 = vcmask 785408  }
  0x38   :  { %404 = vmatprep.mubr.f32.mxu0 %v13720_v0  ;;  %1155 = vmatprep.mubr.f32.mxu1 %v13720_v0  ;;  %v56_v3 = vld [vmem:[#allocation2 + $0x18] sm:$0xff]  ;;  %v316_v4 = vand.u32 4294901760, %v54_v1  ;;  %v320_v5 = vand.u32 4294901760, %v69_v2  ;;  %v71_v6 = vld [vmem:[#allocation2 + $0x90] sm:$0xff]  ;;  %v53_v8 = vld [vmem:[#allocation2] sm:$0xff]  ;;  %s9508_s2 = smov [#allocation8]  }
  0x39   :  { %v1067_v7 = vand.u32 4294901760, %v56_v3  ;;  %v68_v9 = vld [vmem:[#allocation2 + $0x78] sm:$0xff]  ;;  %v1071_v10 = vand.u32 4294901760, %v71_v6  ;;  %v318_v11 = vand.u32 4294901760, %v53_v8  ;;  %v55_v13 = vld [vmem:[#allocation2 + $0x10] sm:$0xff]  ;;  %v70_v14 = vld [vmem:[#allocation2 + $0x88] sm:$0xff] }
  0x3a   :  { %v322_v12 = vand.u32 4294901760, %v68_v9  ;;  %v84_v15 = vld [vmem:[#allocation2 + $0xf8] sm:$0xff]  ;;  %v9574_v16 = vpack.c.bf16 %v320_v5, %v316_v4  ;;  %v9576_v17 = vsub.f32 %v54_v1, %v316_v4  ;;  %v9578_v18 = vsub.f32 %v69_v2, %v320_v5  ;;  %v99_v20 = vld [vmem:[#allocation2 + $0x170] sm:$0xff]  ;;  %v86_v21 = vld [vmem:[#allocation2 + $0x108] sm:$0xff]  ;;  %s7743_s22 = sshll.u32 %s9508_s2, 4  ;;  %s7744_s22 = int_to_ptr.vmem [resolvable:$true] %s7743_s22 }
  0x3b   :  { %v9580_v19 = vsub.f32 %v56_v3, %v1067_v7  ;;  %v101_v22 = vld [vmem:[#allocation2 + $0x180] sm:$0xff]  ;;  %v9582_v23 = vpack.c.bf16 %v1071_v10, %v1067_v7  ;;  %v9584_v24 = vsub.f32 %v71_v6, %v1071_v10  ;;  %v9588_v26 = vsub.f32 %v53_v8, %v318_v11  ;;  %v83_v27 = vld [vmem:[#allocation2 + $0xf0] sm:$0xff]  ;;  %v98_v32 = vld [vmem:[#allocation2 + $0x168] sm:$0xff]  ;;  %s9466_s23 = scalar_lea.vmem %s7744_s22, 1920  ;;  %p9471_p11 = scmp.lt.s32.totalorder %s7744_s22, %s7744_s22 }
  0x3c   :  { %14241 = vst [vmem:[#allocation12_spill] sm:$0xff] %v9574_v16  ;;  %14242 = vst [vmem:[#allocation13_spill] sm:$0xff] %v9578_v18  ;;  %v9586_v25 = vpack.c.bf16 %v322_v12, %v318_v11  ;;  %8054 = vmatprep.subr.bf16.mxu0 %v9574_v16  ;;  %v9591_v28 = vsub.f32 %v68_v9, %v322_v12  ;;  %v1069_v29 = vand.u32 4294901760, %v55_v13  ;;  %v1073_v30 = vand.u32 4294901760, %v70_v14  ;;  %v85_v37 = vld [vmem:[#allocation2 + $0x100] sm:$0xff]  ;;  %v100_v38 = vld [vmem:[#allocation2 + $0x178] sm:$0xff]  ;;  %p9467_p10 = scmp.ne.s32.totalorder %s7744_s22, %s9466_s23  ;;  %p9472_p12 = scmp.lt.s32.totalorder %s9466_s23, %s9466_s23 }
  0x3d   :  { %14243 = vst [vmem:[#allocation14_spill] sm:$0xff] %v9580_v19  ;;  %14244 = vst [vmem:[#allocation15_spill] sm:$0xff] %v9582_v23  ;;  %v324_v31 = vand.u32 4294901760, %v84_v15  ;;  %8198 = vmatprep.subr.bf16.mxu1 %v9582_v23  ;;  %v328_v33 = vand.u32 4294901760, %v99_v20  ;;  %v1075_v34 = vand.u32 4294901760, %v86_v21  ;;  %v1079_v35 = vand.u32 4294901760, %v101_v22 }
  0x3e   :  { %14245 = vst [vmem:[#allocation16_spill] sm:$0xff] %v9584_v24  ;;  %14246 = vst [vmem:[#allocation17_spill] sm:$0xff] %v9586_v25  ;;  %8056 = vmatpush1.bf16.msra.mxu0 %v9586_v25  ;;  %v326_v36 = vand.u32 4294901760, %v83_v27  ;;  %v9595_v39 = vpack.c.bf16 %v1073_v30, %v1069_v29  ;;  %v9597_v40 = vsub.f32 %v55_v13, %v1069_v29  ;;  %v114_v43 = vld [vmem:[#allocation2 + $0x1e8] sm:$0xff]  ;;  %v129_v44 = vld [vmem:[#allocation2 + $0x260] sm:$0xff]  ;;  %v330_v52 = vand.u32 4294901760, %v98_v32  ;;  %p9473_p13 = por %p9472_p12, %p9471_p11 }
  0x3f   :  { %14247 = vst [vmem:[#allocation18_spill] sm:$0xff] %v9591_v28  ;;  %v9599_v41 = vsub.f32 %v70_v14, %v1073_v30  ;;  %v9601_v42 = vsub.f32 %v84_v15, %v324_v31  ;;  %v116_v45 = vld [vmem:[#allocation2 + $0x1f8] sm:$0xff]  ;;  %v9603_v46 = vpack.c.bf16 %v328_v33, %v324_v31  ;;  %v9605_v47 = vsub.f32 %v99_v20, %v328_v33  ;;  %v131_v50 = vld [vmem:[#allocation2 + $0x270] sm:$0xff]  ;;  %v113_v59 = vld [vmem:[#allocation2 + $0x1e0] sm:$0xff] }
  0x40   :  { %14248 = vst [vmem:[#allocation19_spill] sm:$0xff] %v9595_v39  ;;  %v9607_v48 = vpack.c.bf16 %v1079_v35, %v1075_v34  ;;  %v9609_v49 = vsub.f32 %v86_v21, %v1075_v34  ;;  %8200 = vmatpush1.bf16.msra.mxu1 %v9595_v39  ;;  %v9612_v51 = vsub.f32 %v101_v22, %v1079_v35  ;;  %v1077_v54 = vand.u32 4294901760, %v85_v37  ;;  %v128_v60 = vld [vmem:[#allocation2 + $0x258] sm:$0xff]  ;;  %v115_v2 = vld [vmem:[#allocation2 + $0x1f0] sm:$0xff]  ;;  %v130_v3 = vld [vmem:[#allocation2 + $0x268] sm:$0xff]  ;;  %p9474_p0 = pnand %p9473_p13, %p9467_p10 }
  0x41   :  { %14249 = vst [vmem:[#allocation20_spill] sm:$0xff] %v9603_v46  ;;  %v9614_v53 = vsub.f32 %v83_v27, %v326_v36  ;;  %8058 = vmatprep.subr.bf16.mxu0 %v9603_v46  ;;  %v1081_v55 = vand.u32 4294901760, %v100_v38  ;;  %v332_v56 = vand.u32 4294901760, %v114_v43  ;;  %v336_v57 = vand.u32 4294901760, %v129_v44  ;;  %v144_v4 = vld [vmem:[#allocation2 + $0x2d8] sm:$0xff]  ;;  %v159_v9 = vld [vmem:[#allocation2 + $0x350] sm:$0xff] }
  0x42   :  { %14250 = vst [vmem:[#allocation21_spill] sm:$0xff] %v9607_v48  ;;  %8202 = vmatprep.subr.bf16.mxu1 %v9607_v48  ;;  %v1083_v58 = vand.u32 4294901760, %v116_v45  ;;  %v9618_v61 = vpack.c.bf16 %v330_v52, %v326_v36  ;;  %v9620_v62 = vsub.f32 %v98_v32, %v330_v52  ;;  %v9622_v63 = vsub.f32 %v85_v37, %v1077_v54  ;;  %v146_v10 = vld [vmem:[#allocation2 + $0x2e8] sm:$0xff]  ;;  %v161_v11 = vld [vmem:[#allocation2 + $0x360] sm:$0xff]  ;;  %v143_v33 = vld [vmem:[#allocation2 + $0x2d0] sm:$0xff] }
  0x43   :  { %v1087_v1 = vand.u32 4294901760, %v131_v50  ;;  %v9624_v5 = vpack.c.bf16 %v1081_v55, %v1077_v54  ;;  %v9626_v6 = vsub.f32 %v100_v38, %v1081_v55  ;;  %v9628_v7 = vpack.c.bf16 %v336_v57, %v332_v56  ;;  %v158_v38 = vld [vmem:[#allocation2 + $0x348] sm:$0xff]  ;;  %v188_v0 = vld [vmem:[#allocation2 + $0x438] sm:$0xff]  ;;  %v205_v39 = vld [vmem:[#allocation2 + $0x4c0] sm:$0xff] }
  0x44   :  { %14251 = vst [vmem:[#allocation22_spill] sm:$0xff] %v9618_v61  ;;  %v9630_v8 = vsub.f32 %v114_v43, %v332_v56  ;;  %8060 = vmatpush1.bf16.msra.mxu0 %v9618_v61  ;;  %v9633_v12 = vsub.f32 %v129_v44, %v336_v57  ;;  %v9637_v14 = vsub.f32 %v116_v45, %v1083_v58  ;;  %v334_v20 = vand.u32 4294901760, %v113_v59  ;;  %v145_v43 = vld [vmem:[#allocation2 + $0x2e0] sm:$0xff]  ;;  %v160_v44 = vld [vmem:[#allocation2 + $0x358] sm:$0xff]  ;;  %v174_v55 = vld [vmem:[#allocation2 + $0x3c8] sm:$0xff] }
  0x45   :  { %14252 = vst [vmem:[#allocation23_spill] sm:$0xff] %v9624_v5  ;;  %14253 = vst [vmem:[#allocation24_spill] sm:$0xff] %v9628_v7  ;;  %v9635_v13 = vpack.c.bf16 %v1087_v1, %v1083_v58  ;;  %v9639_v15 = vsub.f32 %v131_v50, %v1087_v1  ;;  %8204 = vmatpush1.bf16.msra.mxu1 %v9624_v5  ;;  %8062 = vmatprep.subr.bf16.mxu0 %v9628_v7  ;;  %v338_v21 = vand.u32 4294901760, %v128_v60  ;;  %v189_v56 = vld [vmem:[#allocation2 + $0x440] sm:$0xff]  ;;  %v176_v57 = vld [vmem:[#allocation2 + $0x3d8] sm:$0xff] }
  0x46   :  { %v1085_v22 = vand.u32 4294901760, %v115_v2  ;;  %v1089_v27 = vand.u32 4294901760, %v130_v3  ;;  %v340_v29 = vand.u32 4294901760, %v144_v4  ;;  %v344_v30 = vand.u32 4294901760, %v159_v9  ;;  %v218_v48 = vld [vmem:[#allocation2 + $0x528] sm:$0xff]  ;;  %v220_v16 = vld [vmem:[#allocation2 + $0x538] sm:$0xff] }
  0x47   :  { %14254 = vst [vmem:[#allocation25_spill] sm:$0xff] %v9635_v13  ;;  %8206 = vmatprep.subr.bf16.mxu1 %v9635_v13  ;;  %v1091_v31 = vand.u32 4294901760, %v146_v10  ;;  %v1095_v32 = vand.u32 4294901760, %v161_v11  ;;  %v9644_v34 = vpack.c.bf16 %v338_v21, %v334_v20  ;;  %v9646_v35 = vsub.f32 %v113_v59, %v334_v20  ;;  %v219_v13 = vld [vmem:[#allocation2 + $0x530] sm:$0xff] }
  0x48   :  { %v9648_v36 = vsub.f32 %v128_v60, %v338_v21  ;;  %v9650_v37 = vpack.c.bf16 %v1089_v27, %v1085_v22  ;;  %v9652_v45 = vsub.f32 %v115_v2, %v1085_v22  ;;  %v9654_v50 = vsub.f32 %v130_v3, %v1089_v27  ;;  %v191_v21 = vld [vmem:[#allocation2 + $0x450] sm:$0xff] }
  0x49   :  { %14255 = vst [vmem:[#allocation26_spill] sm:$0xff] %v9644_v34  ;;  %v9656_v52 = vpack.c.bf16 %v344_v30, %v340_v29  ;;  %v9658_v54 = vsub.f32 %v144_v4, %v340_v29  ;;  %8064 = vmatpush1.bf16.msra.mxu0 %v9644_v34  ;;  %v9662_v58 = vsub.f32 %v159_v9, %v344_v30  ;;  %v342_v1 = vand.u32 4294901760, %v143_v33  ;;  %v173_v30 = vld [vmem:[#allocation2 + $0x3c0] sm:$0xff]  ;;  %v204_v34 = vld [vmem:[#allocation2 + $0x4b8] sm:$0xff] }
  0x4a   :  { %14256 = vst [vmem:[#allocation27_spill] sm:$0xff] %v9650_v37  ;;  %8208 = vmatpush1.bf16.msra.mxu1 %v9650_v37  ;;  %v9664_v59 = vpack.c.bf16 %v1095_v32, %v1091_v31  ;;  %v9666_v60 = vsub.f32 %v146_v10, %v1091_v31  ;;  %v9669_v2 = vsub.f32 %v161_v11, %v1095_v32  ;;  %v346_v3 = vand.u32 4294901760, %v158_v38  ;;  %v175_v10 = vld [vmem:[#allocation2 + $0x3d0] sm:$0xff] }
  0x4b   :  { %14257 = vst [vmem:[#allocation28_spill] sm:$0xff] %v9656_v52  ;;  %8066 = vmatprep.subr.bf16.mxu0 %v9656_v52  ;;  %v1093_v4 = vand.u32 4294901760, %v145_v43  ;;  %v1097_v20 = vand.u32 4294901760, %v160_v44  ;;  %v9672_v22 = vsub.f32 %v143_v33, %v342_v1  ;;  %v348_v27 = vand.u32 4294901760, %v174_v55  ;;  %v190_v52 = vld [vmem:[#allocation2 + $0x448] sm:$0xff] }
  0x4c   :  { %14258 = vst [vmem:[#allocation29_spill] sm:$0xff] %v9664_v59  ;;  %8210 = vmatprep.subr.bf16.mxu1 %v9664_v59  ;;  %v352_v9 = vand.u32 4294901760, %v189_v56  ;;  %v1099_v29 = vand.u32 4294901760, %v176_v57  ;;  %v9674_v31 = vpack.c.bf16 %v346_v3, %v342_v1  ;;  %v9676_v37 = vsub.f32 %v158_v38, %v346_v3 }
  0x4d   :  { %v9678_v11 = vpack.c.bf16 %v1097_v20, %v1093_v4  ;;  %v9680_v32 = vsub.f32 %v145_v43, %v1093_v4  ;;  %v9682_v59 = vsub.f32 %v160_v44, %v1097_v20  ;;  %v9686_v5 = vsub.f32 %v174_v55, %v348_v27  ;;  %v206_v55 = vld [vmem:[#allocation2 + $0x4c8] sm:$0xff] }
  0x4e   :  { %14259 = vst [vmem:[#allocation30_spill] sm:$0xff] %v9674_v31  ;;  %v9684_v33 = vpack.c.bf16 %v352_v9, %v348_v27  ;;  %v9688_v7 = vsub.f32 %v189_v56, %v352_v9  ;;  %8068 = vmatpush1.bf16.msra.mxu0 %v9674_v31  ;;  %v1103_v38 = vand.u32 4294901760, %v191_v21  ;;  %v9692_v1 = vsub.f32 %v176_v57, %v1099_v29  ;;  %v221_v27 = vld [vmem:[#allocation2 + $0x540] sm:$0xff]  ;;  %v203_v57 = vld [vmem:[#allocation2 + $0x4b0] sm:$0xff] }
  0x4f   :  { %14260 = vst [vmem:[#allocation31_spill] sm:$0xff] %v9678_v11  ;;  %8212 = vmatpush1.bf16.msra.mxu1 %v9678_v11  ;;  %v350_v43 = vand.u32 4294901760, %v173_v30  ;;  %v354_v3 = vand.u32 4294901760, %v188_v0  ;;  %v1101_v44 = vand.u32 4294901760, %v175_v10  ;;  %v1105_v4 = vand.u32 4294901760, %v190_v52 }
  0x50   :  { %14261 = vst [vmem:[#allocation32_spill] sm:$0xff] %v9684_v33  ;;  %8070 = vmatprep.subr.bf16.mxu0 %v9684_v33  ;;  %v356_v20 = vand.u32 4294901760, %v204_v34  ;;  %v360_v61 = vand.u32 4294901760, %v219_v13  ;;  %v9695_v56 = vpack.c.bf16 %v1103_v38, %v1099_v29  ;;  %v9697_v9 = vsub.f32 %v191_v21, %v1103_v38 }
  0x51   :  { %v9699_v31 = vpack.c.bf16 %v354_v3, %v350_v43  ;;  %v9701_v11 = vsub.f32 %v173_v30, %v350_v43  ;;  %v9703_v46 = vsub.f32 %v188_v0, %v354_v3  ;;  %v9705_v33 = vpack.c.bf16 %v1105_v4, %v1101_v44 }
  0x52   :  { %14262 = vst [vmem:[#allocation33_spill] sm:$0xff] %v9695_v56  ;;  %v9707_v25 = vsub.f32 %v175_v10, %v1101_v44  ;;  %v9709_v23 = vsub.f32 %v190_v52, %v1105_v4  ;;  %8214 = vmatprep.subr.bf16.mxu1 %v9695_v56  ;;  %v9713_v21 = vpack.c.bf16 %v360_v61, %v356_v20  ;;  %v1107_v38 = vand.u32 4294901760, %v206_v55 }
  0x53   :  { %14263 = vst [vmem:[#allocation34_spill] sm:$0xff] %v9699_v31  ;;  %14264 = vst [vmem:[#allocation35_spill] sm:$0xff] %v9705_v33  ;;  %8072 = vmatpush1.bf16.msra.mxu0 %v9699_v31  ;;  %v9715_v29 = vsub.f32 %v204_v34, %v356_v20  ;;  %v9717_v30 = vsub.f32 %v219_v13, %v360_v61  ;;  %8216 = vmatpush1.bf16.msra.mxu1 %v9705_v33  ;;  %v1111_v0 = vand.u32 4294901760, %v221_v27  ;;  %v52_v33 = vld [vmem:[#allocation7] sm:$0xff] }
  0x54   :  { %14265 = vst [vmem:[#allocation36_spill] sm:$0xff] %v9713_v21  ;;  %v358_v43 = vand.u32 4294901760, %v203_v57  ;;  %v362_v10 = vand.u32 4294901760, %v218_v48  ;;  %v1109_v3 = vand.u32 4294901760, %v205_v39  ;;  %8074 = vmatprep.subr.bf16.mxu0 %v9713_v21  ;;  %v9721_v52 = vsub.f32 %v206_v55, %v1107_v38 }
  0x55   :  { %14266 = vst [vmem:[#allocation37_spill] sm:$0xff] %v9717_v30  ;;  %v1113_v44 = vand.u32 4294901760, %v220_v16  ;;  %v13766_v4 = vand.u32 4294901760, %v9576_v17  ;;  %v13765_v31 = vand.u32 4294901760, %v9578_v18  ;;  %v9725_v34 = vpack.c.bf16 %v1111_v0, %v1107_v38 }
  0x56   :  { %14267 = vst [vmem:[#allocation38_spill] sm:$0xff] %v9721_v52  ;;  %v9727_v61 = vsub.f32 %v221_v27, %v1111_v0  ;;  %v9729_v13 = vpack.c.bf16 %v362_v10, %v358_v43  ;;  %v9731_v20 = vsub.f32 %v203_v57, %v358_v43  ;;  %v9733_v56 = vsub.f32 %v218_v48, %v362_v10 }
  0x57   :  { %14268 = vst [vmem:[#allocation39_spill] sm:$0xff] %v9725_v34  ;;  %v9735_v30 = vpack.c.bf16 %v1113_v44, %v1109_v3  ;;  %v9737_v55 = vsub.f32 %v205_v39, %v1109_v3  ;;  %v9739_v21 = vsub.f32 %v220_v16, %v1113_v44  ;;  %8218 = vmatprep.subr.bf16.mxu1 %v9725_v34  ;;  %v13769_v48 = vand.u32 4294901760, %v9580_v19 }
  0x58   :  { %14269 = vst [vmem:[#allocation40_spill] sm:$0xff] %v9727_v61  ;;  %14270 = vst [vmem:[#allocation41_spill] sm:$0xff] %v9729_v13  ;;  %8076 = vmatpush1.bf16.msra.mxu0 %v9729_v13  ;;  %v419_v27 = vsub.f32 %v9576_v17, %v13766_v4  ;;  %v431_v57 = vsub.f32 %v9578_v18, %v13765_v31  ;;  %v13774_v38 = vand.u32 4294901760, %v9584_v24  ;;  %v314_v16 = vsel %vm312_vm0, %v52_v33, 0 }
  0x59   :  { %14271 = vst [vmem:[#allocation42_spill] sm:$0xff] %v9731_v20  ;;  %14272 = vst [vmem:[#allocation43_spill] sm:$0xff] %v9733_v56  ;;  %8220 = vmatpush1.bf16.msra.mxu1 %v9735_v30  ;;  %v13781_v39 = vand.u32 4294901760, %v9588_v26  ;;  %v13782_v0 = vand.u32 4294901760, %v9591_v28  ;;  %v1170_v44 = vsub.f32 %v9580_v19, %v13769_v48  ;;  %v9762_v4 = vand.u32 4294901760, %v314_v16 }
  0x5a   :  { %14273 = vst [vmem:[#allocation44_spill] sm:$0xff] %v9735_v30  ;;  %14274 = vst [vmem:[#allocation45_spill] sm:$0xff] %v9737_v55  ;;  %v420_v10 = vand.u32 4294901760, %v419_v27  ;;  %v432_v3 = vand.u32 4294901760, %v431_v57  ;;  %v1182_v31 = vsub.f32 %v9584_v24, %v13774_v38  ;;  %v14277_v27 = vand.u32 4294901760, %v9597_v40 }
  0x5b   :  { %14275 = vst [vmem:[#allocation46_spill] sm:$0xff] %v9739_v21  ;;  %14276 = vst [vmem:[#allocation47_spill] sm:$0xff] %v9762_v4  ;;  %v425_v33 = vsub.f32 %v9588_v26, %v13781_v39  ;;  %v437_v43 = vsub.f32 %v9591_v28, %v13782_v0  ;;  %v1171_v48 = vand.u32 4294901760, %v1170_v44  ;;  %v13787_v34 = vand.u32 4294901760, %v9599_v41 }
  0x5c   :  { %v1176_v57 = vsub.f32 %v9597_v40, %v14277_v27  ;;  %v8077_v30 = vpack.c.bf16 %v432_v3, %v420_v10  ;;  %v1183_v13 = vand.u32 4294901760, %v1182_v31  ;;  %v9775_v38 = vsub.f32 %v314_v16, %v9762_v4 }
  0x5d   :  { %v426_v24 = vand.u32 4294901760, %v425_v33  ;;  %v438_v19 = vand.u32 4294901760, %v437_v43  ;;  %v1188_v0 = vsub.f32 %v9599_v41, %v13787_v34  ;;  %v13786_v28 = vand.u32 4294901760, %v9601_v42 }
  0x5e   :  { %14278 = vst [vmem:[#allocation48_spill] sm:$0xff] %v9775_v38  ;;  %v1177_v18 = vand.u32 4294901760, %v1176_v57  ;;  %8078 = vmatprep.subr.bf16.mxu0 %v8077_v30  ;;  %v8221_v39 = vpack.c.bf16 %v1183_v13, %v1171_v48  ;;  %v13785_v10 = vand.u32 4294901760, %v9605_v47  ;;  %v9783_v31 = vand.u32 4294901760, %v9775_v38 }
  0x5f   :  { %v8079_v3 = vpack.c.bf16 %v438_v19, %v426_v24  ;;  %v13790_v16 = vand.u32 4294901760, %v9609_v49  ;;  %v13795_v44 = vand.u32 4294901760, %v9612_v51  ;;  %v1189_v43 = vand.u32 4294901760, %v1188_v0 }
  0x60   :  { %14279 = vst [vmem:[#allocation49_spill] sm:$0xff] %v9783_v31  ;;  %8222 = vmatprep.subr.bf16.mxu1 %v8221_v39  ;;  %v443_v30 = vsub.f32 %v9601_v42, %v13786_v28  ;;  %v455_v13 = vsub.f32 %v9605_v47, %v13785_v10  ;;  %v13803_v48 = vand.u32 4294901760, %v9614_v53  ;;  %v408_v33 = vsub.f32 %v9775_v38, %v9783_v31 }
  0x61   :  { %v1194_v19 = vsub.f32 %v9609_v49, %v13790_v16  ;;  %v1206_v24 = vsub.f32 %v9612_v51, %v13795_v44  ;;  %v13801_v39 = vand.u32 4294901760, %v9620_v62  ;;  %v8223_v0 = vpack.c.bf16 %v1189_v43, %v1177_v18 }
  0x62   :  { %v444_v27 = vand.u32 4294901760, %v443_v30  ;;  %v456_v57 = vand.u32 4294901760, %v455_v13  ;;  %v449_v10 = vsub.f32 %v9614_v53, %v13803_v48  ;;  %v9806_v28 = vand.u32 4294901760, %v408_v33 }
  0x63   :  { %v1195_v34 = vand.u32 4294901760, %v1194_v19  ;;  %v1207_v31 = vand.u32 4294901760, %v1206_v24  ;;  %v461_v16 = vsub.f32 %v9620_v62, %v13801_v39  ;;  %v13800_v44 = vand.u32 4294901760, %v9622_v63 }
  0x64   :  { %14280 = vst [vmem:[#allocation50_spill] sm:$0xff] %v9806_v28  ;;  %v8081_v38 = vpack.c.bf16 %v456_v57, %v444_v27  ;;  %v450_v4 = vand.u32 4294901760, %v449_v10  ;;  %v13796_v18 = vand.u32 4294901760, %v9626_v6  ;;  %410 = vmatmul.mubr.f32.vlgmr.msra.gmra.mrb[0].mxu0 %v9806_v28  ;;  %1161 = vmatmul.mubr.f32.vlgmr.msra.gmra.mrb[0].mxu1 %v9806_v28  ;;  %v13798_v13 = vand.u32 4294901760, %v9630_v8 }
  0x65   :  { %v8225_v43 = vpack.c.bf16 %v1207_v31, %v1195_v34  ;;  %v462_v30 = vand.u32 4294901760, %v461_v16  ;;  %v13797_v33 = vand.u32 4294901760, %v9633_v12  ;;  %8080 = vmatpush1.bf16.msra.mxu0 %v8079_v3  ;;  %8224 = vmatpush1.bf16.msra.mxu1 %v8223_v0  ;;  %v1200_v10 = vsub.f32 %v9622_v63, %v13800_v44 }
  0x66   :  { %v1212_v19 = vsub.f32 %v9626_v6, %v13796_v18  ;;  %v13799_v24 = vand.u32 4294901760, %v9637_v14  ;;  %v13802_v27 = vand.u32 4294901760, %v9639_v15  ;;  %8082 = vmatprep.subr.bf16.mxu0 %v8081_v38  ;;  %v467_v31 = vsub.f32 %v9630_v8, %v13798_v13 }
  0x67   :  { %8226 = vmatprep.subr.bf16.mxu1 %v8225_v43  ;;  %v8083_v34 = vpack.c.bf16 %v462_v30, %v450_v4  ;;  %v479_v3 = vsub.f32 %v9633_v12, %v13797_v33  ;;  %v13804_v16 = vand.u32 4294901760, %v9646_v35  ;;  %v1201_v0 = vand.u32 4294901760, %v1200_v10 }
  0x68   :  { %v1213_v57 = vand.u32 4294901760, %v1212_v19  ;;  %v1218_v18 = vsub.f32 %v9637_v14, %v13799_v24  ;;  %v1230_v4 = vsub.f32 %v9639_v15, %v13802_v27  ;;  %v14281_v38 = vmov 0.0  }
  0x69   :  { %600 = vmatprep.mubr.f32.mxu0 %v14281_v38  ;;  %1351 = vmatprep.mubr.f32.mxu1 %v14281_v38  ;;  %v468_v43 = vand.u32 4294901760, %v467_v31  ;;  %v480_v30 = vand.u32 4294901760, %v479_v3  ;;  %v473_v33 = vsub.f32 %v9646_v35, %v13804_v16  ;;  %v13809_v10 = vand.u32 4294901760, %v9648_v36 }
  0x6a   :  { %8084 = vmatpush1.bf16.msra.mxu0 %v8083_v34  ;;  %v8227_v19 = vpack.c.bf16 %v1213_v57, %v1201_v0  ;;  %v1219_v13 = vand.u32 4294901760, %v1218_v18  ;;  %v1231_v24 = vand.u32 4294901760, %v1230_v4  ;;  %v13808_v44 = vand.u32 4294901760, %v9652_v45 }
  0x6b   :  { %v8085_v39 = vpack.c.bf16 %v480_v30, %v468_v43  ;;  %v474_v27 = vand.u32 4294901760, %v473_v33  ;;  %v485_v48 = vsub.f32 %v9648_v36, %v13809_v10  ;;  %v13805_v31 = vand.u32 4294901760, %v9654_v50 }
  0x6c   :  { %8228 = vmatpush1.bf16.msra.mxu1 %v8227_v19  ;;  %v8229_v3 = vpack.c.bf16 %v1231_v24, %v1219_v13  ;;  %v1224_v16 = vsub.f32 %v9652_v45, %v13808_v44  ;;  %v13806_v34 = vand.u32 4294901760, %v9658_v54  ;;  %v13807_v18 = vand.u32 4294901760, %v9662_v58 }
  0x6d   :  { %8086 = vmatprep.subr.bf16.mxu0 %v8085_v39  ;;  %v486_v0 = vand.u32 4294901760, %v485_v48  ;;  %v1236_v33 = vsub.f32 %v9654_v50, %v13805_v31  ;;  %v13810_v57 = vand.u32 4294901760, %v9666_v60  ;;  %v13811_v4 = vand.u32 4294901760, %v9669_v2 }
  0x6e   :  { %8230 = vmatprep.subr.bf16.mxu1 %v8229_v3  ;;  %v1225_v13 = vand.u32 4294901760, %v1224_v16  ;;  %v491_v24 = vsub.f32 %v9658_v54, %v13806_v34  ;;  %v503_v43 = vsub.f32 %v9662_v58, %v13807_v18  ;;  %v13812_v48 = vand.u32 4294901760, %v9672_v22 }
  0x6f   :  { %v8087_v39 = vpack.c.bf16 %v486_v0, %v474_v27  ;;  %v1237_v30 = vand.u32 4294901760, %v1236_v33  ;;  %v1242_v19 = vsub.f32 %v9666_v60, %v13810_v57  ;;  %v1254_v16 = vsub.f32 %v9669_v2, %v13811_v4 }
  0x70   :  { %v492_v3 = vand.u32 4294901760, %v491_v24  ;;  %v504_v31 = vand.u32 4294901760, %v503_v43  ;;  %v497_v34 = vsub.f32 %v9672_v22, %v13812_v48  ;;  %v13817_v18 = vand.u32 4294901760, %v9676_v37 }
  0x71   :  { %8088 = vmatpush1.bf16.msra.mxu0 %v8087_v39  ;;  %v8231_v44 = vpack.c.bf16 %v1237_v30, %v1225_v13  ;;  %v1243_v27 = vand.u32 4294901760, %v1242_v19  ;;  %v1255_v0 = vand.u32 4294901760, %v1254_v16  ;;  %v13816_v33 = vand.u32 4294901760, %v9680_v32 }
  0x72   :  { %v8089_v10 = vpack.c.bf16 %v504_v31, %v492_v3  ;;  %v498_v57 = vand.u32 4294901760, %v497_v34  ;;  %v509_v4 = vsub.f32 %v9676_v37, %v13817_v18  ;;  %v13813_v24 = vand.u32 4294901760, %v9682_v59 }
  0x73   :  { %8232 = vmatpush1.bf16.msra.mxu1 %v8231_v44  ;;  %v8233_v43 = vpack.c.bf16 %v1255_v0, %v1243_v27  ;;  %v1248_v48 = vsub.f32 %v9680_v32, %v13816_v33  ;;  %v13814_v13 = vand.u32 4294901760, %v9686_v5  ;;  %v13815_v39 = vand.u32 4294901760, %v9688_v7 }
  0x74   :  { %8090 = vmatprep.subr.bf16.mxu0 %v8089_v10  ;;  %v510_v30 = vand.u32 4294901760, %v509_v4  ;;  %v1260_v31 = vsub.f32 %v9682_v59, %v13813_v24  ;;  %v13818_v34 = vand.u32 4294901760, %v9692_v1  ;;  %v13819_v19 = vand.u32 4294901760, %v9697_v9 }
  0x75   :  { %8234 = vmatprep.subr.bf16.mxu1 %v8233_v43  ;;  %v1249_v44 = vand.u32 4294901760, %v1248_v48  ;;  %v515_v16 = vsub.f32 %v9686_v5, %v13814_v13  ;;  %v527_v3 = vsub.f32 %v9688_v7, %v13815_v39  ;;  %v13820_v10 = vand.u32 4294901760, %v9701_v11 }
  0x76   :  { %v8091_v4 = vpack.c.bf16 %v510_v30, %v498_v57  ;;  %v1261_v27 = vand.u32 4294901760, %v1260_v31  ;;  %v1266_v0 = vsub.f32 %v9692_v1, %v13818_v34  ;;  %v1278_v48 = vsub.f32 %v9697_v9, %v13819_v19 }
  0x77   :  { %v516_v43 = vand.u32 4294901760, %v515_v16  ;;  %v528_v24 = vand.u32 4294901760, %v527_v3  ;;  %v521_v13 = vsub.f32 %v9701_v11, %v13820_v10  ;;  %v13825_v39 = vand.u32 4294901760, %v9703_v46 }
  0x78   :  { %8092 = vmatpush1.bf16.msra.mxu0 %v8091_v4  ;;  %v8235_v33 = vpack.c.bf16 %v1261_v27, %v1249_v44  ;;  %v1267_v57 = vand.u32 4294901760, %v1266_v0  ;;  %v1279_v30 = vand.u32 4294901760, %v1278_v48  ;;  %v13822_v31 = vand.u32 4294901760, %v9707_v25  ;;  %v14282_v4 = vld [vmem:[#allocation37_spill] sm:$0xff] }
  0x79   :  { %v8093_v18 = vpack.c.bf16 %v528_v24, %v516_v43  ;;  %v522_v34 = vand.u32 4294901760, %v521_v13  ;;  %v533_v19 = vsub.f32 %v9703_v46, %v13825_v39  ;;  %v13821_v16 = vand.u32 4294901760, %v9709_v23 }
  0x7a   :  { %8236 = vmatpush1.bf16.msra.mxu1 %v8235_v33  ;;  %v8237_v3 = vpack.c.bf16 %v1279_v30, %v1267_v57  ;;  %v1272_v10 = vsub.f32 %v9707_v25, %v13822_v31  ;;  %v13823_v44 = vand.u32 4294901760, %v9715_v29  ;;  %v13824_v27 = vand.u32 4294901760, %v14282_v4 }
  0x7b   :  { %8094 = vmatprep.subr.bf16.mxu0 %v8093_v18  ;;  %v534_v0 = vand.u32 4294901760, %v533_v19  ;;  %v1284_v24 = vsub.f32 %v9709_v23, %v13821_v16  ;;  %v13828_v13 = vand.u32 4294901760, %v9721_v52  ;;  %v13829_v48 = vand.u32 4294901760, %v9727_v61 }
  0x7c   :  { %8238 = vmatprep.subr.bf16.mxu1 %v8237_v3  ;;  %v1273_v33 = vand.u32 4294901760, %v1272_v10  ;;  %v539_v43 = vsub.f32 %v9715_v29, %v13823_v44  ;;  %v551_v57 = vsub.f32 %v14282_v4, %v13824_v27  ;;  %v13830_v18 = vand.u32 4294901760, %v9731_v20 }
  0x7d   :  { %v8095_v19 = vpack.c.bf16 %v534_v0, %v522_v34  ;;  %v1285_v30 = vand.u32 4294901760, %v1284_v24  ;;  %v1290_v16 = vsub.f32 %v9721_v52, %v13828_v13  ;;  %v1302_v10 = vsub.f32 %v9727_v61, %v13829_v48 }
  0x7e   :  { %v540_v3 = vand.u32 4294901760, %v539_v43  ;;  %v552_v31 = vand.u32 4294901760, %v551_v57  ;;  %v545_v44 = vsub.f32 %v9731_v20, %v13830_v18  ;;  %v13831_v27 = vand.u32 4294901760, %v9733_v56 }
  0x7f   :  { %8096 = vmatpush1.bf16.msra.mxu0 %v8095_v19  ;;  %v8239_v39 = vpack.c.bf16 %v1285_v30, %v1273_v33  ;;  %v1291_v34 = vand.u32 4294901760, %v1290_v16  ;;  %v1303_v0 = vand.u32 4294901760, %v1302_v10  ;;  %v13834_v24 = vand.u32 4294901760, %v9737_v55 }
  0x80   :  { %v8097_v28 = vpack.c.bf16 %v552_v31, %v540_v3  ;;  %v546_v13 = vand.u32 4294901760, %v545_v44  ;;  %v557_v48 = vsub.f32 %v9733_v56, %v13831_v27  ;;  %v1307_v43 = vand.u32 4294901760, %v9739_v21  ;;  %v14283_v31 = vld [vmem:[#allocation13_spill] sm:$0xff]  ;;  %v14284_v3 = vld [vmem:[#allocation14_spill] sm:$0xff]  ;;  %v14285_v27 = vld [vmem:[#allocation16_spill] sm:$0xff] }
  0x81   :  { %8240 = vmatpush1.bf16.msra.mxu1 %v8239_v39  ;;  %v8241_v57 = vpack.c.bf16 %v1303_v0, %v1291_v34  ;;  %v1296_v18 = vsub.f32 %v9737_v55, %v13834_v24  ;;  %v8101_v44 = vpack.c.bf16 %v14283_v31, %v9576_v17  ;;  %v8245_v56 = vpack.c.bf16 %v14285_v27, %v14284_v3  ;;  %v14286_v34 = vld [vmem:[#allocation18_spill] sm:$0xff] }
  0x82   :  { %8098 = vmatprep.subr.bf16.mxu0 %v8097_v28  ;;  %v558_v33 = vand.u32 4294901760, %v557_v48  ;;  %v1308_v16 = vsub.f32 %v9739_v21, %v1307_v43  ;;  %v8103_v0 = vpack.c.bf16 %v14286_v34, %v9588_v26  ;;  %v8247_v28 = vpack.c.bf16 %v9599_v41, %v9597_v40 }
  0x83   :  { %8242 = vmatprep.subr.bf16.mxu1 %v8241_v57  ;;  %v1297_v19 = vand.u32 4294901760, %v1296_v18  ;;  %v8105_v48 = vpack.c.bf16 %v9605_v47, %v9601_v42  ;;  %v8249_v18 = vpack.c.bf16 %v9612_v51, %v9609_v49  ;;  %v8251_v57 = vpack.c.bf16 %v9626_v6, %v9622_v63 }
  0x84   :  { %v8099_v30 = vpack.c.bf16 %v558_v33, %v546_v13  ;;  %v1309_v10 = vand.u32 4294901760, %v1308_v16  ;;  %v8107_v13 = vpack.c.bf16 %v9620_v62, %v9614_v53  ;;  %v8109_v33 = vpack.c.bf16 %v9633_v12, %v9630_v8 }
  0x85   :  { %v8253_v16 = vpack.c.bf16 %v9639_v15, %v9637_v14  ;;  %v14289_v24 = vand.u32 4294901760, %v14283_v31  ;;  %v14290_v21 = vand.u32 4294901760, %v14284_v3  ;;  %v14291_v55 = vand.u32 4294901760, %v14285_v27 }
  0x86   :  { %8100 = vmatpush1.bf16.msra.mxu0 %v8099_v30  ;;  %v8243_v39 = vpack.c.bf16 %v1309_v10, %v1297_v19  ;;  %v8111_v19 = vpack.c.bf16 %v9648_v36, %v9646_v35  ;;  %v14287_v30 = vld [vmem:[#allocation47_spill] sm:$0xff]  ;;  %v14288_v10 = vand.u32 4294901760, %v9576_v17  ;;  %v14292_v61 = vand.u32 4294901760, %v9588_v26 }
  0x87   :  { %8102 = vmatprep.subr.bf16.mxu0 %v8101_v44  ;;  %v8113_v44 = vpack.c.bf16 %v9662_v58, %v9658_v54  ;;  %v9984_v20 = vpack.c.bf16 %v14291_v55, %v14290_v21  ;;  %v14293_v52 = vand.u32 4294901760, %v14286_v34  ;;  %v14294_v17 = vand.u32 4294901760, %v9597_v40 }
  0x88   :  { %8244 = vmatpush1.bf16.msra.mxu1 %v8243_v39  ;;  %v9978_v39 = vpack.c.bf16 %v14289_v24, %v14288_v10  ;;  %v14296_v31 = vand.u32 4294901760, %v9601_v42  ;;  %v14297_v21 = vand.u32 4294901760, %v9605_v47  ;;  %v14298_v26 = vand.u32 4294901760, %v9609_v49 }
  0x89   :  { %8246 = vmatprep.subr.bf16.mxu1 %v8245_v56  ;;  %602 = vmatmul.mubr.f32.vlgmr.msra.gmra.mrb[0].mxu0 %v14287_v30  ;;  %v9990_v4 = vpack.c.bf16 %v14293_v52, %v14292_v61  ;;  %v14295_v56 = vand.u32 4294901760, %v9599_v41  ;;  %v14299_v52 = vand.u32 4294901760, %v9612_v51  ;;  %v14300_v40 = vand.u32 4294901760, %v9614_v53 }
  0x8a   :  { %8104 = vmatpush1.bf16.msra.mxu0 %v8103_v0  ;;  %720 = vmatprep.mubr.f32.mxu0 %v14281_v38  ;;  %v10003_v55 = vpack.c.bf16 %v14297_v21, %v14296_v31  ;;  %v14301_v41 = vand.u32 4294901760, %v9620_v62  ;;  %v14302_v42 = vand.u32 4294901760, %v9622_v63  ;;  %v14303_v47 = vand.u32 4294901760, %v9626_v6 }
  0x8b   :  { %v9997_v24 = vpack.c.bf16 %v14295_v56, %v14294_v17  ;;  %v10009_v61 = vpack.c.bf16 %v14299_v52, %v14298_v26  ;;  %1353 = vmatmul.mubr.f32.vlgmr.msra.gmra.mrb[0].mxu1 %v14287_v30  ;;  %8106 = vmatprep.subr.bf16.mxu0 %v8105_v48  ;;  %v14304_v49 = vand.u32 4294901760, %v9630_v8  ;;  %v14305_v51 = vand.u32 4294901760, %v9633_v12 }
  0x8c   :  { %v10016_v27 = vpack.c.bf16 %v14301_v41, %v14300_v40  ;;  %v10022_v3 = vpack.c.bf16 %v14303_v47, %v14302_v42  ;;  %8248 = vmatpush1.bf16.msra.mxu1 %v8247_v28  ;;  %1471 = vmatprep.mubr.f32.mxu1 %v14281_v38  ;;  %v14306_v53 = vand.u32 4294901760, %v9637_v14  ;;  %v14307_v62 = vand.u32 4294901760, %v9639_v15 }
  0x8d   :  { %v10028_v34 = vpack.c.bf16 %v14305_v51, %v14304_v49  ;;  %v14308_v63 = vand.u32 4294901760, %v9646_v35  ;;  %v14309_v6 = vand.u32 4294901760, %v9648_v36  ;;  %v14310_v8 = vand.u32 4294901760, %v9652_v45  ;;  %8250 = vmatprep.subr.bf16.mxu1 %v8249_v18 }
  0x8e   :  { %v10035_v0 = vpack.c.bf16 %v14307_v62, %v14306_v53  ;;  %v14311_v12 = vand.u32 4294901760, %v9654_v50  ;;  %v14312_v28 = vand.u32 4294901760, %v9658_v54  ;;  %v14313_v14 = vand.u32 4294901760, %v9662_v58  ;;  %8108 = vmatpush1.bf16.msra.mxu0 %v8107_v13 }
  0x8f   :  { %v10041_v48 = vpack.c.bf16 %v14309_v6, %v14308_v63  ;;  %v14314_v17 = vand.u32 4294901760, %v9666_v60  ;;  %v14315_v35 = vand.u32 4294901760, %v9669_v2  ;;  %v14316_v56 = vand.u32 4294901760, %v9672_v22  ;;  %8110 = vmatprep.subr.bf16.mxu0 %v8109_v33 }
  0x90   :  { %v10047_v10 = vpack.c.bf16 %v14311_v12, %v14310_v8  ;;  %v10053_v15 = vpack.c.bf16 %v14313_v14, %v14312_v28  ;;  %v14317_v31 = vand.u32 4294901760, %v9676_v37  ;;  %v14318_v18 = vand.u32 4294901760, %v9680_v32  ;;  %v14329_v8 = vld [vmem:[#allocation37_spill] sm:$0xff]  ;;  %v14331_v14 = vld [vmem:[#allocation38_spill] sm:$0xff]  ;;  %8252 = vmatpush1.bf16.msra.mxu1 %v8251_v57  ;;  %v14351_v57 = vld [vmem:[#allocation23_spill] sm:$0xff] }
  0x91   :  { %v10059_v36 = vpack.c.bf16 %v14315_v35, %v14314_v17  ;;  %v14319_v54 = vand.u32 4294901760, %v9682_v59  ;;  %v14320_v58 = vand.u32 4294901760, %v9686_v5  ;;  %v14321_v52 = vand.u32 4294901760, %v9688_v7  ;;  %v14333_v35 = vld [vmem:[#allocation40_spill] sm:$0xff]  ;;  %8254 = vmatprep.subr.bf16.mxu1 %v8253_v16  ;;  %v14352_v16 = vld [vmem:[#allocation25_spill] sm:$0xff] }
  0x92   :  { %v10065_v21 = vpack.c.bf16 %v14317_v31, %v14316_v56  ;;  %v14322_v41 = vand.u32 4294901760, %v9692_v1  ;;  %v14323_v42 = vand.u32 4294901760, %v9697_v9  ;;  %v14324_v49 = vand.u32 4294901760, %v9701_v11  ;;  %8112 = vmatpush1.bf16.msra.mxu0 %v8111_v19  ;;  %v14353_v19 = vld [vmem:[#allocation26_spill] sm:$0xff] }
  0x93   :  { %v10071_v26 = vpack.c.bf16 %v14319_v54, %v14318_v18  ;;  %v10077_v40 = vpack.c.bf16 %v14321_v52, %v14320_v58  ;;  %v14325_v51 = vand.u32 4294901760, %v9703_v46  ;;  %v14326_v13 = vand.u32 4294901760, %v9707_v25  ;;  %v14335_v18 = vld [vmem:[#allocation42_spill] sm:$0xff]  ;;  %v14337_v58 = vld [vmem:[#allocation43_spill] sm:$0xff]  ;;  %8114 = vmatprep.subr.bf16.mxu0 %v8113_v44  ;;  %v14354_v44 = vld [vmem:[#allocation28_spill] sm:$0xff] }
  0x94   :  { %v10083_v47 = vpack.c.bf16 %v14323_v42, %v14322_v41  ;;  %v14327_v62 = vand.u32 4294901760, %v9709_v23  ;;  %v14328_v6 = vand.u32 4294901760, %v9715_v29  ;;  %v14330_v12 = vand.u32 4294901760, %v14329_v8  ;;  %v14339_v42 = vld [vmem:[#allocation45_spill] sm:$0xff] }
  0x95   :  { %v10089_v53 = vpack.c.bf16 %v14325_v51, %v14324_v49  ;;  %v14332_v17 = vand.u32 4294901760, %v14331_v14  ;;  %v14334_v56 = vand.u32 4294901760, %v14333_v35  ;;  %v14336_v54 = vand.u32 4294901760, %v14335_v18 }
  0x96   :  { %v10095_v63 = vpack.c.bf16 %v14327_v62, %v14326_v13  ;;  %v10101_v28 = vpack.c.bf16 %v14330_v12, %v14328_v6  ;;  %v14338_v52 = vand.u32 4294901760, %v14337_v58  ;;  %v14340_v33 = vand.u32 4294901760, %v14339_v42  ;;  %v14356_v12 = vld [vmem:[#allocation29_spill] sm:$0xff] }
  0x97   :  { %v10107_v31 = vpack.c.bf16 %v14334_v56, %v14332_v17  ;;  %v8255_v51 = vpack.c.bf16 %v9654_v50, %v9652_v45  ;;  %v8257_v13 = vpack.c.bf16 %v9669_v2, %v9666_v60  ;;  %v8115_v62 = vpack.c.bf16 %v9676_v37, %v9672_v22  ;;  %v14342_v2 = vld [vmem:[#allocation12_spill] sm:$0xff]  ;;  %v14343_v22 = vld [vmem:[#allocation15_spill] sm:$0xff]  ;;  %v14360_v56 = vld [vmem:[#allocation33_spill] sm:$0xff] }
  0x98   :  { %v10113_v41 = vpack.c.bf16 %v14338_v52, %v14336_v54  ;;  %v10117_v49 = vpack.c.bf16 %v1307_v43, %v14340_v33  ;;  %v8117_v6 = vpack.c.bf16 %v9688_v7, %v9686_v5  ;;  %v8259_v43 = vpack.c.bf16 %v9682_v59, %v9680_v32  ;;  %v14347_v32 = vld [vmem:[#allocation19_spill] sm:$0xff]  ;;  %v14358_v17 = vld [vmem:[#allocation32_spill] sm:$0xff]  ;;  %v10171_v33 = vld [vmem:[#allocation2 + $0xa0] sm:$0xff] }
  0x99   :  { %8256 = vmatpush1.bf16.msra.mxu1 %v8255_v51  ;;  %v8261_v45 = vpack.c.bf16 %v9697_v9, %v9692_v1  ;;  %8116 = vmatpush1.bf16.msra.mxu0 %v8115_v62  ;;  %v8119_v50 = vpack.c.bf16 %v9703_v46, %v9701_v11  ;;  %v8121_v37 = vpack.c.bf16 %v14329_v8, %v9715_v29  ;;  %v14341_v46 = vld [vmem:[#allocation46_spill] sm:$0xff]  ;;  %v14346_v11 = vld [vmem:[#allocation20_spill] sm:$0xff]  ;;  %v14348_v1 = vld [vmem:[#allocation21_spill] sm:$0xff] }
  0x9a   :  { %8258 = vmatprep.subr.bf16.mxu1 %v8257_v13  ;;  %8118 = vmatprep.subr.bf16.mxu0 %v8117_v6  ;;  %v8263_v5 = vpack.c.bf16 %v9709_v23, %v9707_v25  ;;  %v8265_v7 = vpack.c.bf16 %v14333_v35, %v14331_v14  ;;  %v8123_v59 = vpack.c.bf16 %v14337_v58, %v14335_v18  ;;  %v14344_v23 = vld [vmem:[#allocation48_spill] sm:$0xff]  ;;  %v14345_v25 = vld [vmem:[#allocation17_spill] sm:$0xff]  ;;  %v14349_v9 = vld [vmem:[#allocation22_spill] sm:$0xff] }
  0x9b   :  { %v8267_v60 = vpack.c.bf16 %v14341_v46, %v14339_v42  ;;  %v14350_v29 = vld [vmem:[#allocation24_spill] sm:$0xff]  ;;  %v14355_v8 = vld [vmem:[#allocation27_spill] sm:$0xff]  ;;  %v14357_v14 = vld [vmem:[#allocation30_spill] sm:$0xff]  ;;  %14366 = vst [vmem:[#allocation14_spill] sm:$0xff] %v10171_v33 }
  0x9c   :  { %v14359_v35 = vld [vmem:[#allocation31_spill] sm:$0xff]  ;;  %v14361_v18 = vld [vmem:[#allocation34_spill] sm:$0xff]  ;;  %v14362_v54 = vld [vmem:[#allocation36_spill] sm:$0xff] }
  0x9d   :  { %8260 = vmatpush1.bf16.msra.mxu1 %v8259_v43  ;;  %8120 = vmatpush1.bf16.msra.mxu0 %v8119_v50  ;;  %v14363_v58 = vld [vmem:[#allocation35_spill] sm:$0xff]  ;;  %v14367_v51 = vld [vmem:[#allocation41_spill] sm:$0xff]  ;;  %v10176_v62 = vld [vmem:[#allocation2 + $0xb0] sm:$0xff] }
  0x9e   :  { %8262 = vmatprep.subr.bf16.mxu1 %v8261_v45  ;;  %8122 = vmatprep.subr.bf16.mxu0 %v8121_v37  ;;  %v14364_v52 = vld [vmem:[#allocation39_spill] sm:$0xff]  ;;  %v10174_v13 = vld [vmem:[#allocation2 + $0x38] sm:$0xff]  ;;  %14369 = vst [vmem:[#allocation18_spill] sm:$0xff] %v10176_v62  ;;  %v10179_v6 = vld [vmem:[#allocation2 + $0x20] sm:$0xff] }
  0x9f   :  { %v10169_v42 = vld [vmem:[#allocation2 + $0x28] sm:$0xff]  ;;  %14368 = vst [vmem:[#allocation16_spill] sm:$0xff] %v10174_v13  ;;  %14370 = vst [vmem:[#allocation37_spill] sm:$0xff] %v10179_v6  ;;  %v10181_v43 = vld [vmem:[#allocation2 + $0x98] sm:$0xff] }
  0xa0   :  { %14365 = vst [vmem:[#allocation13_spill] sm:$0xff] %v10169_v42  ;;  %14371 = vst [vmem:[#allocation38_spill] sm:$0xff] %v10181_v43  ;;  %v14372_v45 = vld [vmem:[#allocation44_spill] sm:$0xff]  ;;  %v13846_v50 = vand.u32 4294901760, %v10169_v42  ;;  %v14376_v46 = vld [vmem:[#allocation49_spill] sm:$0xff] }
  0xa1   :  { %8264 = vmatpush1.bf16.msra.mxu1 %v8263_v5  ;;  %8124 = vmatpush1.bf16.msra.mxu0 %v8123_v59  ;;  %v10186_v5 = vld [vmem:[#allocation2 + $0x30] sm:$0xff]  ;;  %v10190_v59 = vld [vmem:[#allocation2 + $0x118] sm:$0xff] }
  0xa2   :  { %8266 = vmatprep.subr.bf16.mxu1 %v8265_v7  ;;  %8126 = vmatprep.subr.bf16.mxu0 %v14342_v2  ;;  %14373 = vst [vmem:[#allocation40_spill] sm:$0xff] %v10186_v5  ;;  %v10188_v7 = vld [vmem:[#allocation2 + $0xa8] sm:$0xff]  ;;  %14375 = vst [vmem:[#allocation43_spill] sm:$0xff] %v10190_v59  ;;  %v10203_v37 = vsub.f32 %v10169_v42, %v13846_v50  ;;  %v10250_v42 = vld [vmem:[#allocation2 + $0x198] sm:$0xff] }
  0xa3   :  { %14374 = vst [vmem:[#allocation42_spill] sm:$0xff] %v10188_v7  ;;  %14391 = vst [vmem:[#allocation24_spill] sm:$0xff] %v10250_v42 }
  0xa4   :  { %723 = vmatmul.mubr.f32.vlgmr.msra.gmra.mrb[0].mxu0 %v14344_v23  ;;  %14378 = vst [vmem:[#allocation46_spill] sm:$0xff] %v10203_v37 }
  0xa5   :  { %8268 = vmatpush1.bf16.msra.mxu1 %v8267_v60  ;;  %8128 = vmatpush1.bf16.msra.mxu0 %v14345_v25  ;;  %v10226_v60 = vld [vmem:[#allocation2 + $0x110] sm:$0xff] }
  0xa6   :  { %8270 = vmatprep.subr.bf16.mxu1 %v14343_v22  ;;  %817 = vmatprep.mubr.f32.mxu0 %v14281_v38  ;;  %14385 = vst [vmem:[#allocation19_spill] sm:$0xff] %v10226_v60 }
  0xa7   :  { %8130 = vmatprep.subr.bf16.mxu0 %v14346_v11 }
  0xa8   :  { %1474 = vmatmul.mubr.f32.vlgmr.msra.gmra.mrb[0].mxu1 %v14344_v23  ;;  %v10196_v23 = vld [vmem:[#allocation2 + $0x190] sm:$0xff] }
  0xa9   :  { %8272 = vmatpush1.bf16.msra.mxu1 %v14347_v32  ;;  %1568 = vmatprep.mubr.f32.mxu1 %v14281_v38  ;;  %14377 = vst [vmem:[#allocation45_spill] sm:$0xff] %v10196_v23 }
  0xaa   :  { %8274 = vmatprep.subr.bf16.mxu1 %v14348_v1  ;;  %8132 = vmatpush1.bf16.msra.mxu0 %v14349_v9 }
  0xab   :  { %8134 = vmatprep.subr.bf16.mxu0 %v14350_v29 }
  0xad   :  { %8276 = vmatpush1.bf16.msra.mxu1 %v14351_v57  ;;  %v10439_v57 = vld [vmem:[#allocation2 + $0x3f0] sm:$0xff] }
  0xae   :  { %8278 = vmatprep.subr.bf16.mxu1 %v14352_v16  ;;  %8136 = vmatpush1.bf16.msra.mxu0 %v14353_v19  ;;  %v10403_v19 = vld [vmem:[#allocation2 + $0x460] sm:$0xff]  ;;  %14443 = vst [vmem:[#allocation81_spill] sm:$0xff] %v10439_v57 }
  0xaf   :  { %8138 = vmatprep.subr.bf16.mxu0 %v14354_v44  ;;  %14434 = vst [vmem:[#allocation76_spill] sm:$0xff] %v10403_v19  ;;  %v10435_v16 = vld [vmem:[#allocation2 + $0x3e0] sm:$0xff] }
  0xb0   :  { %14442 = vst [vmem:[#allocation80_spill] sm:$0xff] %v10435_v16 }
  0xb1   :  { %8280 = vmatpush1.bf16.msra.mxu1 %v14355_v8  ;;  %v10367_v8 = vld [vmem:[#allocation2 + $0x300] sm:$0xff] }
  0xb2   :  { %8282 = vmatprep.subr.bf16.mxu1 %v14356_v12  ;;  %8140 = vmatpush1.bf16.msra.mxu0 %v14357_v14  ;;  %v10339_v14 = vld [vmem:[#allocation2 + $0x370] sm:$0xff]  ;;  %v10348_v12 = vld [vmem:[#allocation2 + $0x380] sm:$0xff]  ;;  %14426 = vst [vmem:[#allocation73_spill] sm:$0xff] %v10367_v8 }
  0xb3   :  { %8142 = vmatprep.subr.bf16.mxu0 %v14358_v17  ;;  %v10318_v17 = vld [vmem:[#allocation2 + $0x288] sm:$0xff]  ;;  %14419 = vst [vmem:[#allocation68_spill] sm:$0xff] %v10339_v14  ;;  %14421 = vst [vmem:[#allocation70_spill] sm:$0xff] %v10348_v12 }
  0xb4   :  { %14411 = vst [vmem:[#allocation63_spill] sm:$0xff] %v10318_v17 }
  0xb5   :  { %8284 = vmatpush1.bf16.msra.mxu1 %v14359_v35 }
  0xb6   :  { %8286 = vmatprep.subr.bf16.mxu1 %v14360_v56  ;;  %8144 = vmatpush1.bf16.msra.mxu0 %v14361_v18  ;;  %v10271_v18 = vld [vmem:[#allocation2 + $0x280] sm:$0xff]  ;;  %v10282_v56 = vld [vmem:[#allocation2 + $0x218] sm:$0xff] }
  0xb7   :  { %8146 = vmatprep.subr.bf16.mxu0 %v14362_v54  ;;  %v10252_v54 = vld [vmem:[#allocation2 + $0x208] sm:$0xff]  ;;  %14397 = vst [vmem:[#allocation53_spill] sm:$0xff] %v10271_v18  ;;  %14399 = vst [vmem:[#allocation54_spill] sm:$0xff] %v10282_v56 }
  0xb8   :  { %14392 = vst [vmem:[#allocation51_spill] sm:$0xff] %v10252_v54 }
  0xb9   :  { %8288 = vmatpush1.bf16.msra.mxu1 %v14363_v58  ;;  %v14389_v58 = vand.u32 4294901760, %v10181_v43 }
  0xba   :  { %8290 = vmatprep.subr.bf16.mxu1 %v14364_v52  ;;  %8148 = vmatpush1.bf16.msra.mxu0 %v14367_v51  ;;  %v10212_v51 = vld [vmem:[#allocation2 + $0x128] sm:$0xff]  ;;  %v14388_v52 = vand.u32 4294901760, %v10179_v6 }
  0xbb   :  { %8150 = vmatprep.subr.bf16.mxu0 %v9978_v39  ;;  %14381 = vst [vmem:[#allocation15_spill] sm:$0xff] %v10212_v51  ;;  %v10224_v39 = vld [vmem:[#allocation2 + $0x1a0] sm:$0xff] }
  0xbc   :  { %14384 = vst [vmem:[#allocation20_spill] sm:$0xff] %v10224_v39 }
  0xbd   :  { %8292 = vmatpush1.bf16.msra.mxu1 %v14372_v45  ;;  %821 = vmatmul.mubr.f32.vlgmr.msra.gmra.mrb[0].mxu0 %v14376_v46  ;;  %v14379_v45 = vand.u32 4294901760, %v10171_v33 }
  0xbe   :  { %8294 = vmatprep.subr.bf16.mxu1 %v9984_v20  ;;  %8152 = vmatpush1.bf16.msra.mxu0 %v9990_v4  ;;  %v14382_v4 = vand.u32 4294901760, %v10174_v13 }
  0xbf   :  { %963 = vmatprep.mubr.f32.mxu0 %v14281_v38  ;;  %v10208_v20 = vsub.f32 %v10171_v33, %v14379_v45  ;;  %8154 = vmatprep.subr.bf16.mxu0 %v10003_v55  ;;  %v10228_v33 = vld [vmem:[#allocation2 + $0x188] sm:$0xff]  ;;  %v14387_v55 = vand.u32 4294901760, %v10176_v62  ;;  %v10240_v45 = vsub.f32 %v10179_v6, %v14388_v52  ;;  %v14394_v6 = vand.u32 4294901760, %v10188_v7 }
  0xc0   :  { %1572 = vmatmul.mubr.f32.vlgmr.msra.gmra.mrb[0].mxu1 %v14376_v46  ;;  %v10219_v50 = vsub.f32 %v10174_v13, %v14382_v4  ;;  %14386 = vst [vmem:[#allocation21_spill] sm:$0xff] %v10228_v33  ;;  %v10245_v46 = vsub.f32 %v10181_v43, %v14389_v58  ;;  %v14396_v13 = vand.u32 4294901760, %v10190_v59 }
  0xc1   :  { %14380 = vst [vmem:[#allocation12_spill] sm:$0xff] %v10208_v20  ;;  %8296 = vmatpush1.bf16.msra.mxu1 %v9997_v24  ;;  %1714 = vmatprep.mubr.f32.mxu1 %v14281_v38  ;;  %v10235_v4 = vsub.f32 %v10176_v62, %v14387_v55  ;;  %v10248_v24 = vld [vmem:[#allocation2 + $0x120] sm:$0xff]  ;;  %v14393_v55 = vand.u32 4294901760, %v10186_v5  ;;  %v10263_v58 = vsub.f32 %v10188_v7, %v14394_v6  ;;  %v13858_v62 = vand.u32 4294901760, %v10212_v51  ;;  %v10297_v7 = vld [vmem:[#allocation2 + $0x278] sm:$0xff] }
  0xc2   :  { %14383 = vst [vmem:[#allocation17_spill] sm:$0xff] %v10219_v50  ;;  %14390 = vst [vmem:[#allocation22_spill] sm:$0xff] %v10248_v24  ;;  %8298 = vmatprep.subr.bf16.mxu1 %v10009_v61  ;;  %v10268_v43 = vsub.f32 %v10190_v59, %v14396_v13  ;;  %8156 = vmatpush1.bf16.msra.mxu0 %v10016_v27  ;;  %v14398_v61 = vand.u32 4294901760, %v10196_v23  ;;  %v10284_v13 = vld [vmem:[#allocation2 + $0x290] sm:$0xff]  ;;  %v10295_v6 = vld [vmem:[#allocation2 + $0x200] sm:$0xff] }
  0xc3   :  { %v10258_v52 = vsub.f32 %v10186_v5, %v14393_v55  ;;  %14395 = vst [vmem:[#allocation52_spill] sm:$0xff] %v10263_v58  ;;  %14400 = vst [vmem:[#allocation55_spill] sm:$0xff] %v10284_v13  ;;  %8158 = vmatprep.subr.bf16.mxu0 %v10028_v34  ;;  %v10290_v27 = vsub.f32 %v10212_v51, %v13858_v62  ;;  %v10299_v59 = vld [vmem:[#allocation2 + $0x210] sm:$0xff]  ;;  %v14405_v34 = vand.u32 4294901760, %v10224_v39  ;;  %v14407_v62 = vand.u32 4294901760, %v10226_v60 }
  0xc4   :  { %v10277_v55 = vsub.f32 %v10196_v23, %v14398_v61  ;;  %14402 = vst [vmem:[#allocation57_spill] sm:$0xff] %v10295_v6  ;;  %14403 = vst [vmem:[#allocation58_spill] sm:$0xff] %v10297_v7  ;;  %v14409_v5 = vand.u32 4294901760, %v10228_v33 }
  0xc5   :  { %14401 = vst [vmem:[#allocation56_spill] sm:$0xff] %v10290_v27  ;;  %14404 = vst [vmem:[#allocation59_spill] sm:$0xff] %v10299_v59  ;;  %8300 = vmatpush1.bf16.msra.mxu1 %v10022_v3  ;;  %v10305_v35 = vsub.f32 %v10224_v39, %v14405_v34  ;;  %v10310_v61 = vsub.f32 %v10226_v60, %v14407_v62  ;;  %v10320_v3 = vld [vmem:[#allocation2 + $0x2f8] sm:$0xff]  ;;  %v14413_v34 = vand.u32 4294901760, %v10248_v24  ;;  %v14415_v62 = vand.u32 4294901760, %v10250_v42 }
  0xc6   :  { %v10315_v23 = vsub.f32 %v10228_v33, %v14409_v5  ;;  %14412 = vst [vmem:[#allocation64_spill] sm:$0xff] %v10320_v3  ;;  %8302 = vmatprep.subr.bf16.mxu1 %v10035_v0  ;;  %v14417_v5 = vand.u32 4294901760, %v10252_v54  ;;  %8160 = vmatpush1.bf16.msra.mxu0 %v10041_v48  ;;  %v14423_v48 = vand.u32 4294901760, %v10282_v56 }
  0xc7   :  { %14406 = vst [vmem:[#allocation60_spill] sm:$0xff] %v10305_v35  ;;  %14408 = vst [vmem:[#allocation61_spill] sm:$0xff] %v10310_v61  ;;  %v10326_v39 = vsub.f32 %v10248_v24, %v14413_v34  ;;  %v10331_v60 = vsub.f32 %v10250_v42, %v14415_v62  ;;  %v10346_v42 = vld [vmem:[#allocation2 + $0x308] sm:$0xff]  ;;  %8162 = vmatprep.subr.bf16.mxu0 %v10053_v15  ;;  %v10363_v34 = vld [vmem:[#allocation2 + $0x2f0] sm:$0xff]  ;;  %v14427_v15 = vand.u32 4294901760, %v10284_v13  ;;  %v14429_v62 = vand.u32 4294901760, %v10297_v7 }
  0xc8   :  { %14410 = vst [vmem:[#allocation62_spill] sm:$0xff] %v10315_v23  ;;  %v10336_v51 = vsub.f32 %v10252_v54, %v14417_v5  ;;  %14420 = vst [vmem:[#allocation69_spill] sm:$0xff] %v10346_v42  ;;  %v14422_v5 = vand.u32 4294901760, %v10271_v18  ;;  %v10359_v0 = vsub.f32 %v10282_v56, %v14423_v48  ;;  %v10365_v54 = vld [vmem:[#allocation2 + $0x368] sm:$0xff]  ;;  %v14428_v48 = vand.u32 4294901760, %v10295_v6 }
  0xc9   :  { %14414 = vst [vmem:[#allocation65_spill] sm:$0xff] %v10326_v39  ;;  %14416 = vst [vmem:[#allocation66_spill] sm:$0xff] %v10331_v60  ;;  %8304 = vmatpush1.bf16.msra.mxu1 %v10047_v10  ;;  %v10383_v24 = vsub.f32 %v10297_v7, %v14429_v62  ;;  %v10390_v10 = vld [vmem:[#allocation2 + $0x378] sm:$0xff]  ;;  %v10401_v7 = vld [vmem:[#allocation2 + $0x3e8] sm:$0xff] }
  0xca   :  { %14418 = vst [vmem:[#allocation67_spill] sm:$0xff] %v10336_v51  ;;  %v10354_v33 = vsub.f32 %v10271_v18, %v14422_v5  ;;  %14424 = vst [vmem:[#allocation71_spill] sm:$0xff] %v10363_v34  ;;  %v10373_v5 = vsub.f32 %v10284_v13, %v14427_v15  ;;  %v10378_v56 = vsub.f32 %v10295_v6, %v14428_v48  ;;  %v14430_v18 = vand.u32 4294901760, %v10299_v59  ;;  %v10414_v6 = vld [vmem:[#allocation2 + $0x3f8] sm:$0xff]  ;;  %v10416_v62 = vld [vmem:[#allocation2 + $0x470] sm:$0xff] }
  0xcb   :  { %14425 = vst [vmem:[#allocation72_spill] sm:$0xff] %v10365_v54  ;;  %14431 = vst [vmem:[#allocation74_spill] sm:$0xff] %v10390_v10  ;;  %8306 = vmatprep.subr.bf16.mxu1 %v10059_v36  ;;  %v14432_v15 = vand.u32 4294901760, %v10318_v17  ;;  %8164 = vmatpush1.bf16.msra.mxu0 %v10065_v21 }
  0xcc   :  { %v10388_v44 = vsub.f32 %v10299_v59, %v14430_v18  ;;  %14433 = vst [vmem:[#allocation75_spill] sm:$0xff] %v10401_v7  ;;  %v14435_v18 = vand.u32 4294901760, %v10320_v3  ;;  %14436 = vst [vmem:[#allocation77_spill] sm:$0xff] %v10414_v6  ;;  %8166 = vmatprep.subr.bf16.mxu0 %v10077_v40  ;;  %v14438_v59 = vand.u32 4294901760, %v10339_v14  ;;  %v10437_v40 = vld [vmem:[#allocation2 + $0x458] sm:$0xff] }
  0xcd   :  { %v10396_v13 = vsub.f32 %v10318_v17, %v14432_v15  ;;  %14437 = vst [vmem:[#allocation78_spill] sm:$0xff] %v10416_v62  ;;  %v14440_v17 = vand.u32 4294901760, %v10348_v12  ;;  %8308 = vmatpush1.bf16.msra.mxu1 %v10071_v26  ;;  %v14447_v26 = vand.u32 4294901760, %v10367_v8  ;;  %v10484_v15 = vld [vmem:[#allocation2 + $0x560] sm:$0xff] }
  0xce   :  { %v10409_v36 = vsub.f32 %v10320_v3, %v14435_v18  ;;  %v10422_v21 = vsub.f32 %v10339_v14, %v14438_v59  ;;  %v14439_v18 = vand.u32 4294901760, %v10346_v42  ;;  %v14444_v59 = vand.u32 4294901760, %v10363_v34  ;;  %v10454_v14 = vld [vmem:[#allocation2 + $0x468] sm:$0xff]  ;;  %8310 = vmatprep.subr.bf16.mxu1 %v10083_v47  ;;  %14456 = vst [vmem:[#allocation89_spill] sm:$0xff] %v10484_v15 }
  0xcf   :  { %v10432_v48 = vsub.f32 %v10348_v12, %v14440_v17  ;;  %v10471_v12 = vld [vmem:[#allocation2 + $0x550] sm:$0xff]  ;;  %8168 = vmatpush1.bf16.msra.mxu0 %v10089_v53  ;;  %v14453_v47 = vand.u32 4294901760, %v10401_v7  ;;  %v14458_v53 = vand.u32 4294901760, %v10403_v19 }
  0xd0   :  { %v10427_v3 = vsub.f32 %v10346_v42, %v14439_v18  ;;  %v10445_v18 = vsub.f32 %v10363_v34, %v14444_v59  ;;  %v14445_v42 = vand.u32 4294901760, %v10365_v54  ;;  %v14449_v59 = vand.u32 4294901760, %v10390_v10  ;;  %14452 = vst [vmem:[#allocation86_spill] sm:$0xff] %v10471_v12  ;;  %8170 = vmatprep.subr.bf16.mxu0 %v10101_v28  ;;  %v10507_v28 = vld [vmem:[#allocation2 + $0x4e0] sm:$0xff] }
  0xd1   :  { %14441 = vst [vmem:[#allocation79_spill] sm:$0xff] %v10432_v48  ;;  %v10460_v48 = vsub.f32 %v10367_v8, %v14447_v26  ;;  %v10477_v26 = vsub.f32 %v10401_v7, %v14453_v47  ;;  %v14459_v47 = vand.u32 4294901760, %v10414_v6  ;;  %14463 = vst [vmem:[#allocation93_spill] sm:$0xff] %v10507_v28  ;;  %8312 = vmatpush1.bf16.msra.mxu1 %v10095_v63  ;;  %v14469_v7 = vand.u32 4294901760, %v10439_v57 }
  0xd2   :  { %v10450_v17 = vsub.f32 %v10365_v54, %v14445_v42  ;;  %v10465_v34 = vsub.f32 %v10390_v10, %v14449_v59  ;;  %v10469_v54 = vld [vmem:[#allocation2 + $0x4d8] sm:$0xff]  ;;  %v10482_v42 = vld [vmem:[#allocation2 + $0x4e8] sm:$0xff]  ;;  %v14460_v10 = vand.u32 4294901760, %v10416_v62  ;;  %8314 = vmatprep.subr.bf16.mxu1 %v10107_v31  ;;  %v14471_v63 = vand.u32 4294901760, %v10454_v14 }
  0xd3   :  { %14448 = vst [vmem:[#allocation83_spill] sm:$0xff] %v10460_v48  ;;  %14451 = vst [vmem:[#allocation85_spill] sm:$0xff] %v10469_v54  ;;  %v10492_v48 = vsub.f32 %v10403_v19, %v14458_v53  ;;  %v10497_v8 = vsub.f32 %v10414_v6, %v14459_v47  ;;  %v14465_v53 = vand.u32 4294901760, %v10435_v16  ;;  %v14467_v6 = vand.u32 4294901760, %v10437_v40  ;;  %8172 = vmatpush1.bf16.msra.mxu0 %v10113_v41 }
  0xd4   :  { %14446 = vst [vmem:[#allocation82_spill] sm:$0xff] %v10450_v17  ;;  %14450 = vst [vmem:[#allocation84_spill] sm:$0xff] %v10465_v34  ;;  %v10486_v34 = vld [vmem:[#allocation2 + $0x4d0] sm:$0xff]  ;;  %v10502_v59 = vsub.f32 %v10416_v62, %v14460_v10  ;;  %v10509_v17 = vld [vmem:[#allocation2 + $0x558] sm:$0xff]  ;;  %v10525_v62 = vsub.f32 %v10439_v57, %v14469_v7  ;;  %8174 = vmatprep.subr.bf16.mxu0 %v14342_v2  ;;  %v14477_v41 = vand.u32 4294901760, %v10482_v42  ;;  %v14479_v19 = vand.u32 4294901760, %v10484_v15 }
  0xd5   :  { %14454 = vst [vmem:[#allocation87_spill] sm:$0xff] %v10477_v26  ;;  %14455 = vst [vmem:[#allocation88_spill] sm:$0xff] %v10482_v42  ;;  %v10505_v26 = vld [vmem:[#allocation2 + $0x548] sm:$0xff]  ;;  %v10515_v47 = vsub.f32 %v10435_v16, %v14465_v53  ;;  %v10520_v10 = vsub.f32 %v10437_v40, %v14467_v6  ;;  %v13895_v7 = vand.u32 4294901760, %v10486_v34  ;;  %v14475_v16 = vand.u32 4294901760, %v10471_v12  ;;  %8316 = vmatpush1.bf16.msra.mxu1 %v10117_v49 }
  0xd6   :  { %14457 = vst [vmem:[#allocation90_spill] sm:$0xff] %v10486_v34  ;;  %14461 = vst [vmem:[#allocation91_spill] sm:$0xff] %v10502_v59  ;;  %v10532_v59 = vsub.f32 %v10454_v14, %v14471_v63  ;;  %v14473_v63 = vand.u32 4294901760, %v10469_v54  ;;  %v10556_v57 = vsub.f32 %v10482_v42, %v14477_v41  ;;  %v10561_v31 = vsub.f32 %v10484_v15, %v14479_v19 }
  0xd7   :  { %14462 = vst [vmem:[#allocation92_spill] sm:$0xff] %v10505_v26  ;;  %14464 = vst [vmem:[#allocation94_spill] sm:$0xff] %v10509_v17  ;;  %v10551_v6 = vsub.f32 %v10471_v12, %v14475_v16  ;;  %v10567_v2 = vsub.f32 %v10486_v34, %v13895_v7  ;;  %v14482_v16 = vand.u32 4294901760, %v10505_v26  ;;  %v14484_v41 = vand.u32 4294901760, %v10507_v28  ;;  %8318 = vmatprep.subr.bf16.mxu1 %v14343_v22  ;;  %v14496_v12 = vld [vmem:[#allocation26_spill] sm:$0xff] }
  0xd8   :  { %14466 = vst [vmem:[#allocation95_spill] sm:$0xff] %v10515_v47  ;;  %14468 = vst [vmem:[#allocation96_spill] sm:$0xff] %v10520_v10  ;;  %v10546_v53 = vsub.f32 %v10469_v54, %v14473_v63  ;;  %v14486_v19 = vand.u32 4294901760, %v10509_v17  ;;  %965 = vmatmul.mubr.f32.vlgmr.msra.gmra.mrb[0].mxu0 %v14287_v30  ;;  %1716 = vmatmul.mubr.f32.vlgmr.msra.gmra.mrb[0].mxu1 %v14287_v30 }
  0xd9   :  { %14470 = vst [vmem:[#allocation97_spill] sm:$0xff] %v10525_v62  ;;  %14472 = vst [vmem:[#allocation98_spill] sm:$0xff] %v10532_v59  ;;  %v10572_v63 = vsub.f32 %v10505_v26, %v14482_v16  ;;  %v10577_v42 = vsub.f32 %v10507_v28, %v14484_v41  ;;  %8176 = vmatpush1.bf16.msra.mxu0 %v14345_v25  ;;  %1059 = vmatprep.mubr.f32.mxu0 %v14281_v38  ;;  %v14488_v26 = vld [vmem:[#allocation79_spill] sm:$0xff]  ;;  %v14493_v28 = vld [vmem:[#allocation25_spill] sm:$0xff]  ;;  %v14501_v25 = vand.u32 4294901760, %v10208_v20 }
  0xda   :  { %14474 = vst [vmem:[#allocation99_spill] sm:$0xff] %v10546_v53  ;;  %14476 = vst [vmem:[#allocation100_spill] sm:$0xff] %v10551_v6  ;;  %v10582_v15 = vsub.f32 %v10509_v17, %v14486_v19  ;;  %8178 = vmatprep.subr.bf16.mxu0 %v14346_v11  ;;  %8320 = vmatpush1.bf16.msra.mxu1 %v14347_v32  ;;  %v14489_v16 = vld [vmem:[#allocation23_spill] sm:$0xff]  ;;  %v14503_v32 = vand.u32 4294901760, %v10219_v50  ;;  %v14506_v17 = vand.u32 4294901760, %v10240_v45  ;;  %v14507_v19 = vand.u32 4294901760, %v10245_v46 }
  0xdb   :  { %14478 = vst [vmem:[#allocation101_spill] sm:$0xff] %v10556_v57  ;;  %14480 = vst [vmem:[#allocation102_spill] sm:$0xff] %v10561_v31  ;;  %1810 = vmatprep.mubr.f32.mxu1 %v14281_v38  ;;  %8322 = vmatprep.subr.bf16.mxu1 %v14348_v1  ;;  %v14490_v22 = vld [vmem:[#allocation82_spill] sm:$0xff]  ;;  %v14491_v41 = vld [vmem:[#allocation83_spill] sm:$0xff]  ;;  %v14510_v11 = vand.u32 4294901760, %v10263_v58 }
  0xdc   :  { %14481 = vst [vmem:[#allocation103_spill] sm:$0xff] %v10567_v2  ;;  %14483 = vst [vmem:[#allocation104_spill] sm:$0xff] %v10572_v63  ;;  %v14492_v49 = vld [vmem:[#allocation84_spill] sm:$0xff]  ;;  %v14498_v1 = vld [vmem:[#allocation27_spill] sm:$0xff] }
  0xdd   :  { %14485 = vst [vmem:[#allocation105_spill] sm:$0xff] %v10577_v42  ;;  %14487 = vst [vmem:[#allocation106_spill] sm:$0xff] %v10582_v15  ;;  %8180 = vmatpush1.bf16.msra.mxu0 %v14349_v9  ;;  %v14495_v34 = vld [vmem:[#allocation91_spill] sm:$0xff]  ;;  %v14497_v9 = vld [vmem:[#allocation28_spill] sm:$0xff] }
  0xde   :  { %8182 = vmatprep.subr.bf16.mxu0 %v14350_v29  ;;  %8324 = vmatpush1.bf16.msra.mxu1 %v14489_v16  ;;  %v14494_v29 = vld [vmem:[#allocation87_spill] sm:$0xff]  ;;  %v14499_v16 = vld [vmem:[#allocation29_spill] sm:$0xff] }
  0xdf   :  { %8326 = vmatprep.subr.bf16.mxu1 %v14493_v28 }
  0xe1   :  { %8184 = vmatpush1.bf16.msra.mxu0 %v14496_v12  ;;  %v10665_v12 = vpack.c.bf16 %v14507_v19, %v14506_v17  ;;  %v14519_v19 = vand.u32 4294901760, %v10310_v61 }
  0xe2   :  { %8186 = vmatprep.subr.bf16.mxu0 %v14497_v9  ;;  %8328 = vmatpush1.bf16.msra.mxu1 %v14498_v1  ;;  %v14500_v9 = vand.u32 4294901760, %v10203_v37  ;;  %v14504_v1 = vand.u32 4294901760, %v10235_v4 }
  0xe3   :  { %8330 = vmatprep.subr.bf16.mxu1 %v14499_v16  ;;  %14508 = vst [vmem:[#allocation82_spill] sm:$0xff] %v10665_v12  ;;  %v14509_v16 = vand.u32 4294901760, %v10258_v52  ;;  %v14520_v12 = vand.u32 4294901760, %v10315_v23 }
  0xe4   :  { %v10653_v28 = vpack.c.bf16 %v14501_v25, %v14500_v9  ;;  %v10659_v7 = vpack.c.bf16 %v14504_v1, %v14503_v32  ;;  %v14512_v25 = vld [vmem:[#allocation30_spill] sm:$0xff]  ;;  %v14513_v9 = vand.u32 4294901760, %v10268_v43  ;;  %v14516_v1 = vand.u32 4294901760, %v10290_v27 }
  0xe5   :  { %v10671_v54 = vpack.c.bf16 %v14510_v11, %v14509_v16  ;;  %8188 = vmatpush1.bf16.msra.mxu0 %v14512_v25  ;;  %v10690_v11 = vpack.c.bf16 %v14520_v12, %v14519_v19  ;;  %v14522_v16 = vand.u32 4294901760, %v10326_v39  ;;  %v14523_v25 = vand.u32 4294901760, %v10331_v60 }
  0xe6   :  { %14502 = vst [vmem:[#allocation79_spill] sm:$0xff] %v10653_v28  ;;  %14505 = vst [vmem:[#allocation23_spill] sm:$0xff] %v10659_v7  ;;  %v14514_v28 = vand.u32 4294901760, %v10277_v55  ;;  %v14517_v7 = vand.u32 4294901760, %v10305_v35  ;;  %v14532_v19 = vand.u32 4294901760, %v10378_v56 }
  0xe7   :  { %14511 = vst [vmem:[#allocation83_spill] sm:$0xff] %v10671_v54  ;;  %14521 = vst [vmem:[#allocation87_spill] sm:$0xff] %v10690_v11  ;;  %v10696_v54 = vpack.c.bf16 %v14523_v25, %v14522_v16  ;;  %v14533_v11 = vand.u32 4294901760, %v10383_v24  ;;  %v14535_v25 = vand.u32 4294901760, %v10388_v44 }
  0xe8   :  { %v10678_v32 = vpack.c.bf16 %v14514_v28, %v14513_v9  ;;  %v10684_v17 = vpack.c.bf16 %v14517_v7, %v14516_v1  ;;  %v14525_v28 = vld [vmem:[#allocation32_spill] sm:$0xff]  ;;  %v14526_v9 = vand.u32 4294901760, %v10336_v51  ;;  %v14529_v1 = vand.u32 4294901760, %v10359_v0 }
  0xe9   :  { %14524 = vst [vmem:[#allocation91_spill] sm:$0xff] %v10696_v54  ;;  %8190 = vmatprep.subr.bf16.mxu0 %v14525_v28  ;;  %v10715_v16 = vpack.c.bf16 %v14533_v11, %v14532_v19  ;;  %v14536_v28 = vand.u32 4294901760, %v10396_v13  ;;  %v14545_v19 = vand.u32 4294901760, %v10445_v18 }
  0xea   :  { %14515 = vst [vmem:[#allocation84_spill] sm:$0xff] %v10678_v32  ;;  %14518 = vst [vmem:[#allocation25_spill] sm:$0xff] %v10684_v17  ;;  %v14527_v32 = vand.u32 4294901760, %v10354_v33  ;;  %v14530_v17 = vand.u32 4294901760, %v10373_v5 }
  0xeb   :  { %14534 = vst [vmem:[#allocation27_spill] sm:$0xff] %v10715_v16  ;;  %v10721_v54 = vpack.c.bf16 %v14536_v28, %v14535_v25  ;;  %v14546_v16 = vand.u32 4294901760, %v14490_v22  ;;  %v14548_v28 = vand.u32 4294901760, %v14491_v41 }
  0xec   :  { %v10703_v7 = vpack.c.bf16 %v14527_v32, %v14526_v9  ;;  %v10709_v12 = vpack.c.bf16 %v14530_v17, %v14529_v1  ;;  %v14538_v32 = vld [vmem:[#allocation31_spill] sm:$0xff]  ;;  %v14539_v9 = vand.u32 4294901760, %v10409_v36  ;;  %v14542_v1 = vand.u32 4294901760, %v10427_v3 }
  0xed   :  { %14537 = vst [vmem:[#allocation29_spill] sm:$0xff] %v10721_v54  ;;  %8332 = vmatpush1.bf16.msra.mxu1 %v14538_v32  ;;  %v10740_v25 = vpack.c.bf16 %v14546_v16, %v14545_v19  ;;  %v14549_v32 = vand.u32 4294901760, %v14492_v49  ;;  %v14558_v19 = vand.u32 4294901760, %v10515_v47 }
  0xee   :  { %14528 = vst [vmem:[#allocation26_spill] sm:$0xff] %v10703_v7  ;;  %14531 = vst [vmem:[#allocation28_spill] sm:$0xff] %v10709_v12  ;;  %v14540_v7 = vand.u32 4294901760, %v10422_v21  ;;  %v14543_v12 = vand.u32 4294901760, %v14488_v26 }
  0xef   :  { %14547 = vst [vmem:[#allocation31_spill] sm:$0xff] %v10740_v25  ;;  %v10746_v54 = vpack.c.bf16 %v14549_v32, %v14548_v28  ;;  %v14559_v25 = vand.u32 4294901760, %v10520_v10  ;;  %v14561_v32 = vand.u32 4294901760, %v10525_v62  ;;  %v14654_v62 = vld [vmem:[#allocation72_spill] sm:$0xff] }
  0xf0   :  { %v10728_v17 = vpack.c.bf16 %v14540_v7, %v14539_v9  ;;  %v10734_v11 = vpack.c.bf16 %v14543_v12, %v14542_v1  ;;  %v14551_v7 = vld [vmem:[#allocation33_spill] sm:$0xff]  ;;  %v14552_v9 = vand.u32 4294901760, %v14494_v29  ;;  %v14555_v1 = vand.u32 4294901760, %v10497_v8 }
  0xf1   :  { %14550 = vst [vmem:[#allocation107_spill] sm:$0xff] %v10746_v54  ;;  %8334 = vmatprep.subr.bf16.mxu1 %v14551_v7  ;;  %v10765_v28 = vpack.c.bf16 %v14559_v25, %v14558_v19  ;;  %v14562_v7 = vand.u32 4294901760, %v10532_v59  ;;  %v14571_v19 = vand.u32 4294901760, %v10567_v2  ;;  %v14644_v59 = vld [vmem:[#allocation68_spill] sm:$0xff] }
  0xf2   :  { %14541 = vst [vmem:[#allocation30_spill] sm:$0xff] %v10728_v17  ;;  %14544 = vst [vmem:[#allocation32_spill] sm:$0xff] %v10734_v11  ;;  %v14553_v17 = vand.u32 4294901760, %v10492_v48  ;;  %v14556_v11 = vand.u32 4294901760, %v14495_v34 }
  0xf3   :  { %14560 = vst [vmem:[#allocation109_spill] sm:$0xff] %v10765_v28  ;;  %v10771_v54 = vpack.c.bf16 %v14562_v7, %v14561_v32  ;;  %v14572_v28 = vand.u32 4294901760, %v10572_v63  ;;  %v14574_v7 = vand.u32 4294901760, %v10577_v42 }
  0xf4   :  { %v10753_v12 = vpack.c.bf16 %v14553_v17, %v14552_v9  ;;  %v10759_v16 = vpack.c.bf16 %v14556_v11, %v14555_v1  ;;  %v14564_v17 = vld [vmem:[#allocation34_spill] sm:$0xff]  ;;  %v14565_v9 = vand.u32 4294901760, %v10546_v53  ;;  %v14568_v1 = vand.u32 4294901760, %v10556_v57 }
  0xf5   :  { %14563 = vst [vmem:[#allocation110_spill] sm:$0xff] %v10771_v54  ;;  %8192 = vmatpush1.bf16.msra.mxu0 %v14564_v17  ;;  %v10790_v32 = vpack.c.bf16 %v14572_v28, %v14571_v19  ;;  %v14575_v17 = vand.u32 4294901760, %v10582_v15  ;;  %v14580_v57 = vld [vmem:[#allocation14_spill] sm:$0xff]  ;;  %v14585_v28 = vld [vmem:[#allocation16_spill] sm:$0xff] }
  0xf6   :  { %14554 = vst [vmem:[#allocation33_spill] sm:$0xff] %v10753_v12  ;;  %14557 = vst [vmem:[#allocation108_spill] sm:$0xff] %v10759_v16  ;;  %v14566_v12 = vand.u32 4294901760, %v10551_v6  ;;  %v14569_v16 = vand.u32 4294901760, %v10561_v31  ;;  %v14581_v31 = vand.u32 4294901760, %v14580_v57  ;;  %v14586_v19 = vand.u32 4294901760, %v14585_v28 }
  0xf7   :  { %14573 = vst [vmem:[#allocation112_spill] sm:$0xff] %v10790_v32  ;;  %v10796_v54 = vpack.c.bf16 %v14575_v17, %v14574_v7  ;;  %v14587_v32 = vld [vmem:[#allocation18_spill] sm:$0xff]  ;;  %v14590_v7 = vld [vmem:[#allocation41_spill] sm:$0xff]  ;;  %v14596_v57 = vld [vmem:[#allocation43_spill] sm:$0xff] }
  0xf8   :  { %v10778_v11 = vpack.c.bf16 %v14566_v12, %v14565_v9  ;;  %v10784_v25 = vpack.c.bf16 %v14569_v16, %v14568_v1  ;;  %v14577_v12 = vld [vmem:[#allocation36_spill] sm:$0xff]  ;;  %v14578_v9 = vld [vmem:[#allocation13_spill] sm:$0xff]  ;;  %v14583_v1 = vld [vmem:[#allocation35_spill] sm:$0xff]  ;;  %v14588_v42 = vand.u32 4294901760, %v14587_v32 }
  0xf9   :  { %14576 = vst [vmem:[#allocation113_spill] sm:$0xff] %v10796_v54  ;;  %8194 = vmatprep.subr.bf16.mxu0 %v14577_v12  ;;  %8336 = vmatpush1.bf16.msra.mxu1 %v14583_v1  ;;  %v14591_v17 = vld [vmem:[#allocation37_spill] sm:$0xff]  ;;  %v14593_v54 = vld [vmem:[#allocation38_spill] sm:$0xff]  ;;  %v14601_v28 = vld [vmem:[#allocation44_spill] sm:$0xff] }
  0xfa   :  { %14567 = vst [vmem:[#allocation34_spill] sm:$0xff] %v10778_v11  ;;  %14570 = vst [vmem:[#allocation111_spill] sm:$0xff] %v10784_v25  ;;  %v14579_v11 = vand.u32 4294901760, %v14578_v9  ;;  %v14584_v25 = vld [vmem:[#allocation39_spill] sm:$0xff]  ;;  %v10811_v63 = vpack.c.bf16 %v14588_v42, %v14586_v19  ;;  %8196 = vmatpush1.bf16.msra.mxu0 %v14590_v7  ;;  %v14592_v12 = vand.u32 4294901760, %v14591_v17  ;;  %v14594_v9 = vand.u32 4294901760, %v14593_v54 }
  0xfb   :  { %8338 = vmatprep.subr.bf16.mxu1 %v14584_v25  ;;  %v14602_v42 = vld [vmem:[#allocation40_spill] sm:$0xff]  ;;  %v14604_v19 = vld [vmem:[#allocation42_spill] sm:$0xff]  ;;  %v14607_v54 = vld [vmem:[#allocation15_spill] sm:$0xff] }
  0xfc   :  { %v10803_v16 = vpack.c.bf16 %v14581_v31, %v14579_v11  ;;  %14589 = vst [vmem:[#allocation13_spill] sm:$0xff] %v10811_v63  ;;  %v10818_v15 = vpack.c.bf16 %v14594_v9, %v14592_v12  ;;  %v14597_v31 = vand.u32 4294901760, %v14596_v57  ;;  %v14598_v11 = vld [vmem:[#allocation45_spill] sm:$0xff]  ;;  %v14603_v32 = vand.u32 4294901760, %v14602_v42  ;;  %v14609_v12 = vld [vmem:[#allocation20_spill] sm:$0xff]  ;;  %v14659_v6 = vld [vmem:[#allocation74_spill] sm:$0xff] }
  0xfd   :  { %v14599_v25 = vand.u32 4294901760, %v14598_v11  ;;  %8340 = vmatpush1.bf16.msra.mxu1 %v14601_v28  ;;  %v14605_v7 = vand.u32 4294901760, %v14604_v19  ;;  %1061 = vmatmul.mubr.f32.vlgmr.msra.gmra.mrb[0].mxu0 %v14287_v30  ;;  %v14608_v17 = vand.u32 4294901760, %v14607_v54  ;;  %v14610_v9 = vand.u32 4294901760, %v14609_v12  ;;  %v14622_v12 = vld [vmem:[#allocation22_spill] sm:$0xff] }
  0xfe   :  { %14582 = vst [vmem:[#allocation36_spill] sm:$0xff] %v10803_v16  ;;  %14595 = vst [vmem:[#allocation14_spill] sm:$0xff] %v10818_v15  ;;  %8342 = vmatprep.subr.bf16.mxu0 %v10803_v16  ;;  %8486 = vmatprep.subr.bf16.mxu1 %v10811_v63 }
  0xff   :  { %v10825_v1 = vpack.c.bf16 %v14599_v25, %v14597_v31  ;;  %v10832_v2 = vpack.c.bf16 %v14605_v7, %v14603_v32  ;;  %v10840_v57 = vpack.c.bf16 %v14610_v9, %v14608_v17  ;;  %8344 = vmatpush1.bf16.msra.mxu0 %v10818_v15  ;;  %v14612_v31 = vld [vmem:[#allocation19_spill] sm:$0xff]  ;;  %v14614_v25 = vld [vmem:[#allocation21_spill] sm:$0xff]  ;;  %1906 = vmatprep.mubr.f32.mxu0 %v14281_v38  ;;  %v14623_v9 = vand.u32 4294901760, %v14622_v12 }
 0x100   :  { %v14613_v11 = vand.u32 4294901760, %v14612_v31  ;;  %v14615_v28 = vand.u32 4294901760, %v14614_v25  ;;  %1812 = vmatmul.mubr.f32.vlgmr.msra.gmra.mrb[0].mxu1 %v14287_v30  ;;  %v14617_v32 = vld [vmem:[#allocation51_spill] sm:$0xff]  ;;  %v14619_v7 = vld [vmem:[#allocation53_spill] sm:$0xff]  ;;  %v14624_v31 = vld [vmem:[#allocation24_spill] sm:$0xff] }
 0x101   :  { %14600 = vst [vmem:[#allocation35_spill] sm:$0xff] %v10825_v1  ;;  %14606 = vst [vmem:[#allocation39_spill] sm:$0xff] %v10832_v2  ;;  %8346 = vmatprep.subr.bf16.mxu0 %v10825_v1  ;;  %v14618_v19 = vand.u32 4294901760, %v14617_v32  ;;  %v14620_v54 = vand.u32 4294901760, %v14619_v7  ;;  %8488 = vmatpush1.bf16.msra.mxu1 %v10832_v2  ;;  %v14625_v25 = vand.u32 4294901760, %v14624_v31  ;;  %v14629_v15 = vld [vmem:[#allocation55_spill] sm:$0xff] }
 0x102   :  { %14611 = vst [vmem:[#allocation16_spill] sm:$0xff] %v10840_v57  ;;  %v10847_v42 = vpack.c.bf16 %v14615_v28, %v14613_v11  ;;  %2657 = vmatprep.mubr.f32.mxu1 %v14281_v38  ;;  %8490 = vmatprep.subr.bf16.mxu1 %v10840_v57  ;;  %v14627_v28 = vld [vmem:[#allocation54_spill] sm:$0xff]  ;;  %v14630_v32 = vand.u32 4294901760, %v14629_v15  ;;  %v14642_v57 = vld [vmem:[#allocation64_spill] sm:$0xff]  ;;  %v14645_v15 = vand.u32 4294901760, %v14644_v59  ;;  %v14660_v59 = vand.u32 4294901760, %v14659_v6 }
 0x103   :  { %v10856_v17 = vpack.c.bf16 %v14620_v54, %v14618_v19  ;;  %v10863_v11 = vpack.c.bf16 %v14625_v25, %v14623_v9  ;;  %v14628_v1 = vand.u32 4294901760, %v14627_v28  ;;  %v14632_v19 = vld [vmem:[#allocation57_spill] sm:$0xff]  ;;  %v14634_v54 = vld [vmem:[#allocation58_spill] sm:$0xff]  ;;  %v14637_v9 = vld [vmem:[#allocation59_spill] sm:$0xff]  ;;  %v14643_v28 = vand.u32 4294901760, %v14642_v57 }
 0x104   :  { %14616 = vst [vmem:[#allocation18_spill] sm:$0xff] %v10847_v42  ;;  %8348 = vmatpush1.bf16.msra.mxu0 %v10847_v42  ;;  %v14633_v7 = vand.u32 4294901760, %v14632_v19  ;;  %v14635_v12 = vand.u32 4294901760, %v14634_v54  ;;  %v14638_v31 = vand.u32 4294901760, %v14637_v9  ;;  %v14639_v25 = vld [vmem:[#allocation63_spill] sm:$0xff]  ;;  %v14649_v42 = vld [vmem:[#allocation70_spill] sm:$0xff] }
 0x105   :  { %14621 = vst [vmem:[#allocation41_spill] sm:$0xff] %v10856_v17  ;;  %14626 = vst [vmem:[#allocation37_spill] sm:$0xff] %v10863_v11  ;;  %v10871_v63 = vpack.c.bf16 %v14630_v32, %v14628_v1  ;;  %v14640_v16 = vand.u32 4294901760, %v14639_v25  ;;  %v10890_v1 = vpack.c.bf16 %v14645_v15, %v14643_v28  ;;  %8350 = vmatprep.subr.bf16.mxu0 %v10856_v17  ;;  %v14647_v32 = vld [vmem:[#allocation69_spill] sm:$0xff]  ;;  %v14650_v54 = vand.u32 4294901760, %v14649_v42  ;;  %v14663_v42 = vld [vmem:[#allocation75_spill] sm:$0xff] }
 0x106   :  { %v10878_v2 = vpack.c.bf16 %v14635_v12, %v14633_v7  ;;  %v14648_v19 = vand.u32 4294901760, %v14647_v32  ;;  %v14652_v12 = vld [vmem:[#allocation71_spill] sm:$0xff]  ;;  %v14655_v25 = vand.u32 4294901760, %v14654_v62  ;;  %v14662_v15 = vand.u32 4294901760, %v10203_v37  ;;  %8492 = vmatpush1.bf16.msra.mxu1 %v10863_v11  ;;  %v14668_v62 = vld [vmem:[#allocation77_spill] sm:$0xff] }
 0x107   :  { %14631 = vst [vmem:[#allocation38_spill] sm:$0xff] %v10871_v63  ;;  %v10884_v30 = vpack.c.bf16 %v14640_v16, %v14638_v31  ;;  %14646 = vst [vmem:[#allocation44_spill] sm:$0xff] %v10890_v1  ;;  %v14653_v9 = vand.u32 4294901760, %v14652_v12  ;;  %v14657_v31 = vld [vmem:[#allocation73_spill] sm:$0xff]  ;;  %v14673_v6 = vand.u32 4294901760, %v10208_v20  ;;  %8494 = vmatprep.subr.bf16.mxu1 %v10871_v63 }
 0x108   :  { %14636 = vst [vmem:[#allocation43_spill] sm:$0xff] %v10878_v2  ;;  %v10897_v7 = vpack.c.bf16 %v14650_v54, %v14648_v19  ;;  %v14658_v57 = vand.u32 4294901760, %v14657_v31  ;;  %v1921_v32 = vsub.f32 %v10203_v37, %v14662_v15  ;;  %v14664_v19 = vand.u32 4294901760, %v14663_v42  ;;  %v14665_v54 = vld [vmem:[#allocation76_spill] sm:$0xff]  ;;  %v14683_v11 = vld [vmem:[#allocation85_spill] sm:$0xff]  ;;  %8352 = vmatpush1.bf16.msra.mxu0 %v10878_v2 }
 0x109   :  { %14641 = vst [vmem:[#allocation45_spill] sm:$0xff] %v10884_v30  ;;  %v10903_v16 = vpack.c.bf16 %v14655_v25, %v14653_v9  ;;  %v14666_v12 = vand.u32 4294901760, %v14665_v54  ;;  %v14669_v9 = vand.u32 4294901760, %v14668_v62  ;;  %v14670_v25 = vld [vmem:[#allocation78_spill] sm:$0xff]  ;;  %v14675_v42 = vld [vmem:[#allocation80_spill] sm:$0xff]  ;;  %v14679_v62 = vld [vmem:[#allocation81_spill] sm:$0xff]  ;;  %8354 = vmatprep.subr.bf16.mxu0 %v10890_v1 }
 0x10a   :  { %14651 = vst [vmem:[#allocation40_spill] sm:$0xff] %v10897_v7  ;;  %v10909_v28 = vpack.c.bf16 %v14660_v59, %v14658_v57  ;;  %v14671_v31 = vand.u32 4294901760, %v14670_v25  ;;  %v1933_v57 = vsub.f32 %v10208_v20, %v14673_v6  ;;  %v14674_v59 = vand.u32 4294901760, %v10219_v50  ;;  %v14685_v20 = vld [vmem:[#allocation86_spill] sm:$0xff]  ;;  %8496 = vmatpush1.bf16.msra.mxu1 %v10884_v30 }
 0x10b   :  { %14656 = vst [vmem:[#allocation42_spill] sm:$0xff] %v10903_v16  ;;  %v10919_v17 = vpack.c.bf16 %v14666_v12, %v14664_v19  ;;  %v14676_v54 = vand.u32 4294901760, %v14675_v42  ;;  %v14677_v19 = vand.u32 4294901760, %v10437_v40  ;;  %v14680_v25 = vand.u32 4294901760, %v14679_v62  ;;  %v14693_v40 = vld [vmem:[#allocation90_spill] sm:$0xff]  ;;  %8498 = vmatprep.subr.bf16.mxu1 %v10897_v7 }
 0x10c   :  { %14661 = vst [vmem:[#allocation15_spill] sm:$0xff] %v10909_v28  ;;  %v10925_v53 = vpack.c.bf16 %v14671_v31, %v14669_v9  ;;  %v2672_v15 = vsub.f32 %v10219_v50, %v14674_v59  ;;  %v14681_v9 = vand.u32 4294901760, %v10454_v14  ;;  %v14684_v6 = vand.u32 4294901760, %v14683_v11  ;;  %v14688_v59 = vld [vmem:[#allocation88_spill] sm:$0xff]  ;;  %v14690_v50 = vld [vmem:[#allocation89_spill] sm:$0xff]  ;;  %8356 = vmatpush1.bf16.msra.mxu0 %v10903_v16 }
 0x10d   :  { %14667 = vst [vmem:[#allocation20_spill] sm:$0xff] %v10919_v17  ;;  %v10938_v12 = vpack.c.bf16 %v14677_v19, %v14676_v54  ;;  %v14686_v37 = vand.u32 4294901760, %v14685_v20  ;;  %v14689_v63 = vand.u32 4294901760, %v14688_v59  ;;  %v14691_v42 = vand.u32 4294901760, %v14690_v50  ;;  %v14695_v19 = vld [vmem:[#allocation92_spill] sm:$0xff]  ;;  %8358 = vmatprep.subr.bf16.mxu0 %v10919_v17 }
 0x10e   :  { %14672 = vst [vmem:[#allocation19_spill] sm:$0xff] %v10925_v53  ;;  %v10944_v31 = vpack.c.bf16 %v14681_v9, %v14680_v25  ;;  %v14694_v54 = vand.u32 4294901760, %v14693_v40  ;;  %v14696_v14 = vand.u32 4294901760, %v14695_v19  ;;  %v14698_v25 = vld [vmem:[#allocation93_spill] sm:$0xff]  ;;  %v14700_v9 = vld [vmem:[#allocation94_spill] sm:$0xff]  ;;  %v14705_v40 = vand.u32 4294901760, %v10245_v46  ;;  %8500 = vmatpush1.bf16.msra.mxu1 %v10909_v28 }
 0x10f   :  { %14678 = vst [vmem:[#allocation21_spill] sm:$0xff] %v10938_v12  ;;  %v10950_v10 = vpack.c.bf16 %v14686_v37, %v14684_v6  ;;  %v10956_v47 = vpack.c.bf16 %v14691_v42, %v14689_v63  ;;  %v14699_v11 = vand.u32 4294901760, %v14698_v25  ;;  %v14701_v20 = vand.u32 4294901760, %v14700_v9  ;;  %8502 = vmatprep.subr.bf16.mxu1 %v10925_v53  ;;  %v14751_v53 = vld [vmem:[#allocation102_spill] sm:$0xff] }
 0x110   :  { %14682 = vst [vmem:[#allocation51_spill] sm:$0xff] %v10944_v31  ;;  %v10963_v62 = vpack.c.bf16 %v14696_v14, %v14694_v54  ;;  %v14703_v6 = vand.u32 4294901760, %v10235_v4  ;;  %v14704_v63 = vand.u32 4294901760, %v10240_v45  ;;  %v1922_v42 = vand.u32 4294901760, %v1921_v32  ;;  %8360 = vmatpush1.bf16.msra.mxu0 %v10938_v12 }
 0x111   :  { %14687 = vst [vmem:[#allocation53_spill] sm:$0xff] %v10950_v10  ;;  %14692 = vst [vmem:[#allocation22_spill] sm:$0xff] %v10956_v47  ;;  %v10969_v37 = vpack.c.bf16 %v14701_v20, %v14699_v11  ;;  %v1939_v54 = vsub.f32 %v10245_v46, %v14705_v40  ;;  %v14706_v19 = vand.u32 4294901760, %v10258_v52  ;;  %v14707_v25 = vand.u32 4294901760, %v10263_v58  ;;  %8362 = vmatprep.subr.bf16.mxu0 %v10950_v10  ;;  %v14749_v10 = vld [vmem:[#allocation101_spill] sm:$0xff] }
 0x112   :  { %14697 = vst [vmem:[#allocation24_spill] sm:$0xff] %v10963_v62  ;;  %v2684_v50 = vsub.f32 %v10235_v4, %v14703_v6  ;;  %v1927_v59 = vsub.f32 %v10240_v45, %v14704_v63  ;;  %v1934_v9 = vand.u32 4294901760, %v1933_v57  ;;  %v2673_v20 = vand.u32 4294901760, %v2672_v15  ;;  %8504 = vmatpush1.bf16.msra.mxu1 %v10944_v31 }
 0x113   :  { %14702 = vst [vmem:[#allocation54_spill] sm:$0xff] %v10969_v37  ;;  %v2678_v14 = vsub.f32 %v10258_v52, %v14706_v19  ;;  %v2690_v11 = vsub.f32 %v10263_v58, %v14707_v25  ;;  %v14708_v6 = vand.u32 4294901760, %v10268_v43  ;;  %v14709_v63 = vand.u32 4294901760, %v10277_v55  ;;  %8506 = vmatprep.subr.bf16.mxu1 %v10956_v47 }
 0x114   :  { %v14710_v19 = vand.u32 4294901760, %v10290_v27  ;;  %v14711_v25 = vand.u32 4294901760, %v10305_v35  ;;  %v14712_v57 = vand.u32 4294901760, %v10310_v61  ;;  %v1928_v7 = vand.u32 4294901760, %v1927_v59  ;;  %8364 = vmatpush1.bf16.msra.mxu0 %v10963_v62  ;;  %v14747_v62 = vld [vmem:[#allocation98_spill] sm:$0xff] }
 0x115   :  { %v1945_v32 = vsub.f32 %v10268_v43, %v14708_v6  ;;  %v1957_v40 = vsub.f32 %v10277_v55, %v14709_v63  ;;  %v14713_v6 = vand.u32 4294901760, %v10315_v23  ;;  %v2685_v63 = vand.u32 4294901760, %v2684_v50 }
 0x116   :  { %v2696_v1 = vsub.f32 %v10290_v27, %v14710_v19  ;;  %v2708_v30 = vsub.f32 %v10305_v35, %v14711_v25  ;;  %v1951_v15 = vsub.f32 %v10310_v61, %v14712_v57  ;;  %v14714_v58 = vand.u32 4294901760, %v10326_v39  ;;  %8508 = vmatpush1.bf16.msra.mxu1 %v10969_v37 }
 0x117   :  { %v1963_v2 = vsub.f32 %v10315_v23, %v14713_v6  ;;  %v14715_v27 = vand.u32 4294901760, %v10331_v60  ;;  %v1940_v35 = vand.u32 4294901760, %v1939_v54  ;;  %v2679_v57 = vand.u32 4294901760, %v2678_v14 }
 0x118   :  { %v2702_v19 = vsub.f32 %v10326_v39, %v14714_v58  ;;  %v14716_v61 = vand.u32 4294901760, %v10336_v51  ;;  %v14717_v16 = vand.u32 4294901760, %v10354_v33  ;;  %v8365_v59 = vpack.c.bf16 %v1934_v9, %v1922_v42 }
 0x119   :  { %v2714_v25 = vsub.f32 %v10331_v60, %v14715_v27  ;;  %v2691_v58 = vand.u32 4294901760, %v2690_v11  ;;  %v1946_v39 = vand.u32 4294901760, %v1945_v32  ;;  %v1958_v23 = vand.u32 4294901760, %v1957_v40 }
 0x11a   :  { %v1969_v6 = vsub.f32 %v10336_v51, %v14716_v61  ;;  %v1981_v50 = vsub.f32 %v10354_v33, %v14717_v16  ;;  %v2697_v27 = vand.u32 4294901760, %v2696_v1  ;;  %v2709_v17 = vand.u32 4294901760, %v2708_v30  ;;  %8366 = vmatprep.subr.bf16.mxu0 %v8365_v59 }
 0x11b   :  { %v1952_v54 = vand.u32 4294901760, %v1951_v15  ;;  %v1964_v14 = vand.u32 4294901760, %v1963_v2  ;;  %v2703_v60 = vand.u32 4294901760, %v2702_v19  ;;  %v2715_v61 = vand.u32 4294901760, %v2714_v25 }
 0x11c   :  { %v14718_v51 = vand.u32 4294901760, %v10359_v0  ;;  %v14719_v28 = vand.u32 4294901760, %v10373_v5  ;;  %v1970_v11 = vand.u32 4294901760, %v1969_v6  ;;  %v1982_v9 = vand.u32 4294901760, %v1981_v50 }
 0x11d   :  { %v14720_v30 = vand.u32 4294901760, %v10378_v56  ;;  %v14721_v1 = vand.u32 4294901760, %v10383_v24  ;;  %v8509_v40 = vpack.c.bf16 %v2685_v63, %v2673_v20  ;;  %v8511_v15 = vpack.c.bf16 %v2691_v58, %v2679_v57 }
 0x11e   :  { %v2720_v16 = vsub.f32 %v10359_v0, %v14718_v51  ;;  %v2732_v42 = vsub.f32 %v10373_v5, %v14719_v28  ;;  %v8367_v51 = vpack.c.bf16 %v1940_v35, %v1928_v7  ;;  %v8369_v19 = vpack.c.bf16 %v1958_v23, %v1946_v39 }
 0x11f   :  { %v1975_v2 = vsub.f32 %v10378_v56, %v14720_v30  ;;  %v1987_v32 = vsub.f32 %v10383_v24, %v14721_v1  ;;  %v14722_v28 = vand.u32 4294901760, %v10388_v44  ;;  %v14723_v6 = vand.u32 4294901760, %v10396_v13  ;;  %8510 = vmatprep.subr.bf16.mxu1 %v8509_v40 }
 0x120   :  { %v14724_v30 = vand.u32 4294901760, %v10409_v36  ;;  %v14725_v31 = vand.u32 4294901760, %v10422_v21  ;;  %v8513_v23 = vpack.c.bf16 %v2709_v17, %v2697_v27  ;;  %v8371_v39 = vpack.c.bf16 %v1964_v14, %v1952_v54  ;;  %v14730_v54 = vld [vmem:[#allocation50_spill] sm:$0xff] }
 0x121   :  { %v2726_v25 = vsub.f32 %v10388_v44, %v14722_v28  ;;  %v2738_v50 = vsub.f32 %v10396_v13, %v14723_v6  ;;  %v2721_v7 = vand.u32 4294901760, %v2720_v16  ;;  %v2733_v20 = vand.u32 4294901760, %v2732_v42  ;;  %1912 = vmatmul.mubr.f32.vlgmr.msra.gmra.mrb[2].mxu0 %v14730_v54  ;;  %2663 = vmatmul.mubr.f32.vlgmr.msra.gmra.mrb[2].mxu1 %v14730_v54  ;;  %v14745_v54 = vld [vmem:[#allocation97_spill] sm:$0xff] }
 0x122   :  { %v1993_v1 = vsub.f32 %v10409_v36, %v14724_v30  ;;  %v2005_v35 = vsub.f32 %v10422_v21, %v14725_v31  ;;  %v8515_v63 = vpack.c.bf16 %v2715_v61, %v2703_v60  ;;  %v8373_v57 = vpack.c.bf16 %v1982_v9, %v1970_v11  ;;  %8368 = vmatpush1.bf16.msra.mxu0 %v8367_v51 }
 0x123   :  { %v1976_v58 = vand.u32 4294901760, %v1975_v2  ;;  %v1988_v28 = vand.u32 4294901760, %v1987_v32  ;;  %v14726_v6 = vand.u32 4294901760, %v10427_v3  ;;  %v14727_v47 = vand.u32 4294901760, %v14488_v26  ;;  %2102 = vmatprep.mubr.f32.mxu0 %v14281_v38  ;;  %8370 = vmatprep.subr.bf16.mxu0 %v8369_v19 }
 0x124   :  { %v14728_v17 = vand.u32 4294901760, %v10445_v18  ;;  %v14729_v59 = vand.u32 4294901760, %v14490_v22  ;;  %v2727_v14 = vand.u32 4294901760, %v2726_v25  ;;  %v2739_v61 = vand.u32 4294901760, %v2738_v50  ;;  %8512 = vmatpush1.bf16.msra.mxu1 %v8511_v15  ;;  %2853 = vmatprep.mubr.f32.mxu1 %v14281_v38 }
 0x125   :  { %v2744_v30 = vsub.f32 %v10427_v3, %v14726_v6  ;;  %v2756_v31 = vsub.f32 %v14488_v26, %v14727_v47  ;;  %v1994_v16 = vand.u32 4294901760, %v1993_v1  ;;  %v2006_v42 = vand.u32 4294901760, %v2005_v35  ;;  %8514 = vmatprep.subr.bf16.mxu1 %v8513_v23 }
 0x126   :  { %v1999_v27 = vsub.f32 %v10445_v18, %v14728_v17  ;;  %v2011_v60 = vsub.f32 %v14490_v22, %v14729_v59  ;;  %v8517_v11 = vpack.c.bf16 %v2733_v20, %v2721_v7  ;;  %v14731_v9 = vand.u32 4294901760, %v14491_v41  ;;  %8372 = vmatpush1.bf16.msra.mxu0 %v8371_v39 }
 0x127   :  { %v14732_v2 = vand.u32 4294901760, %v14492_v49  ;;  %v8375_v40 = vpack.c.bf16 %v1988_v28, %v1976_v58  ;;  %v14733_v25 = vand.u32 4294901760, %v14494_v29  ;;  %v14734_v51 = vand.u32 4294901760, %v10492_v48  ;;  %8374 = vmatprep.subr.bf16.mxu0 %v8373_v57 }
 0x128   :  { %v2750_v47 = vsub.f32 %v14491_v41, %v14731_v9  ;;  %v2745_v35 = vand.u32 4294901760, %v2744_v30  ;;  %v2757_v7 = vand.u32 4294901760, %v2756_v31  ;;  %v2000_v20 = vand.u32 4294901760, %v1999_v27  ;;  %v14737_v30 = vld [vmem:[#allocation95_spill] sm:$0xff]  ;;  %8516 = vmatpush1.bf16.msra.mxu1 %v8515_v63 }
 0x129   :  { %v2762_v32 = vsub.f32 %v14492_v49, %v14732_v2  ;;  %v2017_v50 = vsub.f32 %v14494_v29, %v14733_v25  ;;  %v2029_v1 = vsub.f32 %v10492_v48, %v14734_v51  ;;  %v2012_v6 = vand.u32 4294901760, %v2011_v60  ;;  %v14739_v60 = vld [vmem:[#allocation96_spill] sm:$0xff]  ;;  %8518 = vmatprep.subr.bf16.mxu1 %v8517_v11 }
 0x12a   :  { %v8519_v17 = vpack.c.bf16 %v2739_v61, %v2727_v14  ;;  %v8377_v59 = vpack.c.bf16 %v2006_v42, %v1994_v16  ;;  %v14735_v19 = vand.u32 4294901760, %v10497_v8  ;;  %v14736_v28 = vand.u32 4294901760, %v14495_v34  ;;  %v14741_v16 = vld [vmem:[#allocation99_spill] sm:$0xff]  ;;  %8376 = vmatpush1.bf16.msra.mxu0 %v8375_v40 }
 0x12b   :  { %v2751_v2 = vand.u32 4294901760, %v2750_v47  ;;  %v2763_v15 = vand.u32 4294901760, %v2762_v32  ;;  %v14738_v31 = vand.u32 4294901760, %v14737_v30  ;;  %v14740_v25 = vand.u32 4294901760, %v14739_v60 }
 0x12c   :  { %v2768_v58 = vsub.f32 %v10497_v8, %v14735_v19  ;;  %v2780_v9 = vsub.f32 %v14495_v34, %v14736_v28  ;;  %v2018_v14 = vand.u32 4294901760, %v2017_v50  ;;  %v2030_v61 = vand.u32 4294901760, %v2029_v1  ;;  %v14743_v19 = vld [vmem:[#allocation100_spill] sm:$0xff]  ;;  %8378 = vmatprep.subr.bf16.mxu0 %v8377_v59  ;;  %8520 = vmatpush1.bf16.msra.mxu1 %v8519_v17 }
 0x12d   :  { %v2023_v27 = vsub.f32 %v14737_v30, %v14738_v31  ;;  %v2035_v23 = vsub.f32 %v14739_v60, %v14740_v25  ;;  %v14742_v42 = vand.u32 4294901760, %v14741_v16  ;;  %v14744_v28 = vand.u32 4294901760, %v14743_v19 }
 0x12e   :  { %v8521_v47 = vpack.c.bf16 %v2757_v7, %v2745_v35  ;;  %v8379_v32 = vpack.c.bf16 %v2012_v6, %v2000_v20  ;;  %v14746_v31 = vand.u32 4294901760, %v14745_v54  ;;  %v14748_v25 = vand.u32 4294901760, %v14747_v62  ;;  %v14753_v20 = vld [vmem:[#allocation103_spill] sm:$0xff] }
 0x12f   :  { %v2041_v51 = vsub.f32 %v14741_v16, %v14742_v42  ;;  %v2053_v39 = vsub.f32 %v14743_v19, %v14744_v28  ;;  %v2769_v50 = vand.u32 4294901760, %v2768_v58  ;;  %v2781_v1 = vand.u32 4294901760, %v2780_v9 }
 0x130   :  { %v2774_v37 = vsub.f32 %v14745_v54, %v14746_v31  ;;  %v2786_v57 = vsub.f32 %v14747_v62, %v14748_v25  ;;  %v14750_v42 = vand.u32 4294901760, %v14749_v10  ;;  %v14752_v28 = vand.u32 4294901760, %v14751_v53  ;;  %v14755_v54 = vld [vmem:[#allocation104_spill] sm:$0xff]  ;;  %8522 = vmatprep.subr.bf16.mxu1 %v8521_v47  ;;  %8380 = vmatpush1.bf16.msra.mxu0 %v8379_v32  ;;  %v14763_v32 = vld [vmem:[#allocation17_spill] sm:$0xff] }
 0x131   :  { %v2024_v35 = vand.u32 4294901760, %v2023_v27  ;;  %v2036_v7 = vand.u32 4294901760, %v2035_v23  ;;  %v14754_v6 = vand.u32 4294901760, %v14753_v20  ;;  %v14756_v25 = vand.u32 4294901760, %v14755_v54  ;;  %v14759_v23 = vld [vmem:[#allocation106_spill] sm:$0xff]  ;;  %v14762_v47 = vld [vmem:[#allocation12_spill] sm:$0xff] }
 0x132   :  { %v2792_v12 = vsub.f32 %v14749_v10, %v14750_v42  ;;  %v2804_v63 = vsub.f32 %v14751_v53, %v14752_v28  ;;  %v8523_v58 = vpack.c.bf16 %v2763_v15, %v2751_v2  ;;  %v8381_v9 = vpack.c.bf16 %v2030_v61, %v2018_v14  ;;  %v14757_v28 = vld [vmem:[#allocation105_spill] sm:$0xff] }
 0x133   :  { %v2047_v31 = vsub.f32 %v14753_v20, %v14754_v6  ;;  %v2059_v11 = vsub.f32 %v14755_v54, %v14756_v25  ;;  %v2042_v62 = vand.u32 4294901760, %v2041_v51  ;;  %v2054_v42 = vand.u32 4294901760, %v2053_v39 }
 0x134   :  { %v2775_v10 = vand.u32 4294901760, %v2774_v37  ;;  %v2787_v19 = vand.u32 4294901760, %v2786_v57  ;;  %v14758_v40 = vand.u32 4294901760, %v14757_v28  ;;  %v14760_v53 = vand.u32 4294901760, %v14759_v23  ;;  %8382 = vmatprep.subr.bf16.mxu0 %v8381_v9  ;;  %8524 = vmatpush1.bf16.msra.mxu1 %v8523_v58 }
 0x135   :  { %v8525_v20 = vpack.c.bf16 %v2781_v1, %v2769_v50  ;;  %v2793_v16 = vand.u32 4294901760, %v2792_v12  ;;  %v2805_v25 = vand.u32 4294901760, %v2804_v63  ;;  %v8383_v59 = vpack.c.bf16 %v2036_v7, %v2024_v35  ;;  %v14765_v1 = vld [vmem:[#allocation47_spill] sm:$0xff]  ;;  %v14766_v63 = vld [vmem:[#allocation56_spill] sm:$0xff] }
 0x136   :  { %v2798_v27 = vsub.f32 %v14757_v28, %v14758_v40  ;;  %v2810_v6 = vsub.f32 %v14759_v23, %v14760_v53  ;;  %v2048_v2 = vand.u32 4294901760, %v2047_v31  ;;  %v2060_v15 = vand.u32 4294901760, %v2059_v11  ;;  %v14761_v53 = vld [vmem:[#allocation46_spill] sm:$0xff]  ;;  %v14767_v35 = vld [vmem:[#allocation60_spill] sm:$0xff] }
 0x137   :  { %v8385_v17 = vpack.c.bf16 %v2054_v42, %v2042_v62  ;;  %v8527_v37 = vpack.c.bf16 %v2787_v19, %v2775_v10  ;;  %8526 = vmatprep.subr.bf16.mxu1 %v8525_v20  ;;  %v8529_v51 = vpack.c.bf16 %v2805_v25, %v2793_v16  ;;  %8384 = vmatpush1.bf16.msra.mxu0 %v8383_v59  ;;  %v14764_v16 = vld [vmem:[#allocation52_spill] sm:$0xff]  ;;  %v14769_v20 = vld [vmem:[#allocation62_spill] sm:$0xff]  ;;  %v14789_v25 = vld [vmem:[#allocation37_spill] sm:$0xff] }
 0x138   :  { %v2799_v14 = vand.u32 4294901760, %v2798_v27  ;;  %v2811_v61 = vand.u32 4294901760, %v2810_v6  ;;  %v8387_v39 = vpack.c.bf16 %v2060_v15, %v2048_v2  ;;  %v8389_v57 = vpack.c.bf16 %v14762_v47, %v14761_v53  ;;  %v14783_v40 = vld [vmem:[#allocation14_spill] sm:$0xff]  ;;  %v14785_v27 = vld [vmem:[#allocation39_spill] sm:$0xff]  ;;  %v14788_v6 = vld [vmem:[#allocation41_spill] sm:$0xff] }
 0x139   :  { %8386 = vmatprep.subr.bf16.mxu0 %v8385_v17  ;;  %8528 = vmatpush1.bf16.msra.mxu1 %v8527_v37  ;;  %v8533_v50 = vpack.c.bf16 %v10235_v4, %v14763_v32  ;;  %v8391_v10 = vpack.c.bf16 %v10245_v46, %v10240_v45  ;;  %v8393_v62 = vpack.c.bf16 %v10277_v55, %v10268_v43  ;;  %v14768_v4 = vld [vmem:[#allocation61_spill] sm:$0xff]  ;;  %v14770_v43 = vld [vmem:[#allocation67_spill] sm:$0xff]  ;;  %v14790_v59 = vld [vmem:[#allocation38_spill] sm:$0xff] }
 0x13a   :  { %v8531_v12 = vpack.c.bf16 %v2811_v61, %v2799_v14  ;;  %8530 = vmatprep.subr.bf16.mxu1 %v8529_v51  ;;  %v8535_v19 = vpack.c.bf16 %v14764_v16, %v10258_v52  ;;  %v8537_v7 = vpack.c.bf16 %v14767_v35, %v14766_v63  ;;  %v8395_v31 = vpack.c.bf16 %v14769_v20, %v14768_v4  ;;  %v14771_v45 = vld [vmem:[#allocation65_spill] sm:$0xff]  ;;  %v14772_v52 = vld [vmem:[#allocation66_spill] sm:$0xff]  ;;  %v14791_v2 = vld [vmem:[#allocation43_spill] sm:$0xff] }
 0x13b   :  { %8388 = vmatpush1.bf16.msra.mxu0 %v8387_v39  ;;  %v8397_v46 = vpack.c.bf16 %v10354_v33, %v14770_v43  ;;  %v8539_v55 = vpack.c.bf16 %v14772_v52, %v14771_v45  ;;  %v8541_v11 = vpack.c.bf16 %v10373_v5, %v10359_v0  ;;  %v8399_v58 = vpack.c.bf16 %v10383_v24, %v10378_v56  ;;  %v14774_v5 = vld [vmem:[#allocation100_spill] sm:$0xff]  ;;  %v14793_v17 = vld [vmem:[#allocation45_spill] sm:$0xff]  ;;  %v14795_v14 = vld [vmem:[#allocation42_spill] sm:$0xff] }
 0x13c   :  { %8390 = vmatprep.subr.bf16.mxu0 %v8389_v57  ;;  %v8401_v9 = vpack.c.bf16 %v10422_v21, %v10409_v36  ;;  %v8543_v33 = vpack.c.bf16 %v10396_v13, %v10388_v44  ;;  %v8545_v42 = vpack.c.bf16 %v14488_v26, %v10427_v3  ;;  %v8403_v0 = vpack.c.bf16 %v14490_v22, %v10445_v18  ;;  %v14773_v3 = vld [vmem:[#allocation99_spill] sm:$0xff]  ;;  %v14775_v21 = vld [vmem:[#allocation97_spill] sm:$0xff]  ;;  %v14776_v18 = vld [vmem:[#allocation98_spill] sm:$0xff] }
 0x13d   :  { %8532 = vmatpush1.bf16.msra.mxu1 %v8531_v12  ;;  %v8405_v56 = vpack.c.bf16 %v10492_v48, %v14494_v29  ;;  %v8547_v24 = vpack.c.bf16 %v14492_v49, %v14491_v41  ;;  %v8549_v44 = vpack.c.bf16 %v14495_v34, %v10497_v8  ;;  %v8407_v13 = vpack.c.bf16 %v14739_v60, %v14737_v30  ;;  %v14777_v26 = vld [vmem:[#allocation101_spill] sm:$0xff]  ;;  %v14778_v22 = vld [vmem:[#allocation102_spill] sm:$0xff]  ;;  %v14779_v41 = vld [vmem:[#allocation103_spill] sm:$0xff] }
 0x13e   :  { %8534 = vmatprep.subr.bf16.mxu1 %v8533_v50  ;;  %2104 = vmatmul.mubr.f32.vlgmr.msra.gmra.mrb[2].mxu0 %v14765_v1  ;;  %v8409_v36 = vpack.c.bf16 %v14774_v5, %v14773_v3  ;;  %v8551_v48 = vpack.c.bf16 %v14776_v18, %v14775_v21  ;;  %v8553_v49 = vpack.c.bf16 %v14778_v22, %v14777_v26  ;;  %v14780_v29 = vld [vmem:[#allocation36_spill] sm:$0xff]  ;;  %v14781_v30 = vld [vmem:[#allocation13_spill] sm:$0xff]  ;;  %v14797_v51 = vld [vmem:[#allocation15_spill] sm:$0xff] }
 0x13f   :  { %8392 = vmatpush1.bf16.msra.mxu0 %v8391_v10  ;;  %2222 = vmatprep.mubr.f32.mxu0 %v14281_v38  ;;  %v8411_v8 = vpack.c.bf16 %v14755_v54, %v14779_v41  ;;  %v8555_v34 = vpack.c.bf16 %v14759_v23, %v14757_v28  ;;  %v14782_v60 = vld [vmem:[#allocation48_spill] sm:$0xff]  ;;  %v14784_v54 = vld [vmem:[#allocation35_spill] sm:$0xff]  ;;  %v14787_v23 = vld [vmem:[#allocation18_spill] sm:$0xff] }
 0x140   :  { %2855 = vmatmul.mubr.f32.vlgmr.msra.gmra.mrb[2].mxu1 %v14765_v1  ;;  %8394 = vmatprep.subr.bf16.mxu0 %v8393_v62  ;;  %v14786_v28 = vld [vmem:[#allocation16_spill] sm:$0xff]  ;;  %v14798_v39 = vld [vmem:[#allocation19_spill] sm:$0xff]  ;;  %v14799_v53 = vld [vmem:[#allocation21_spill] sm:$0xff] }
 0x141   :  { %8536 = vmatpush1.bf16.msra.mxu1 %v8535_v19  ;;  %2973 = vmatprep.mubr.f32.mxu1 %v14281_v38  ;;  %v14792_v15 = vld [vmem:[#allocation44_spill] sm:$0xff]  ;;  %v14800_v47 = vld [vmem:[#allocation53_spill] sm:$0xff]  ;;  %v14801_v57 = vld [vmem:[#allocation51_spill] sm:$0xff] }
 0x142   :  { %8538 = vmatprep.subr.bf16.mxu1 %v8537_v7  ;;  %v14794_v37 = vld [vmem:[#allocation40_spill] sm:$0xff]  ;;  %v14802_v12 = vld [vmem:[#allocation22_spill] sm:$0xff]  ;;  %v14804_v50 = vld [vmem:[#allocation79_spill] sm:$0xff] }
 0x143   :  { %8396 = vmatpush1.bf16.msra.mxu0 %v8395_v31  ;;  %v14796_v61 = vld [vmem:[#allocation20_spill] sm:$0xff]  ;;  %v14805_v10 = vld [vmem:[#allocation54_spill] sm:$0xff]  ;;  %v14806_v62 = vld [vmem:[#allocation23_spill] sm:$0xff] }
 0x144   :  { %8398 = vmatprep.subr.bf16.mxu0 %v8397_v46  ;;  %v14803_v32 = vld [vmem:[#allocation24_spill] sm:$0xff]  ;;  %v14807_v16 = vld [vmem:[#allocation49_spill] sm:$0xff]  ;;  %v14808_v19 = vld [vmem:[#allocation82_spill] sm:$0xff] }
 0x145   :  { %8540 = vmatpush1.bf16.msra.mxu1 %v8539_v55  ;;  %v14809_v63 = vld [vmem:[#allocation84_spill] sm:$0xff]  ;;  %v14810_v35 = vld [vmem:[#allocation83_spill] sm:$0xff]  ;;  %v14811_v7 = vld [vmem:[#allocation25_spill] sm:$0xff] }
 0x146   :  { %8542 = vmatprep.subr.bf16.mxu1 %v8541_v11  ;;  %v14812_v4 = vld [vmem:[#allocation87_spill] sm:$0xff]  ;;  %v14813_v20 = vld [vmem:[#allocation26_spill] sm:$0xff]  ;;  %v14815_v43 = vld [vmem:[#allocation28_spill] sm:$0xff] }
 0x147   :  { %8400 = vmatpush1.bf16.msra.mxu0 %v8399_v58  ;;  %v14814_v31 = vld [vmem:[#allocation91_spill] sm:$0xff]  ;;  %v77_v52 = vld [vmem:[#allocation2 + $0xc0] sm:$0xff]  ;;  %v64_v55 = vld [vmem:[#allocation2 + $0x58] sm:$0xff] }
 0x148   :  { %8402 = vmatprep.subr.bf16.mxu0 %v8401_v9  ;;  %v14816_v46 = vld [vmem:[#allocation27_spill] sm:$0xff]  ;;  %v14817_v11 = vld [vmem:[#allocation30_spill] sm:$0xff]  ;;  %v79_v58 = vld [vmem:[#allocation2 + $0xd0] sm:$0xff] }
 0x149   :  { %8544 = vmatpush1.bf16.msra.mxu1 %v8543_v33  ;;  %v62_v45 = vld [vmem:[#allocation2 + $0x48] sm:$0xff]  ;;  %v61_v9 = vld [vmem:[#allocation2 + $0x40] sm:$0xff]  ;;  %v76_v33 = vld [vmem:[#allocation2 + $0xb8] sm:$0xff]  ;;  %v4075_v3 = vand.u32 4294901760, %v79_v58 }
 0x14a   :  { %8546 = vmatprep.subr.bf16.mxu1 %v8545_v42  ;;  %v14818_v42 = vld [vmem:[#allocation29_spill] sm:$0xff]  ;;  %v3322_v5 = vand.u32 4294901760, %v61_v9  ;;  %v63_v21 = vld [vmem:[#allocation2 + $0x50] sm:$0xff]  ;;  %v78_v18 = vld [vmem:[#allocation2 + $0xc8] sm:$0xff] }
 0x14b   :  { %8404 = vmatpush1.bf16.msra.mxu0 %v8403_v0  ;;  %v14819_v0 = vld [vmem:[#allocation32_spill] sm:$0xff]  ;;  %v92_v26 = vld [vmem:[#allocation2 + $0x138] sm:$0xff]  ;;  %v94_v41 = vld [vmem:[#allocation2 + $0x148] sm:$0xff] }
 0x14c   :  { %8406 = vmatprep.subr.bf16.mxu0 %v8405_v56  ;;  %v3320_v56 = vand.u32 4294901760, %v62_v45  ;;  %v107_v22 = vld [vmem:[#allocation2 + $0x1b0] sm:$0xff] }
 0x14d   :  { %8548 = vmatpush1.bf16.msra.mxu1 %v8547_v24  ;;  %v3324_v24 = vand.u32 4294901760, %v77_v52 }
 0x14e   :  { %8550 = vmatprep.subr.bf16.mxu1 %v8549_v44  ;;  %v14820_v44 = vld [vmem:[#allocation31_spill] sm:$0xff] }
 0x14f   :  { %8408 = vmatpush1.bf16.msra.mxu0 %v8407_v13  ;;  %v4071_v13 = vand.u32 4294901760, %v64_v55 }
 0x150   :  { %8410 = vmatprep.subr.bf16.mxu0 %v8409_v36  ;;  %v3326_v36 = vand.u32 4294901760, %v76_v33 }
 0x151   :  { %8552 = vmatpush1.bf16.msra.mxu1 %v8551_v48  ;;  %v14821_v48 = vld [vmem:[#allocation33_spill] sm:$0xff] }
 0x152   :  { %8554 = vmatprep.subr.bf16.mxu1 %v8553_v49  ;;  %v14822_v49 = vld [vmem:[#allocation107_spill] sm:$0xff] }
 0x153   :  { %8412 = vmatpush1.bf16.msra.mxu0 %v8411_v8  ;;  %v109_v8 = vld [vmem:[#allocation2 + $0x1c0] sm:$0xff] }
 0x154   :  { %8414 = vmatprep.subr.bf16.mxu0 %v14780_v29 }
 0x155   :  { %8556 = vmatpush1.bf16.msra.mxu1 %v8555_v34  ;;  %v14823_v34 = vld [vmem:[#allocation108_spill] sm:$0xff] }
 0x156   :  { %8558 = vmatprep.subr.bf16.mxu1 %v14781_v30  ;;  %2225 = vmatmul.mubr.f32.vlgmr.msra.gmra.mrb[2].mxu0 %v14782_v60 }
 0x157   :  { %8416 = vmatpush1.bf16.msra.mxu0 %v14783_v40  ;;  %2319 = vmatprep.mubr.f32.mxu0 %v14281_v38 }
 0x158   :  { %2976 = vmatmul.mubr.f32.vlgmr.msra.gmra.mrb[2].mxu1 %v14782_v60  ;;  %8418 = vmatprep.subr.bf16.mxu0 %v14784_v54 }
 0x159   :  { %8560 = vmatpush1.bf16.msra.mxu1 %v14785_v27  ;;  %3070 = vmatprep.mubr.f32.mxu1 %v14281_v38 }
 0x15a   :  { %8562 = vmatprep.subr.bf16.mxu1 %v14786_v28 }
 0x15b   :  { %8420 = vmatpush1.bf16.msra.mxu0 %v14787_v23 }
 0x15c   :  { %8422 = vmatprep.subr.bf16.mxu0 %v14788_v6 }
 0x15d   :  { %8564 = vmatpush1.bf16.msra.mxu1 %v14789_v25 }
 0x15e   :  { %8566 = vmatprep.subr.bf16.mxu1 %v14790_v59 }
 0x15f   :  { %8424 = vmatpush1.bf16.msra.mxu0 %v14791_v2 }
 0x160   :  { %8426 = vmatprep.subr.bf16.mxu0 %v14792_v15 }
 0x161   :  { %8568 = vmatpush1.bf16.msra.mxu1 %v14793_v17 }
 0x162   :  { %8570 = vmatprep.subr.bf16.mxu1 %v14794_v37 }
 0x163   :  { %8428 = vmatpush1.bf16.msra.mxu0 %v14795_v14 }
 0x164   :  { %8430 = vmatprep.subr.bf16.mxu0 %v14796_v61 }
 0x165   :  { %8572 = vmatpush1.bf16.msra.mxu1 %v14797_v51 }
 0x166   :  { %8574 = vmatprep.subr.bf16.mxu1 %v14798_v39 }
 0x167   :  { %8432 = vmatpush1.bf16.msra.mxu0 %v14799_v53 }
 0x168   :  { %8434 = vmatprep.subr.bf16.mxu0 %v14800_v47 }
 0x169   :  { %8576 = vmatpush1.bf16.msra.mxu1 %v14801_v57 }
 0x16a   :  { %8578 = vmatprep.subr.bf16.mxu1 %v14802_v12 }
 0x16b   :  { %8436 = vmatpush1.bf16.msra.mxu0 %v14803_v32 }
 0x16c   :  { %8438 = vmatprep.subr.bf16.mxu0 %v14804_v50  ;;  %v11225_v50 = vpack.c.bf16 %v3324_v24, %v3320_v56 }
 0x16d   :  { %8580 = vmatpush1.bf16.msra.mxu1 %v14805_v10  ;;  %v11243_v10 = vsub.f32 %v61_v9, %v3322_v5  ;;  %v139_v9 = vld [vmem:[#allocation2 + $0x2b0] sm:$0xff] }
 0x16e   :  { %8582 = vmatprep.subr.bf16.mxu1 %v14806_v62  ;;  %2323 = vmatmul.mubr.f32.vlgmr.msra.gmra.mrb[2].mxu0 %v14807_v16  ;;  %14824 = vst [vmem:[#allocation55_spill] sm:$0xff] %v11225_v50  ;;  %v4073_v62 = vand.u32 4294901760, %v63_v21  ;;  %v169_v50 = vld [vmem:[#allocation2 + $0x3a0] sm:$0xff] }
 0x16f   :  { %8440 = vmatpush1.bf16.msra.mxu0 %v14808_v19  ;;  %2465 = vmatprep.mubr.f32.mxu0 %v14281_v38  ;;  %v4077_v19 = vand.u32 4294901760, %v78_v18  ;;  %14833 = vst [vmem:[#allocation64_spill] sm:$0xff] %v11243_v10 }
 0x170   :  { %3074 = vmatmul.mubr.f32.vlgmr.msra.gmra.mrb[2].mxu1 %v14807_v16  ;;  %8442 = vmatprep.subr.bf16.mxu0 %v14809_v63  ;;  %v91_v63 = vld [vmem:[#allocation2 + $0x130] sm:$0xff] }
 0x171   :  { %8584 = vmatpush1.bf16.msra.mxu1 %v14810_v35  ;;  %3216 = vmatprep.mubr.f32.mxu1 %v14281_v38  ;;  %v106_v35 = vld [vmem:[#allocation2 + $0x1a8] sm:$0xff]  ;;  %v3330_v16 = vand.u32 4294901760, %v91_v63 }
 0x172   :  { %8586 = vmatprep.subr.bf16.mxu1 %v14811_v7  ;;  %v14825_v7 = vld [vmem:[#allocation109_spill] sm:$0xff]  ;;  %v3334_v60 = vand.u32 4294901760, %v106_v35 }
 0x173   :  { %8444 = vmatpush1.bf16.msra.mxu0 %v14812_v4  ;;  %v11228_v4 = vpack.c.bf16 %v4075_v3, %v4071_v13 }
 0x174   :  { %8446 = vmatprep.subr.bf16.mxu0 %v14813_v20  ;;  %v11230_v20 = vpack.c.bf16 %v3326_v36, %v3322_v5  ;;  %v121_v5 = vld [vmem:[#allocation2 + $0x220] sm:$0xff] }
 0x175   :  { %8588 = vmatpush1.bf16.msra.mxu1 %v14814_v31  ;;  %14826 = vst [vmem:[#allocation57_spill] sm:$0xff] %v11228_v4  ;;  %v3328_v31 = vand.u32 4294901760, %v92_v26  ;;  %v14832_v4 = vld [vmem:[#allocation111_spill] sm:$0xff] }
 0x176   :  { %8590 = vmatprep.subr.bf16.mxu1 %v14815_v43  ;;  %14827 = vst [vmem:[#allocation58_spill] sm:$0xff] %v11230_v20  ;;  %v3332_v43 = vand.u32 4294901760, %v107_v22  ;;  %v108_v20 = vld [vmem:[#allocation2 + $0x1b8] sm:$0xff] }
 0x177   :  { %8448 = vmatpush1.bf16.msra.mxu0 %v14816_v46  ;;  %v14828_v46 = vld [vmem:[#allocation34_spill] sm:$0xff] }
 0x178   :  { %8450 = vmatprep.subr.bf16.mxu0 %v14817_v11  ;;  %v11233_v11 = vsub.f32 %v62_v45, %v3320_v56  ;;  %v11245_v45 = vsub.f32 %v76_v33, %v3326_v36  ;;  %v11249_v56 = vsub.f32 %v63_v21, %v4073_v62  ;;  %v136_v33 = vld [vmem:[#allocation2 + $0x298] sm:$0xff]  ;;  %v11259_v36 = vsub.f32 %v107_v22, %v3332_v43 }
 0x179   :  { %8592 = vmatpush1.bf16.msra.mxu1 %v14818_v42  ;;  %v11235_v42 = vsub.f32 %v77_v52, %v3324_v24  ;;  %v11247_v52 = vpack.c.bf16 %v4077_v19, %v4073_v62  ;;  %v122_v24 = vld [vmem:[#allocation2 + $0x228] sm:$0xff]  ;;  %v4091_v22 = vand.u32 4294901760, %v139_v9 }
 0x17a   :  { %8594 = vmatprep.subr.bf16.mxu1 %v14819_v0  ;;  %v4079_v0 = vand.u32 4294901760, %v94_v41  ;;  %14834 = vst [vmem:[#allocation68_spill] sm:$0xff] %v11245_v45  ;;  %14836 = vst [vmem:[#allocation70_spill] sm:$0xff] %v11249_v56 }
 0x17b   :  { %8452 = vmatpush1.bf16.msra.mxu0 %v14820_v44  ;;  %v4083_v44 = vand.u32 4294901760, %v109_v8  ;;  %14835 = vst [vmem:[#allocation69_spill] sm:$0xff] %v11247_v52  ;;  %14841 = vst [vmem:[#allocation74_spill] sm:$0xff] %v11259_v36  ;;  %v4085_v52 = vand.u32 4294901760, %v108_v20 }
 0x17c   :  { %8454 = vmatprep.subr.bf16.mxu0 %v14821_v48  ;;  %v93_v48 = vld [vmem:[#allocation2 + $0x140] sm:$0xff]  ;;  %v11263_v62 = vsub.f32 %v94_v41, %v4079_v0  ;;  %v138_v41 = vld [vmem:[#allocation2 + $0x2a8] sm:$0xff] }
 0x17d   :  { %8596 = vmatpush1.bf16.msra.mxu1 %v14822_v49  ;;  %v14829_v49 = vld [vmem:[#allocation110_spill] sm:$0xff]  ;;  %v11261_v21 = vpack.c.bf16 %v4083_v44, %v4079_v0  ;;  %v11276_v0 = vsub.f32 %v106_v35, %v3334_v60  ;;  %v4093_v35 = vand.u32 4294901760, %v138_v41 }
 0x17e   :  { %8598 = vmatprep.subr.bf16.mxu1 %v14823_v34  ;;  %v11238_v34 = vsub.f32 %v64_v55, %v4071_v13  ;;  %v14837_v55 = vld [vmem:[#allocation112_spill] sm:$0xff]  ;;  %v11254_v13 = vpack.c.bf16 %v3332_v43, %v3328_v31  ;;  %14843 = vst [vmem:[#allocation76_spill] sm:$0xff] %v11263_v62  ;;  %v3338_v43 = vand.u32 4294901760, %v121_v5  ;;  %v154_v62 = vld [vmem:[#allocation2 + $0x328] sm:$0xff] }
 0x17f   :  { %8456 = vmatpush1.bf16.msra.mxu0 %v14825_v7  ;;  %v11240_v7 = vsub.f32 %v79_v58, %v4075_v3  ;;  %v11252_v58 = vsub.f32 %v78_v18, %v4077_v19  ;;  %v11256_v3 = vsub.f32 %v92_v26, %v3328_v31  ;;  %14842 = vst [vmem:[#allocation75_spill] sm:$0xff] %v11261_v21  ;;  %v3336_v26 = vand.u32 4294901760, %v122_v24  ;;  %v123_v21 = vld [vmem:[#allocation2 + $0x230] sm:$0xff] }
 0x180   :  { %8458 = vmatprep.subr.bf16.mxu0 %v14828_v46  ;;  %14830 = vst [vmem:[#allocation59_spill] sm:$0xff] %v11238_v34  ;;  %v137_v46 = vld [vmem:[#allocation2 + $0x2a0] sm:$0xff]  ;;  %14839 = vst [vmem:[#allocation72_spill] sm:$0xff] %v11254_v13  ;;  %v11266_v18 = vsub.f32 %v109_v8, %v4083_v44  ;;  %v11268_v19 = vpack.c.bf16 %v3334_v60, %v3330_v16  ;;  %v3342_v13 = vand.u32 4294901760, %v136_v33 }
 0x181   :  { %8600 = vmatpush1.bf16.msra.mxu1 %v14829_v49  ;;  %14831 = vst [vmem:[#allocation63_spill] sm:$0xff] %v11240_v7  ;;  %v124_v49 = vld [vmem:[#allocation2 + $0x238] sm:$0xff]  ;;  %14838 = vst [vmem:[#allocation71_spill] sm:$0xff] %v11252_v58  ;;  %v3340_v31 = vand.u32 4294901760, %v137_v46  ;;  %v11274_v8 = vsub.f32 %v91_v63, %v3330_v16  ;;  %v4089_v63 = vand.u32 4294901760, %v123_v21 }
 0x182   :  { %8602 = vmatprep.subr.bf16.mxu1 %v14832_v4  ;;  %14840 = vst [vmem:[#allocation73_spill] sm:$0xff] %v11256_v3  ;;  %v4081_v4 = vand.u32 4294901760, %v93_v48  ;;  %14845 = vst [vmem:[#allocation77_spill] sm:$0xff] %v11266_v18  ;;  %v11286_v18 = vsub.f32 %v122_v24, %v3336_v26  ;;  %v11299_v24 = vsub.f32 %v139_v9, %v4091_v22 }
 0x183   :  { %8460 = vmatpush1.bf16.msra.mxu0 %v14837_v55  ;;  %v14844_v55 = vld [vmem:[#allocation113_spill] sm:$0xff]  ;;  %14846 = vst [vmem:[#allocation78_spill] sm:$0xff] %v11268_v19  ;;  %14847 = vst [vmem:[#allocation80_spill] sm:$0xff] %v11274_v8  ;;  %v11284_v19 = vsub.f32 %v108_v20, %v4085_v52  ;;  %v11290_v60 = vpack.c.bf16 %v3340_v31, %v3336_v26  ;;  %v11292_v16 = vsub.f32 %v137_v46, %v3340_v31 }
 0x184   :  { %8462 = vmatprep.subr.bf16.mxu0 %v14780_v29  ;;  %v4087_v29 = vand.u32 4294901760, %v124_v49  ;;  %14848 = vst [vmem:[#allocation81_spill] sm:$0xff] %v11276_v0  ;;  %v11278_v44 = vsub.f32 %v93_v48, %v4081_v4  ;;  %14852 = vst [vmem:[#allocation89_spill] sm:$0xff] %v11286_v18  ;;  %v166_v48 = vld [vmem:[#allocation2 + $0x388] sm:$0xff]  ;;  %v168_v18 = vld [vmem:[#allocation2 + $0x398] sm:$0xff]  ;;  %v4095_v31 = vand.u32 4294901760, %v154_v62 }
 0x185   :  { %8604 = vmatpush1.bf16.msra.mxu1 %v14844_v55  ;;  %v152_v55 = vld [vmem:[#allocation2 + $0x318] sm:$0xff]  ;;  %14851 = vst [vmem:[#allocation88_spill] sm:$0xff] %v11284_v19  ;;  %14853 = vst [vmem:[#allocation90_spill] sm:$0xff] %v11290_v60  ;;  %v182_v19 = vld [vmem:[#allocation2 + $0x408] sm:$0xff] }
 0x186   :  { %8606 = vmatprep.subr.bf16.mxu1 %v14781_v30  ;;  %2467 = vmatmul.mubr.f32.vlgmr.msra.gmra.mrb[2].mxu0 %v14765_v1  ;;  %14849 = vst [vmem:[#allocation85_spill] sm:$0xff] %v11278_v44  ;;  %v11282_v30 = vpack.c.bf16 %v4085_v52, %v4081_v4  ;;  %14854 = vst [vmem:[#allocation92_spill] sm:$0xff] %v11292_v16  ;;  %v11295_v20 = vpack.c.bf16 %v4091_v22, %v4087_v29  ;;  %v3344_v46 = vand.u32 4294901760, %v152_v55 }
 0x187   :  { %8464 = vmatpush1.bf16.msra.mxu0 %v14783_v40  ;;  %2561 = vmatprep.mubr.f32.mxu0 %v14281_v38  ;;  %v167_v40 = vld [vmem:[#allocation2 + $0x390] sm:$0xff]  ;;  %v11297_v52 = vsub.f32 %v124_v49, %v4087_v29  ;;  %14857 = vst [vmem:[#allocation95_spill] sm:$0xff] %v11299_v24  ;;  %v11301_v4 = vpack.c.bf16 %v3342_v13, %v3338_v43  ;;  %v4099_v16 = vand.u32 4294901760, %v169_v50  ;;  %v3350_v29 = vand.u32 4294901760, %v166_v48 }
 0x188   :  { %3218 = vmatmul.mubr.f32.vlgmr.msra.gmra.mrb[2].mxu1 %v14765_v1  ;;  %8466 = vmatprep.subr.bf16.mxu0 %v14784_v54  ;;  %14850 = vst [vmem:[#allocation86_spill] sm:$0xff] %v11282_v30  ;;  %v151_v54 = vld [vmem:[#allocation2 + $0x310] sm:$0xff]  ;;  %14855 = vst [vmem:[#allocation93_spill] sm:$0xff] %v11295_v20  ;;  %v3348_v26 = vand.u32 4294901760, %v167_v40  ;;  %v197_v30 = vld [vmem:[#allocation2 + $0x480] sm:$0xff]  ;;  %v11307_v49 = vsub.f32 %v136_v33, %v3342_v13  ;;  %v11310_v22 = vpack.c.bf16 %v4093_v35, %v4089_v63 }
 0x189   :  { %8608 = vmatpush1.bf16.msra.mxu1 %v14785_v27  ;;  %3312 = vmatprep.mubr.f32.mxu1 %v14281_v38  ;;  %14856 = vst [vmem:[#allocation94_spill] sm:$0xff] %v11297_v52  ;;  %14858 = vst [vmem:[#allocation96_spill] sm:$0xff] %v11301_v4  ;;  %v153_v27 = vld [vmem:[#allocation2 + $0x320] sm:$0xff]  ;;  %v3346_v9 = vand.u32 4294901760, %v151_v54  ;;  %v11312_v24 = vsub.f32 %v123_v21, %v4089_v63  ;;  %v11316_v52 = vsub.f32 %v152_v55, %v3344_v46  ;;  %v184_v4 = vld [vmem:[#allocation2 + $0x418] sm:$0xff] }
 0x18a   :  { %8610 = vmatprep.subr.bf16.mxu1 %v14786_v28  ;;  %v11305_v28 = vsub.f32 %v121_v5, %v3338_v43  ;;  %14860 = vst [vmem:[#allocation105_spill] sm:$0xff] %v11307_v49  ;;  %14861 = vst [vmem:[#allocation106_spill] sm:$0xff] %v11310_v22  ;;  %v199_v20 = vld [vmem:[#allocation2 + $0x490] sm:$0xff]  ;;  %v4101_v5 = vand.u32 4294901760, %v168_v18  ;;  %v3352_v13 = vand.u32 4294901760, %v182_v19  ;;  %v3356_v33 = vand.u32 4294901760, %v197_v30 }
 0x18b   :  { %8468 = vmatpush1.bf16.msra.mxu0 %v14787_v23  ;;  %14862 = vst [vmem:[#allocation46_spill] sm:$0xff] %v11312_v24  ;;  %v11314_v23 = vsub.f32 %v138_v41, %v4093_v35  ;;  %14864 = vst [vmem:[#allocation17_spill] sm:$0xff] %v11316_v52  ;;  %v181_v43 = vld [vmem:[#allocation2 + $0x400] sm:$0xff]  ;;  %v196_v49 = vld [vmem:[#allocation2 + $0x478] sm:$0xff]  ;;  %v11322_v21 = vsub.f32 %v167_v40, %v3348_v26  ;;  %v11324_v41 = vpack.c.bf16 %v4099_v16, %v4095_v31 }
 0x18c   :  { %8470 = vmatprep.subr.bf16.mxu0 %v14788_v6  ;;  %14859 = vst [vmem:[#allocation104_spill] sm:$0xff] %v11305_v28  ;;  %v4097_v6 = vand.u32 4294901760, %v153_v27  ;;  %v11326_v55 = vsub.f32 %v154_v62, %v4095_v31  ;;  %v183_v63 = vld [vmem:[#allocation2 + $0x410] sm:$0xff]  ;;  %v11331_v35 = vpack.c.bf16 %v3350_v29, %v3346_v9  ;;  %v4103_v52 = vand.u32 4294901760, %v184_v4  ;;  %v198_v24 = vld [vmem:[#allocation2 + $0x488] sm:$0xff]  ;;  %v212_v22 = vld [vmem:[#allocation2 + $0x4f8] sm:$0xff] }
 0x18d   :  { %8612 = vmatpush1.bf16.msra.mxu1 %v14789_v25  ;;  %14863 = vst [vmem:[#allocation12_spill] sm:$0xff] %v11314_v23  ;;  %v11320_v25 = vpack.c.bf16 %v3348_v26, %v3344_v46  ;;  %14866 = vst [vmem:[#allocation56_spill] sm:$0xff] %v11324_v41  ;;  %v4107_v23 = vand.u32 4294901760, %v199_v20  ;;  %v11334_v40 = vsub.f32 %v151_v54, %v3346_v9  ;;  %v3354_v62 = vand.u32 4294901760, %v181_v43 }
 0x18e   :  { %8614 = vmatprep.subr.bf16.mxu1 %v14790_v59  ;;  %14867 = vst [vmem:[#allocation60_spill] sm:$0xff] %v11326_v55  ;;  %v11329_v59 = vsub.f32 %v169_v50, %v4099_v16  ;;  %14869 = vst [vmem:[#allocation62_spill] sm:$0xff] %v11331_v35  ;;  %v11336_v46 = vsub.f32 %v166_v48, %v3350_v29  ;;  %v3358_v26 = vand.u32 4294901760, %v196_v49  ;;  %v229_v55 = vld [vmem:[#allocation2 + $0x580] sm:$0xff]  ;;  %v4109_v54 = vand.u32 4294901760, %v198_v24  ;;  %v211_v29 = vld [vmem:[#allocation2 + $0x4f0] sm:$0xff] }
 0x18f   :  { %8472 = vmatpush1.bf16.msra.mxu0 %v14791_v2  ;;  %14865 = vst [vmem:[#allocation52_spill] sm:$0xff] %v11320_v25  ;;  %v227_v2 = vld [vmem:[#allocation2 + $0x570] sm:$0xff]  ;;  %14870 = vst [vmem:[#allocation67_spill] sm:$0xff] %v11334_v40  ;;  %v11341_v50 = vsub.f32 %v153_v27, %v4097_v6  ;;  %v11343_v16 = vsub.f32 %v168_v18, %v4101_v5  ;;  %v11345_v31 = vpack.c.bf16 %v3356_v33, %v3352_v13 }
 0x190   :  { %8474 = vmatprep.subr.bf16.mxu0 %v14792_v15  ;;  %14868 = vst [vmem:[#allocation61_spill] sm:$0xff] %v11329_v59  ;;  %14871 = vst [vmem:[#allocation65_spill] sm:$0xff] %v11336_v46  ;;  %v11339_v15 = vpack.c.bf16 %v4101_v5, %v4097_v6  ;;  %v214_v59 = vld [vmem:[#allocation2 + $0x508] sm:$0xff]  ;;  %v3360_v48 = vand.u32 4294901760, %v212_v22  ;;  %v3364_v9 = vand.u32 4294901760, %v227_v2  ;;  %v11351_v27 = vsub.f32 %v197_v30, %v3356_v33 }
 0x191   :  { %8616 = vmatpush1.bf16.msra.mxu1 %v14793_v17  ;;  %14873 = vst [vmem:[#allocation99_spill] sm:$0xff] %v11341_v50  ;;  %14874 = vst [vmem:[#allocation100_spill] sm:$0xff] %v11343_v16  ;;  %v4105_v17 = vand.u32 4294901760, %v183_v63  ;;  %v226_v46 = vld [vmem:[#allocation2 + $0x568] sm:$0xff]  ;;  %v11353_v18 = vpack.c.bf16 %v4107_v23, %v4103_v52  ;;  %v11355_v6 = vsub.f32 %v184_v4, %v4103_v52  ;;  %v4111_v16 = vand.u32 4294901760, %v214_v59 }
 0x192   :  { %8618 = vmatprep.subr.bf16.mxu1 %v14794_v37  ;;  %14872 = vst [vmem:[#allocation66_spill] sm:$0xff] %v11339_v15  ;;  %14875 = vst [vmem:[#allocation97_spill] sm:$0xff] %v11345_v31  ;;  %v11349_v37 = vsub.f32 %v182_v19, %v3352_v13  ;;  %v11358_v5 = vsub.f32 %v199_v20, %v4107_v23  ;;  %v4115_v50 = vand.u32 4294901760, %v229_v55  ;;  %v3362_v19 = vand.u32 4294901760, %v211_v29 }
 0x193   :  { %8476 = vmatpush1.bf16.msra.mxu0 %v14795_v14  ;;  %14876 = vst [vmem:[#allocation98_spill] sm:$0xff] %v11353_v18  ;;  %v11360_v14 = vpack.c.bf16 %v3358_v26, %v3354_v62  ;;  %v11363_v40 = vsub.f32 %v181_v43, %v3354_v62  ;;  %v3366_v30 = vand.u32 4294901760, %v226_v46  ;;  %v11368_v52 = vpack.c.bf16 %v4109_v54, %v4105_v17 }
 0x194   :  { %8478 = vmatprep.subr.bf16.mxu0 %v14796_v61  ;;  %v11365_v61 = vsub.f32 %v196_v49, %v3358_v26  ;;  %v11370_v4 = vsub.f32 %v183_v63, %v4105_v17  ;;  %v11374_v20 = vpack.c.bf16 %v3364_v9, %v3360_v48  ;;  %v11377_v23 = vsub.f32 %v212_v22, %v3360_v48  ;;  %v213_v22 = vld [vmem:[#allocation2 + $0x500] sm:$0xff] }
 0x195   :  { %8620 = vmatpush1.bf16.msra.mxu1 %v14797_v51  ;;  %14877 = vst [vmem:[#allocation101_spill] sm:$0xff] %v11360_v14  ;;  %14878 = vst [vmem:[#allocation102_spill] sm:$0xff] %v11368_v52  ;;  %v11372_v51 = vsub.f32 %v198_v24, %v4109_v54  ;;  %v14027_v49 = vand.u32 4294901760, %v11233_v11  ;;  %v14026_v13 = vand.u32 4294901760, %v11235_v42  ;;  %v14025_v33 = vand.u32 4294901760, %v11238_v34 }
 0x196   :  { %8622 = vmatprep.subr.bf16.mxu1 %v14798_v39  ;;  %14879 = vst [vmem:[#allocation103_spill] sm:$0xff] %v11374_v20  ;;  %v11379_v39 = vsub.f32 %v227_v2, %v3364_v9  ;;  %v14024_v24 = vand.u32 4294901760, %v11240_v7  ;;  %v14028_v43 = vand.u32 4294901760, %v11243_v10  ;;  %v14029_v63 = vand.u32 4294901760, %v11245_v45 }
 0x197   :  { %8480 = vmatpush1.bf16.msra.mxu0 %v14799_v53  ;;  %v11384_v53 = vpack.c.bf16 %v4115_v50, %v4111_v16  ;;  %v14030_v2 = vand.u32 4294901760, %v11249_v56  ;;  %v14033_v62 = vand.u32 4294901760, %v11252_v58  ;;  %v11398_v26 = vpack.c.bf16 %v3366_v30, %v3362_v19 }
 0x198   :  { %8482 = vmatprep.subr.bf16.mxu0 %v14800_v47  ;;  %14880 = vst [vmem:[#allocation36_spill] sm:$0xff] %v11379_v39  ;;  %v11390_v47 = vsub.f32 %v214_v59, %v4111_v16  ;;  %v14040_v17 = vand.u32 4294901760, %v11256_v3  ;;  %v11403_v59 = vsub.f32 %v211_v29, %v3362_v19  ;;  %v11405_v16 = vsub.f32 %v226_v46, %v3366_v30  ;;  %v14888_v19 = vld [vmem:[#allocation57_spill] sm:$0xff] }
 0x199   :  { %8624 = vmatpush1.bf16.msra.mxu1 %v14801_v57  ;;  %14881 = vst [vmem:[#allocation13_spill] sm:$0xff] %v11384_v53  ;;  %v11396_v57 = vsub.f32 %v229_v55, %v4115_v50  ;;  %14883 = vst [vmem:[#allocation35_spill] sm:$0xff] %v11398_v26  ;;  %v3423_v48 = vsub.f32 %v11233_v11, %v14027_v49  ;;  %v14887_v55 = vld [vmem:[#allocation54_spill] sm:$0xff]  ;;  %v228_v50 = vld [vmem:[#allocation2 + $0x578] sm:$0xff]  ;;  %v4113_v9 = vand.u32 4294901760, %v213_v22 }
 0x19a   :  { %8626 = vmatprep.subr.bf16.mxu1 %v14802_v12  ;;  %v14884_v12 = vld [vmem:[#allocation55_spill] sm:$0xff]  ;;  %14885 = vst [vmem:[#allocation39_spill] sm:$0xff] %v11403_v59  ;;  %14886 = vst [vmem:[#allocation16_spill] sm:$0xff] %v11405_v16  ;;  %v4174_v54 = vsub.f32 %v11238_v34, %v14025_v33  ;;  %v4186_v46 = vsub.f32 %v11240_v7, %v14024_v24  ;;  %v3429_v29 = vsub.f32 %v11243_v10, %v14028_v43  ;;  %v14889_v33 = vld [vmem:[#allocation76_spill] sm:$0xff] }
 0x19b   :  { %8484 = vmatpush1.bf16.msra.mxu0 %v14803_v32  ;;  %14882 = vst [vmem:[#allocation14_spill] sm:$0xff] %v11396_v57  ;;  %v3435_v32 = vsub.f32 %v11235_v42, %v14026_v13  ;;  %v3441_v30 = vsub.f32 %v11245_v45, %v14029_v63  ;;  %v4192_v24 = vsub.f32 %v11252_v58, %v14033_v62  ;;  %v14890_v49 = vld [vmem:[#allocation58_spill] sm:$0xff]  ;;  %v14891_v63 = vand.u32 4294901760, %v11259_v36  ;;  %v14893_v62 = vld [vmem:[#allocation72_spill] sm:$0xff]  ;;  %v14894_v10 = vld [vmem:[#allocation69_spill] sm:$0xff] }
 0x19c   :  { %8630 = vmatprep.subr.bf16.mxu0 %v14884_v12  ;;  %v3447_v43 = vsub.f32 %v11256_v3, %v14040_v17  ;;  %v14892_v12 = vld [vmem:[#allocation77_spill] sm:$0xff]  ;;  %v4117_v13 = vand.u32 4294901760, %v228_v50  ;;  %v4175_v17 = vand.u32 4294901760, %v4174_v54  ;;  %v4187_v3 = vand.u32 4294901760, %v4186_v46 }
 0x19d   :  { %8628 = vmatpush1.bf16.msra.mxu1 %v14887_v55  ;;  %v4180_v55 = vsub.f32 %v11249_v56, %v14030_v2  ;;  %v3436_v58 = vand.u32 4294901760, %v3435_v32  ;;  %v3442_v56 = vand.u32 4294901760, %v3441_v30  ;;  %v4193_v7 = vand.u32 4294901760, %v4192_v24  ;;  %v14897_v32 = vld [vmem:[#allocation78_spill] sm:$0xff] }
 0x19e   :  { %2563 = vmatmul.mubr.f32.vlgmr.msra.gmra.mrb[2].mxu0 %v14765_v1  ;;  %8774 = vmatprep.subr.bf16.mxu1 %v14888_v19  ;;  %v3459_v19 = vsub.f32 %v11259_v36, %v14891_v63  ;;  %v3430_v63 = vand.u32 4294901760, %v3429_v29  ;;  %v14895_v36 = vld [vmem:[#allocation75_spill] sm:$0xff]  ;;  %v3448_v45 = vand.u32 4294901760, %v3447_v43  ;;  %v14898_v34 = vand.u32 4294901760, %v14892_v12 }
 0x19f   :  { %8632 = vmatpush1.bf16.msra.mxu0 %v14890_v49  ;;  %3408 = vmatprep.mubr.f32.mxu0 %v14281_v38  ;;  %v3424_v49 = vand.u32 4294901760, %v3423_v48  ;;  %v14899_v46 = vand.u32 4294901760, %v11274_v8  ;;  %v11463_v30 = vpack.c.bf16 %v4117_v13, %v4113_v9  ;;  %v11465_v24 = vsub.f32 %v213_v22, %v4113_v9  ;;  %v14906_v9 = vld [vmem:[#allocation93_spill] sm:$0xff] }
 0x1a0   :  { %3314 = vmatmul.mubr.f32.vlgmr.msra.gmra.mrb[2].mxu1 %v14765_v1  ;;  %8634 = vmatprep.subr.bf16.mxu0 %v14893_v62  ;;  %v4181_v1 = vand.u32 4294901760, %v4180_v55  ;;  %v14896_v62 = vand.u32 4294901760, %v14889_v33  ;;  %v4210_v54 = vsub.f32 %v14892_v12, %v14898_v34  ;;  %v11467_v55 = vsub.f32 %v228_v50, %v4117_v13 }
 0x1a1   :  { %8776 = vmatpush1.bf16.msra.mxu1 %v14894_v10  ;;  %4159 = vmatprep.mubr.f32.mxu1 %v14281_v38  ;;  %v3460_v10 = vand.u32 4294901760, %v3459_v19  ;;  %v3453_v29 = vsub.f32 %v11274_v8, %v14899_v46  ;;  %14900 = vst [vmem:[#allocation18_spill] sm:$0xff] %v11463_v30  ;;  %v14902_v19 = vld [vmem:[#allocation86_spill] sm:$0xff]  ;;  %v11473_v2 = vpack.c.bf16 %v3436_v58, %v3424_v49  ;;  %v14903_v34 = vand.u32 4294901760, %v11278_v44  ;;  %v14907_v58 = vld [vmem:[#allocation96_spill] sm:$0xff]  ;;  %v14917_v8 = vld [vmem:[#allocation17_spill] sm:$0xff] }
 0x1a2   :  { %8778 = vmatprep.subr.bf16.mxu1 %v14895_v36  ;;  %v4198_v48 = vsub.f32 %v14889_v33, %v14896_v62  ;;  %v14901_v62 = vand.u32 4294901760, %v11276_v0  ;;  %v14905_v36 = vld [vmem:[#allocation89_spill] sm:$0xff]  ;;  %v11483_v13 = vpack.c.bf16 %v4187_v3, %v4175_v17  ;;  %v11485_v50 = vpack.c.bf16 %v3442_v56, %v3430_v63  ;;  %v14910_v3 = vld [vmem:[#allocation95_spill] sm:$0xff] }
 0x1a3   :  { %8636 = vmatpush1.bf16.msra.mxu0 %v14897_v32  ;;  %v11478_v46 = vsub.f32 %v11278_v44, %v14903_v34  ;;  %v11490_v49 = vpack.c.bf16 %v3460_v10, %v3448_v45  ;;  %v3454_v34 = vand.u32 4294901760, %v3453_v29  ;;  %v14908_v44 = vld [vmem:[#allocation92_spill] sm:$0xff]  ;;  %v14909_v32 = vld [vmem:[#allocation94_spill] sm:$0xff]  ;;  %v14913_v63 = vand.u32 4294901760, %v14905_v36 }
 0x1a4   :  { %8638 = vmatprep.subr.bf16.mxu0 %v11290_v60  ;;  %v3465_v43 = vsub.f32 %v11276_v0, %v14901_v62  ;;  %v14904_v60 = vld [vmem:[#allocation88_spill] sm:$0xff]  ;;  %v11487_v62 = vpack.c.bf16 %v4193_v7, %v4181_v1  ;;  %v4211_v0 = vand.u32 4294901760, %v4210_v54  ;;  %v14911_v1 = vld [vmem:[#allocation106_spill] sm:$0xff]  ;;  %v14914_v54 = vld [vmem:[#allocation105_spill] sm:$0xff]  ;;  %v14922_v56 = vand.u32 4294901760, %v14910_v3 }
 0x1a5   :  { %8780 = vmatpush1.bf16.msra.mxu1 %v14902_v19  ;;  %v4199_v19 = vand.u32 4294901760, %v4198_v48  ;;  %v4205_v7 = vand.u32 4294901760, %v11478_v46  ;;  %v14912_v10 = vand.u32 4294901760, %v14904_v60  ;;  %v3471_v48 = vsub.f32 %v14905_v36, %v14913_v63 }
 0x1a6   :  { %8782 = vmatprep.subr.bf16.mxu1 %v14906_v9  ;;  %v3466_v22 = vand.u32 4294901760, %v3465_v43  ;;  %v14915_v43 = vld [vmem:[#allocation46_spill] sm:$0xff]  ;;  %v14916_v9 = vld [vmem:[#allocation12_spill] sm:$0xff] }
 0x1a7   :  { %8640 = vmatpush1.bf16.msra.mxu0 %v14907_v58  ;;  %v4216_v45 = vsub.f32 %v14904_v60, %v14912_v10  ;;  %v14918_v10 = vand.u32 4294901760, %v14908_v44  ;;  %v14919_v58 = vld [vmem:[#allocation60_spill] sm:$0xff]  ;;  %v14920_v60 = vld [vmem:[#allocation61_spill] sm:$0xff] }
 0x1a8   :  { %8642 = vmatprep.subr.bf16.mxu0 %v11320_v25  ;;  %v11512_v25 = vpack.c.bf16 %v4211_v0, %v4199_v19  ;;  %v11520_v17 = vpack.c.bf16 %v3466_v22, %v3454_v34  ;;  %v4234_v0 = vsub.f32 %v14910_v3, %v14922_v56  ;;  %v14923_v19 = vand.u32 4294901760, %v11305_v28  ;;  %v14925_v34 = vld [vmem:[#allocation67_spill] sm:$0xff] }
 0x1a9   :  { %8784 = vmatpush1.bf16.msra.mxu1 %v14911_v1  ;;  %v3483_v63 = vsub.f32 %v14908_v44, %v14918_v10  ;;  %v14921_v1 = vand.u32 4294901760, %v14909_v32  ;;  %v4217_v29 = vand.u32 4294901760, %v4216_v45  ;;  %v14928_v3 = vand.u32 4294901760, %v14916_v9 }
 0x1aa   :  { %8786 = vmatprep.subr.bf16.mxu1 %v11324_v41  ;;  %v3477_v10 = vsub.f32 %v11305_v28, %v14923_v19  ;;  %v14924_v41 = vand.u32 4294901760, %v14914_v54  ;;  %v14929_v45 = vand.u32 4294901760, %v14917_v8  ;;  %v3472_v44 = vand.u32 4294901760, %v3471_v48  ;;  %v14933_v28 = vld [vmem:[#allocation99_spill] sm:$0xff] }
 0x1ab   :  { %8644 = vmatpush1.bf16.msra.mxu0 %v11331_v35  ;;  %v4222_v46 = vsub.f32 %v14909_v32, %v14921_v1  ;;  %v14926_v35 = vld [vmem:[#allocation65_spill] sm:$0xff]  ;;  %v14927_v1 = vand.u32 4294901760, %v14915_v43  ;;  %v4240_v19 = vsub.f32 %v14916_v9, %v14928_v3  ;;  %v14934_v48 = vand.u32 4294901760, %v14925_v34 }
 0x1ac   :  { %8646 = vmatprep.subr.bf16.mxu0 %v11345_v31  ;;  %v3489_v22 = vsub.f32 %v14914_v54, %v14924_v41  ;;  %v14930_v41 = vand.u32 4294901760, %v11322_v21  ;;  %v14931_v54 = vand.u32 4294901760, %v14919_v58  ;;  %v8803_v32 = vpack.c.bf16 %v4217_v29, %v4205_v7 }
 0x1ad   :  { %8788 = vmatpush1.bf16.msra.mxu1 %v11339_v15  ;;  %v4228_v56 = vsub.f32 %v14915_v43, %v14927_v1  ;;  %v3495_v15 = vsub.f32 %v14917_v8, %v14929_v45  ;;  %v14932_v43 = vand.u32 4294901760, %v14920_v60  ;;  %v4223_v9 = vand.u32 4294901760, %v4222_v46 }
 0x1ae   :  { %8790 = vmatprep.subr.bf16.mxu1 %v11353_v18  ;;  %v3507_v31 = vsub.f32 %v11322_v21, %v14930_v41  ;;  %v3484_v18 = vand.u32 4294901760, %v3483_v63  ;;  %v4246_v1 = vsub.f32 %v14919_v58, %v14931_v54  ;;  %v4235_v45 = vand.u32 4294901760, %v4234_v0  ;;  %v14936_v58 = vld [vmem:[#allocation100_spill] sm:$0xff] }
 0x1af   :  { %8648 = vmatpush1.bf16.msra.mxu0 %v11360_v14  ;;  %v4258_v3 = vsub.f32 %v14920_v60, %v14932_v43  ;;  %v3478_v8 = vand.u32 4294901760, %v3477_v10  ;;  %v3490_v41 = vand.u32 4294901760, %v3489_v22  ;;  %v3501_v63 = vsub.f32 %v14925_v34, %v14934_v48 }
 0x1b0   :  { %8650 = vmatprep.subr.bf16.mxu0 %v11374_v20  ;;  %v14935_v54 = vand.u32 4294901760, %v14926_v35  ;;  %v4229_v46 = vand.u32 4294901760, %v4228_v56  ;;  %v4241_v0 = vand.u32 4294901760, %v4240_v19  ;;  %v3496_v10 = vand.u32 4294901760, %v3495_v15 }
 0x1b1   :  { %8792 = vmatpush1.bf16.msra.mxu1 %v11368_v52  ;;  %v3508_v20 = vand.u32 4294901760, %v3507_v31  ;;  %v4247_v22 = vand.u32 4294901760, %v4246_v1  ;;  %v4259_v52 = vand.u32 4294901760, %v4258_v3  ;;  %v14099_v60 = vand.u32 4294901760, %v11349_v37 }
 0x1b2   :  { %v3513_v14 = vsub.f32 %v14926_v35, %v14935_v54  ;;  %8794 = vmatprep.subr.bf16.mxu1 %v11384_v53  ;;  %v8661_v48 = vpack.c.bf16 %v3484_v18, %v3472_v44  ;;  %v8805_v34 = vpack.c.bf16 %v4235_v45, %v4223_v9  ;;  %v14937_v54 = vand.u32 4294901760, %v14933_v28  ;;  %v14939_v44 = vld [vmem:[#allocation50_spill] sm:$0xff] }
 0x1b3   :  { %8652 = vmatpush1.bf16.msra.mxu0 %v11398_v26  ;;  %v14098_v56 = vand.u32 4294901760, %v11351_v27  ;;  %v8663_v15 = vpack.c.bf16 %v3490_v41, %v3478_v8  ;;  %v3502_v31 = vand.u32 4294901760, %v3501_v63  ;;  %v14938_v29 = vand.u32 4294901760, %v14936_v58 }
 0x1b4   :  { %8654 = vmatprep.subr.bf16.mxu0 %v11473_v2  ;;  %v11574_v43 = vsub.f32 %v14933_v28, %v14937_v54  ;;  %v3514_v7 = vand.u32 4294901760, %v3513_v14  ;;  %v8807_v18 = vpack.c.bf16 %v4241_v0, %v4229_v46  ;;  %v8665_v2 = vpack.c.bf16 %v3508_v20, %v3496_v10 }
 0x1b5   :  { %8796 = vmatpush1.bf16.msra.mxu1 %v11463_v30  ;;  %v4264_v19 = vsub.f32 %v14936_v58, %v14938_v29  ;;  %v14096_v9 = vand.u32 4294901760, %v11355_v6  ;;  %v14094_v1 = vand.u32 4294901760, %v11358_v5  ;;  %v8809_v3 = vpack.c.bf16 %v4259_v52, %v4247_v22 }
 0x1b6   :  { %8798 = vmatprep.subr.bf16.mxu1 %v11483_v13  ;;  %3414 = vmatmul.mubr.f32.vlgmr.msra.gmra.mrb[4].mxu0 %v14939_v44  ;;  %v3519_v8 = vsub.f32 %v11349_v37, %v14099_v60  ;;  %v14090_v14 = vand.u32 4294901760, %v11363_v40  ;;  %v14089_v45 = vand.u32 4294901760, %v11365_v61  ;;  %v4253_v20 = vand.u32 4294901760, %v11574_v43 }
 0x1b7   :  { %8656 = vmatpush1.bf16.msra.mxu0 %v11485_v50  ;;  %3604 = vmatprep.mubr.f32.mxu0 %v14281_v38  ;;  %v3531_v52 = vsub.f32 %v11351_v27, %v14098_v56  ;;  %v14091_v13 = vand.u32 4294901760, %v11377_v23  ;;  %v14092_v50 = vand.u32 4294901760, %v11379_v39  ;;  %v8667_v41 = vpack.c.bf16 %v3514_v7, %v3502_v31 }
 0x1b8   :  { %4165 = vmatmul.mubr.f32.vlgmr.msra.gmra.mrb[4].mxu1 %v14939_v44  ;;  %8658 = vmatprep.subr.bf16.mxu0 %v11490_v49  ;;  %v4265_v63 = vand.u32 4294901760, %v4264_v19  ;;  %v14093_v46 = vand.u32 4294901760, %v11370_v4  ;;  %v14095_v0 = vand.u32 4294901760, %v11372_v51  ;;  %v4270_v49 = vsub.f32 %v11355_v6, %v14096_v9 }
 0x1b9   :  { %8800 = vmatpush1.bf16.msra.mxu1 %v11487_v62  ;;  %4355 = vmatprep.mubr.f32.mxu1 %v14281_v38  ;;  %v4282_v43 = vsub.f32 %v11358_v5, %v14094_v1  ;;  %v14097_v62 = vand.u32 4294901760, %v11390_v47  ;;  %v14104_v10 = vand.u32 4294901760, %v11396_v57  ;;  %v3525_v22 = vsub.f32 %v11363_v40, %v14090_v14 }
 0x1ba   :  { %8802 = vmatprep.subr.bf16.mxu1 %v11512_v25  ;;  %v3537_v25 = vsub.f32 %v11365_v61, %v14089_v45  ;;  %v14100_v54 = vand.u32 4294901760, %v11403_v59  ;;  %v14101_v31 = vand.u32 4294901760, %v11405_v16  ;;  %v3520_v7 = vand.u32 4294901760, %v3519_v8 }
 0x1bb   :  { %8660 = vmatpush1.bf16.msra.mxu0 %v11520_v17  ;;  %v3532_v29 = vand.u32 4294901760, %v3531_v52  ;;  %v3543_v19 = vsub.f32 %v11377_v23, %v14091_v13  ;;  %v3555_v17 = vsub.f32 %v11379_v39, %v14092_v50  ;;  %v4276_v45 = vsub.f32 %v11370_v4, %v14093_v46 }
 0x1bc   :  { %8662 = vmatprep.subr.bf16.mxu0 %v8661_v48  ;;  %v4288_v14 = vsub.f32 %v11372_v51, %v14095_v0  ;;  %v14103_v48 = vand.u32 4294901760, %v11465_v24  ;;  %v14102_v8 = vand.u32 4294901760, %v11467_v55  ;;  %v4271_v52 = vand.u32 4294901760, %v4270_v49 }
 0x1bd   :  { %8804 = vmatpush1.bf16.msra.mxu1 %v8803_v32  ;;  %v4283_v13 = vand.u32 4294901760, %v4282_v43  ;;  %v4294_v50 = vsub.f32 %v11390_v47, %v14097_v62  ;;  %v4306_v32 = vsub.f32 %v11396_v57, %v14104_v10  ;;  %v3526_v46 = vand.u32 4294901760, %v3525_v22  ;;  %v14964_v10 = vld [vmem:[#allocation67_spill] sm:$0xff] }
 0x1be   :  { %8806 = vmatprep.subr.bf16.mxu1 %v8805_v34  ;;  %v3538_v1 = vand.u32 4294901760, %v3537_v25  ;;  %v3549_v0 = vsub.f32 %v11403_v59, %v14100_v54  ;;  %v3561_v34 = vsub.f32 %v11405_v16, %v14101_v31  ;;  %v8811_v49 = vpack.c.bf16 %v4265_v63, %v4253_v20 }
 0x1bf   :  { %8664 = vmatpush1.bf16.msra.mxu0 %v8663_v15  ;;  %v8669_v43 = vpack.c.bf16 %v3532_v29, %v3520_v7  ;;  %v3544_v9 = vand.u32 4294901760, %v3543_v19  ;;  %v3556_v62 = vand.u32 4294901760, %v3555_v17  ;;  %v4277_v56 = vand.u32 4294901760, %v4276_v45 }
 0x1c0   :  { %8666 = vmatprep.subr.bf16.mxu0 %v8665_v2  ;;  %v4289_v60 = vand.u32 4294901760, %v4288_v14  ;;  %v4300_v15 = vsub.f32 %v11465_v24, %v14103_v48  ;;  %v4312_v22 = vsub.f32 %v11467_v55, %v14102_v8  ;;  %v8813_v25 = vpack.c.bf16 %v4283_v13, %v4271_v52  ;;  %v14948_v52 = vld [vmem:[#allocation47_spill] sm:$0xff]  ;;  %v14962_v8 = vld [vmem:[#allocation61_spill] sm:$0xff] }
 0x1c1   :  { %8808 = vmatpush1.bf16.msra.mxu1 %v8807_v18  ;;  %v4295_v54 = vand.u32 4294901760, %v4294_v50  ;;  %v4307_v31 = vand.u32 4294901760, %v4306_v32  ;;  %v8671_v2 = vpack.c.bf16 %v3538_v1, %v3526_v46  ;;  %v3550_v20 = vand.u32 4294901760, %v3549_v0  ;;  %v14940_v1 = vld [vmem:[#allocation59_spill] sm:$0xff]  ;;  %v14943_v46 = vld [vmem:[#allocation68_spill] sm:$0xff]  ;;  %v14945_v0 = vld [vmem:[#allocation74_spill] sm:$0xff] }
 0x1c2   :  { %8810 = vmatprep.subr.bf16.mxu1 %v8809_v3  ;;  %v3562_v63 = vand.u32 4294901760, %v3561_v34  ;;  %v8673_v18 = vpack.c.bf16 %v3556_v62, %v3544_v9  ;;  %v8815_v14 = vpack.c.bf16 %v4289_v60, %v4277_v56  ;;  %v4301_v45 = vand.u32 4294901760, %v4300_v15  ;;  %v14941_v50 = vld [vmem:[#allocation63_spill] sm:$0xff]  ;;  %v14942_v9 = vld [vmem:[#allocation64_spill] sm:$0xff]  ;;  %v14944_v56 = vld [vmem:[#allocation73_spill] sm:$0xff] }
 0x1c3   :  { %8668 = vmatpush1.bf16.msra.mxu0 %v8667_v41  ;;  %v4313_v7 = vand.u32 4294901760, %v4312_v22  ;;  %v8817_v29 = vpack.c.bf16 %v4307_v31, %v4295_v54  ;;  %v8677_v3 = vpack.c.bf16 %v11235_v42, %v11233_v11  ;;  %v8821_v41 = vpack.c.bf16 %v14941_v50, %v14940_v1  ;;  %v14946_v54 = vld [vmem:[#allocation70_spill] sm:$0xff]  ;;  %v14947_v31 = vld [vmem:[#allocation71_spill] sm:$0xff]  ;;  %v14949_v34 = vld [vmem:[#allocation80_spill] sm:$0xff] }
 0x1c4   :  { %8670 = vmatprep.subr.bf16.mxu0 %v8669_v43  ;;  %v8675_v19 = vpack.c.bf16 %v3562_v63, %v3550_v20  ;;  %v8679_v60 = vpack.c.bf16 %v14943_v46, %v14942_v9  ;;  %v8681_v62 = vpack.c.bf16 %v14945_v0, %v14944_v56  ;;  %v8823_v17 = vpack.c.bf16 %v14947_v31, %v14946_v54  ;;  %v14951_v15 = vld [vmem:[#allocation92_spill] sm:$0xff]  ;;  %v14954_v63 = vld [vmem:[#allocation94_spill] sm:$0xff] }
 0x1c5   :  { %8812 = vmatpush1.bf16.msra.mxu1 %v8811_v49  ;;  %v8819_v13 = vpack.c.bf16 %v4313_v7, %v4301_v45  ;;  %v8825_v32 = vpack.c.bf16 %v14892_v12, %v14889_v33  ;;  %v14950_v49 = vld [vmem:[#allocation81_spill] sm:$0xff]  ;;  %v8685_v22 = vpack.c.bf16 %v14951_v15, %v14905_v36  ;;  %v237_v45 = vlaneseq  ;;  %v14956_v7 = vld [vmem:[#allocation104_spill] sm:$0xff] }
 0x1c6   :  { %8814 = vmatprep.subr.bf16.mxu1 %v8813_v25  ;;  %v8683_v43 = vpack.c.bf16 %v14950_v49, %v14949_v34  ;;  %v14952_v25 = vld [vmem:[#allocation85_spill] sm:$0xff]  ;;  %v8841_v26 = vpack.c.bf16 %v11396_v57, %v11390_v47 }
 0x1c7   :  { %8672 = vmatpush1.bf16.msra.mxu0 %v8671_v2  ;;  %v14953_v2 = vld [vmem:[#allocation88_spill] sm:$0xff]  ;;  %v11686_v48 = vshrl.u32 %v237_v45, 7  ;;  %v8695_v45 = vpack.c.bf16 %v11365_v61, %v11363_v40 }
 0x1c8   :  { %8674 = vmatprep.subr.bf16.mxu0 %v8673_v18  ;;  %v8827_v20 = vpack.c.bf16 %v14953_v2, %v14952_v25  ;;  %v14955_v18 = vld [vmem:[#allocation95_spill] sm:$0xff] }
 0x1c9   :  { %8816 = vmatpush1.bf16.msra.mxu1 %v8815_v14  ;;  %v8829_v14 = vpack.c.bf16 %v14955_v18, %v14954_v63  ;;  %14963 = vst [vmem:[#allocation41_spill] sm:$0xff] %v11686_v48  ;;  %v14113_v44 = vsub.s32 0, %v11686_v48 }
 0x1ca   :  { %8818 = vmatprep.subr.bf16.mxu1 %v8817_v29  ;;  %v14957_v29 = vld [vmem:[#allocation105_spill] sm:$0xff] }
 0x1cb   :  { %8676 = vmatpush1.bf16.msra.mxu0 %v8675_v19  ;;  %v8687_v19 = vpack.c.bf16 %v14957_v29, %v14956_v7 }
 0x1cc   :  { %8678 = vmatprep.subr.bf16.mxu0 %v8677_v3  ;;  %v14958_v3 = vld [vmem:[#allocation17_spill] sm:$0xff] }
 0x1cd   :  { %8820 = vmatpush1.bf16.msra.mxu1 %v8819_v13  ;;  %v8689_v13 = vpack.c.bf16 %v11322_v21, %v14958_v3 }
 0x1ce   :  { %8822 = vmatprep.subr.bf16.mxu1 %v8821_v41  ;;  %3606 = vmatmul.mubr.f32.vlgmr.msra.gmra.mrb[4].mxu0 %v14948_v52  ;;  %v14959_v41 = vld [vmem:[#allocation46_spill] sm:$0xff] }
 0x1cf   :  { %8680 = vmatpush1.bf16.msra.mxu0 %v8679_v60  ;;  %3724 = vmatprep.mubr.f32.mxu0 %v14281_v38  ;;  %v14960_v60 = vld [vmem:[#allocation12_spill] sm:$0xff] }
 0x1d0   :  { %4357 = vmatmul.mubr.f32.vlgmr.msra.gmra.mrb[4].mxu1 %v14948_v52  ;;  %8682 = vmatprep.subr.bf16.mxu0 %v8681_v62  ;;  %v8831_v62 = vpack.c.bf16 %v14960_v60, %v14959_v41  ;;  %v14119_v52 = vsub.s32 2, %v11686_v48  ;;  %v1062_v53 = vpop.f32.mrb[0].mxu0 }
 0x1d1   :  { %8824 = vmatpush1.bf16.msra.mxu1 %v8823_v17  ;;  %4475 = vmatprep.mubr.f32.mxu1 %v14281_v38  ;;  %v14961_v17 = vld [vmem:[#allocation60_spill] sm:$0xff] }
 0x1d2   :  { %8826 = vmatprep.subr.bf16.mxu1 %v8825_v32  ;;  %v8833_v32 = vpack.c.bf16 %v14962_v8, %v14961_v17 }
 0x1d3   :  { %8684 = vmatpush1.bf16.msra.mxu0 %v8683_v43  ;;  %v8691_v43 = vpack.c.bf16 %v14926_v35, %v14964_v10 }
 0x1d4   :  { %8686 = vmatprep.subr.bf16.mxu0 %v8685_v22  ;;  %v8693_v22 = vpack.c.bf16 %v11351_v27, %v11349_v37 }
 0x1d5   :  { %8828 = vmatpush1.bf16.msra.mxu1 %v8827_v20  ;;  %v8835_v20 = vpack.c.bf16 %v14936_v58, %v14933_v28 }
 0x1d6   :  { %8830 = vmatprep.subr.bf16.mxu1 %v8829_v14  ;;  %v8837_v14 = vpack.c.bf16 %v11358_v5, %v11355_v6 }
 0x1d7   :  { %8688 = vmatpush1.bf16.msra.mxu0 %v8687_v19  ;;  %v233_v19 = vld [vmem:[#allocation5] sm:$0xff] }
 0x1d8   :  { %8690 = vmatprep.subr.bf16.mxu0 %v8689_v13  ;;  %v14116_v13 = vsub.s32 1, %v11686_v48 }
 0x1d9   :  { %8832 = vmatpush1.bf16.msra.mxu1 %v8831_v62  ;;  %v8697_v62 = vpack.c.bf16 %v11379_v39, %v11377_v23  ;;  %v1064_v39 = vpop.f32.mrb[1].mxu0 }
 0x1da   :  { %8834 = vmatprep.subr.bf16.mxu1 %v8833_v32  ;;  %v8839_v32 = vpack.c.bf16 %v11372_v51, %v11370_v4 }
 0x1db   :  { %8692 = vmatpush1.bf16.msra.mxu0 %v8691_v43  ;;  %v240_v43 = vrot.slane %v233_v19, %v14113_v44  ;;  %v8843_v44 = vpack.c.bf16 %v11467_v55, %v11465_v24 }
 0x1dc   :  { %8694 = vmatprep.subr.bf16.mxu0 %v8693_v22  ;;  %v244_v22 = vrot.slane %v233_v19, %v14116_v13  ;;  %v14966_v13 = vand.u32 4294901760, %v11233_v11  ;;  %v14973_v11 = vand.u32 4294901760, %v14946_v54  ;;  %v14979_v54 = vand.u32 4294901760, %v14892_v12 }
 0x1dd   :  { %8836 = vmatpush1.bf16.msra.mxu1 %v8835_v20  ;;  %v8699_v20 = vpack.c.bf16 %v11405_v16, %v11403_v59  ;;  %v11718_v30 = vadd.f32 %v1062_v53, %v240_v43  ;;  %v14967_v16 = vand.u32 4294901760, %v11235_v42  ;;  %v14970_v53 = vand.u32 4294901760, %v14941_v50  ;;  %v14975_v50 = vld [vmem:[#allocation55_spill] sm:$0xff] }
 0x1de   :  { %8838 = vmatprep.subr.bf16.mxu1 %v8837_v14  ;;  %v248_v14 = vrot.slane %v233_v19, %v14119_v52  ;;  %v11728_v59 = vadd.f32 %v1064_v39, %v244_v22  ;;  %v14969_v52 = vand.u32 4294901760, %v14940_v1  ;;  %v14974_v42 = vand.u32 4294901760, %v14947_v31 }
 0x1df   :  { %8696 = vmatpush1.bf16.msra.mxu0 %v8695_v45  ;;  %v14965_v45 = vsub.s32 3, %v11686_v48  ;;  %v14971_v48 = vand.u32 4294901760, %v14942_v9  ;;  %v14124_v39 = vand.u32 2147483647, %v11718_v30  ;;  %v6165_v1 = vand.u32 2139095040, %v11718_v30 }
 0x1e0   :  { %8698 = vmatprep.subr.bf16.mxu0 %v8697_v62  ;;  %v11726_v62 = vpack.c.bf16 %v14967_v16, %v14966_v13  ;;  %14968 = vst [vmem:[#allocation37_spill] sm:$0xff] %v11728_v59  ;;  %v11734_v43 = vpack.c.bf16 %v14970_v53, %v14969_v52  ;;  %v11746_v16 = vpack.c.bf16 %v14974_v42, %v14973_v11  ;;  %v14976_v52 = vand.u32 4294901760, %v14944_v56  ;;  %v14985_v11 = vld [vmem:[#allocation48_spill] sm:$0xff] }
 0x1e1   :  { %8840 = vmatpush1.bf16.msra.mxu1 %v8839_v32  ;;  %v252_v57 = vrot.slane %v233_v19, %v14965_v45  ;;  %v1813_v32 = vpop.f32.mrb[0].mxu1  ;;  %v14977_v9 = vand.u32 4294901760, %v14945_v0  ;;  %v14980_v45 = vand.u32 4294901760, %v14949_v34  ;;  %v14981_v53 = vand.u32 4294901760, %v14950_v49 }
 0x1e2   :  { %8842 = vmatprep.subr.bf16.mxu1 %v8841_v26  ;;  %v14972_v26 = vand.u32 4294901760, %v14943_v46  ;;  %v1815_v13 = vpop.f32.mrb[1].mxu1  ;;  %v11763_v22 = vadd.f32 %v1813_v32, %v248_v14  ;;  %v14982_v0 = vand.u32 4294901760, %v14952_v25  ;;  %v6166_v12 = vshrl.u32 %v6165_v1, 23  ;;  %v14984_v32 = vld [vmem:[#allocation57_spill] sm:$0xff] }
 0x1e3   :  { %8700 = vmatpush1.bf16.msra.mxu0 %v8699_v20  ;;  %v11755_v46 = vpack.c.bf16 %v14977_v9, %v14976_v52  ;;  %v6269_v20 = vand.u32 2139095040, %v11728_v59  ;;  %v11770_v56 = vpack.c.bf16 %v14981_v53, %v14980_v45  ;;  %v6169_v14 = vand.u32 8388607, %v14124_v39  ;;  %v14993_v45 = vld [vmem:[#allocation72_spill] sm:$0xff] }
 0x1e4   :  { %v11740_v19 = vpack.c.bf16 %v14972_v26, %v14971_v48  ;;  %8702 = vmatprep.subr.bf16.mxu0 %v14975_v50  ;;  %v14978_v48 = vand.u32 4294901760, %v14889_v33  ;;  %v14983_v26 = vand.u32 4294901760, %v14953_v2  ;;  %v14987_v34 = vand.u32 4294901760, %v14951_v15 }
 0x1e5   :  { %8844 = vmatpush1.bf16.msra.mxu1 %v8843_v44  ;;  %v14986_v44 = vand.u32 4294901760, %v14905_v36  ;;  %v14988_v25 = vand.u32 4294901760, %v14954_v63  ;;  %v14989_v2 = vand.u32 4294901760, %v14955_v18  ;;  %v14123_v1 = vand.u32 2147483647, %v11763_v22 }
 0x1e6   :  { %v11761_v31 = vpack.c.bf16 %v14979_v54, %v14978_v48  ;;  %v11776_v33 = vpack.c.bf16 %v14983_v26, %v14982_v0  ;;  %8846 = vmatprep.subr.bf16.mxu1 %v14984_v32  ;;  %3727 = vmatmul.mubr.f32.vlgmr.msra.gmra.mrb[4].mxu0 %v14985_v11  ;;  %v6373_v52 = vand.u32 2139095040, %v11763_v22  ;;  %v14122_v9 = vand.u32 2147483647, %v11728_v59  ;;  %v14990_v48 = vld [vmem:[#allocation58_spill] sm:$0xff] }
 0x1e7   :  { %v11786_v49 = vpack.c.bf16 %v14987_v34, %v14986_v44  ;;  %v11792_v42 = vpack.c.bf16 %v14989_v2, %v14988_v25  ;;  %8704 = vmatpush1.bf16.msra.mxu0 %v14990_v48  ;;  %3821 = vmatprep.mubr.f32.mxu0 %v14281_v38  ;;  %v14991_v36 = vand.u32 4294901760, %v14956_v7  ;;  %v14992_v15 = vand.u32 4294901760, %v14957_v29  ;;  %v15044_v48 = vld [vmem:[#allocation49_spill] sm:$0xff] }
 0x1e8   :  { %v7753_v63 = vadd.s32 4294967169, %v6166_v12  ;;  %v6270_v18 = vshrl.u32 %v6269_v20, 23  ;;  %4478 = vmatmul.mubr.f32.vlgmr.msra.gmra.mrb[4].mxu1 %v14985_v11  ;;  %8706 = vmatprep.subr.bf16.mxu0 %v14993_v45  ;;  %v14994_v53 = vand.u32 4294901760, %v14959_v41  ;;  %v14995_v0 = vand.u32 4294901760, %v14960_v60  ;;  %v14998_v12 = vld [vmem:[#allocation69_spill] sm:$0xff] }
 0x1e9   :  { %v11803_v54 = vpack.c.bf16 %v14992_v15, %v14991_v36  ;;  %v14996_v44 = vand.u32 4294901760, %v14958_v3  ;;  %v14997_v7 = vand.u32 4294901760, %v11322_v21  ;;  %v6374_v29 = vshrl.u32 %v6373_v52, 23  ;;  %8848 = vmatpush1.bf16.msra.mxu1 %v14998_v12  ;;  %4572 = vmatprep.mubr.f32.mxu1 %v14281_v38 }
 0x1ea   :  { %v11811_v26 = vpack.c.bf16 %v14995_v0, %v14994_v53  ;;  %v6377_v20 = vand.u32 8388607, %v14123_v1  ;;  %v14999_v41 = vand.u32 4294901760, %v14961_v17  ;;  %v15000_v60 = vand.u32 4294901760, %v14962_v8  ;;  %v15003_v53 = vld [vmem:[#allocation75_spill] sm:$0xff]  ;;  %v15026_v1 = vld [vmem:[#allocation106_spill] sm:$0xff] }
 0x1eb   :  { %v11817_v34 = vpack.c.bf16 %v14997_v7, %v14996_v44  ;;  %v15001_v3 = vand.u32 4294901760, %v14964_v10  ;;  %v15002_v21 = vand.u32 4294901760, %v14926_v35  ;;  %v6170_v52 = vor.u32 8388608, %v6169_v14  ;;  %8850 = vmatprep.subr.bf16.mxu1 %v15003_v53  ;;  %v15043_v53 = vld [vmem:[#allocation18_spill] sm:$0xff] }
 0x1ec   :  { %v11827_v25 = vpack.c.bf16 %v15000_v60, %v14999_v41  ;;  %v6172_v36 = vadd.s32 1, %v7753_v63  ;;  %v7757_v15 = vadd.s32 4294967169, %v6270_v18  ;;  %v15004_v0 = vand.u32 4294901760, %v14933_v28  ;;  %v15006_v41 = vld [vmem:[#allocation78_spill] sm:$0xff] }
 0x1ed   :  { %v11833_v2 = vpack.c.bf16 %v15002_v21, %v15001_v3  ;;  %v15005_v44 = vand.u32 4294901760, %v14936_v58  ;;  %v7761_v8 = vadd.s32 4294967169, %v6374_v29  ;;  %v6378_v7 = vor.u32 8388608, %v6377_v20  ;;  %8708 = vmatpush1.bf16.msra.mxu0 %v15006_v41  ;;  %v15007_v63 = vld [vmem:[#allocation90_spill] sm:$0xff] }
 0x1ee   :  { %v11844_v10 = vand.u32 8388607, %v14122_v9  ;;  %v11846_v35 = vadd.f32 %v1815_v13, %v252_v57  ;;  %vm6173_vm1 = vcmp.gt.s32.totalorder %v6172_v36, 0  ;;  %v11849_v14 = vadd.s32 1, %v7757_v15  ;;  %8710 = vmatprep.subr.bf16.mxu0 %v15007_v63  ;;  %v15012_v3 = vld [vmem:[#allocation86_spill] sm:$0xff] }
 0x1ef   :  { %v11840_v17 = vpack.c.bf16 %v15005_v44, %v15004_v0  ;;  %v15008_v28 = vand.u32 4294901760, %v11349_v37  ;;  %v15009_v58 = vand.u32 4294901760, %v11351_v27  ;;  %v15010_v29 = vand.u32 4294901760, %v11355_v6  ;;  %8852 = vmatpush1.bf16.msra.mxu1 %v15012_v3  ;;  %v15030_v3 = vld [vmem:[#allocation97_spill] sm:$0xff] }
 0x1f0   :  { %v15011_v20 = vand.u32 4294901760, %v11358_v5  ;;  %v6174_v57 = vsel %vm6173_vm1, %v6172_v36, 0  ;;  %v6380_v13 = vadd.s32 1, %v7761_v8  ;;  %v15013_v21 = vand.u32 4294901760, %v11363_v40  ;;  %v15019_v8 = vld [vmem:[#allocation36_spill] sm:$0xff] }
 0x1f1   :  { %v11856_v18 = vpack.c.bf16 %v15009_v58, %v15008_v28  ;;  %v15014_v15 = vand.u32 4294901760, %v11365_v61  ;;  %v15015_v37 = vand.u32 4294901760, %v11370_v4  ;;  %v15016_v27 = vand.u32 4294901760, %v11372_v51  ;;  %v15017_v28 = vld [vmem:[#allocation93_spill] sm:$0xff] }
 0x1f2   :  { %v11862_v60 = vpack.c.bf16 %v15011_v20, %v15010_v29  ;;  %v11877_v6 = vshrl.u32 %v6174_v57, 5  ;;  %v6176_v5 = vand.u32 31, %v6174_v57  ;;  %8854 = vmatprep.subr.bf16.mxu1 %v15017_v28  ;;  %v15018_v36 = vand.u32 4294901760, %v11377_v23  ;;  %v15022_v29 = vld [vmem:[#allocation14_spill] sm:$0xff] }
 0x1f3   :  { %v11869_v0 = vpack.c.bf16 %v15014_v15, %v15013_v21  ;;  %v11875_v44 = vpack.c.bf16 %v15016_v27, %v15015_v37  ;;  %v15020_v58 = vand.u32 4294901760, %v15019_v8  ;;  %v15021_v61 = vand.u32 4294901760, %v11390_v47  ;;  %v15024_v37 = vld [vmem:[#allocation96_spill] sm:$0xff]  ;;  %8856 = vmatpush1.bf16.msra.mxu1 %v15026_v1 }
 0x1f4   :  { %v15023_v20 = vand.u32 4294901760, %v15022_v29  ;;  %v11892_v51 = vshll.u32 %v6170_v52, 8  ;;  %v11894_v21 = vshll.u32 %v6378_v7, 8  ;;  %8712 = vmatpush1.bf16.msra.mxu0 %v15024_v37  ;;  %v6177_v23 = vsub.s32 32, %v6176_v5  ;;  %v15025_v47 = vld [vmem:[#allocation52_spill] sm:$0xff] }
 0x1f5   :  { %v11884_v40 = vpack.c.bf16 %v15020_v58, %v15018_v36  ;;  %v14125_v27 = vmov 683565275   ;;  %vm6381_vm2 = vcmp.gt.s32.totalorder %v6380_v13, 0  ;;  %vm6277_vm3 = vcmp.gt.s32.totalorder %v11849_v14, 0  ;;  %8714 = vmatprep.subr.bf16.mxu0 %v15025_v47 }
 0x1f6   :  { %v11890_v4 = vpack.c.bf16 %v15023_v20, %v15021_v61  ;;  %v6179_v36 = vshll.u32 %v14125_v27, %v6176_v5  ;;  %v14130_v8 = vmov 2475754826   ;;  %v14132_v7 = vmov 2131351028   ;;  %v15027_v27 = vld [vmem:[#allocation56_spill] sm:$0xff] }
 0x1f7   :  { %v6182_v52 = vshll.u32 %v14130_v8, %v6176_v5  ;;  %v6185_v58 = vshll.u32 %v14132_v7, %v6176_v5  ;;  %v14134_v61 = vmov 2102212464   ;;  %v14136_v20 = vmov 920167782   ;;  %8858 = vmatprep.subr.bf16.mxu1 %v15027_v27 }
 0x1f8   :  { %v6188_v29 = vshll.u32 %v14134_v61, %v6176_v5  ;;  %v6191_v9 = vshll.u32 %v14136_v20, %v6176_v5  ;;  %v6180_v15 = vshrl.u32 %v14130_v8, %v6177_v23  ;;  %v6183_v57 = vshrl.u32 %v14132_v7, %v6177_v23  ;;  %v15029_v5 = vld [vmem:[#allocation62_spill] sm:$0xff] }
 0x1f9   :  { %v6186_v39 = vshrl.u32 %v14134_v61, %v6177_v23  ;;  %vm6194_vm4 = vcmp.lt.s32.totalorder %v11877_v6, 1  ;;  %v15028_v11 = vmov 683565275   ;;  %v6189_v37 = vshrl.u32 %v14136_v20, %v6177_v23  ;;  %8716 = vmatpush1.bf16.msra.mxu0 %v15029_v5  ;;  %v15031_v20 = vld [vmem:[#allocation66_spill] sm:$0xff] }
 0x1fa   :  { %v6178_v47 = vshrl.u32 %v15028_v11, %v6177_v23  ;;  %v14138_v28 = vmov 1326507024   ;;  %vm6196_vm5 = vcmp.lt.s32.totalorder %v11877_v6, 3  ;;  %v6181_v8 = vor.u32 %v6180_v15, %v6179_v36  ;;  %8718 = vmatprep.subr.bf16.mxu0 %v15030_v3  ;;  %8860 = vmatpush1.bf16.msra.mxu1 %v15031_v20  ;;  %v15033_v36 = vld [vmem:[#allocation101_spill] sm:$0xff] }
 0x1fb   :  { %v6192_v59 = vshrl.u32 %v14138_v28, %v6177_v23  ;;  %v6184_v1 = vor.u32 %v6183_v57, %v6182_v52  ;;  %v6187_v7 = vor.u32 %v6186_v39, %v6185_v58  ;;  %v6382_v61 = vsel %vm6381_vm2, %v6380_v13, 0  ;;  %v15032_v13 = vld [vmem:[#allocation98_spill] sm:$0xff]  ;;  %v15034_v58 = vld [vmem:[#allocation103_spill] sm:$0xff] }
 0x1fc   :  { %v6190_v63 = vor.u32 %v6189_v37, %v6188_v29  ;;  %vm6197_vm6 = vcmp.lt.s32.totalorder %v11877_v6, 4  ;;  %v6384_v41 = vand.u32 31, %v6382_v61  ;;  %v6198_v23 = vsel %vm6194_vm4, %v6178_v47, %v6181_v8  ;;  %8862 = vmatprep.subr.bf16.mxu1 %v15032_v13 }
 0x1fd   :  { %v6193_v27 = vor.u32 %v6192_v59, %v6191_v9  ;;  %v6199_v28 = vsel %vm6197_vm6, %v6187_v7, 2102212464  ;;  %v6202_v15 = vsel %vm6194_vm4, %v6181_v8, %v6184_v1  ;;  %v6206_v39 = vsel %vm6194_vm4, %v6184_v1, %v6187_v7  ;;  %8720 = vmatpush1.bf16.msra.mxu0 %v15033_v36  ;;  %v15035_v36 = vld [vmem:[#allocation102_spill] sm:$0xff] }
 0x1fe   :  { %v6200_v59 = vsel %vm6196_vm5, %v6184_v1, %v6199_v28  ;;  %v6203_v9 = vsel %vm6197_vm6, %v6190_v63, 920167782  ;;  %v6385_v37 = vsub.s32 32, %v6384_v41  ;;  %vm6195_vm7 = vcmp.lt.s32.totalorder %v11877_v6, 2  ;;  %8722 = vmatprep.subr.bf16.mxu0 %v15034_v58  ;;  %8864 = vmatpush1.bf16.msra.mxu1 %v15035_v36 }
 0x1ff   :  { %v6207_v57 = vsel %vm6197_vm6, %v6193_v27, 1326507024  ;;  %v6204_v47 = vsel %vm6196_vm5, %v6187_v7, %v6203_v9  ;;  %v11939_v52 = vsel %vm6277_vm3, %v11849_v14, 0  ;;  %v6201_v1 = vsel %vm6195_vm7, %v6198_v23, %v6200_v59  ;;  %v15036_v14 = vld [vmem:[#allocation13_spill] sm:$0xff] }
 0x200   :  { %v6208_v8 = vsel %vm6196_vm5, %v6190_v63, %v6207_v57  ;;  %v6205_v28 = vsel %vm6195_vm7, %v6202_v15, %v6204_v47  ;;  %v11942_v29 = vshrl.u32 %v6382_v61, 5  ;;  %8866 = vmatprep.subr.bf16.mxu1 %v15036_v14  ;;  %v6387_v9 = vshll.u32 %v15028_v11, %v6384_v41  ;;  %v15039_v57 = vld [vmem:[#allocation35_spill] sm:$0xff] }
 0x201   :  { %v6209_v27 = vsel %vm6195_vm7, %v6206_v39, %v6208_v8  ;;  %v11950_v63 = vmul.u32.u64.low %v11892_v51, %v6205_v28  ;;  %v11951_v6 = vmul.u32.u64.high %v11892_v51, %v6205_v28, %v11950_v63  ;;  %v15037_v23 = vmov 2475754826   ;;  %8724 = vmatpush1.bf16.msra.mxu0 %v15039_v57 }
 0x202   :  { %v11946_v13 = vmul.u32.u64.low %v11892_v51, %v6209_v27  ;;  %v11947_v7 = vmul.u32.u64.high %v11892_v51, %v6209_v27, %v11946_v13  ;;  %v6388_v15 = vshrl.u32 %v15037_v23, %v6385_v37  ;;  %v6390_v61 = vshll.u32 %v15037_v23, %v6384_v41  ;;  %8726 = vmatprep.subr.bf16.mxu0 %v11726_v62  ;;  %8868 = vmatpush1.bf16.msra.mxu1 %v15043_v53 }
 0x203   :  { %v15038_v39 = vmov 2131351028   ;;  %v15040_v13 = vmov 2102212464   ;;  %v15041_v27 = vmov 920167782   ;;  %v6217_v57 = vmul.u32 %v11892_v51, %v6201_v1  ;;  %8870 = vmatprep.subr.bf16.mxu1 %v11734_v43 }
 0x204   :  { %v6391_v59 = vshrl.u32 %v15038_v39, %v6385_v37  ;;  %v6393_v47 = vshll.u32 %v15038_v39, %v6384_v41  ;;  %v6394_v8 = vshrl.u32 %v15040_v13, %v6385_v37  ;;  %v6396_v28 = vshll.u32 %v15040_v13, %v6384_v41  ;;  %3825 = vmatmul.mubr.f32.vlgmr.msra.gmra.mrb[4].mxu0 %v15044_v48 }
 0x205   :  { %v6397_v36 = vshrl.u32 %v15041_v27, %v6385_v37  ;;  %v6389_v14 = vor.u32 %v6388_v15, %v6387_v9  ;;  %v6399_v20 = vshll.u32 %v15041_v27, %v6384_v41  ;;  %v15042_v3 = vmov 1326507024   ;;  %8728 = vmatpush1.bf16.msra.mxu0 %v11740_v19  ;;  %3967 = vmatprep.mubr.f32.mxu0 %v14281_v38 }
 0x206   :  { %v6392_v58 = vor.u32 %v6391_v59, %v6390_v61  ;;  %v6400_v5 = vshrl.u32 %v15042_v3, %v6385_v37  ;;  %vm6219_vm8 = vc.u32 %v11947_v7, %v11950_v63  ;;  %v6220_v12 = vadd.s32 1, %v11951_v6  ;;  %4576 = vmatmul.mubr.f32.vlgmr.msra.gmra.mrb[4].mxu1 %v15044_v48  ;;  %8730 = vmatprep.subr.bf16.mxu0 %v11755_v46 }
 0x207   :  { %v6395_v45 = vor.u32 %v6394_v8, %v6393_v47  ;;  %v6386_v62 = vshrl.u32 %v15028_v11, %v6385_v37  ;;  %v6398_v9 = vor.u32 %v6397_v36, %v6396_v28  ;;  %vm6402_vm9 = vcmp.lt.s32.totalorder %v11942_v29, 1  ;;  %8872 = vmatpush1.bf16.msra.mxu1 %v11746_v16  ;;  %4718 = vmatprep.mubr.f32.mxu1 %v14281_v38  ;;  %v15045_v8 = vld [vmem:[#allocation39_spill] sm:$0xff] }
 0x208   :  { %v6401_v41 = vor.u32 %v6400_v5, %v6399_v20  ;;  %v6221_v51 = vsel %vm6219_vm8, %v6220_v12, %v11951_v6  ;;  %vm6404_vm10 = vcmp.lt.s32.totalorder %v11942_v29, 3  ;;  %vm6405_vm11 = vcmp.lt.s32.totalorder %v11942_v29, 4  ;;  %8874 = vmatprep.subr.bf16.mxu1 %v11761_v31 }
 0x209   :  { %v6410_v43 = vsel %vm6402_vm9, %v6389_v14, %v6392_v58  ;;  %v6222_v20 = vadd.s32 %v6221_v51, %v6217_v57  ;;  %v6407_v5 = vsel %vm6405_vm11, %v6395_v45, 2102212464  ;;  %v6411_v37 = vsel %vm6405_vm11, %v6398_v9, 920167782  ;;  %8732 = vmatpush1.bf16.msra.mxu0 %v11770_v56 }
 0x20a   :  { %v6414_v19 = vsel %vm6402_vm9, %v6392_v58, %v6395_v45  ;;  %vm6403_vm12 = vcmp.lt.s32.totalorder %v11942_v29, 2  ;;  %v6406_v12 = vsel %vm6402_vm9, %v6386_v62, %v6389_v14  ;;  %v6412_v36 = vsel %vm6404_vm10, %v6395_v45, %v6411_v37  ;;  %8734 = vmatprep.subr.bf16.mxu0 %v11786_v49  ;;  %v15047_v62 = vld [vmem:[#allocation16_spill] sm:$0xff] }
 0x20b   :  { %v6415_v1 = vsel %vm6405_vm11, %v6401_v41, 1326507024  ;;  %v6223_v46 = vadd.s32 536870912, %v6222_v20  ;;  %v6408_v6 = vsel %vm6404_vm10, %v6392_v58, %v6407_v5  ;;  %v6413_v16 = vsel %vm6403_vm12, %v6410_v43, %v6412_v36  ;;  %8876 = vmatpush1.bf16.msra.mxu1 %v11776_v33 }
 0x20c   :  { %v6416_v15 = vsel %vm6404_vm10, %v6398_v9, %v6415_v1  ;;  %v12005_v45 = vmul.u32.u64.low %v11894_v21, %v6413_v16  ;;  %v12006_v61 = vmul.u32.u64.high %v11894_v21, %v6413_v16, %v12005_v45  ;;  %v6474_v31 = vand.u32 2147483647, %v11846_v35  ;;  %8878 = vmatprep.subr.bf16.mxu1 %v11792_v42 }
 0x20d   :  { %v6417_v14 = vsel %vm6403_vm12, %v6414_v19, %v6416_v15  ;;  %v6224_v58 = vshrl.u32 %v6223_v46, 30  ;;  %v6280_v47 = vand.u32 31, %v11939_v52  ;;  %vm6164_vm13 = vcmp.lt.s32.totalorder %v11718_v30, 0  ;;  %8736 = vmatpush1.bf16.msra.mxu0 %v11803_v54 }
 0x20e   :  { %v12012_v59 = vmul.u32.u64.low %v11894_v21, %v6417_v14  ;;  %v12013_v57 = vmul.u32.u64.high %v11894_v21, %v6417_v14, %v12012_v59  ;;  %v6409_v56 = vsel %vm6403_vm12, %v6406_v12, %v6408_v6  ;;  %v15046_v28 = vand.u32 4294901760, %v15045_v8  ;;  %8738 = vmatprep.subr.bf16.mxu0 %v11817_v34 }
 0x20f   :  { %v15048_v49 = vand.u32 4294901760, %v15047_v62  ;;  %v15049_v41 = vand.u32 4294901760, %v11465_v24  ;;  %v15050_v51 = vand.u32 4294901760, %v11467_v55  ;;  %v15051_v33 = vand.u32 2147483647, %v11718_v30  ;;  %8880 = vmatpush1.bf16.msra.mxu1 %v11811_v26 }
 0x210   :  { %v6225_v29 = vshll.u32 %v6224_v58, 30  ;;  %v6281_v42 = vsub.s32 32, %v6280_v47  ;;  %v15054_v37 = vor.u32 8388608, %v11844_v10  ;;  %v15055_v12 = vand.u32 2139095040, %v11846_v35  ;;  %8882 = vmatprep.subr.bf16.mxu1 %v11827_v25 }
 0x211   :  { %v12025_v9 = vpack.c.bf16 %v15048_v49, %v15046_v28  ;;  %v12031_v43 = vpack.c.bf16 %v15050_v51, %v15049_v41  ;;  %vm12035_vm14 = vcmp.le.f32.partialorder %v15051_v33, 0.7853982  ;;  %v12050_v24 = vadd.s32 %v11950_v63, %v11947_v7  ;;  %8740 = vmatpush1.bf16.msra.mxu0 %v11833_v2 }
 0x212   :  { %v12041_v19 = vshll.u32 %v15054_v37, 8  ;;  %v12045_v36 = vshrl.u32 %v15055_v12, 23  ;;  %v6248_v55 = vsub.s32 4, %v6224_v58  ;;  %v6428_v1 = vadd.s32 1, %v12006_v61  ;;  %8742 = vmatprep.subr.bf16.mxu0 %v11856_v18 }
 0x213   :  { %v12055_v46 = vand.u32 8388607, %v6474_v31  ;;  %v12058_v10 = vsub.s32 %v6222_v20, %v6225_v29  ;;  %v6425_v6 = vmul.u32 %v11894_v21, %v6409_v56  ;;  %vm6427_vm15 = vc.u32 %v12013_v57, %v12005_v45  ;;  %8884 = vmatpush1.bf16.msra.mxu1 %v11840_v17 }
 0x214   :  { %v12064_v54 = vshrl.u32 %v11939_v52, 5  ;;  %v6429_v7 = vsel %vm6427_vm15, %v6428_v1, %v12006_v61  ;;  %v6283_v63 = vshll.u32 %v15028_v11, %v6280_v47  ;;  %v6284_v16 = vshrl.u32 %v15037_v23, %v6281_v42  ;;  %8886 = vmatprep.subr.bf16.mxu1 %v11862_v60 }
 0x215   :  { %v6286_v34 = vshll.u32 %v15037_v23, %v6280_v47  ;;  %v6228_v21 = vsub.s32 0, %v12058_v10  ;;  %v6430_v20 = vadd.s32 %v6429_v7, %v6425_v6  ;;  %v6287_v15 = vshrl.u32 %v15038_v39, %v6281_v42  ;;  %8744 = vmatpush1.bf16.msra.mxu0 %v11869_v0 }
 0x216   :  { %v6289_v52 = vshll.u32 %v15038_v39, %v6280_v47  ;;  %v12078_v26 = vsel %vm6164_vm13, %v6248_v55, %v6224_v58  ;;  %vm6372_vm0 = vcmp.lt.s32.totalorder %v11763_v22, 0  ;;  %v6290_v14 = vshrl.u32 %v15040_v13, %v6281_v42  ;;  %8746 = vmatprep.subr.bf16.mxu0 %v11884_v40 }
 0x217   :  { %v6292_v61 = vshll.u32 %v15040_v13, %v6280_v47  ;;  %v6293_v25 = vshrl.u32 %v15041_v27, %v6281_v42  ;;  %v7754_v59 = vmin.u32 %v6228_v21, %v12058_v10  ;;  %v6431_v56 = vadd.s32 536870912, %v6430_v20  ;;  %8888 = vmatpush1.bf16.msra.mxu1 %v11875_v44 }
 0x218   :  { %v6285_v8 = vor.u32 %v6284_v16, %v6283_v63  ;;  %v6295_v2 = vshll.u32 %v15041_v27, %v6280_v47  ;;  %v6288_v58 = vor.u32 %v6287_v15, %v6286_v34  ;;  %v6291_v28 = vor.u32 %v6290_v14, %v6289_v52  ;;  %8890 = vmatprep.subr.bf16.mxu1 %v11890_v4 }
 0x219   :  { %v6294_v62 = vor.u32 %v6293_v25, %v6292_v61  ;;  %v6296_v49 = vshrl.u32 %v15042_v3, %v6281_v42  ;;  %v6230_v41 = vclz %v7754_v59  ;;  %vm6298_vm1 = vcmp.lt.s32.totalorder %v12064_v54, 1  ;;  %8748 = vmatpush1.bf16.msra.mxu0 %v12025_v9 }
 0x21a   :  { %vm6299_vm2 = vcmp.lt.s32.totalorder %v12064_v54, 2  ;;  %vm6300_vm3 = vcmp.lt.s32.totalorder %v12064_v54, 3  ;;  %v6251_v17 = vsel %vm12035_vm14, 0, %v12078_v26  ;;  %v15056_v18 = vand.u32 2147483647, %v11763_v22  ;;  %8750 = vmatprep.subr.bf16.mxu0 %v14975_v50  ;;  %v15059_v50 = vld [vmem:[#allocation47_spill] sm:$0xff] }
 0x21b   :  { %v6432_v60 = vshrl.u32 %v6431_v56, 30  ;;  %v6297_v51 = vor.u32 %v6296_v49, %v6295_v2  ;;  %vm6301_vm5 = vcmp.lt.s32.totalorder %v12064_v54, 4  ;;  %v7755_v33 = vadd.s32 4294967294, %v6230_v41  ;;  %8892 = vmatpush1.bf16.msra.mxu1 %v12031_v43  ;;  %v15060_v43 = vld [vmem:[#allocation58_spill] sm:$0xff]  ;;  %v15062_v49 = vld [vmem:[#allocation69_spill] sm:$0xff]  ;;  %v15063_v41 = vld [vmem:[#allocation75_spill] sm:$0xff] }
 0x21c   :  { %vm12099_vm4 = vcmp.le.f32.partialorder %v15056_v18, 0.7853982  ;;  %v6282_v29 = vshrl.u32 %v15028_v11, %v6281_v42  ;;  %v6303_v0 = vsel %vm6301_vm5, %v6291_v28, 2102212464  ;;  %v6307_v37 = vsel %vm6301_vm5, %v6294_v62, 920167782  ;;  %8894 = vmatprep.subr.bf16.mxu1 %v14984_v32  ;;  %3969 = vmatmul.mubr.f32.vlgmr.msra.gmra.mrb[4].mxu0 %v15059_v50 }
 0x21d   :  { %v6433_v12 = vshll.u32 %v6432_v60, 30  ;;  %v6456_v55 = vsub.s32 4, %v6432_v60  ;;  %v6306_v1 = vsel %vm6298_vm1, %v6285_v8, %v6288_v58  ;;  %v6308_v6 = vsel %vm6300_vm3, %v6291_v28, %v6307_v37  ;;  %8752 = vmatpush1.bf16.msra.mxu0 %v15060_v43  ;;  %4063 = vmatprep.mubr.f32.mxu0 %v14281_v38 }
 0x21e   :  { %vm7756_vm6 = vcmp.lt.s32.totalorder %v7755_v33, 0  ;;  %v6302_v40 = vsel %vm6298_vm1, %v6282_v29, %v6285_v8  ;;  %v6310_v42 = vsel %vm6298_vm1, %v6288_v58, %v6291_v28  ;;  %v6311_v7 = vsel %vm6301_vm5, %v6297_v51, 1326507024  ;;  %4720 = vmatmul.mubr.f32.vlgmr.msra.gmra.mrb[4].mxu1 %v15059_v50 }
 0x21f   :  { %v6233_v44 = vsel %vm7756_vm6, 0, %v7755_v33  ;;  %v12117_v63 = vsub.s32 %v6430_v20, %v6433_v12  ;;  %v6304_v16 = vsel %vm6300_vm3, %v6288_v58, %v6303_v0  ;;  %v6312_v34 = vsel %vm6300_vm3, %v6294_v62, %v6311_v7  ;;  %8896 = vmatpush1.bf16.msra.mxu1 %v15062_v49  ;;  %4814 = vmatprep.mubr.f32.mxu1 %v14281_v38  ;;  %v15064_v33 = vld [vmem:[#allocation78_spill] sm:$0xff] }
 0x220   :  { %v6234_v4 = vsub.s32 32, %v6233_v44  ;;  %v6238_v21 = vsub.s32 4294967266, %v6233_v44  ;;  %v6457_v15 = vsel %vm6372_vm0, %v6456_v55, %v6432_v60  ;;  %v6309_v52 = vsel %vm6299_vm2, %v6306_v1, %v6308_v6  ;;  %8898 = vmatprep.subr.bf16.mxu1 %v15063_v41  ;;  %v15065_v12 = vld [vmem:[#allocation90_spill] sm:$0xff] }
 0x221   :  { %v6235_v9 = vshll.u32 %v12058_v10, %v6233_v44  ;;  %v6436_v20 = vsub.s32 0, %v12117_v63  ;;  %v6313_v26 = vsel %vm6299_vm2, %v6310_v42, %v6312_v34  ;;  %v7765_v14 = vadd.s32 4294967169, %v12045_v36  ;;  %v15066_v42 = vld [vmem:[#allocation86_spill] sm:$0xff] }
 0x222   :  { %v6236_v61 = vshrl.u32 %v12050_v24, %v6234_v4  ;;  %v6239_v25 = vadd.s32 127, %v6238_v21  ;;  %v12138_v59 = vmul.u32.u64.low %v12041_v19, %v6313_v26  ;;  %v12139_v56 = vmul.u32.u64.high %v12041_v19, %v6313_v26, %v12138_v59  ;;  %v15061_v24 = vld [vmem:[#allocation72_spill] sm:$0xff] }
 0x223   :  { %v7762_v10 = vmin.u32 %v6436_v20, %v12117_v63  ;;  %v6305_v36 = vsel %vm6299_vm2, %v6302_v40, %v6304_v16  ;;  %v12147_v32 = vmul.u32.u64.low %v12041_v19, %v6309_v52  ;;  %v12148_v8 = vmul.u32.u64.high %v12041_v19, %v6309_v52, %v12147_v32  ;;  %8754 = vmatprep.subr.bf16.mxu0 %v15061_v24  ;;  %8900 = vmatpush1.bf16.msra.mxu1 %v15066_v42  ;;  %v15068_v16 = vld [vmem:[#allocation93_spill] sm:$0xff]  ;;  %v12174_v52 = vld [vmem:[#allocation2 + $0x68] sm:$0xff] }
 0x224   :  { %v6237_v2 = vor.u32 %v6236_v61, %v6235_v9  ;;  %v6240_v58 = vshll.u32 %v6239_v25, 23  ;;  %v6459_v28 = vsel %vm12099_vm4, 0, %v6457_v15  ;;  %v6484_v62 = vadd.s32 1, %v7765_v14  ;;  %8756 = vmatpush1.bf16.msra.mxu0 %v15064_v33  ;;  %8902 = vmatprep.subr.bf16.mxu1 %v15068_v16  ;;  %v15069_v15 = vld [vmem:[#allocation96_spill] sm:$0xff] }
 0x225   :  { %v6438_v54 = vclz %v7762_v10  ;;  %v6255_v60 = vadd.s32 3, %v6251_v17  ;;  %v6321_v51 = vmul.u32 %v12041_v19, %v6305_v36  ;;  %vm6323_vm7 = vc.u32 %v12139_v56, %v12147_v32  ;;  %8758 = vmatprep.subr.bf16.mxu0 %v15065_v12  ;;  %v15067_v17 = vld [vmem:[#allocation37_spill] sm:$0xff]  ;;  %v15073_v61 = vld [vmem:[#allocation52_spill] sm:$0xff]  ;;  %v15074_v36 = vld [vmem:[#allocation106_spill] sm:$0xff] }
 0x226   :  { %v6241_v18 = vor.u32 4788187, %v6240_v58  ;;  %v6463_v0 = vadd.s32 3, %v6459_v28  ;;  %v6324_v37 = vadd.s32 1, %v12148_v8  ;;  %vm6485_vm8 = vcmp.gt.s32.totalorder %v6484_v62, 0  ;;  %v15075_v58 = vld [vmem:[#allocation56_spill] sm:$0xff] }
 0x227   :  { %v7763_v29 = vadd.s32 4294967294, %v6438_v54  ;;  %v6244_v1 = vcvt.s32.f32 %v6237_v2  ;;  %v6482_v6 = vor.u32 8388608, %v12055_v46  ;;  %v6486_v40 = vsel %vm6485_vm8, %v6484_v62, 0  ;;  %8904 = vmatpush1.bf16.msra.mxu1 %v15074_v36 }
 0x228   :  { %v6242_v55 = vand.u32 2147483647, %v6241_v18  ;;  %v6426_v19 = vadd.s32 %v12005_v45, %v12013_v57  ;;  %vm6268_vm10 = vcmp.lt.s32.totalorder %v15067_v17, 0  ;;  %v6325_v7 = vsel %vm6323_vm7, %v6324_v37, %v12148_v8  ;;  %8760 = vmatpush1.bf16.msra.mxu0 %v15069_v15  ;;  %8906 = vmatprep.subr.bf16.mxu1 %v15075_v58  ;;  %v15078_v37 = vld [vmem:[#allocation66_spill] sm:$0xff]  ;;  %v15083_v58 = vld [vmem:[#allocation13_spill] sm:$0xff] }
 0x229   :  { %vm7764_vm9 = vcmp.lt.s32.totalorder %v7763_v29, 0  ;;  %v12168_v44 = vand.u32 31, %v6486_v40  ;;  %v12171_v4 = vand.u32 3, %v6255_v60  ;;  %v6326_v46 = vadd.s32 %v6325_v7, %v6321_v51  ;;  %8762 = vmatprep.subr.bf16.mxu0 %v15073_v61  ;;  %v15077_v51 = vld [vmem:[#allocation97_spill] sm:$0xff] }
 0x22a   :  { %v6245_v34 = vmul.f32 %v6244_v1, %v6242_v55  ;;  %v6441_v21 = vsel %vm7764_vm9, 0, %v7763_v29  ;;  %v12176_v57 = vand.u32 3, %v6463_v0  ;;  %v15070_v20 = vand.u32 2147483647, %v15067_v17  ;;  %v15079_v1 = vld [vmem:[#allocation98_spill] sm:$0xff]  ;;  %v15080_v7 = vld [vmem:[#allocation101_spill] sm:$0xff] }
 0x22b   :  { %v6442_v9 = vsub.s32 32, %v6441_v21  ;;  %v6446_v45 = vsub.s32 4294967266, %v6441_v21  ;;  %v6489_v14 = vsub.s32 32, %v12168_v44  ;;  %v12187_v59 = vadd.s32 %v12147_v32, %v12139_v56  ;;  %v15076_v32 = vld [vmem:[#allocation62_spill] sm:$0xff]  ;;  %8908 = vmatpush1.bf16.msra.mxu1 %v15078_v37 }
 0x22c   :  { %vm12180_vm11 = vcmp.le.f32.partialorder %v15070_v20, 0.7853982  ;;  %v6246_v25 = vxor.u32 2147483648, %v6245_v34  ;;  %v6327_v43 = vadd.s32 536870912, %v6326_v46  ;;  %v12189_v10 = vshll.u32 %v6482_v6, 8  ;;  %8764 = vmatpush1.bf16.msra.mxu0 %v15076_v32  ;;  %8910 = vmatprep.subr.bf16.mxu1 %v15079_v1 }
 0x22d   :  { %v6443_v8 = vshll.u32 %v12117_v63, %v6441_v21  ;;  %v6444_v24 = vshrl.u32 %v6426_v19, %v6442_v9  ;;  %v6447_v2 = vadd.s32 127, %v6446_v45  ;;  %v4822_v28 = vand.u32 4294901760, %v12174_v52  ;;  %8766 = vmatprep.subr.bf16.mxu0 %v15077_v51  ;;  %v15081_v9 = vld [vmem:[#allocation103_spill] sm:$0xff] }
 0x22e   :  { %v6247_v62 = vsel %vm6164_vm13, %v6246_v25, %v6245_v34  ;;  %v6328_v49 = vshrl.u32 %v6327_v43, 30  ;;  %v12197_v54 = vshrl.u32 %v6486_v40, 5  ;;  %v6491_v56 = vshll.u32 %v15028_v11, %v12168_v44  ;;  %v15082_v43 = vld [vmem:[#allocation102_spill] sm:$0xff] }
 0x22f   :  { %v6250_v63 = vsel %vm12035_vm14, %v11718_v30, %v6247_v62  ;;  %v6445_v41 = vor.u32 %v6444_v24, %v6443_v8  ;;  %v6448_v18 = vshll.u32 %v6447_v2, 23  ;;  %v6492_v60 = vshrl.u32 %v15037_v23, %v6489_v14  ;;  %8912 = vmatpush1.bf16.msra.mxu1 %v15082_v43 }
 0x230   :  { %9339 = vcosq.f32 %v6250_v63  ;;  %v6329_v33 = vshll.u32 %v6328_v49, 30  ;;  %v6352_v29 = vsub.s32 4, %v6328_v49  ;;  %v6495_v0 = vshrl.u32 %v15038_v39, %v6489_v14  ;;  %8768 = vmatpush1.bf16.msra.mxu0 %v15080_v7  ;;  %8914 = vmatprep.subr.bf16.mxu1 %v15083_v58 }
 0x231   :  { %9341 = vsinq.f32 %v6250_v63  ;;  %v6449_v12 = vor.u32 4788187, %v6448_v18  ;;  %v6497_v55 = vshll.u32 %v15038_v39, %v12168_v44  ;;  %v6498_v5 = vshrl.u32 %v15040_v13, %v6489_v14  ;;  %8770 = vmatprep.subr.bf16.mxu0 %v15081_v9 }
 0x232   :  { %v12213_v6 = vsub.s32 %v6326_v46, %v6329_v33  ;;  %v6353_v40 = vsel %vm6268_vm10, %v6352_v29, %v6328_v49  ;;  %v6494_v42 = vshll.u32 %v15037_v23, %v12168_v44  ;;  %v6501_v19 = vshrl.u32 %v15041_v27, %v6489_v14  ;;  %v12224_v46 = vld [vmem:[#allocation2 + $0xe0] sm:$0xff] }
 0x233   :  { %v6450_v16 = vand.u32 2147483647, %v6449_v12  ;;  %v6452_v34 = vcvt.s32.f32 %v6445_v41  ;;  %v6499_v21 = vor.u32 %v6498_v5, %v6497_v55  ;;  %v6500_v15 = vshll.u32 %v15040_v13, %v12168_v44  ;;  %8916 = vmatpush1.bf16.msra.mxu1 %v15043_v53  ;;  %v217_v13 = vld [vmem:[#allocation2 + $0x520] sm:$0xff] }
 0x234   :  { %vm6261_vm12 = vcmp.eq.s32.totalorder %v12171_v4, 2  ;;  %v6332_v45 = vsub.s32 0, %v12213_v6  ;;  %v6355_v20 = vsel %vm12180_vm11, 0, %v6353_v40  ;;  %v6493_v61 = vor.u32 %v6492_v60, %v6491_v56  ;;  %v15084_v56 = vld [vmem:[#allocation35_spill] sm:$0xff] }
 0x235   :  { %v6504_v25 = vshrl.u32 %v15042_v3, %v6489_v14  ;;  %vm6258_vm13 = vcmp.eq.s32.totalorder %v12171_v4, 0  ;;  %v6453_v36 = vmul.f32 %v6452_v34, %v6450_v16  ;;  %v6496_v8 = vor.u32 %v6495_v0, %v6494_v42  ;;  %8772 = vmatpush1.bf16.msra.mxu0 %v15084_v56  ;;  %v231_v3 = vld [vmem:[#allocation2 + $0x590] sm:$0xff] }
 0x236   :  { %v6502_v24 = vor.u32 %v6501_v19, %v6500_v15  ;;  %v6503_v2 = vshll.u32 %v15041_v27, %v12168_v44  ;;  %vm6257_vm14 = vcmp.lt.s32.totalorder %v12171_v4, 2  ;;  %v7758_v62 = vmin.u32 %v6332_v45, %v12213_v6  ;;  %4816 = vmatmul.mubr.f32.vlgmr.msra.gmra.mrb[4].mxu1 %v15059_v50 }
 0x237   :  { %v6490_v49 = vshrl.u32 %v15028_v11, %v6489_v14  ;;  %vm6509_vm15 = vcmp.lt.s32.totalorder %v12197_v54, 4  ;;  %v4826_v32 = vand.u32 4294901760, %v12224_v46  ;;  %vm6254_vm1 = vweird.f32 %v11718_v30 }
 0x238   :  { %v6454_v63 = vxor.u32 2147483648, %v6453_v36  ;;  %v6359_v41 = vadd.s32 3, %v6355_v20  ;;  %v6505_v18 = vor.u32 %v6504_v25, %v6503_v2  ;;  %v6511_v44 = vsel %vm6509_vm15, %v6499_v21, 2102212464  ;;  %4065 = vmatmul.mubr.f32.vlgmr.msra.gmra.mrb[4].mxu0 %v15059_v50 }
 0x239   :  { %v6334_v60 = vclz %v7758_v62  ;;  %vm6506_vm2 = vcmp.lt.s32.totalorder %v12197_v54, 1  ;;  %vm6507_vm3 = vcmp.lt.s32.totalorder %v12197_v54, 2  ;;  %vm6508_vm5 = vcmp.lt.s32.totalorder %v12197_v54, 3  ;;  %4910 = vmatprep.mubr.f32.mxu0 %v14281_v38  ;;  %v67_v62 = vld [vmem:[#allocation2 + $0x70] sm:$0xff] }
 0x23a   :  { %v6455_v14 = vsel %vm6372_vm0, %v6454_v63, %v6453_v36  ;;  %v6510_v51 = vsel %vm6506_vm2, %v6490_v49, %v6493_v61  ;;  %v6514_v33 = vsel %vm6506_vm2, %v6493_v61, %v6496_v8  ;;  %v6515_v29 = vsel %vm6509_vm15, %v6502_v24, 920167782  ;;  %v9340_v0 = vpop.eup %9339  ;;  %v82_v49 = vld [vmem:[#allocation2 + $0xe8] sm:$0xff] }
 0x23b   :  { %v6458_v37 = vsel %vm12099_vm4, %v11763_v22, %v6455_v14  ;;  %v7759_v12 = vadd.s32 4294967294, %v6334_v60  ;;  %v6512_v55 = vsel %vm6508_vm5, %v6496_v8, %v6511_v44  ;;  %v6518_v53 = vsel %vm6506_vm2, %v6496_v8, %v6499_v21  ;;  %v9342_v5 = vpop.eup %9341  ;;  %v65_v8 = vld [vmem:[#allocation2 + $0x60] sm:$0xff] }
 0x23c   :  { %v6262_v1 = vxor.u32 2147483648, %v9340_v0  ;;  %9343 = vcosq.f32 %v6458_v37  ;;  %v6516_v40 = vsel %vm6508_vm5, %v6499_v21, %v6515_v29  ;;  %v6519_v42 = vsel %vm6509_vm15, %v6505_v18, 1326507024  ;;  %v96_v29 = vld [vmem:[#allocation2 + $0x158] sm:$0xff] }
 0x23d   :  { %v6259_v47 = vxor.u32 2147483648, %v9342_v5  ;;  %9345 = vsinq.f32 %v6458_v37  ;;  %vm7760_vm0 = vcmp.lt.s32.totalorder %v7759_v12, 0  ;;  %v6520_v19 = vsel %vm6508_vm5, %v6502_v24, %v6519_v42  ;;  %v80_v24 = vld [vmem:[#allocation2 + $0xd8] sm:$0xff] }
 0x23e   :  { %v6263_v7 = vsel %vm6261_vm12, %v6262_v1, %v9342_v5  ;;  %v6337_v16 = vsel %vm7760_vm0, 0, %v7759_v12  ;;  %v12271_v34 = vsel %vm6507_vm3, %v6510_v51, %v6512_v55  ;;  %v6521_v21 = vsel %vm6507_vm3, %v6518_v53, %v6520_v19  ;;  %v111_v55 = vld [vmem:[#allocation2 + $0x1d0] sm:$0xff]  ;;  %v110_v19 = vld [vmem:[#allocation2 + $0x1c8] sm:$0xff] }
 0x23f   :  { %v6260_v15 = vsel %vm6258_vm13, %v9340_v0, %v6259_v47  ;;  %v6338_v9 = vsub.s32 32, %v6337_v16  ;;  %v6342_v45 = vsub.s32 4294967266, %v6337_v16  ;;  %v6517_v20 = vsel %vm6507_vm3, %v6514_v33, %v6516_v40 }
 0x240   :  { %v6264_v61 = vsel %vm6257_vm14, %v6260_v15, %v6263_v7  ;;  %vm6469_vm4 = vcmp.eq.s32.totalorder %v12176_v57, 2  ;;  %v12283_v25 = vmul.u32.u64.low %v12189_v10, %v6521_v21  ;;  %v12284_v43 = vmul.u32.u64.high %v12189_v10, %v6521_v21, %v12283_v25 }
 0x241   :  { %v12290_v36 = vpack.c.bf16 %v4826_v32, %v4822_v28  ;;  %v6265_v54 = vsel %vm6254_vm1, nan, %v6264_v61  ;;  %vm6466_vm6 = vcmp.eq.s32.totalorder %v12176_v57, 0  ;;  %v6339_v4 = vshll.u32 %v12213_v6, %v6337_v16  ;;  %v97_v25 = vld [vmem:[#allocation2 + $0x160] sm:$0xff] }
 0x242   :  { %v6340_v2 = vshrl.u32 %v12187_v59, %v6338_v9  ;;  %v6343_v58 = vadd.s32 127, %v6342_v45  ;;  %7722 = vst [vmem:[#allocation8] sm:$0xff] %v6265_v54  ;;  %vm6465_vm7 = vcmp.lt.s32.totalorder %v12176_v57, 2  ;;  %v12298_v56 = vand.u32 3, %v6359_v41 }
 0x243   :  { %15085 = vst [vmem:[#allocation38_spill] sm:$0xff] %v12290_v36  ;;  %v12301_v63 = vmul.u32.u64.low %v12189_v10, %v6517_v20  ;;  %v12302_v18 = vmul.u32.u64.high %v12189_v10, %v6517_v20, %v12301_v63  ;;  %8918 = vmatprep.subr.bf16.mxu0 %v12290_v36  ;;  %vm6462_vm8 = vweird.f32 %v11763_v22  ;;  %v14140_v44 = vmov 0.0|0.0   ;;  %v216_v36 = vld [vmem:[#allocation2 + $0x518] sm:$0xff] }
 0x244   :  { %v6341_v30 = vor.u32 %v6340_v2, %v6339_v4  ;;  %v6344_v6 = vshll.u32 %v6343_v58, 23  ;;  %9061 = vmatprep.subr.bf16.mxu1 %v14140_v44  ;;  %v4824_v59 = vand.u32 4294901760, %v65_v8  ;;  %v4828_v60 = vand.u32 4294901760, %v80_v24  ;;  %v112_v2 = vld [vmem:[#allocation2 + $0x1d8] sm:$0xff]  ;;  %v126_v58 = vld [vmem:[#allocation2 + $0x248] sm:$0xff] }
 0x245   :  { %v6529_v14 = vmul.u32 %v12189_v10, %v12271_v34  ;;  %v12312_v41 = vsub.f32 %v12174_v52, %v4822_v28  ;;  %v5574_v51 = vand.u32 4294901760, %v67_v62  ;;  %v5577_v33 = vand.u32 4294901760, %v82_v49  ;;  %v95_v10 = vld [vmem:[#allocation2 + $0x150] sm:$0xff] }
 0x246   :  { %v6345_v0 = vor.u32 4788187, %v6344_v6  ;;  %vm6531_vm9 = vc.u32 %v12284_v43, %v12301_v63  ;;  %v12318_v37 = vsub.f32 %v12224_v46, %v4826_v32  ;;  %v12320_v12 = vpack.c.bf16 %v4828_v60, %v4824_v59  ;;  %v9344_v53 = vpop.eup %9343  ;;  %v125_v6 = vld [vmem:[#allocation2 + $0x240] sm:$0xff] }
 0x247   :  { %v6348_v5 = vcvt.s32.f32 %v6341_v30  ;;  %v12323_v52 = vadd.s32 %v12301_v63, %v12284_v43  ;;  %v6532_v28 = vadd.s32 1, %v12302_v18  ;;  %v12326_v1 = vpack.c.bf16 %v5577_v33, %v5574_v51  ;;  %v9346_v40 = vpop.eup %9345  ;;  %v141_v30 = vld [vmem:[#allocation2 + $0x2c0] sm:$0xff] }
 0x248   :  { %15086 = vst [vmem:[#allocation43_spill] sm:$0xff] %v12320_v12  ;;  %v6470_v42 = vxor.u32 2147483648, %v9344_v53  ;;  %v6346_v47 = vand.u32 2147483647, %v6345_v0  ;;  %8920 = vmatpush1.bf16.msra.mxu0 %v12320_v12  ;;  %v12329_v46 = vsub.f32 %v65_v8, %v4824_v59  ;;  %v4830_v32 = vand.u32 4294901760, %v96_v29  ;;  %v202_v12 = vld [vmem:[#allocation2 + $0x4a8] sm:$0xff] }
 0x249   :  { %15087 = vst [vmem:[#allocation44_spill] sm:$0xff] %v12326_v1  ;;  %v6467_v7 = vxor.u32 2147483648, %v9346_v40  ;;  %vm6476_vm12 = vcmp.lt.s32.totalorder %v11846_v35, 0  ;;  %v6533_v16 = vsel %vm6531_vm9, %v6532_v28, %v12302_v18  ;;  %9063 = vmatpush3.bf16.msra.mxu1 %v12326_v1  ;;  %v4834_v34 = vand.u32 4294901760, %v111_v55 }
 0x24a   :  { %v4832_v21 = vand.u32 4294901760, %v95_v10  ;;  %v6471_v15 = vsel %vm6469_vm4, %v6470_v42, %v9346_v40  ;;  %v6349_v9 = vmul.f32 %v6348_v5, %v6346_v47  ;;  %vm12340_vm13 = vcmp.le.f32.partialorder %v6474_v31, 0.7853982  ;;  %9064 = vmatprep.subr.bf16.mxu1 %v14140_v44  ;;  %v127_v47 = vld [vmem:[#allocation2 + $0x250] sm:$0xff] }
 0x24b   :  { %v6534_v20 = vadd.s32 %v6533_v16, %v6529_v14  ;;  %v12344_v61 = vsub.f32 %v80_v24, %v4828_v60  ;;  %v6468_v43 = vsel %vm6466_vm6, %v9344_v53, %v6467_v7  ;;  %v12349_v8 = vsub.f32 %v67_v62, %v5574_v51  ;;  %v140_v53 = vld [vmem:[#allocation2 + $0x2b8] sm:$0xff] }
 0x24c   :  { %v12351_v54 = vpack.c.bf16 %v4834_v34, %v4830_v32  ;;  %v4836_v4 = vand.u32 4294901760, %v110_v19  ;;  %v6472_v31 = vsel %vm6465_vm7, %v6468_v43, %v6471_v15  ;;  %v6350_v63 = vxor.u32 2147483648, %v6349_v9  ;;  %v156_v43 = vld [vmem:[#allocation2 + $0x338] sm:$0xff] }
 0x24d   :  { %v6535_v18 = vadd.s32 536870912, %v6534_v20  ;;  %v12355_v24 = vsub.f32 %v82_v49, %v5577_v33  ;;  %v6473_v59 = vsel %vm6462_vm8, nan, %v6472_v31  ;;  %v12360_v62 = vsub.f32 %v96_v29, %v4830_v32  ;;  %v142_v32 = vld [vmem:[#allocation2 + $0x2c8] sm:$0xff] }
 0x24e   :  { %15090 = vst [vmem:[#allocation45_spill] sm:$0xff] %v12351_v54  ;;  %8922 = vmatprep.subr.bf16.mxu0 %v12351_v54  ;;  %v12362_v60 = vpack.c.bf16 %v4836_v4, %v4832_v21  ;;  %v5580_v14 = vand.u32 4294901760, %v97_v25  ;;  %7724 = vst [vmem:[#allocation8 + $0x10] sm:$0xff] %v6473_v59  ;;  %v6351_v57 = vsel %vm6268_vm10, %v6350_v63, %v6349_v9  ;;  %v5583_v0 = vand.u32 4294901760, %v112_v2 }
 0x24f   :  { %v6536_v51 = vshrl.u32 %v6535_v18, 30  ;;  %v4838_v49 = vand.u32 4294901760, %v126_v58  ;;  %v6354_v33 = vsel %vm12180_vm11, %v15067_v17, %v6351_v57  ;;  %v12369_v22 = vsub.f32 %v111_v55, %v4834_v34  ;;  %v172_v57 = vld [vmem:[#allocation2 + $0x3b8] sm:$0xff] }
 0x250   :  { %15091 = vst [vmem:[#allocation40_spill] sm:$0xff] %v12362_v60  ;;  %8924 = vmatpush1.bf16.msra.mxu0 %v12362_v60  ;;  %v4842_v29 = vand.u32 4294901760, %v141_v30  ;;  %v4840_v5 = vand.u32 4294901760, %v125_v6  ;;  %9347 = vcosq.f32 %v6354_v33  ;;  %v12372_v42 = vpack.c.bf16 %v5583_v0, %v5580_v14 }
 0x251   :  { %v6537_v28 = vshll.u32 %v6536_v51, 30  ;;  %v6560_v40 = vsub.s32 4, %v6536_v51  ;;  %9349 = vsinq.f32 %v6354_v33  ;;  %v12374_v7 = vsub.f32 %v95_v10, %v4832_v21 }
 0x252   :  { %15092 = vst [vmem:[#allocation42_spill] sm:$0xff] %v12372_v42  ;;  %v12376_v16 = vsub.f32 %v110_v19, %v4836_v4  ;;  %v12378_v26 = vpack.c.bf16 %v4842_v29, %v4838_v49  ;;  %9066 = vmatpush3.bf16.msra.mxu1 %v12372_v42  ;;  %v12385_v15 = vsub.f32 %v97_v25, %v5580_v14  ;;  %v4844_v9 = vand.u32 4294901760, %v140_v53  ;;  %v155_v4 = vld [vmem:[#allocation2 + $0x330] sm:$0xff]  ;;  %v170_v14 = vld [vmem:[#allocation2 + $0x3a8] sm:$0xff] }
 0x253   :  { %v12380_v55 = vsub.s32 %v6534_v20, %v6537_v28  ;;  %v6561_v34 = vsel %vm6476_vm12, %v6560_v40, %v6536_v51  ;;  %v12389_v10 = vsub.f32 %v112_v2, %v5583_v0  ;;  %9067 = vmatprep.subr.bf16.mxu1 %v14140_v44  ;;  %v5586_v19 = vand.u32 4294901760, %v127_v47  ;;  %v171_v20 = vld [vmem:[#allocation2 + $0x3b0] sm:$0xff]  ;;  %v157_v2 = vld [vmem:[#allocation2 + $0x340] sm:$0xff] }
 0x254   :  { %15093 = vst [vmem:[#allocation20_spill] sm:$0xff] %v12378_v26  ;;  %v6563_v31 = vsel %vm12340_vm13, 0, %v6561_v34  ;;  %8926 = vmatprep.subr.bf16.mxu0 %v12378_v26  ;;  %v5589_v21 = vand.u32 4294901760, %v142_v32  ;;  %vm6365_vm10 = vcmp.eq.s32.totalorder %v12298_v56, 2  ;;  %v12395_v18 = vsub.f32 %v126_v58, %v4838_v49 }
 0x255   :  { %v6540_v25 = vsub.s32 0, %v12380_v55  ;;  %v6567_v63 = vadd.s32 3, %v6563_v31  ;;  %v12397_v59 = vpack.c.bf16 %v4844_v9, %v4840_v5  ;;  %vm6362_vm11 = vcmp.eq.s32.totalorder %v12298_v56, 0 }
 0x256   :  { %v12400_v51 = vsub.f32 %v141_v30, %v4842_v29  ;;  %v12402_v0 = vsub.f32 %v125_v6, %v4840_v5  ;;  %v12404_v33 = vpack.c.bf16 %v5589_v21, %v5586_v19  ;;  %v4846_v28 = vand.u32 4294901760, %v156_v43 }
 0x257   :  { %15094 = vst [vmem:[#allocation15_spill] sm:$0xff] %v12397_v59  ;;  %vm6361_vm14 = vcmp.lt.s32.totalorder %v12298_v56, 2  ;;  %v7766_v40 = vmin.u32 %v6540_v25, %v12380_v55  ;;  %8928 = vmatpush1.bf16.msra.mxu0 %v12397_v59  ;;  %v12409_v58 = vsub.f32 %v140_v53, %v4844_v9  ;;  %v4850_v49 = vand.u32 4294901760, %v171_v20  ;;  %v186_v9 = vld [vmem:[#allocation2 + $0x428] sm:$0xff]  ;;  %v201_v59 = vld [vmem:[#allocation2 + $0x4a0] sm:$0xff] }
 0x258   :  { %15095 = vst [vmem:[#allocation19_spill] sm:$0xff] %v12404_v33  ;;  %v4848_v34 = vand.u32 4294901760, %v155_v4  ;;  %vm6358_vm15 = vweird.f32 %v15067_v17  ;;  %9069 = vmatpush3.bf16.msra.mxu1 %v12404_v33  ;;  %v12413_v30 = vsub.f32 %v127_v47, %v5586_v19  ;;  %v4852_v6 = vand.u32 4294901760, %v170_v14  ;;  %v185_v33 = vld [vmem:[#allocation2 + $0x420] sm:$0xff] }
 0x259   :  { %v5592_v29 = vand.u32 4294901760, %v157_v2  ;;  %v5595_v5 = vand.u32 4294901760, %v172_v57  ;;  %v6542_v31 = vclz %v7766_v40  ;;  %v12415_v44 = vand.u32 3, %v6567_v63  ;;  %v200_v40 = vld [vmem:[#allocation2 + $0x498] sm:$0xff] }
 0x25a   :  { %v12417_v48 = vsub.f32 %v142_v32, %v5589_v21  ;;  %v12419_v25 = vsub.f32 %v156_v43, %v4846_v28  ;;  %v15096_v53 = vmov 0.0|0.0   ;;  %v12422_v26 = vpack.c.bf16 %v4850_v49, %v4846_v28  ;;  %v9348_v63 = vpop.eup %9347 }
 0x25b   :  { %9070 = vmatprep.subr.bf16.mxu1 %v15096_v53  ;;  %v12424_v42 = vsub.f32 %v171_v20, %v4850_v49  ;;  %v12426_v47 = vpack.c.bf16 %v4852_v6, %v4848_v34  ;;  %v12428_v19 = vsub.f32 %v155_v4, %v4848_v34  ;;  %v7767_v60 = vadd.s32 4294967294, %v6542_v31  ;;  %v9350_v54 = vpop.eup %9349 }
 0x25c   :  { %15097 = vst [vmem:[#allocation21_spill] sm:$0xff] %v12422_v26  ;;  %v12430_v32 = vsub.f32 %v170_v14, %v4852_v6  ;;  %v12432_v43 = vpack.c.bf16 %v5595_v5, %v5592_v29  ;;  %v12434_v21 = vsub.f32 %v157_v2, %v5592_v29  ;;  %v6366_v1 = vxor.u32 2147483648, %v9348_v63  ;;  %8930 = vmatprep.subr.bf16.mxu0 %v12422_v26 }
 0x25d   :  { %15098 = vst [vmem:[#allocation53_spill] sm:$0xff] %v12426_v47  ;;  %v12437_v20 = vsub.f32 %v172_v57, %v5595_v5  ;;  %v4854_v28 = vand.u32 4294901760, %v186_v9  ;;  %v4858_v49 = vand.u32 4294901760, %v201_v59  ;;  %v6363_v4 = vxor.u32 2147483648, %v9350_v54  ;;  %8932 = vmatpush1.bf16.msra.mxu0 %v12426_v47  ;;  %v187_v57 = vld [vmem:[#allocation2 + $0x430] sm:$0xff] }
 0x25e   :  { %15099 = vst [vmem:[#allocation51_spill] sm:$0xff] %v12432_v43  ;;  %vm7768_vm1 = vcmp.lt.s32.totalorder %v7767_v60, 0  ;;  %9072 = vmatpush3.bf16.msra.mxu1 %v12432_v43  ;;  %v4856_v14 = vand.u32 4294901760, %v185_v33  ;;  %v4860_v34 = vand.u32 4294901760, %v200_v40  ;;  %v6367_v2 = vsel %vm6365_vm10, %v6366_v1, %v9350_v54 }
 0x25f   :  { %15100 = vst [vmem:[#allocation22_spill] sm:$0xff] %v12437_v20  ;;  %v6545_v6 = vsel %vm7768_vm1, 0, %v7767_v60  ;;  %v12443_v29 = vpack.c.bf16 %v4858_v49, %v4854_v28  ;;  %v12445_v31 = vsub.f32 %v186_v9, %v4854_v28  ;;  %9073 = vmatprep.subr.bf16.mxu1 %v15096_v53  ;;  %v6364_v5 = vsel %vm6362_vm11, %v9348_v63, %v6363_v4  ;;  %v215_v28 = vld [vmem:[#allocation2 + $0x510] sm:$0xff]  ;;  %v230_v63 = vld [vmem:[#allocation2 + $0x588] sm:$0xff] }
 0x260   :  { %v6546_v26 = vsub.s32 32, %v6545_v6  ;;  %v6547_v47 = vshll.u32 %v12380_v55, %v6545_v6  ;;  %v6550_v43 = vsub.s32 4294967266, %v6545_v6  ;;  %v6368_v1 = vsel %vm6361_vm14, %v6364_v5, %v6367_v2 }
 0x261   :  { %15101 = vst [vmem:[#allocation24_spill] sm:$0xff] %v12443_v29  ;;  %8934 = vmatprep.subr.bf16.mxu0 %v12443_v29  ;;  %v12454_v54 = vsub.f32 %v201_v59, %v4858_v49  ;;  %v12456_v60 = vpack.c.bf16 %v4860_v34, %v4856_v14  ;;  %v12458_v9 = vsub.f32 %v185_v33, %v4856_v14  ;;  %v6369_v55 = vsel %vm6358_vm15, nan, %v6368_v1 }
 0x262   :  { %v6548_v4 = vshrl.u32 %v12323_v52, %v6546_v26  ;;  %v6551_v6 = vadd.s32 127, %v6550_v43  ;;  %v12463_v27 = vsub.f32 %v200_v40, %v4860_v34  ;;  %7723 = vst [vmem:[#allocation8 + $0x8] sm:$0xff] %v6369_v55  ;;  %v5598_v56 = vand.u32 4294901760, %v187_v57  ;;  %v232_v40 = vld [vmem:[#allocation2 + $0x598] sm:$0xff] }
 0x263   :  { %15102 = vst [vmem:[#allocation79_spill] sm:$0xff] %v12456_v60  ;;  %15103 = vst [vmem:[#allocation23_spill] sm:$0xff] %v12458_v9  ;;  %8936 = vmatpush1.bf16.msra.mxu0 %v12456_v60  ;;  %v5601_v59 = vand.u32 4294901760, %v202_v12  ;;  %v4862_v49 = vand.u32 4294901760, %v216_v36  ;;  %v4866_v2 = vand.u32 4294901760, %v231_v3  ;;  %v4864_v14 = vand.u32 4294901760, %v215_v28 }
 0x264   :  { %15104 = vst [vmem:[#allocation82_spill] sm:$0xff] %v12463_v27  ;;  %v6549_v5 = vor.u32 %v6548_v4, %v6547_v47  ;;  %v6552_v33 = vshll.u32 %v6551_v6, 23  ;;  %v4868_v29 = vand.u32 4294901760, %v230_v63  ;;  %v12468_v17 = vsub.f32 %v187_v57, %v5598_v56 }
 0x265   :  { %v12466_v39 = vpack.c.bf16 %v5601_v59, %v5598_v56  ;;  %v12470_v52 = vsub.f32 %v202_v12, %v5601_v59  ;;  %v12472_v26 = vpack.c.bf16 %v4866_v2, %v4862_v49  ;;  %v12474_v1 = vsub.f32 %v216_v36, %v4862_v49 }
 0x266   :  { %15106 = vst [vmem:[#allocation83_spill] sm:$0xff] %v12468_v17  ;;  %v6553_v43 = vor.u32 4788187, %v6552_v33  ;;  %v6556_v34 = vcvt.s32.f32 %v6549_v5  ;;  %v12476_v55 = vsub.f32 %v231_v3, %v4866_v2  ;;  %v12480_v47 = vpack.c.bf16 %v4868_v29, %v4864_v14 }
 0x267   :  { %15105 = vst [vmem:[#allocation84_spill] sm:$0xff] %v12466_v39  ;;  %15107 = vst [vmem:[#allocation25_spill] sm:$0xff] %v12470_v52  ;;  %9075 = vmatpush3.bf16.msra.mxu1 %v12466_v39  ;;  %8938 = vmatprep.subr.bf16.mxu0 %v12472_v26  ;;  %v12482_v4 = vsub.f32 %v215_v28, %v4864_v14  ;;  %v12484_v57 = vsub.f32 %v230_v63, %v4868_v29  ;;  %v5604_v12 = vand.u32 4294901760, %v217_v13  ;;  %vm9507_vm2 = vmmov 0  }
 0x268   :  { %15108 = vst [vmem:[#allocation87_spill] sm:$0xff] %v12472_v26  ;;  %15109 = vst [vmem:[#allocation26_spill] sm:$0xff] %v12474_v1  ;;  %v6554_v6 = vand.u32 2147483647, %v6553_v43  ;;  %9076 = vmatprep.subr.bf16.mxu1 %v15096_v53  ;;  %v5607_v56 = vand.u32 4294901760, %v232_v40  ;;  %v14175_v36 = vand.u32 4294901760, %v12312_v41  ;;  %8940 = vmatpush1.bf16.msra.mxu0 %v12480_v47  ;;  %vm6566_vm4 = vweird.f32 %v11846_v35 }
 0x269   :  { %15110 = vst [vmem:[#allocation91_spill] sm:$0xff] %v12476_v55  ;;  %15111 = vst [vmem:[#allocation28_spill] sm:$0xff] %v12480_v47  ;;  %v14173_v3 = vand.u32 4294901760, %v12318_v37  ;;  %v12490_v59 = vsub.f32 %v217_v13, %v5604_v12  ;;  %v14174_v49 = vand.u32 4294901760, %v12329_v46  ;;  %v14176_v28 = vand.u32 4294901760, %v12344_v61  ;;  %7915 = vmatprep.mubr.msk.f32.mxu1 %vm9507_vm2, %v14281_v38 }
 0x26a   :  { %15112 = vst [vmem:[#allocation27_spill] sm:$0xff] %v12482_v4  ;;  %15113 = vst [vmem:[#allocation30_spill] sm:$0xff] %v12484_v57  ;;  %v6557_v2 = vmul.f32 %v6556_v34, %v6554_v6  ;;  %v12494_v29 = vpack.c.bf16 %v5607_v56, %v5604_v12  ;;  %v12496_v63 = vsub.f32 %v232_v40, %v5607_v56  ;;  %v14179_v40 = vand.u32 4294901760, %v12349_v8  ;;  %v15117_v12 = vld [vmem:[#allocation50_spill] sm:$0xff] }
 0x26b   :  { %15114 = vst [vmem:[#allocation29_spill] sm:$0xff] %v12490_v59  ;;  %v4925_v5 = vsub.f32 %v12312_v41, %v14175_v36  ;;  %v4937_v13 = vsub.f32 %v12318_v37, %v14173_v3  ;;  %v4931_v33 = vsub.f32 %v12329_v46, %v14174_v49  ;;  %v4943_v14 = vsub.f32 %v12344_v61, %v14176_v28 }
 0x26c   :  { %15115 = vst [vmem:[#allocation32_spill] sm:$0xff] %v12494_v29  ;;  %15116 = vst [vmem:[#allocation31_spill] sm:$0xff] %v12496_v63  ;;  %v6558_v43 = vxor.u32 2147483648, %v6557_v2  ;;  %9078 = vmatpush3.bf16.msra.mxu1 %v12494_v29  ;;  %4916 = vmatmul.mubr.f32.vlgmr.msra.gmra.mrb[6].mxu0 %v15117_v12  ;;  %v14184_v6 = vand.u32 4294901760, %v12355_v24  ;;  %v14196_v56 = vand.u32 4294901760, %v12360_v62  ;;  %v5664_v28 = vsub.f32 %v12349_v8, %v14179_v40 }
 0x26d   :  { %v4926_v34 = vand.u32 4294901760, %v4925_v5  ;;  %v4938_v3 = vand.u32 4294901760, %v4937_v13  ;;  %9079 = vmatprep.subr.bf16.mxu1 %v15096_v53  ;;  %v4932_v49 = vand.u32 4294901760, %v4931_v33  ;;  %v4944_v36 = vand.u32 4294901760, %v4943_v14  ;;  %5106 = vmatprep.mubr.f32.mxu0 %v14281_v38 }
 0x26e   :  { %v6559_v5 = vsel %vm6476_vm12, %v6558_v43, %v6557_v2  ;;  %v5671_v29 = vsub.f32 %v12355_v24, %v14184_v6  ;;  %v4949_v13 = vsub.f32 %v12360_v62, %v14196_v56  ;;  %v14191_v33 = vand.u32 4294901760, %v12369_v22 }
 0x26f   :  { %v6562_v14 = vsel %vm12340_vm13, %v11846_v35, %v6559_v5  ;;  %v8941_v40 = vpack.c.bf16 %v4938_v3, %v4926_v34  ;;  %v8943_v47 = vpack.c.bf16 %v4944_v36, %v4932_v49  ;;  %7916 = vmatmul.mubr.f32.vlgmr.msra.gmra.mrb[6].mxu1 %v15117_v12  ;;  %v5665_v26 = vand.u32 4294901760, %v5664_v28 }
 0x270   :  { %9351 = vcosq.f32 %v6562_v14  ;;  %v5672_v2 = vand.u32 4294901760, %v5671_v29  ;;  %v4950_v43 = vand.u32 4294901760, %v4949_v13  ;;  %v4961_v6 = vsub.f32 %v12369_v22, %v14191_v33  ;;  %7942 = vmatprep.mubr.msk.f32.mxu1 %vm9507_vm2, %v14281_v38 }
 0x271   :  { %9353 = vsinq.f32 %v6562_v14  ;;  %8942 = vmatprep.subr.bf16.mxu0 %v8941_v40  ;;  %v14189_v45 = vand.u32 4294901760, %v12374_v7  ;;  %v14186_v3 = vand.u32 4294901760, %v12376_v16  ;;  %v14185_v36 = vand.u32 4294901760, %v12385_v15 }
 0x272   :  { %8944 = vmatpush1.bf16.msra.mxu0 %v8943_v47  ;;  %v9080_v49 = vpack.c.bf16 %v5672_v2, %v5665_v26  ;;  %v4962_v28 = vand.u32 4294901760, %v4961_v6  ;;  %v14188_v29 = vand.u32 4294901760, %v12389_v10  ;;  %v14187_v34 = vand.u32 4294901760, %v12395_v18 }
 0x273   :  { %v4955_v12 = vsub.f32 %v12374_v7, %v14189_v45  ;;  %v4967_v40 = vsub.f32 %v12376_v16, %v14186_v3  ;;  %v5678_v5 = vsub.f32 %v12385_v15, %v14185_v36  ;;  %v14190_v47 = vand.u32 4294901760, %v12400_v51 }
 0x274   :  { %vm6573_vm3 = vcmp.eq.s32.totalorder %v12415_v44, 2  ;;  %9081 = vmatpush3.bf16.msra.mxu1 %v9080_v49  ;;  %v8945_v26 = vpack.c.bf16 %v4962_v28, %v4950_v43  ;;  %v5685_v6 = vsub.f32 %v12389_v10, %v14188_v29  ;;  %v4973_v13 = vsub.f32 %v12395_v18, %v14187_v34 }
 0x275   :  { %v14192_v14 = vand.u32 4294901760, %v12402_v0  ;;  %vm6570_vm5 = vcmp.eq.s32.totalorder %v12415_v44, 0  ;;  %9082 = vmatprep.subr.bf16.mxu1 %v15096_v53  ;;  %v4956_v2 = vand.u32 4294901760, %v4955_v12  ;;  %v4968_v36 = vand.u32 4294901760, %v4967_v40 }
 0x276   :  { %v5679_v3 = vand.u32 4294901760, %v5678_v5  ;;  %v4985_v43 = vsub.f32 %v12400_v51, %v14190_v47  ;;  %vm6569_vm0 = vcmp.lt.s32.totalorder %v12415_v44, 2  ;;  %8946 = vmatprep.subr.bf16.mxu0 %v8945_v26  ;;  %v5686_v49 = vand.u32 4294901760, %v5685_v6 }
 0x277   :  { %v4974_v28 = vand.u32 4294901760, %v4973_v13  ;;  %v4979_v34 = vsub.f32 %v12402_v0, %v14192_v14  ;;  %v14195_v29 = vand.u32 4294901760, %v12409_v58  ;;  %v8947_v12 = vpack.c.bf16 %v4968_v36, %v4956_v2 }
 0x278   :  { %v4986_v40 = vand.u32 4294901760, %v4985_v43  ;;  %v14193_v5 = vand.u32 4294901760, %v12413_v30  ;;  %v14194_v45 = vand.u32 4294901760, %v12417_v48  ;;  %v9083_v47 = vpack.c.bf16 %v5686_v49, %v5679_v3 }
 0x279   :  { %v4980_v33 = vand.u32 4294901760, %v4979_v34  ;;  %v4991_v26 = vsub.f32 %v12409_v58, %v14195_v29  ;;  %v14197_v6 = vand.u32 4294901760, %v12419_v25  ;;  %8948 = vmatpush1.bf16.msra.mxu0 %v8947_v12  ;;  %v14202_v2 = vand.u32 4294901760, %v12424_v42 }
 0x27a   :  { %v8949_v13 = vpack.c.bf16 %v4986_v40, %v4974_v28  ;;  %v5692_v14 = vsub.f32 %v12413_v30, %v14193_v5  ;;  %v5699_v36 = vsub.f32 %v12417_v48, %v14194_v45  ;;  %v9352_v3 = vpop.eup %9351  ;;  %9084 = vmatpush3.bf16.msra.mxu1 %v9083_v47  ;;  %v14220_v49 = vand.u32 4294901760, %v12428_v19 }
 0x27b   :  { %v4992_v34 = vand.u32 4294901760, %v4991_v26  ;;  %v4997_v43 = vsub.f32 %v12419_v25, %v14197_v6  ;;  %v9354_v12 = vpop.eup %9353  ;;  %v6574_v40 = vxor.u32 2147483648, %v9352_v3  ;;  %9085 = vmatprep.subr.bf16.mxu1 %v15096_v53  ;;  %v5009_v47 = vsub.f32 %v12424_v42, %v14202_v2 }
 0x27c   :  { %8950 = vmatprep.subr.bf16.mxu0 %v8949_v13  ;;  %v5693_v5 = vand.u32 4294901760, %v5692_v14  ;;  %v5700_v45 = vand.u32 4294901760, %v5699_v36  ;;  %v6571_v26 = vxor.u32 2147483648, %v9354_v12  ;;  %v5003_v6 = vsub.f32 %v12428_v19, %v14220_v49 }
 0x27d   :  { %v8951_v29 = vpack.c.bf16 %v4992_v34, %v4980_v33  ;;  %v4998_v56 = vand.u32 4294901760, %v4997_v43  ;;  %v6575_v28 = vsel %vm6573_vm3, %v6574_v40, %v9354_v12  ;;  %v5010_v13 = vand.u32 4294901760, %v5009_v47 }
 0x27e   :  { %v9086_v39 = vpack.c.bf16 %v5700_v45, %v5693_v5  ;;  %v15118_v60 = vand.u32 4294901760, %v12430_v32  ;;  %v6572_v36 = vsel %vm6570_vm5, %v9352_v3, %v6571_v26  ;;  %v5004_v2 = vand.u32 4294901760, %v5003_v6 }
 0x27f   :  { %8952 = vmatpush1.bf16.msra.mxu0 %v8951_v29  ;;  %v14204_v33 = vand.u32 4294901760, %v12434_v21  ;;  %v14203_v34 = vand.u32 4294901760, %v12437_v20  ;;  %v6576_v43 = vsel %vm6569_vm0, %v6572_v36, %v6575_v28  ;;  %v8953_v12 = vpack.c.bf16 %v5010_v13, %v4998_v56  ;;  %v12634_v36 = vpop.f32.mrb[2].mxu1 }
 0x280   :  { %v5015_v14 = vsub.f32 %v12430_v32, %v15118_v60  ;;  %9087 = vmatpush3.bf16.msra.mxu1 %v9086_v39  ;;  %v14208_v5 = vand.u32 4294901760, %v12445_v31  ;;  %v6577_v60 = vsel %vm6566_vm4, nan, %v6576_v43  ;;  %v14207_v44 = vand.u32 4294901760, %v12454_v54  ;;  %v12621_v39 = vpop.f32.mrb[2].mxu0 }
 0x281   :  { %9088 = vmatprep.subr.bf16.mxu1 %v15096_v53  ;;  %v5706_v29 = vsub.f32 %v12434_v21, %v14204_v33  ;;  %v5713_v6 = vsub.f32 %v12437_v20, %v14203_v34  ;;  %7725 = vst [vmem:[#allocation8 + $0x18] sm:$0xff] %v6577_v60  ;;  %8954 = vmatprep.subr.bf16.mxu0 %v8953_v12  ;;  %v14205_v3 = vand.u32 4294901760, %v12458_v9  ;;  %v14206_v28 = vand.u32 4294901760, %v12463_v27  ;;  %v12628_v40 = vpop.f32.mrb[3].mxu0  ;;  %v12643_v60 = vpop.f32.mrb[3].mxu1 }
 0x282   :  { %v5016_v45 = vand.u32 4294901760, %v5015_v14  ;;  %v5021_v35 = vsub.f32 %v12445_v31, %v14208_v5  ;;  %v5033_v13 = vsub.f32 %v12454_v54, %v14207_v44  ;;  %v14210_v14 = vand.u32 4294901760, %v12468_v17 }
 0x283   :  { %v5707_v47 = vand.u32 4294901760, %v5706_v29  ;;  %v5714_v26 = vand.u32 4294901760, %v5713_v6  ;;  %v5027_v43 = vsub.f32 %v12458_v9, %v14205_v3  ;;  %v5039_v12 = vsub.f32 %v12463_v27, %v14206_v28 }
 0x284   :  { %v8955_v56 = vpack.c.bf16 %v5016_v45, %v5004_v2  ;;  %v5022_v2 = vand.u32 4294901760, %v5021_v35  ;;  %v14209_v45 = vand.u32 4294901760, %v12470_v52  ;;  %v5034_v6 = vand.u32 4294901760, %v5033_v13 }
 0x285   :  { %v9089_v29 = vpack.c.bf16 %v5714_v26, %v5707_v47  ;;  %v5720_v34 = vsub.f32 %v12468_v17, %v14210_v14  ;;  %v5028_v35 = vand.u32 4294901760, %v5027_v43  ;;  %v5040_v33 = vand.u32 4294901760, %v5039_v12 }
 0x286   :  { %8956 = vmatpush1.bf16.msra.mxu0 %v8955_v56  ;;  %v14215_v56 = vand.u32 4294901760, %v12474_v1  ;;  %v5727_v3 = vsub.f32 %v12470_v52, %v14209_v45  ;;  %v14212_v28 = vand.u32 4294901760, %v12476_v55  ;;  %v8957_v44 = vpack.c.bf16 %v5034_v6, %v5022_v2 }
 0x287   :  { %9090 = vmatpush3.bf16.msra.mxu1 %v9089_v29  ;;  %v5721_v5 = vand.u32 4294901760, %v5720_v34  ;;  %v14211_v26 = vand.u32 4294901760, %v12482_v4  ;;  %v8959_v13 = vpack.c.bf16 %v5040_v33, %v5028_v35  ;;  %v14214_v45 = vand.u32 4294901760, %v12484_v57 }
 0x288   :  { %v5045_v47 = vsub.f32 %v12474_v1, %v14215_v56  ;;  %9091 = vmatprep.subr.bf16.mxu1 %v15096_v53  ;;  %v5728_v43 = vand.u32 4294901760, %v5727_v3  ;;  %v5057_v12 = vsub.f32 %v12476_v55, %v14212_v28  ;;  %8958 = vmatprep.subr.bf16.mxu0 %v8957_v44  ;;  %v14213_v2 = vand.u32 4294901760, %v12490_v59 }
 0x289   :  { %v5051_v34 = vsub.f32 %v12482_v4, %v14211_v26  ;;  %v14218_v6 = vand.u32 4294901760, %v12496_v63  ;;  %v5063_v3 = vsub.f32 %v12484_v57, %v14214_v45  ;;  %v15119_v45 = vld [vmem:[#allocation41_spill] sm:$0xff] }
 0x28a   :  { %v5046_v29 = vand.u32 4294901760, %v5045_v47  ;;  %8960 = vmatpush1.bf16.msra.mxu0 %v8959_v13  ;;  %v9092_v14 = vpack.c.bf16 %v5728_v43, %v5721_v5  ;;  %v5058_v33 = vand.u32 4294901760, %v5057_v12  ;;  %v5734_v44 = vsub.f32 %v12490_v59, %v14213_v2 }
 0x28b   :  { %v5052_v35 = vand.u32 4294901760, %v5051_v34  ;;  %v5741_v47 = vsub.f32 %v12496_v63, %v14218_v6  ;;  %v5064_v28 = vand.u32 4294901760, %v5063_v3  ;;  %v8965_v43 = vpack.c.bf16 %v12318_v37, %v12312_v41  ;;  %v9399_v3 = vld [vmem:[#allocation5] sm:$0xff] }
 0x28c   :  { %9093 = vmatpush3.bf16.msra.mxu1 %v9092_v14  ;;  %v8961_v26 = vpack.c.bf16 %v5058_v33, %v5046_v29  ;;  %v5735_v5 = vand.u32 4294901760, %v5734_v44  ;;  %v8967_v2 = vpack.c.bf16 %v12344_v61, %v12329_v46  ;;  %v14216_v56 = vsub.s32 4, %v15119_v45 }
 0x28d   :  { %9094 = vmatprep.subr.bf16.mxu1 %v15096_v53  ;;  %v5742_v13 = vand.u32 4294901760, %v5741_v47  ;;  %v8963_v12 = vpack.c.bf16 %v5064_v28, %v5052_v35  ;;  %v9098_v14 = vpack.c.bf16 %v12355_v24, %v12349_v8  ;;  %v8969_v29 = vpack.c.bf16 %v12369_v22, %v12360_v62 }
 0x28e   :  { %8962 = vmatprep.subr.bf16.mxu0 %v8961_v26  ;;  %v14217_v33 = vsub.s32 6, %v15119_v45  ;;  %v14219_v26 = vsub.s32 5, %v15119_v45  ;;  %v8971_v28 = vpack.c.bf16 %v12376_v16, %v12374_v7  ;;  %v256_v35 = vrot.slane %v9399_v3, %v14216_v56 }
 0x28f   :  { %v9095_v34 = vpack.c.bf16 %v5742_v13, %v5735_v5  ;;  %8964 = vmatpush1.bf16.msra.mxu0 %v8963_v12  ;;  %v15120_v44 = vand.u32 4294901760, %v12312_v41  ;;  %v15121_v47 = vand.u32 4294901760, %v12318_v37  ;;  %v9101_v13 = vpack.c.bf16 %v12389_v10, %v12385_v15 }
 0x290   :  { %8966 = vmatprep.subr.bf16.mxu0 %v8965_v43  ;;  %v264_v43 = vrot.slane %v9399_v3, %v14217_v33  ;;  %v260_v12 = vrot.slane %v9399_v3, %v14219_v26  ;;  %v15123_v56 = vand.u32 4294901760, %v12344_v61  ;;  %v12714_v37 = vadd.f32 %v12621_v39, %v256_v35 }
 0x291   :  { %9096 = vmatpush3.bf16.msra.mxu1 %v9095_v34  ;;  %v12697_v5 = vpack.c.bf16 %v15121_v47, %v15120_v44  ;;  %v15122_v34 = vand.u32 4294901760, %v12329_v46  ;;  %v267_v44 = vsub.s32 7, %v15119_v45  ;;  %v15124_v47 = vand.u32 4294901760, %v12349_v8 }
 0x292   :  { %9097 = vmatprep.subr.bf16.mxu1 %v15096_v53  ;;  %5108 = vmatmul.mubr.f32.vlgmr.msra.gmra.mrb[6].mxu0 %v15059_v50  ;;  %v15125_v33 = vand.u32 4294901760, %v12355_v24  ;;  %v15126_v46 = vand.u32 4294901760, %v12360_v62  ;;  %v15127_v61 = vand.u32 4294901760, %v12369_v22  ;;  %v8973_v39 = vpack.c.bf16 %v12400_v51, %v12395_v18 }
 0x293   :  { %v12710_v41 = vpack.c.bf16 %v15123_v56, %v15122_v34  ;;  %8968 = vmatpush1.bf16.msra.mxu0 %v8967_v2  ;;  %v12732_v2 = vadd.f32 %v12634_v36, %v264_v43  ;;  %v12735_v8 = vadd.f32 %v12628_v40, %v260_v12  ;;  %v14222_v24 = vand.u32 2147483647, %v12714_v37  ;;  %5226 = vmatprep.mubr.f32.mxu0 %v14281_v38 }
 0x294   :  { %7943 = vmatmul.mubr.f32.vlgmr.msra.gmra.mrb[6].mxu1 %v15059_v50  ;;  %v12721_v6 = vpack.c.bf16 %v15125_v33, %v15124_v47  ;;  %v12727_v56 = vpack.c.bf16 %v15127_v61, %v15126_v46  ;;  %8970 = vmatprep.subr.bf16.mxu0 %v8969_v29  ;;  %v6581_v62 = vand.u32 2139095040, %v12714_v37  ;;  %v8975_v22 = vpack.c.bf16 %v12409_v58, %v12402_v0 }
 0x295   :  { %9099 = vmatpush3.bf16.msra.mxu1 %v9098_v14  ;;  %15128 = vst [vmem:[#allocation33_spill] sm:$0xff] %v12735_v8  ;;  %v14221_v14 = vand.u32 2147483647, %v12732_v2  ;;  %v6789_v29 = vand.u32 2139095040, %v12732_v2  ;;  %7969 = vmatprep.mubr.msk.f32.mxu1 %vm9507_vm2, %v14281_v38  ;;  %v9104_v40 = vpack.c.bf16 %v12417_v48, %v12413_v30  ;;  %v6585_v33 = vand.u32 8388607, %v14222_v24 }
 0x296   :  { %9100 = vmatprep.subr.bf16.mxu1 %v15096_v53  ;;  %v6582_v36 = vshrl.u32 %v6581_v62, 23  ;;  %v268_v35 = vrot.slane %v9399_v3, %v267_v44  ;;  %v8977_v43 = vpack.c.bf16 %v12424_v42, %v12419_v25  ;;  %v6685_v47 = vand.u32 2139095040, %v12735_v8 }
 0x297   :  { %8972 = vmatpush1.bf16.msra.mxu0 %v8971_v28  ;;  %v6790_v12 = vshrl.u32 %v6789_v29, 23  ;;  %v6793_v34 = vand.u32 8388607, %v14221_v14  ;;  %v8979_v46 = vpack.c.bf16 %v12430_v32, %v12428_v19  ;;  %v9107_v3 = vpack.c.bf16 %v12437_v20, %v12434_v21  ;;  %v15157_v20 = vld [vmem:[#allocation32_spill] sm:$0xff] }
 0x298   :  { %8974 = vmatprep.subr.bf16.mxu0 %v8973_v39  ;;  %v7769_v28 = vadd.s32 4294967169, %v6582_v36  ;;  %v6686_v44 = vshrl.u32 %v6685_v47, 23  ;;  %v8981_v61 = vpack.c.bf16 %v12454_v54, %v12445_v31  ;;  %v6586_v39 = vor.u32 8388608, %v6585_v33 }
 0x299   :  { %9102 = vmatpush3.bf16.msra.mxu1 %v9101_v13  ;;  %v7777_v13 = vadd.s32 4294967169, %v6790_v12  ;;  %v12764_v29 = vadd.f32 %v12643_v60, %v268_v35  ;;  %v6794_v36 = vor.u32 8388608, %v6793_v34  ;;  %v14224_v49 = vand.u32 2147483647, %v12735_v8 }
 0x29a   :  { %9103 = vmatprep.subr.bf16.mxu1 %v15096_v53  ;;  %v6588_v62 = vadd.s32 1, %v7769_v28  ;;  %v7773_v14 = vadd.s32 4294967169, %v6686_v44  ;;  %v9110_v12 = vpack.c.bf16 %v12470_v52, %v12468_v17  ;;  %v8985_v60 = vpack.c.bf16 %v12476_v55, %v12474_v1 }
 0x29b   :  { %8976 = vmatpush1.bf16.msra.mxu0 %v8975_v22  ;;  %15129 = vst [vmem:[#allocation107_spill] sm:$0xff] %v12764_v29  ;;  %v6796_v26 = vadd.s32 1, %v7777_v13  ;;  %v8983_v22 = vpack.c.bf16 %v12463_v27, %v12458_v9  ;;  %v9113_v35 = vpack.c.bf16 %v12496_v63, %v12490_v59  ;;  %v12778_v47 = vshll.u32 %v6586_v39, 8 }
 0x29c   :  { %8978 = vmatprep.subr.bf16.mxu0 %v8977_v43  ;;  %vm6589_vm6 = vcmp.gt.s32.totalorder %v6588_v62, 0  ;;  %v12780_v13 = vshll.u32 %v6794_v36, 8  ;;  %v12784_v44 = vand.u32 8388607, %v14224_v49  ;;  %v15131_v45 = vmov 2102212464  }
 0x29d   :  { %9105 = vmatpush3.bf16.msra.mxu1 %v9104_v40  ;;  %v6590_v33 = vsel %vm6589_vm6, %v6588_v62, 0  ;;  %vm6797_vm7 = vcmp.gt.s32.totalorder %v6796_v26, 0  ;;  %v8987_v40 = vpack.c.bf16 %v12484_v57, %v12482_v4  ;;  %v12786_v62 = vadd.s32 1, %v7773_v14 }
 0x29e   :  { %9106 = vmatprep.subr.bf16.mxu1 %v15096_v53  ;;  %v6591_v43 = vshrl.u32 %v6590_v33, 5  ;;  %v6592_v34 = vand.u32 31, %v6590_v33  ;;  %v6798_v28 = vsel %vm6797_vm7, %v6796_v26, 0  ;;  %v15132_v50 = vmov 920167782  }
 0x29f   :  { %8980 = vmatpush1.bf16.msra.mxu0 %v8979_v46  ;;  %v12791_v39 = vshrl.u32 %v6798_v28, 5  ;;  %v12793_v26 = vand.u32 31, %v6798_v28  ;;  %v15133_v57 = vmov 1326507024   ;;  %vm6693_vm10 = vcmp.gt.s32.totalorder %v12786_v62, 0 }
 0x2a0   :  { %8982 = vmatprep.subr.bf16.mxu0 %v8981_v61  ;;  %v6593_v46 = vsub.s32 32, %v6592_v34  ;;  %v6595_v33 = vshll.u32 %v15028_v11, %v6592_v34  ;;  %v15130_v61 = vmov 2131351028   ;;  %v6604_v49 = vshll.u32 %v15131_v45, %v6592_v34 }
 0x2a1   :  { %9108 = vmatpush3.bf16.msra.mxu1 %v9107_v3  ;;  %v6598_v3 = vshll.u32 %v15037_v23, %v6592_v34  ;;  %v6601_v36 = vshll.u32 %v15130_v61, %v6592_v34  ;;  %v6607_v14 = vshll.u32 %v15132_v50, %v6592_v34  ;;  %vm6610_vm8 = vcmp.lt.s32.totalorder %v6591_v43, 1 }
 0x2a2   :  { %9109 = vmatprep.subr.bf16.mxu1 %v15096_v53  ;;  %v6596_v24 = vshrl.u32 %v15037_v23, %v6593_v46  ;;  %v6599_v8 = vshrl.u32 %v15130_v61, %v6593_v46  ;;  %v6602_v63 = vshrl.u32 %v15131_v45, %v6593_v46  ;;  %v6594_v28 = vshrl.u32 %v15028_v11, %v6593_v46 }
 0x2a3   :  { %8984 = vmatpush1.bf16.msra.mxu0 %v8983_v22  ;;  %v6605_v59 = vshrl.u32 %v15132_v50, %v6593_v46  ;;  %v6608_v4 = vshrl.u32 %v15133_v57, %v6593_v46  ;;  %vm6611_vm9 = vcmp.lt.s32.totalorder %v6591_v43, 2  ;;  %v6801_v22 = vsub.s32 32, %v12793_v26 }
 0x2a4   :  { %8986 = vmatprep.subr.bf16.mxu0 %v8985_v60  ;;  %v6597_v52 = vor.u32 %v6596_v24, %v6595_v33  ;;  %v6600_v17 = vor.u32 %v6599_v8, %v6598_v3  ;;  %v6603_v34 = vor.u32 %v6602_v63, %v6601_v36  ;;  %vm6612_vm12 = vcmp.lt.s32.totalorder %v6591_v43, 3 }
 0x2a5   :  { %9111 = vmatpush3.bf16.msra.mxu1 %v9110_v12  ;;  %v6606_v55 = vor.u32 %v6605_v59, %v6604_v49  ;;  %v6609_v1 = vor.u32 %v6608_v4, %v6607_v14  ;;  %vm6613_vm13 = vcmp.lt.s32.totalorder %v6591_v43, 4  ;;  %v6803_v63 = vshll.u32 %v15028_v11, %v12793_v26  ;;  %v15134_v4 = vld [vmem:[#allocation38_spill] sm:$0xff] }
 0x2a6   :  { %9112 = vmatprep.subr.bf16.mxu1 %v15096_v53  ;;  %v6614_v12 = vsel %vm6610_vm8, %v6594_v28, %v6597_v52  ;;  %v6615_v27 = vsel %vm6613_vm13, %v6603_v34, 2102212464  ;;  %v6618_v9 = vsel %vm6610_vm8, %v6597_v52, %v6600_v17  ;;  %v6622_v46 = vsel %vm6610_vm8, %v6600_v17, %v6603_v34  ;;  %v15136_v28 = vld [vmem:[#allocation43_spill] sm:$0xff] }
 0x2a7   :  { %8988 = vmatpush1.bf16.msra.mxu0 %v8987_v40  ;;  %v6616_v60 = vsel %vm6612_vm12, %v6600_v17, %v6615_v27  ;;  %v6619_v24 = vsel %vm6613_vm13, %v6606_v55, 920167782  ;;  %v6623_v8 = vsel %vm6613_vm13, %v6609_v1, 1326507024  ;;  %v6804_v33 = vshrl.u32 %v15037_v23, %v6801_v22 }
 0x2a8   :  { %8990 = vmatprep.subr.bf16.mxu0 %v15134_v4  ;;  %v6620_v59 = vsel %vm6612_vm12, %v6603_v34, %v6619_v24  ;;  %v6624_v49 = vsel %vm6612_vm12, %v6606_v55, %v6623_v8  ;;  %v6806_v52 = vshll.u32 %v15037_v23, %v12793_v26  ;;  %v6617_v27 = vsel %vm6611_vm9, %v6614_v12, %v6616_v60 }
 0x2a9   :  { %9114 = vmatpush3.bf16.msra.mxu1 %v9113_v35  ;;  %v6621_v17 = vsel %vm6611_vm9, %v6618_v9, %v6620_v59  ;;  %v6625_v1 = vsel %vm6611_vm9, %v6622_v46, %v6624_v49  ;;  %v6807_v40 = vshrl.u32 %v15130_v61, %v6801_v22  ;;  %v15135_v35 = vld [vmem:[#allocation48_spill] sm:$0xff]  ;;  %v6805_v9 = vor.u32 %v6804_v33, %v6803_v63  ;;  %v15138_v49 = vld [vmem:[#allocation45_spill] sm:$0xff] }
 0x2aa   :  { %9115 = vmatprep.subr.bf16.mxu1 %v15096_v53  ;;  %5229 = vmatmul.mubr.f32.vlgmr.msra.gmra.mrb[6].mxu0 %v15135_v35  ;;  %v12824_v3 = vmul.u32.u64.low %v12778_v47, %v6625_v1  ;;  %v12825_v55 = vmul.u32.u64.high %v12778_v47, %v6625_v1, %v12824_v3  ;;  %v12828_v36 = vmul.u32.u64.low %v12778_v47, %v6621_v17  ;;  %v12829_v14 = vmul.u32.u64.high %v12778_v47, %v6621_v17, %v12828_v36  ;;  %v15137_v46 = vld [vmem:[#allocation44_spill] sm:$0xff] }
 0x2ab   :  { %8992 = vmatpush1.bf16.msra.mxu0 %v15136_v28  ;;  %v6808_v43 = vor.u32 %v6807_v40, %v6806_v52  ;;  %v6809_v34 = vshll.u32 %v15130_v61, %v12793_v26  ;;  %v6810_v12 = vshrl.u32 %v15131_v45, %v6801_v22  ;;  %v6802_v60 = vshrl.u32 %v15028_v11, %v6801_v22  ;;  %v15139_v1 = vld [vmem:[#allocation40_spill] sm:$0xff] }
 0x2ac   :  { %7970 = vmatmul.mubr.f32.vlgmr.msra.gmra.mrb[6].mxu1 %v15135_v35  ;;  %v6812_v24 = vshll.u32 %v15131_v45, %v12793_v26  ;;  %v6813_v8 = vshrl.u32 %v15132_v50, %v6801_v22  ;;  %v6816_v59 = vshrl.u32 %v15133_v57, %v6801_v22  ;;  %8994 = vmatprep.subr.bf16.mxu0 %v15138_v49  ;;  %vm6818_vm11 = vcmp.lt.s32.totalorder %v12791_v39, 1  ;;  %v15141_v40 = vld [vmem:[#allocation20_spill] sm:$0xff] }
 0x2ad   :  { %9117 = vmatpush3.bf16.msra.mxu1 %v15137_v46  ;;  %v6633_v63 = vmul.u32 %v12778_v47, %v6617_v27  ;;  %v6811_v33 = vor.u32 %v6810_v12, %v6809_v34  ;;  %v6815_v52 = vshll.u32 %v15132_v50, %v12793_v26  ;;  %5323 = vmatprep.mubr.f32.mxu0 %v14281_v38  ;;  %v6636_v17 = vadd.s32 1, %v12829_v14  ;;  %v15140_v27 = vld [vmem:[#allocation42_spill] sm:$0xff]  ;;  %v15156_v49 = vld [vmem:[#allocation28_spill] sm:$0xff] }
 0x2ae   :  { %9118 = vmatprep.subr.bf16.mxu1 %v15096_v53  ;;  %vm6635_vm14 = vc.u32 %v12825_v55, %v12828_v36  ;;  %v6814_v22 = vor.u32 %v6813_v8, %v6812_v24  ;;  %vm6819_vm15 = vcmp.lt.s32.totalorder %v12791_v39, 2  ;;  %7996 = vmatprep.mubr.msk.f32.mxu1 %vm9507_vm2, %v14281_v38  ;;  %vm6820_vm1 = vcmp.lt.s32.totalorder %v12791_v39, 3 }
 0x2af   :  { %8996 = vmatpush1.bf16.msra.mxu0 %v15139_v1  ;;  %v6817_v47 = vor.u32 %v6816_v59, %v6815_v52  ;;  %vm6821_vm3 = vcmp.lt.s32.totalorder %v12791_v39, 4  ;;  %v6826_v26 = vsel %vm6818_vm11, %v6805_v9, %v6808_v43  ;;  %v6637_v35 = vsel %vm6635_vm14, %v6636_v17, %v12829_v14 }
 0x2b0   :  { %8998 = vmatprep.subr.bf16.mxu0 %v15141_v40  ;;  %v6823_v3 = vsel %vm6821_vm3, %v6811_v33, 2102212464  ;;  %v6827_v34 = vsel %vm6821_vm3, %v6814_v22, 920167782  ;;  %v6830_v12 = vsel %vm6818_vm11, %v6808_v43, %v6811_v33  ;;  %v6638_v24 = vadd.s32 %v6637_v35, %v6633_v63  ;;  %v15142_v35 = vld [vmem:[#allocation15_spill] sm:$0xff] }
 0x2b1   :  { %9120 = vmatpush3.bf16.msra.mxu1 %v15140_v27  ;;  %v6822_v8 = vsel %vm6818_vm11, %v6802_v60, %v6805_v9  ;;  %v6828_v59 = vsel %vm6820_vm1, %v6811_v33, %v6827_v34  ;;  %v6831_v52 = vsel %vm6821_vm3, %v6817_v47, 1326507024  ;;  %v6824_v27 = vsel %vm6820_vm1, %v6808_v43, %v6823_v3  ;;  %v15143_v43 = vld [vmem:[#allocation19_spill] sm:$0xff] }
 0x2b2   :  { %9121 = vmatprep.subr.bf16.mxu1 %v15096_v53  ;;  %v6829_v14 = vsel %vm6819_vm15, %v6826_v26, %v6828_v59  ;;  %v6832_v17 = vsel %vm6820_vm1, %v6814_v22, %v6831_v52  ;;  %v6694_v63 = vsel %vm6693_vm10, %v12786_v62, 0  ;;  %v6639_v9 = vadd.s32 536870912, %v6638_v24  ;;  %v15144_v26 = vld [vmem:[#allocation21_spill] sm:$0xff]  ;;  %v15148_v62 = vld [vmem:[#allocation24_spill] sm:$0xff] }
 0x2b3   :  { %9000 = vmatpush1.bf16.msra.mxu0 %v15142_v35  ;;  %v6833_v60 = vsel %vm6819_vm15, %v6830_v12, %v6832_v17  ;;  %v12884_v33 = vmul.u32.u64.low %v12780_v13, %v6829_v14  ;;  %v12885_v47 = vmul.u32.u64.high %v12780_v13, %v6829_v14, %v12884_v33  ;;  %v6825_v12 = vsel %vm6819_vm15, %v6822_v8, %v6824_v27  ;;  %v15145_v14 = vld [vmem:[#allocation53_spill] sm:$0xff]  ;;  %v15147_v35 = vld [vmem:[#allocation51_spill] sm:$0xff] }
 0x2b4   :  { %9002 = vmatprep.subr.bf16.mxu0 %v15144_v26  ;;  %v12891_v22 = vmul.u32.u64.low %v12780_v13, %v6833_v60  ;;  %v12892_v3 = vmul.u32.u64.high %v12780_v13, %v6833_v60, %v12891_v22  ;;  %v6640_v34 = vshrl.u32 %v6639_v9, 30  ;;  %v6690_v59 = vor.u32 8388608, %v12784_v44 }
 0x2b5   :  { %9123 = vmatpush3.bf16.msra.mxu1 %v15143_v43  ;;  %v6696_v52 = vand.u32 31, %v6694_v63  ;;  %v6844_v43 = vadd.s32 1, %v12885_v47  ;;  %v15146_v60 = vand.u32 2139095040, %v12764_v29  ;;  %v6841_v9 = vmul.u32 %v12780_v13, %v6825_v12 }
 0x2b6   :  { %9124 = vmatprep.subr.bf16.mxu1 %v15096_v53  ;;  %v6641_v17 = vshll.u32 %v6640_v34, 30  ;;  %vm6843_vm5 = vc.u32 %v12892_v3, %v12884_v33  ;;  %v15149_v44 = vand.u32 2147483647, %v12764_v29  ;;  %vm6580_vm0 = vcmp.lt.s32.totalorder %v12714_v37, 0 }
 0x2b7   :  { %9004 = vmatpush1.bf16.msra.mxu0 %v15145_v14  ;;  %v6697_v26 = vsub.s32 32, %v6696_v52  ;;  %v6894_v22 = vshrl.u32 %v15146_v60, 23  ;;  %v6845_v8 = vsel %vm6843_vm5, %v6844_v43, %v12885_v47  ;;  %v12917_v60 = vshll.u32 %v6690_v59, 8  ;;  %v15155_v14 = vld [vmem:[#allocation87_spill] sm:$0xff] }
 0x2b8   :  { %9006 = vmatprep.subr.bf16.mxu0 %v15148_v62  ;;  %v12910_v39 = vand.u32 8388607, %v15149_v44  ;;  %v12914_v27 = vsub.s32 %v6638_v24, %v6641_v17  ;;  %v12927_v12 = vadd.s32 %v12828_v36, %v12825_v55  ;;  %v6846_v44 = vadd.s32 %v6845_v8, %v6841_v9  ;;  %v15153_v17 = vld [vmem:[#allocation79_spill] sm:$0xff]  ;;  %v15154_v62 = vld [vmem:[#allocation84_spill] sm:$0xff] }
 0x2b9   :  { %9126 = vmatpush3.bf16.msra.mxu1 %v15147_v35  ;;  %v15150_v35 = vand.u32 2147483647, %v12714_v37  ;;  %v12929_v29 = vshrl.u32 %v6694_v63, 5  ;;  %v6700_v24 = vshrl.u32 %v15037_v23, %v6697_v26  ;;  %v6703_v43 = vshrl.u32 %v15130_v61, %v6697_v26 }
 0x2ba   :  { %9127 = vmatprep.subr.bf16.mxu1 %v15096_v53  ;;  %v6644_v47 = vsub.s32 0, %v12914_v27  ;;  %v12936_v59 = vadd.s32 4294967169, %v6894_v22  ;;  %v6664_v55 = vsub.s32 4, %v6640_v34  ;;  %v6847_v36 = vadd.s32 536870912, %v6846_v44 }
 0x2bb   :  { %vm12921_vm4 = vcmp.le.f32.partialorder %v15150_v35, 0.7853982  ;;  %9008 = vmatpush1.bf16.msra.mxu0 %v15153_v17  ;;  %v6706_v35 = vshrl.u32 %v15131_v45, %v6697_v26  ;;  %v6699_v63 = vshll.u32 %v15028_v11, %v6696_v52  ;;  %v6702_v17 = vshll.u32 %v15037_v23, %v6696_v52 }
 0x2bc   :  { %9010 = vmatprep.subr.bf16.mxu0 %v15155_v14  ;;  %v7770_v8 = vmin.u32 %v6644_v47, %v12914_v27  ;;  %v6705_v40 = vshll.u32 %v15130_v61, %v6696_v52  ;;  %v6709_v22 = vshrl.u32 %v15132_v50, %v6697_v26  ;;  %v6848_v1 = vshrl.u32 %v6847_v36, 30 }
 0x2bd   :  { %9129 = vmatpush3.bf16.msra.mxu1 %v15154_v62  ;;  %v6701_v62 = vor.u32 %v6700_v24, %v6699_v63  ;;  %v6708_v14 = vshll.u32 %v15131_v45, %v6696_v52  ;;  %v6712_v46 = vshrl.u32 %v15133_v57, %v6697_v26  ;;  %vm6788_vm6 = vcmp.lt.s32.totalorder %v12732_v2, 0 }
 0x2be   :  { %9130 = vmatprep.subr.bf16.mxu1 %v15096_v53  ;;  %v6646_v28 = vclz %v7770_v8  ;;  %v6704_v9 = vor.u32 %v6703_v43, %v6702_v17  ;;  %v6707_v4 = vor.u32 %v6706_v35, %v6705_v40  ;;  %v6711_v47 = vshll.u32 %v15132_v50, %v6696_v52  ;;  %v15158_v40 = vld [vmem:[#allocation49_spill] sm:$0xff] }
 0x2bf   :  { %9012 = vmatpush1.bf16.msra.mxu0 %v15156_v49  ;;  %v6665_v24 = vsel %vm6580_vm0, %v6664_v55, %v6640_v34  ;;  %v6849_v36 = vshll.u32 %v6848_v1, 30  ;;  %v6710_v63 = vor.u32 %v6709_v22, %v6708_v14  ;;  %vm6714_vm7 = vcmp.lt.s32.totalorder %v12929_v29, 1 }
 0x2c0   :  { %9014 = vmatprep.subr.bf16.mxu0 %v12697_v5  ;;  %v7771_v8 = vadd.s32 4294967294, %v6646_v28  ;;  %v6713_v49 = vor.u32 %v6712_v46, %v6711_v47  ;;  %vm6715_vm8 = vcmp.lt.s32.totalorder %v12929_v29, 2  ;;  %vm6717_vm9 = vcmp.lt.s32.totalorder %v12929_v29, 4 }
 0x2c1   :  { %9132 = vmatpush3.bf16.msra.mxu1 %v15157_v20  ;;  %v12961_v52 = vsub.s32 %v6846_v44, %v6849_v36  ;;  %v6698_v5 = vshrl.u32 %v15028_v11, %v6697_v26  ;;  %vm6716_vm12 = vcmp.lt.s32.totalorder %v12929_v29, 3  ;;  %v6723_v34 = vsel %vm6717_vm9, %v6710_v63, 920167782 }
 0x2c2   :  { %9133 = vmatprep.subr.bf16.mxu1 %v15096_v53  ;;  %5327 = vmatmul.mubr.f32.vlgmr.msra.gmra.mrb[6].mxu0 %v15158_v40  ;;  %vm7772_vm13 = vcmp.lt.s32.totalorder %v7771_v8, 0  ;;  %v6667_v28 = vsel %vm12921_vm4, 0, %v6665_v24  ;;  %v15159_v46 = vand.u32 2147483647, %v12732_v2  ;;  %v6722_v26 = vsel %vm6714_vm7, %v6701_v62, %v6704_v9 }
 0x2c3   :  { %9016 = vmatpush1.bf16.msra.mxu0 %v12710_v41  ;;  %v6724_v44 = vsel %vm6716_vm12, %v6707_v4, %v6723_v34  ;;  %v6649_v41 = vsel %vm7772_vm13, 0, %v7771_v8  ;;  %v6852_v17 = vsub.s32 0, %v12961_v52  ;;  %v6872_v43 = vsub.s32 4, %v6848_v1  ;;  %5469 = vmatprep.mubr.f32.mxu0 %v14281_v38 }
 0x2c4   :  { %7997 = vmatmul.mubr.f32.vlgmr.msra.gmra.mrb[6].mxu1 %v15158_v40  ;;  %vm12973_vm10 = vcmp.le.f32.partialorder %v15159_v46, 0.7853982  ;;  %9018 = vmatprep.subr.bf16.mxu0 %v12727_v56  ;;  %v6726_v35 = vsel %vm6714_vm7, %v6704_v9, %v6707_v4  ;;  %v6650_v55 = vsub.s32 32, %v6649_v41  ;;  %v6654_v22 = vsub.s32 4294967266, %v6649_v41 }
 0x2c5   :  { %9135 = vmatpush3.bf16.msra.mxu1 %v12721_v6  ;;  %v6719_v47 = vsel %vm6717_vm9, %v6707_v4, 2102212464  ;;  %v6727_v6 = vsel %vm6717_vm9, %v6713_v49, 1326507024  ;;  %8023 = vmatprep.mubr.msk.f32.mxu1 %vm9507_vm2, %v14281_v38  ;;  %v6651_v56 = vshll.u32 %v12914_v27, %v6649_v41  ;;  %v7778_v24 = vmin.u32 %v6852_v17, %v12961_v52 }
 0x2c6   :  { %9136 = vmatprep.subr.bf16.mxu1 %v15096_v53  ;;  %v6725_v36 = vsel %vm6715_vm8, %v6722_v26, %v6724_v44  ;;  %v6728_v8 = vsel %vm6716_vm12, %v6710_v63, %v6727_v6  ;;  %v6652_v40 = vshrl.u32 %v12927_v12, %v6650_v55  ;;  %v6655_v34 = vadd.s32 127, %v6654_v22 }
 0x2c7   :  { %v6729_v4 = vsel %vm6715_vm8, %v6726_v35, %v6728_v8  ;;  %v6900_v49 = vadd.s32 1, %v12936_v59  ;;  %v6854_v46 = vclz %v7778_v24  ;;  %v13006_v27 = vsel %vm6788_vm6, %v6872_v43, %v6848_v1 }
 0x2c8   :  { %v6718_v41 = vsel %vm6714_vm7, %v6698_v5, %v6701_v62  ;;  %v6720_v26 = vsel %vm6716_vm12, %v6704_v9, %v6719_v47  ;;  %v6653_v63 = vor.u32 %v6652_v40, %v6651_v56  ;;  %v6656_v44 = vshll.u32 %v6655_v34, 23 }
 0x2c9   :  { %v13013_v12 = vmul.u32.u64.low %v12917_v60, %v6729_v4  ;;  %v13014_v17 = vmul.u32.u64.high %v12917_v60, %v6729_v4, %v13013_v12  ;;  %v7779_v35 = vadd.s32 4294967294, %v6854_v46  ;;  %vm6901_vm11 = vcmp.gt.s32.totalorder %v6900_v49, 0 }
 0x2ca   :  { %v13017_v59 = vmul.u32.u64.low %v12917_v60, %v6725_v36  ;;  %v13018_v55 = vmul.u32.u64.high %v12917_v60, %v6725_v36, %v13017_v59  ;;  %v6657_v1 = vor.u32 4788187, %v6656_v44  ;;  %v6842_v62 = vadd.s32 %v12884_v33, %v12892_v3 }
 0x2cb   :  { %v6721_v9 = vsel %vm6715_vm8, %v6718_v41, %v6720_v26  ;;  %v6902_v5 = vsel %vm6901_vm11, %v6900_v49, 0  ;;  %v6671_v43 = vadd.s32 3, %v6667_v28  ;;  %vm7780_vm14 = vcmp.lt.s32.totalorder %v7779_v35, 0 }
 0x2cc   :  { %v6875_v22 = vsel %vm12973_vm10, 0, %v13006_v27  ;;  %v6904_v47 = vand.u32 31, %v6902_v5  ;;  %v6658_v6 = vand.u32 2147483647, %v6657_v1  ;;  %v6660_v56 = vcvt.s32.f32 %v6653_v63 }
 0x2cd   :  { %v6857_v24 = vsel %vm7780_vm14, 0, %v7779_v35  ;;  %vm6739_vm15 = vc.u32 %v13014_v17, %v13017_v59  ;;  %v6737_v33 = vmul.u32 %v12917_v60, %v6721_v9  ;;  %v6740_v29 = vadd.s32 1, %v13018_v55 }
 0x2ce   :  { %v6858_v36 = vsub.s32 32, %v6857_v24  ;;  %v6862_v8 = vsub.s32 4294967266, %v6857_v24  ;;  %v6661_v3 = vmul.f32 %v6660_v56, %v6658_v6  ;;  %v6859_v28 = vshll.u32 %v12961_v52, %v6857_v24 }
 0x2cf   :  { %v13033_v40 = vshrl.u32 %v6902_v5, 5  ;;  %v6905_v34 = vsub.s32 32, %v6904_v47  ;;  %v6741_v46 = vsel %vm6739_vm15, %v6740_v29, %v13018_v55  ;;  %v6907_v27 = vshll.u32 %v15028_v11, %v6904_v47 }
 0x2d0   :  { %v6860_v4 = vshrl.u32 %v6842_v62, %v6858_v36  ;;  %v6863_v49 = vadd.s32 127, %v6862_v8  ;;  %v6662_v41 = vxor.u32 2147483648, %v6661_v3  ;;  %v6742_v26 = vadd.s32 %v6741_v46, %v6737_v33 }
 0x2d1   :  { %v6908_v63 = vshrl.u32 %v15037_v23, %v6905_v34  ;;  %v6910_v60 = vshll.u32 %v15037_v23, %v6904_v47  ;;  %v6911_v35 = vshrl.u32 %v15130_v61, %v6905_v34  ;;  %v6914_v52 = vshrl.u32 %v15131_v45, %v6905_v34 }
 0x2d2   :  { %v6861_v44 = vor.u32 %v6860_v4, %v6859_v28  ;;  %v6864_v12 = vshll.u32 %v6863_v49, 23  ;;  %v6663_v1 = vsel %vm6580_vm0, %v6662_v41, %v6661_v3  ;;  %v6743_v62 = vadd.s32 536870912, %v6742_v26 }
 0x2d3   :  { %v6909_v9 = vor.u32 %v6908_v63, %v6907_v27  ;;  %v6913_v55 = vshll.u32 %v15130_v61, %v6904_v47  ;;  %v6666_v5 = vsel %vm12921_vm4, %v12714_v37, %v6663_v1  ;;  %v6916_v24 = vshll.u32 %v15131_v45, %v6904_v47 }
 0x2d4   :  { %v6865_v6 = vor.u32 4788187, %v6864_v12  ;;  %v6868_v56 = vcvt.s32.f32 %v6861_v44  ;;  %9355 = vcosq.f32 %v6666_v5  ;;  %v13048_v36 = vshrl.u32 %v6743_v62, 30 }
 0x2d5   :  { %v6912_v8 = vor.u32 %v6911_v35, %v6910_v60  ;;  %v6917_v33 = vshrl.u32 %v15132_v50, %v6905_v34  ;;  %9357 = vsinq.f32 %v6666_v5  ;;  %v6915_v3 = vor.u32 %v6914_v52, %v6913_v55 }
 0x2d6   :  { %v6866_v29 = vand.u32 2147483647, %v6865_v6  ;;  %v6920_v28 = vshrl.u32 %v15133_v57, %v6905_v34  ;;  %v6672_v4 = vand.u32 3, %v6671_v43  ;;  %v6745_v49 = vshll.u32 %v13048_v36, 30 }
 0x2d7   :  { %v6918_v13 = vor.u32 %v6917_v33, %v6916_v24  ;;  %v6879_v27 = vadd.s32 3, %v6875_v22  ;;  %v6919_v41 = vshll.u32 %v15132_v50, %v6904_v47  ;;  %v15162_v63 = vor.u32 8388608, %v12910_v39 }
 0x2d8   :  { %v6869_v46 = vmul.f32 %v6868_v56, %v6866_v29  ;;  %v13058_v60 = vsub.s32 %v6742_v26, %v6745_v49  ;;  %v6906_v12 = vshrl.u32 %v15028_v11, %v6905_v34  ;;  %vm6922_vm1 = vcmp.lt.s32.totalorder %v13033_v40, 1 }
 0x2d9   :  { %v13056_v44 = vshll.u32 %v15162_v63, 8  ;;  %vm6925_vm3 = vcmp.lt.s32.totalorder %v13033_v40, 4  ;;  %v6921_v35 = vor.u32 %v6920_v28, %v6919_v41  ;;  %v6930_v22 = vsel %vm6922_vm1, %v6909_v9, %v6912_v8 }
 0x2da   :  { %v6870_v43 = vxor.u32 2147483648, %v6869_v46  ;;  %v6927_v52 = vsel %vm6925_vm3, %v6915_v3, 2102212464  ;;  %vm6673_vm5 = vcmp.lt.s32.totalorder %v6672_v4, 2  ;;  %v6748_v39 = vsub.s32 0, %v13058_v60 }
 0x2db   :  { %vm6923_vm0 = vcmp.lt.s32.totalorder %v13033_v40, 2  ;;  %vm6924_vm4 = vcmp.lt.s32.totalorder %v13033_v40, 3  ;;  %v6931_v47 = vsel %vm6925_vm3, %v6918_v13, 920167782  ;;  %vm6670_vm7 = vweird.f32 %v12714_v37 }
 0x2dc   :  { %v6871_v34 = vsel %vm6788_vm6, %v6870_v43, %v6869_v46  ;;  %v6926_v26 = vsel %vm6922_vm1, %v6906_v12, %v6909_v9  ;;  %v6928_v1 = vsel %vm6924_vm4, %v6912_v8, %v6927_v52  ;;  %v6932_v62 = vsel %vm6924_vm4, %v6915_v3, %v6931_v47 }
 0x2dd   :  { %v6874_v55 = vsel %vm12973_vm10, %v12732_v2, %v6871_v34  ;;  %v7774_v5 = vmin.u32 %v6748_v39, %v13058_v60  ;;  %v6933_v6 = vsel %vm6923_vm0, %v6930_v22, %v6932_v62  ;;  %v6934_v56 = vsel %vm6922_vm1, %v6912_v8, %v6915_v3 }
 0x2de   :  { %9359 = vcosq.f32 %v6874_v55  ;;  %v6935_v9 = vsel %vm6925_vm3, %v6921_v35, 1326507024  ;;  %v13092_v24 = vmul.u32.u64.low %v13056_v44, %v6933_v6  ;;  %v13093_v33 = vmul.u32.u64.high %v13056_v44, %v6933_v6, %v13092_v24  ;;  %v9356_v29 = vpop.eup %9355 }
 0x2df   :  { %vm6674_vm6 = vcmp.eq.s32.totalorder %v6672_v4, 0  ;;  %vm6677_vm8 = vcmp.eq.s32.totalorder %v6672_v4, 2  ;;  %9361 = vsinq.f32 %v6874_v55  ;;  %v6750_v14 = vclz %v7774_v5  ;;  %v9358_v28 = vpop.eup %9357 }
 0x2e0   :  { %v6678_v49 = vxor.u32 2147483648, %v9356_v29  ;;  %v13096_v46 = vand.u32 3, %v6879_v27  ;;  %v6929_v8 = vsel %vm6923_vm0, %v6926_v26, %v6928_v1  ;;  %v6936_v3 = vsel %vm6924_vm4, %v6918_v13, %v6935_v9 }
 0x2e1   :  { %v6675_v41 = vxor.u32 2147483648, %v9358_v28  ;;  %v7775_v63 = vadd.s32 4294967294, %v6750_v14  ;;  %v6937_v12 = vsel %vm6923_vm0, %v6934_v56, %v6936_v3  ;;  %v15163_v43 = vand.u32 4294901760, %v12374_v7 }
 0x2e2   :  { %v15164_v35 = vand.u32 4294901760, %v12376_v16  ;;  %v6679_v22 = vsel %vm6677_vm8, %v6678_v49, %v9358_v28  ;;  %v13109_v27 = vmul.u32.u64.low %v13056_v44, %v6937_v12  ;;  %v13110_v39 = vmul.u32.u64.high %v13056_v44, %v6937_v12, %v13109_v27 }
 0x2e3   :  { %v6948_v47 = vadd.s32 1, %v13093_v33  ;;  %v6676_v34 = vsel %vm6674_vm6, %v9356_v29, %v6675_v41  ;;  %vm7776_vm9 = vcmp.lt.s32.totalorder %v7775_v63, 0  ;;  %v15165_v13 = vand.u32 4294901760, %v12385_v15  ;;  %v15182_v27 = vld [vmem:[#allocation23_spill] sm:$0xff] }
 0x2e4   :  { %v9019_v52 = vpack.c.bf16 %v15164_v35, %v15163_v43  ;;  %v15166_v40 = vand.u32 4294901760, %v12389_v10  ;;  %v15167_v7 = vand.u32 4294901760, %v12395_v18  ;;  %v15168_v16 = vand.u32 4294901760, %v12400_v51  ;;  %v15180_v35 = vld [vmem:[#allocation22_spill] sm:$0xff] }
 0x2e5   :  { %v6680_v62 = vsel %vm6673_vm5, %v6676_v34, %v6679_v22  ;;  %v6738_v55 = vadd.s32 %v13017_v59, %v13014_v17  ;;  %v6753_v5 = vsel %vm7776_vm9, 0, %v7775_v63  ;;  %v15169_v6 = vand.u32 4294901760, %v12402_v0  ;;  %v15184_v34 = vld [vmem:[#allocation82_spill] sm:$0xff] }
 0x2e6   :  { %9020 = vmatpush1.bf16.msra.mxu0 %v9019_v52  ;;  %v9137_v26 = vpack.c.bf16 %v15166_v40, %v15165_v13  ;;  %v9021_v1 = vpack.c.bf16 %v15168_v16, %v15167_v7  ;;  %v15170_v56 = vand.u32 4294901760, %v12409_v58  ;;  %v6681_v15 = vsel %vm6670_vm7, nan, %v6680_v62  ;;  %v15186_v7 = vld [vmem:[#allocation26_spill] sm:$0xff] }
 0x2e7   :  { %v6754_v10 = vsub.s32 32, %v6753_v5  ;;  %v6758_v29 = vsub.s32 4294967266, %v6753_v5  ;;  %v15171_v18 = vand.u32 4294901760, %v12413_v30  ;;  %v15172_v51 = vand.u32 4294901760, %v12417_v48  ;;  %7726 = vst [vmem:[#allocation8 + $0x20] sm:$0xff] %v6681_v15 }
 0x2e8   :  { %v9023_v9 = vpack.c.bf16 %v15170_v56, %v15169_v6  ;;  %9138 = vmatpush3.bf16.msra.mxu1 %v9137_v26  ;;  %9022 = vmatprep.subr.bf16.mxu0 %v9021_v1  ;;  %v6755_v17 = vshll.u32 %v13058_v60, %v6753_v5  ;;  %v6945_v0 = vmul.u32 %v13056_v44, %v6929_v8  ;;  %v15173_v58 = vand.u32 4294901760, %v12419_v25  ;;  %v9360_v49 = vpop.eup %9359  ;;  %v15188_v1 = vld [vmem:[#allocation91_spill] sm:$0xff] }
 0x2e9   :  { %v9140_v4 = vpack.c.bf16 %v15172_v51, %v15171_v18  ;;  %vm6947_vm12 = vc.u32 %v13110_v39, %v13092_v24  ;;  %9139 = vmatprep.subr.bf16.mxu1 %v15096_v53  ;;  %v15174_v37 = vand.u32 4294901760, %v12424_v42  ;;  %v6756_v14 = vshrl.u32 %v6738_v55, %v6754_v10  ;;  %v9362_v42 = vpop.eup %9361  ;;  %v15192_v10 = vld [vmem:[#allocation25_spill] sm:$0xff] }
 0x2ea   :  { %v6759_v30 = vadd.s32 127, %v6758_v29  ;;  %v6949_v48 = vsel %vm6947_vm12, %v6948_v47, %v13093_v33  ;;  %9024 = vmatpush1.bf16.msra.mxu0 %v9023_v9  ;;  %v15175_v28 = vand.u32 4294901760, %v12428_v19  ;;  %v15176_v60 = vand.u32 4294901760, %v12430_v32  ;;  %v15190_v9 = vld [vmem:[#allocation83_spill] sm:$0xff] }
 0x2eb   :  { %v9025_v59 = vpack.c.bf16 %v15174_v37, %v15173_v58  ;;  %v6950_v8 = vadd.s32 %v6949_v48, %v6945_v0  ;;  %v15177_v3 = vand.u32 4294901760, %v12445_v31  ;;  %v15178_v25 = vand.u32 4294901760, %v12454_v54  ;;  %v15194_v0 = vld [vmem:[#allocation27_spill] sm:$0xff]  ;;  %v15196_v37 = vld [vmem:[#allocation30_spill] sm:$0xff] }
 0x2ec   :  { %v9027_v44 = vpack.c.bf16 %v15176_v60, %v15175_v28  ;;  %v6886_v63 = vxor.u32 2147483648, %v9360_v49  ;;  %v6757_v12 = vor.u32 %v6756_v14, %v6755_v17  ;;  %v6760_v43 = vshll.u32 %v6759_v30, 23  ;;  %9141 = vmatpush3.bf16.msra.mxu1 %v9140_v4  ;;  %v15200_v60 = vld [vmem:[#allocation31_spill] sm:$0xff] }
 0x2ed   :  { %9026 = vmatprep.subr.bf16.mxu0 %v9025_v59  ;;  %v9029_v41 = vpack.c.bf16 %v15178_v25, %v15177_v3  ;;  %v15179_v33 = vand.u32 4294901760, %v12434_v21  ;;  %v15181_v19 = vand.u32 4294901760, %v15180_v35  ;;  %vm6878_vm13 = vweird.f32 %v12732_v2  ;;  %9142 = vmatprep.subr.bf16.mxu1 %v15096_v53  ;;  %v15198_v2 = vld [vmem:[#allocation29_spill] sm:$0xff] }
 0x2ee   :  { %v6883_v32 = vxor.u32 2147483648, %v9362_v42  ;;  %vm6885_vm10 = vcmp.eq.s32.totalorder %v13096_v46, 2  ;;  %v6951_v22 = vadd.s32 536870912, %v6950_v8  ;;  %vm6882_vm11 = vcmp.eq.s32.totalorder %v13096_v46, 0  ;;  %9028 = vmatpush1.bf16.msra.mxu0 %v9027_v44  ;;  %v15202_v3 = vld [vmem:[#allocation33_spill] sm:$0xff] }
 0x2ef   :  { %v9143_v52 = vpack.c.bf16 %v15181_v19, %v15179_v33  ;;  %v6887_v31 = vsel %vm6885_vm10, %v6886_v63, %v9362_v42  ;;  %v6761_v54 = vor.u32 4788187, %v6760_v43  ;;  %v15183_v47 = vand.u32 4294901760, %v15182_v27  ;;  %9030 = vmatprep.subr.bf16.mxu0 %v9029_v41  ;;  %v15206_v33 = vld [vmem:[#allocation38_spill] sm:$0xff] }
 0x2f0   :  { %v15185_v21 = vand.u32 4294901760, %v15184_v34  ;;  %vm6881_vm14 = vcmp.lt.s32.totalorder %v13096_v46, 2  ;;  %v6884_v40 = vsel %vm6882_vm11, %v9360_v49, %v6883_v32  ;;  %v13166_v26 = vshrl.u32 %v6951_v22, 30  ;;  %v15209_v22 = vld [vmem:[#allocation45_spill] sm:$0xff] }
 0x2f1   :  { %v15187_v16 = vand.u32 4294901760, %v15186_v7  ;;  %v15189_v62 = vand.u32 4294901760, %v15188_v1  ;;  %v6888_v5 = vsel %vm6881_vm14, %v6884_v40, %v6887_v31  ;;  %v6762_v6 = vand.u32 2147483647, %v6761_v54  ;;  %9144 = vmatpush3.bf16.msra.mxu1 %v9143_v52  ;;  %v15207_v52 = vld [vmem:[#allocation47_spill] sm:$0xff]  ;;  %v15210_v54 = vld [vmem:[#allocation44_spill] sm:$0xff] }
 0x2f2   :  { %v9031_v13 = vpack.c.bf16 %v15185_v21, %v15183_v47  ;;  %v6764_v56 = vcvt.s32.f32 %v6757_v12  ;;  %v15191_v15 = vand.u32 4294901760, %v15190_v9  ;;  %v15193_v29 = vand.u32 4294901760, %v15192_v10  ;;  %9145 = vmatprep.subr.bf16.mxu1 %v15096_v53  ;;  %v15211_v47 = vld [vmem:[#allocation40_spill] sm:$0xff]  ;;  %v15216_v10 = vld [vmem:[#allocation19_spill] sm:$0xff] }
 0x2f3   :  { %v9033_v55 = vpack.c.bf16 %v15189_v62, %v15187_v16  ;;  %v6889_v46 = vsel %vm6878_vm13, nan, %v6888_v5  ;;  %v6953_v51 = vshll.u32 %v13166_v26, 30  ;;  %v6768_v17 = vsub.s32 4, %v13048_v36  ;;  %v15212_v40 = vld [vmem:[#allocation20_spill] sm:$0xff]  ;;  %v15213_v16 = vld [vmem:[#allocation42_spill] sm:$0xff]  ;;  %v15214_v5 = vld [vmem:[#allocation15_spill] sm:$0xff] }
 0x2f4   :  { %v9146_v18 = vpack.c.bf16 %v15193_v29, %v15191_v15  ;;  %7728 = vst [vmem:[#allocation8 + $0x30] sm:$0xff] %v6889_v46  ;;  %v6765_v4 = vmul.f32 %v6764_v56, %v6762_v6  ;;  %9032 = vmatpush1.bf16.msra.mxu0 %v9031_v13  ;;  %v15195_v58 = vand.u32 4294901760, %v15194_v0  ;;  %v15197_v59 = vand.u32 4294901760, %v15196_v37 }
 0x2f5   :  { %v6954_v30 = vsub.s32 %v6950_v8, %v6953_v51  ;;  %9034 = vmatprep.subr.bf16.mxu0 %v9033_v55  ;;  %v15199_v28 = vand.u32 4294901760, %v15198_v2  ;;  %v15201_v44 = vand.u32 4294901760, %v15200_v60  ;;  %vm6684_vm15 = vcmp.lt.s32.totalorder %v15202_v3, 0  ;;  %v15217_v51 = vld [vmem:[#allocation53_spill] sm:$0xff]  ;;  %v15221_v2 = vld [vmem:[#allocation107_spill] sm:$0xff] }
 0x2f6   :  { %v9035_v14 = vpack.c.bf16 %v15197_v59, %v15195_v58  ;;  %v6766_v48 = vxor.u32 2147483648, %v6765_v4  ;;  %9147 = vmatpush3.bf16.msra.mxu1 %v9146_v18  ;;  %v15203_v41 = vand.u32 2147483647, %v15202_v3  ;;  %v6769_v63 = vsel %vm6684_vm15, %v6768_v17, %v13048_v36  ;;  %v15208_v36 = vld [vmem:[#allocation43_spill] sm:$0xff]  ;;  %v15218_v58 = vld [vmem:[#allocation24_spill] sm:$0xff] }
 0x2f7   :  { %v9149_v49 = vpack.c.bf16 %v15201_v44, %v15199_v28  ;;  %v6956_v25 = vsub.s32 0, %v6954_v30  ;;  %9148 = vmatprep.subr.bf16.mxu1 %v15096_v53  ;;  %v6946_v34 = vadd.s32 %v13092_v24, %v13110_v39  ;;  %v15215_v24 = vld [vmem:[#allocation21_spill] sm:$0xff]  ;;  %vm6774_vm4 = vweird.f32 %v15202_v3  ;;  %v15222_v60 = vld [vmem:[#allocation87_spill] sm:$0xff] }
 0x2f8   :  { %vm13193_vm1 = vcmp.le.f32.partialorder %v15203_v41, 0.7853982  ;;  %v6767_v8 = vsel %vm6684_vm15, %v6766_v48, %v6765_v4  ;;  %9036 = vmatpush1.bf16.msra.mxu0 %v9035_v14  ;;  %v6976_v59 = vsub.s32 4, %v13166_v26  ;;  %v15219_v14 = vld [vmem:[#allocation51_spill] sm:$0xff]  ;;  %vm6892_vm7 = vcmp.lt.s32.totalorder %v15221_v2, 0 }
 0x2f9   :  { %v6770_v12 = vsel %vm13193_vm1, %v15202_v3, %v6767_v8  ;;  %v7782_v43 = vmin.u32 %v6956_v25, %v6954_v30  ;;  %9038 = vmatprep.subr.bf16.mxu0 %v15206_v33  ;;  %v6771_v35 = vsel %vm13193_vm1, 0, %v6769_v63  ;;  %v15220_v48 = vld [vmem:[#allocation79_spill] sm:$0xff]  ;;  %v15224_v25 = vand.u32 2147483647, %v15221_v2  ;;  %v15225_v8 = vld [vmem:[#allocation28_spill] sm:$0xff] }
 0x2fa   :  { %9363 = vcosq.f32 %v6770_v12  ;;  %9150 = vmatpush3.bf16.msra.mxu1 %v9149_v49  ;;  %v6775_v31 = vadd.s32 3, %v6771_v35  ;;  %v6977_v44 = vsel %vm6892_vm7, %v6976_v59, %v13166_v26  ;;  %v15223_v49 = vld [vmem:[#allocation84_spill] sm:$0xff]  ;;  %v13235_v3 = vld [vmem:[#allocation5 + $0x8] sm:$0xff]  ;;  %vm6982_vm10 = vweird.f32 %v15221_v2 }
 0x2fb   :  { %9365 = vsinq.f32 %v6770_v12  ;;  %v6958_v19 = vclz %v7782_v43  ;;  %9151 = vmatprep.subr.bf16.mxu1 %v15096_v53  ;;  %5471 = vmatmul.mubr.f32.vlgmr.msra.gmra.mrb[6].mxu0 %v15207_v52  ;;  %vm6891_vm6 = vcmp.le.f32.partialorder %v15224_v25, 0.7853982  ;;  %v15226_v12 = vld [vmem:[#allocation41_spill] sm:$0xff] }
 0x2fc   :  { %9040 = vmatpush1.bf16.msra.mxu0 %v15208_v36  ;;  %5565 = vmatprep.mubr.f32.mxu0 %v14281_v38  ;;  %v6776_v7 = vand.u32 3, %v6775_v31  ;;  %v6979_v63 = vsel %vm6891_vm6, 0, %v6977_v44  ;;  %v15227_v43 = vsub.s32 0, %v15226_v12  ;;  %v15228_v33 = vsub.s32 1, %v15226_v12 }
 0x2fd   :  { %v7783_v32 = vadd.s32 4294967294, %v6958_v19  ;;  %8024 = vmatmul.mubr.f32.vlgmr.msra.gmra.mrb[6].mxu1 %v15207_v52  ;;  %9042 = vmatprep.subr.bf16.mxu0 %v15209_v22  ;;  %v15229_v36 = vsub.s32 2, %v15226_v12 }
 0x2fe   :  { %9153 = vmatpush3.bf16.msra.mxu1 %v15210_v54  ;;  %8050 = vmatprep.mubr.msk.f32.mxu1 %vm9507_vm2, %v14281_v38  ;;  %vm6781_vm2 = vcmp.eq.s32.totalorder %v6776_v7, 2  ;;  %vm6778_vm5 = vcmp.eq.s32.totalorder %v6776_v7, 0  ;;  %vm6777_vm0 = vcmp.lt.s32.totalorder %v6776_v7, 2  ;;  %v272_v26 = vrot.slane %v13235_v3, %v15227_v43 }
 0x2ff   :  { %vm7784_vm3 = vcmp.lt.s32.totalorder %v7783_v32, 0  ;;  %9154 = vmatprep.subr.bf16.mxu1 %v15096_v53  ;;  %v276_v35 = vrot.slane %v13235_v3, %v15228_v33 }
 0x300   :  { %v6961_v27 = vsel %vm7784_vm3, 0, %v7783_v32  ;;  %9044 = vmatpush1.bf16.msra.mxu0 %v15211_v47  ;;  %v280_v32 = vrot.slane %v13235_v3, %v15229_v36 }
 0x301   :  { %v6962_v21 = vsub.s32 32, %v6961_v27  ;;  %v6966_v13 = vsub.s32 4294967266, %v6961_v27  ;;  %9046 = vmatprep.subr.bf16.mxu0 %v15212_v40  ;;  %v6963_v1 = vshll.u32 %v6954_v30, %v6961_v27 }
 0x302   :  { %9156 = vmatpush3.bf16.msra.mxu1 %v15213_v16 }
 0x303   :  { %v6964_v62 = vshrl.u32 %v6946_v34, %v6962_v21  ;;  %v6967_v55 = vadd.s32 127, %v6966_v13  ;;  %9157 = vmatprep.subr.bf16.mxu1 %v15096_v53 }
 0x304   :  { %v9364_v38 = vpop.eup %9363  ;;  %9048 = vmatpush1.bf16.msra.mxu0 %v15214_v5 }
 0x305   :  { %v9366_v6 = vpop.eup %9365  ;;  %v6782_v56 = vxor.u32 2147483648, %v9364_v38  ;;  %v6965_v9 = vor.u32 %v6964_v62, %v6963_v1  ;;  %v6968_v15 = vshll.u32 %v6967_v55, 23  ;;  %9050 = vmatprep.subr.bf16.mxu0 %v15215_v24 }
 0x306   :  { %v6779_v39 = vxor.u32 2147483648, %v9366_v6  ;;  %9159 = vmatpush3.bf16.msra.mxu1 %v15216_v10 }
 0x307   :  { %v6783_v29 = vsel %vm6781_vm2, %v6782_v56, %v9366_v6  ;;  %v6969_v18 = vor.u32 4788187, %v6968_v15  ;;  %9160 = vmatprep.subr.bf16.mxu1 %v15096_v53  ;;  %v6972_v0 = vcvt.s32.f32 %v6965_v9 }
 0x308   :  { %v6780_v46 = vsel %vm6778_vm5, %v9364_v38, %v6779_v39  ;;  %9052 = vmatpush1.bf16.msra.mxu0 %v15217_v51 }
 0x309   :  { %v6784_v4 = vsel %vm6777_vm0, %v6780_v46, %v6783_v29  ;;  %v6970_v17 = vand.u32 2147483647, %v6969_v18  ;;  %9054 = vmatprep.subr.bf16.mxu0 %v15218_v58  ;;  %v4817_v54 = vpop.f32.mrb[4].mxu1 }
 0x30a   :  { %v6785_v37 = vsel %vm6774_vm4, nan, %v6784_v4  ;;  %9162 = vmatpush3.bf16.msra.mxu1 %v15219_v14  ;;  %v13260_v34 = vpop.f32.mrb[5].mxu1  ;;  %v13262_v13 = vadd.f32 %v4817_v54, %v280_v32 }
 0x30b   :  { %7727 = vst [vmem:[#allocation8 + $0x28] sm:$0xff] %v6785_v37  ;;  %v6973_v30 = vmul.f32 %v6972_v0, %v6970_v17  ;;  %9163 = vmatprep.subr.bf16.mxu1 %v15096_v53  ;;  %v4066_v19 = vpop.f32.mrb[4].mxu0 }
 0x30c   :  { %9056 = vmatpush1.bf16.msra.mxu0 %v15220_v48  ;;  %v13254_v22 = vadd.f32 %v4066_v19, %v272_v26  ;;  %v4068_v31 = vpop.f32.mrb[5].mxu0  ;;  %v7202_v16 = vand.u32 2147483647, %v13262_v13  ;;  %v7205_v1 = vand.u32 2139095040, %v13262_v13 }
 0x30d   :  { %v6974_v28 = vxor.u32 2147483648, %v6973_v30  ;;  %9058 = vmatprep.subr.bf16.mxu0 %v15222_v60  ;;  %v13256_v27 = vadd.f32 %v4068_v31, %v276_v35 }
 0x30e   :  { %9165 = vmatpush3.bf16.msra.mxu1 %v15223_v49  ;;  %v6997_v47 = vand.u32 2139095040, %v13254_v22  ;;  %v7206_v56 = vshrl.u32 %v7205_v1, 23  ;;  %v7209_v9 = vand.u32 8388607, %v7202_v16 }
 0x30f   :  { %v6975_v41 = vsel %vm6892_vm7, %v6974_v28, %v6973_v30  ;;  %9166 = vmatprep.subr.bf16.mxu1 %v15096_v53  ;;  %v6983_v53 = vadd.s32 3, %v6979_v63  ;;  %v7101_v40 = vand.u32 2139095040, %v13256_v27 }
 0x310   :  { %v6978_v42 = vsel %vm6891_vm6, %v15221_v2, %v6975_v41  ;;  %9060 = vmatpush1.bf16.msra.mxu0 %v15225_v8  ;;  %v6998_v7 = vshrl.u32 %v6997_v47, 23  ;;  %v7793_v29 = vadd.s32 4294967169, %v7206_v56  ;;  %v7210_v18 = vor.u32 8388608, %v7209_v9 }
 0x311   :  { %9367 = vcosq.f32 %v6978_v42  ;;  %v6984_v21 = vand.u32 3, %v6983_v53  ;;  %v7102_v38 = vshrl.u32 %v7101_v40, 23 }
 0x312   :  { %9369 = vsinq.f32 %v6978_v42  ;;  %9168 = vmatpush3.bf16.msra.mxu1 %v15157_v20  ;;  %v6994_v20 = vand.u32 2147483647, %v13254_v22  ;;  %v7785_v55 = vadd.s32 4294967169, %v6998_v7  ;;  %v7212_v0 = vadd.s32 1, %v7793_v29 }
 0x313   :  { %5567 = vmatmul.mubr.f32.vlgmr.msra.gmra.mrb[6].mxu0 %v15207_v52  ;;  %vm6986_vm8 = vcmp.eq.s32.totalorder %v6984_v21, 0  ;;  %vm6989_vm9 = vcmp.eq.s32.totalorder %v6984_v21, 2  ;;  %v7789_v46 = vadd.s32 4294967169, %v7102_v38  ;;  %vm6985_vm12 = vcmp.lt.s32.totalorder %v6984_v21, 2 }
 0x314   :  { %v7004_v39 = vadd.s32 1, %v7785_v55  ;;  %v13274_v30 = vshll.u32 %v7210_v18, 8  ;;  %vm7213_vm11 = vcmp.gt.s32.totalorder %v7212_v0, 0 }
 0x315   :  { %8051 = vmatmul.mubr.f32.vlgmr.msra.gmra.mrb[6].mxu1 %v15207_v52  ;;  %v7001_v52 = vand.u32 8388607, %v6994_v20  ;;  %v13276_v48 = vadd.s32 1, %v7789_v46  ;;  %v7214_v19 = vsel %vm7213_vm11, %v7212_v0, 0 }
 0x316   :  { %vm7005_vm13 = vcmp.gt.s32.totalorder %v7004_v39, 0  ;;  %v7216_v31 = vand.u32 31, %v7214_v19  ;;  %v7215_v9 = vshrl.u32 %v7214_v19, 5 }
 0x317   :  { %v7002_v24 = vor.u32 8388608, %v7001_v52  ;;  %v7006_v17 = vsel %vm7005_vm13, %v7004_v39, 0  ;;  %vm7109_vm2 = vcmp.gt.s32.totalorder %v13276_v48, 0 }
 0x318   :  { %v7007_v37 = vshrl.u32 %v7006_v17, 5  ;;  %v7008_v59 = vand.u32 31, %v7006_v17  ;;  %v7225_v17 = vshll.u32 %v15130_v61, %v7216_v31  ;;  %vm7234_vm0 = vcmp.lt.s32.totalorder %v7215_v9, 1 }
 0x319   :  { %v13272_v14 = vshll.u32 %v7002_v24, 8  ;;  %vm7235_vm4 = vcmp.lt.s32.totalorder %v7215_v9, 2  ;;  %vm7236_vm7 = vcmp.lt.s32.totalorder %v7215_v9, 3  ;;  %vm7237_vm6 = vcmp.lt.s32.totalorder %v7215_v9, 4 }
 0x31a   :  { %v7009_v28 = vsub.s32 32, %v7008_v59  ;;  %v7011_v60 = vshll.u32 %v15028_v11, %v7008_v59  ;;  %v7014_v44 = vshll.u32 %v15037_v23, %v7008_v59  ;;  %v7017_v2 = vshll.u32 %v15130_v61, %v7008_v59 }
 0x31b   :  { %v9368_v62 = vpop.eup %9367  ;;  %v7020_v49 = vshll.u32 %v15131_v45, %v7008_v59  ;;  %v7023_v25 = vshll.u32 %v15132_v50, %v7008_v59  ;;  %vm7026_vm14 = vcmp.lt.s32.totalorder %v7007_v37, 1  ;;  %vm7027_vm15 = vcmp.lt.s32.totalorder %v7007_v37, 2 }
 0x31c   :  { %v9370_v5 = vpop.eup %9369  ;;  %v6990_v6 = vxor.u32 2147483648, %v9368_v62  ;;  %v7012_v41 = vshrl.u32 %v15037_v23, %v7009_v28  ;;  %v7015_v42 = vshrl.u32 %v15130_v61, %v7009_v28  ;;  %v7018_v8 = vshrl.u32 %v15131_v45, %v7009_v28 }
 0x31d   :  { %v6987_v15 = vxor.u32 2147483648, %v9370_v5  ;;  %v7010_v63 = vshrl.u32 %v15028_v11, %v7009_v28  ;;  %v7021_v43 = vshrl.u32 %v15132_v50, %v7009_v28  ;;  %v7024_v26 = vshrl.u32 %v15133_v57, %v7009_v28 }
 0x31e   :  { %v6991_v10 = vsel %vm6989_vm9, %v6990_v6, %v9370_v5  ;;  %vm7028_vm1 = vcmp.lt.s32.totalorder %v7007_v37, 3  ;;  %v7013_v33 = vor.u32 %v7012_v41, %v7011_v60  ;;  %v7016_v35 = vor.u32 %v7015_v42, %v7014_v44 }
 0x31f   :  { %v6988_v51 = vsel %vm6986_vm8, %v9368_v62, %v6987_v15  ;;  %v7019_v53 = vor.u32 %v7018_v8, %v7017_v2  ;;  %v7022_v36 = vor.u32 %v7021_v43, %v7020_v49  ;;  %v7025_v32 = vor.u32 %v7024_v26, %v7023_v25 }
 0x320   :  { %v6992_v4 = vsel %vm6985_vm12, %v6988_v51, %v6991_v10  ;;  %vm7029_vm3 = vcmp.lt.s32.totalorder %v7007_v37, 4  ;;  %v7030_v54 = vsel %vm7026_vm14, %v7010_v63, %v7013_v33  ;;  %v7034_v21 = vsel %vm7026_vm14, %v7013_v33, %v7016_v35 }
 0x321   :  { %v6993_v58 = vsel %vm6982_vm10, nan, %v6992_v4  ;;  %v7031_v47 = vsel %vm7029_vm3, %v7019_v53, 2102212464  ;;  %v7038_v40 = vsel %vm7026_vm14, %v7016_v35, %v7019_v53  ;;  %v7035_v52 = vsel %vm7029_vm3, %v7022_v36, 920167782 }
 0x322   :  { %7729 = vst [vmem:[#allocation8 + $0x38] sm:$0xff] %v6993_v58  ;;  %v7032_v7 = vsel %vm7028_vm1, %v7016_v35, %v7031_v47  ;;  %v7039_v1 = vsel %vm7029_vm3, %v7025_v32, 1326507024  ;;  %v7217_v62 = vsub.s32 32, %v7216_v31  ;;  %v7036_v38 = vsel %vm7028_vm1, %v7019_v53, %v7035_v52 }
 0x323   :  { %v7033_v55 = vsel %vm7027_vm15, %v7030_v54, %v7032_v7  ;;  %v7040_v5 = vsel %vm7028_vm1, %v7022_v36, %v7039_v1  ;;  %v7037_v6 = vsel %vm7027_vm15, %v7034_v21, %v7036_v38  ;;  %v7219_v15 = vshll.u32 %v15028_v11, %v7216_v31 }
 0x324   :  { %v7041_v56 = vsel %vm7027_vm15, %v7038_v40, %v7040_v5  ;;  %v13306_v10 = vmul.u32.u64.low %v13272_v14, %v7037_v6  ;;  %v13307_v29 = vmul.u32.u64.high %v13272_v14, %v7037_v6, %v13306_v10  ;;  %v7049_v18 = vmul.u32 %v13272_v14, %v7033_v55 }
 0x325   :  { %v13302_v24 = vmul.u32.u64.low %v13272_v14, %v7041_v56  ;;  %v13303_v39 = vmul.u32.u64.high %v13272_v14, %v7041_v56, %v13302_v24  ;;  %v7220_v46 = vshrl.u32 %v15037_v23, %v7217_v62  ;;  %v7222_v51 = vshll.u32 %v15037_v23, %v7216_v31 }
 0x326   :  { %v7223_v4 = vshrl.u32 %v15130_v61, %v7217_v62  ;;  %v7226_v0 = vshrl.u32 %v15131_v45, %v7217_v62  ;;  %v7228_v58 = vshll.u32 %v15131_v45, %v7216_v31  ;;  %v7229_v37 = vshrl.u32 %v15132_v50, %v7217_v62 }
 0x327   :  { %v7221_v59 = vor.u32 %v7220_v46, %v7219_v15  ;;  %v7231_v60 = vshll.u32 %v15132_v50, %v7216_v31  ;;  %v7232_v14 = vshrl.u32 %v15133_v57, %v7217_v62  ;;  %vm7051_vm5 = vc.u32 %v13303_v39, %v13306_v10 }
 0x328   :  { %v7224_v28 = vor.u32 %v7223_v4, %v7222_v51  ;;  %v7052_v44 = vadd.s32 1, %v13307_v29  ;;  %v7218_v2 = vshrl.u32 %v15028_v11, %v7217_v62  ;;  %v7227_v49 = vor.u32 %v7226_v0, %v7225_v17 }
 0x329   :  { %v7230_v25 = vor.u32 %v7229_v37, %v7228_v58  ;;  %v7233_v41 = vor.u32 %v7232_v14, %v7231_v60  ;;  %v7110_v47 = vsel %vm7109_vm2, %v13276_v48, 0  ;;  %v7098_v52 = vand.u32 2147483647, %v13256_v27 }
 0x32a   :  { %v7053_v42 = vsel %vm7051_vm5, %v7052_v44, %v13307_v29  ;;  %v7242_v8 = vsel %vm7234_vm0, %v7221_v59, %v7224_v28  ;;  %v7239_v43 = vsel %vm7237_vm6, %v7227_v49, 2102212464  ;;  %v7246_v33 = vsel %vm7234_vm0, %v7224_v28, %v7227_v49 }
 0x32b   :  { %v7054_v63 = vadd.s32 %v7053_v42, %v7049_v18  ;;  %v7243_v26 = vsel %vm7237_vm6, %v7230_v25, 920167782  ;;  %v7238_v35 = vsel %vm7234_vm0, %v7218_v2, %v7221_v59  ;;  %v7240_v53 = vsel %vm7236_vm7, %v7224_v28, %v7239_v43 }
 0x32c   :  { %v7244_v19 = vsel %vm7236_vm7, %v7227_v49, %v7243_v26  ;;  %v7247_v36 = vsel %vm7237_vm6, %v7233_v41, 1326507024  ;;  %v7241_v38 = vsel %vm7235_vm4, %v7238_v35, %v7240_v53  ;;  %v7112_v5 = vand.u32 31, %v7110_v47 }
 0x32d   :  { %v7055_v32 = vadd.s32 536870912, %v7054_v63  ;;  %v7245_v31 = vsel %vm7235_vm4, %v7242_v8, %v7244_v19  ;;  %v7248_v54 = vsel %vm7236_vm7, %v7230_v25, %v7247_v36  ;;  %v7105_v56 = vand.u32 8388607, %v7098_v52 }
 0x32e   :  { %v7249_v21 = vsel %vm7235_vm4, %v7246_v33, %v7248_v54  ;;  %v13331_v40 = vmul.u32.u64.low %v13274_v30, %v7245_v31  ;;  %v13332_v7 = vmul.u32.u64.high %v13274_v30, %v7245_v31, %v13331_v40  ;;  %v7113_v15 = vsub.s32 32, %v7112_v5 }
 0x32f   :  { %v13336_v1 = vshrl.u32 %v7055_v32, 30  ;;  %v13339_v62 = vmul.u32.u64.low %v13274_v30, %v7249_v21  ;;  %v13340_v55 = vmul.u32.u64.high %v13274_v30, %v7249_v21, %v13339_v62  ;;  %v15230_v24 = vsub.s32 3, %v15226_v12 }
 0x330   :  { %v7260_v6 = vadd.s32 1, %v13332_v7  ;;  %v7257_v46 = vmul.u32 %v13274_v30, %v7241_v38  ;;  %v7116_v17 = vshrl.u32 %v15037_v23, %v7113_v15  ;;  %v7106_v0 = vor.u32 8388608, %v7105_v56 }
 0x331   :  { %v7057_v48 = vshll.u32 %v13336_v1, 30  ;;  %v284_v29 = vrot.slane %v13235_v3, %v15230_v24  ;;  %vm7259_vm8 = vc.u32 %v13340_v55, %v13331_v40  ;;  %v13355_v58 = vshrl.u32 %v7110_v47, 5 }
 0x332   :  { %v7261_v9 = vsel %vm7259_vm8, %v7260_v6, %v13332_v7  ;;  %v7119_v37 = vshrl.u32 %v15130_v61, %v7113_v15  ;;  %v7115_v30 = vshll.u32 %v15028_v11, %v7112_v5  ;;  %v7122_v14 = vshrl.u32 %v15131_v45, %v7113_v15 }
 0x333   :  { %v7058_v18 = vsub.s32 %v7054_v63, %v7057_v48  ;;  %v7262_v4 = vadd.s32 %v7261_v9, %v7257_v46  ;;  %v13359_v59 = vadd.f32 %v13260_v34, %v284_v29  ;;  %v7118_v44 = vshll.u32 %v15037_v23, %v7112_v5 }
 0x334   :  { %v7124_v2 = vshll.u32 %v15131_v45, %v7112_v5  ;;  %v7125_v49 = vshrl.u32 %v15132_v50, %v7113_v15  ;;  %v7128_v25 = vshrl.u32 %v15133_v57, %v7113_v15  ;;  %v7050_v41 = vadd.s32 %v13306_v10, %v13303_v39 }
 0x335   :  { %v7060_v51 = vsub.s32 0, %v7058_v18  ;;  %v7263_v60 = vadd.s32 536870912, %v7262_v4  ;;  %v7117_v34 = vor.u32 %v7116_v17, %v7115_v30  ;;  %v7121_v8 = vshll.u32 %v15130_v61, %v7112_v5 }
 0x336   :  { %v7120_v43 = vor.u32 %v7119_v37, %v7118_v44  ;;  %v7126_v26 = vor.u32 %v7125_v49, %v7124_v2  ;;  %v7127_v33 = vshll.u32 %v15132_v50, %v7112_v5  ;;  %vm7133_vm9 = vcmp.lt.s32.totalorder %v13355_v58, 4 }
 0x337   :  { %v7786_v28 = vmin.u32 %v7060_v51, %v7058_v18  ;;  %v13370_v63 = vshrl.u32 %v7263_v60, 30  ;;  %v7123_v53 = vor.u32 %v7122_v14, %v7121_v8  ;;  %v13374_v19 = vshll.u32 %v7106_v0, 8 }
 0x338   :  { %vm6996_vm12 = vcmp.lt.s32.totalorder %v13254_v22, 0  ;;  %v7129_v10 = vor.u32 %v7128_v25, %v7127_v33  ;;  %v7139_v36 = vsel %vm7133_vm9, %v7126_v26, 920167782  ;;  %v7309_v32 = vand.u32 2139095040, %v13359_v59 }
 0x339   :  { %v7062_v42 = vclz %v7786_v28  ;;  %v7265_v39 = vshll.u32 %v13370_v63, 30  ;;  %v7080_v31 = vsub.s32 4, %v13336_v1  ;;  %vm7130_vm10 = vcmp.lt.s32.totalorder %v13355_v58, 1 }
 0x33a   :  { %vm7131_vm11 = vcmp.lt.s32.totalorder %v13355_v58, 2  ;;  %vm7132_vm14 = vcmp.lt.s32.totalorder %v13355_v58, 3  ;;  %v7138_v21 = vsel %vm7130_vm10, %v7117_v34, %v7120_v43  ;;  %v7142_v5 = vsel %vm7130_vm10, %v7120_v43, %v7123_v53 }
 0x33b   :  { %v7787_v35 = vadd.s32 4294967294, %v7062_v42  ;;  %v13384_v47 = vsub.s32 %v7262_v4, %v7265_v39  ;;  %v7140_v38 = vsel %vm7132_vm14, %v7123_v53, %v7139_v36  ;;  %v7114_v6 = vshrl.u32 %v15028_v11, %v7113_v15 }
 0x33c   :  { %v7135_v56 = vsel %vm7133_vm9, %v7123_v53, 2102212464  ;;  %v7143_v24 = vsel %vm7133_vm9, %v7129_v10, 1326507024  ;;  %v7141_v17 = vsel %vm7131_vm11, %v7138_v21, %v7140_v38  ;;  %v7310_v0 = vshrl.u32 %v7309_v32, 23 }
 0x33d   :  { %vm7788_vm13 = vcmp.lt.s32.totalorder %v7787_v35, 0  ;;  %v7268_v48 = vsub.s32 0, %v13384_v47  ;;  %v7144_v51 = vsel %vm7132_vm14, %v7126_v26, %v7143_v24  ;;  %vm13412_vm15 = vcmp.le.f32.partialorder %v6994_v20, 0.7853982 }
 0x33e   :  { %v7065_v54 = vsel %vm7788_vm13, 0, %v7787_v35  ;;  %v7145_v15 = vsel %vm7131_vm11, %v7142_v5, %v7144_v51  ;;  %v7134_v44 = vsel %vm7130_vm10, %v7114_v6, %v7117_v34  ;;  %v7136_v2 = vsel %vm7132_vm14, %v7120_v43, %v7135_v56 }
 0x33f   :  { %v7066_v7 = vsub.s32 32, %v7065_v54  ;;  %v7070_v62 = vsub.s32 4294967266, %v7065_v54  ;;  %v7067_v29 = vshll.u32 %v7058_v18, %v7065_v54  ;;  %v7794_v4 = vmin.u32 %v7268_v48, %v13384_v47 }
 0x340   :  { %v13407_v60 = vmul.u32.u64.low %v13374_v19, %v7145_v15  ;;  %v13408_v30 = vmul.u32.u64.high %v13374_v19, %v7145_v15, %v13407_v60  ;;  %v7081_v25 = vsel %vm6996_vm12, %v7080_v31, %v13336_v1  ;;  %vm7204_vm1 = vcmp.lt.s32.totalorder %v13262_v13, 0 }
 0x341   :  { %v7068_v46 = vshrl.u32 %v7050_v41, %v7066_v7  ;;  %v7071_v9 = vadd.s32 127, %v7070_v62  ;;  %v7270_v14 = vclz %v7794_v4  ;;  %v7306_v8 = vand.u32 2147483647, %v13359_v59 }
 0x342   :  { %v13424_v41 = vmul.u32.u64.low %v13374_v19, %v7141_v17  ;;  %v13425_v42 = vmul.u32.u64.high %v13374_v19, %v7141_v17, %v13424_v41  ;;  %v7797_v26 = vadd.s32 4294967169, %v7310_v0  ;;  %v7258_v43 = vadd.s32 %v13331_v40, %v13340_v55 }
 0x343   :  { %v7069_v37 = vor.u32 %v7068_v46, %v7067_v29  ;;  %v7072_v28 = vshll.u32 %v7071_v9, 23  ;;  %v7795_v20 = vadd.s32 4294967294, %v7270_v14  ;;  %v7137_v35 = vsel %vm7131_vm11, %v7134_v44, %v7136_v2 }
 0x344   :  { %v7083_v1 = vsel %vm13412_vm15, 0, %v7081_v25  ;;  %vm7155_vm2 = vc.u32 %v13408_v30, %v13424_v41  ;;  %v7316_v53 = vadd.s32 1, %v7797_v26  ;;  %v7288_v36 = vsub.s32 4, %v13370_v63 }
 0x345   :  { %v7073_v49 = vor.u32 4788187, %v7072_v28  ;;  %v7076_v33 = vcvt.s32.f32 %v7069_v37  ;;  %vm7796_vm3 = vcmp.lt.s32.totalorder %v7795_v20, 0  ;;  %v7156_v32 = vadd.s32 1, %v13425_v42 }
 0x346   :  { %v7273_v10 = vsel %vm7796_vm3, 0, %v7795_v20  ;;  %v7153_v40 = vmul.u32 %v13374_v19, %v7137_v35  ;;  %vm7317_vm5 = vcmp.gt.s32.totalorder %v7316_v53, 0  ;;  %v7087_v58 = vadd.s32 3, %v7083_v1 }
 0x347   :  { %v7074_v34 = vand.u32 2147483647, %v7073_v49  ;;  %v7274_v31 = vsub.s32 32, %v7273_v10  ;;  %v7278_v54 = vsub.s32 4294967266, %v7273_v10  ;;  %v7157_v21 = vsel %vm7155_vm2, %v7156_v32, %v13425_v42 }
 0x348   :  { %v7318_v7 = vsel %vm7317_vm5, %v7316_v53, 0  ;;  %v7275_v62 = vshll.u32 %v13384_v47, %v7273_v10  ;;  %v7158_v48 = vadd.s32 %v7157_v21, %v7153_v40  ;;  %v7289_v56 = vsel %vm7204_vm1, %v7288_v36, %v13370_v63 }
 0x349   :  { %v7077_v39 = vmul.f32 %v7076_v33, %v7074_v34  ;;  %v7276_v38 = vshrl.u32 %v7258_v43, %v7274_v31  ;;  %v7279_v5 = vadd.s32 127, %v7278_v54  ;;  %v7320_v24 = vand.u32 31, %v7318_v7 }
 0x34a   :  { %v7159_v9 = vadd.s32 536870912, %v7158_v48  ;;  %v13451_v47 = vand.u32 3, %v7087_v58  ;;  %vm13455_vm0 = vcmp.le.f32.partialorder %v7202_v16, 0.7853982  ;;  %v7313_v15 = vand.u32 8388607, %v7306_v8 }
 0x34b   :  { %v7078_v55 = vxor.u32 2147483648, %v7077_v39  ;;  %v7277_v29 = vor.u32 %v7276_v38, %v7275_v62  ;;  %v7280_v46 = vshll.u32 %v7279_v5, 23  ;;  %v7321_v4 = vsub.s32 32, %v7320_v24 }
 0x34c   :  { %v13459_v17 = vshrl.u32 %v7159_v9, 30  ;;  %v7291_v0 = vsel %vm13455_vm0, 0, %v7289_v56  ;;  %vm7093_vm4 = vcmp.eq.s32.totalorder %v13451_v47, 2  ;;  %v7332_v44 = vshll.u32 %v15131_v45, %v7320_v24 }
 0x34d   :  { %v7079_v6 = vsel %vm6996_vm12, %v7078_v55, %v7077_v39  ;;  %v7281_v63 = vor.u32 4788187, %v7280_v46  ;;  %v7284_v28 = vcvt.s32.f32 %v7277_v29  ;;  %v7324_v16 = vshrl.u32 %v15037_v23, %v7321_v4 }
 0x34e   :  { %v7082_v19 = vsel %vm13412_vm15, %v13254_v22, %v7079_v6  ;;  %v7161_v60 = vshll.u32 %v13459_v17, 30  ;;  %v7327_v18 = vshrl.u32 %v15130_v61, %v7321_v4  ;;  %v7330_v14 = vshrl.u32 %v15131_v45, %v7321_v4 }
 0x34f   :  { %9371 = vcosq.f32 %v7082_v19  ;;  %v7282_v37 = vand.u32 2147483647, %v7281_v63  ;;  %v7333_v2 = vshrl.u32 %v15132_v50, %v7321_v4  ;;  %vm7090_vm7 = vcmp.eq.s32.totalorder %v13451_v47, 0 }
 0x350   :  { %9373 = vsinq.f32 %v7082_v19  ;;  %v13473_v25 = vsub.s32 %v7158_v48, %v7161_v60  ;;  %v7314_v42 = vor.u32 8388608, %v7313_v15  ;;  %v7319_v20 = vshrl.u32 %v7318_v7, 5 }
 0x351   :  { %v7285_v49 = vmul.f32 %v7284_v28, %v7282_v37  ;;  %vm7089_vm6 = vcmp.lt.s32.totalorder %v13451_v47, 2  ;;  %v7323_v26 = vshll.u32 %v15028_v11, %v7320_v24  ;;  %v7326_v34 = vshll.u32 %v15037_v23, %v7320_v24 }
 0x352   :  { %v7329_v33 = vshll.u32 %v15130_v61, %v7320_v24  ;;  %v7334_v43 = vor.u32 %v7333_v2, %v7332_v44  ;;  %vm7086_vm8 = vweird.f32 %v13254_v22  ;;  %v7295_v1 = vadd.s32 3, %v7291_v0 }
 0x353   :  { %v7286_v35 = vxor.u32 2147483648, %v7285_v49  ;;  %v7164_v53 = vsub.s32 0, %v13473_v25  ;;  %v7336_v39 = vshrl.u32 %v15133_v57, %v7321_v4  ;;  %v7154_v10 = vadd.s32 %v13424_v41, %v13408_v30 }
 0x354   :  { %v7325_v36 = vor.u32 %v7324_v16, %v7323_v26  ;;  %v7328_v32 = vor.u32 %v7327_v18, %v7326_v34  ;;  %v7331_v31 = vor.u32 %v7330_v14, %v7329_v33  ;;  %v7335_v55 = vshll.u32 %v15132_v50, %v7320_v24 }
 0x355   :  { %v7287_v54 = vsel %vm7204_vm1, %v7286_v35, %v7285_v49  ;;  %v7790_v40 = vmin.u32 %v7164_v53, %v13473_v25  ;;  %vm7341_vm9 = vcmp.lt.s32.totalorder %v7319_v20, 4  ;;  %vm7338_vm12 = vcmp.lt.s32.totalorder %v7319_v20, 1 }
 0x356   :  { %v7290_v21 = vsel %vm13455_vm0, %v13262_v13, %v7287_v54  ;;  %v7347_v7 = vsel %vm7341_vm9, %v7334_v43, 920167782  ;;  %v7354_v30 = vshll.u32 %v7314_v42, 8  ;;  %v7337_v5 = vor.u32 %v7336_v39, %v7335_v55 }
 0x357   :  { %9375 = vcosq.f32 %v7290_v21  ;;  %v7166_v38 = vclz %v7790_v40  ;;  %vm7340_vm13 = vcmp.lt.s32.totalorder %v7319_v20, 3  ;;  %v7346_v6 = vsel %vm7338_vm12, %v7325_v36, %v7328_v32 }
 0x358   :  { %9377 = vsinq.f32 %v7290_v21  ;;  %v7322_v19 = vshrl.u32 %v15028_v11, %v7321_v4  ;;  %v7348_v29 = vsel %vm7340_vm13, %v7331_v31, %v7347_v7  ;;  %vm7339_vm10 = vcmp.lt.s32.totalorder %v7319_v20, 2 }
 0x359   :  { %v9372_v58 = vpop.eup %9371  ;;  %v7791_v24 = vadd.s32 4294967294, %v7166_v38  ;;  %v7343_v9 = vsel %vm7341_vm9, %v7331_v31, 2102212464  ;;  %v7350_v51 = vsel %vm7338_vm12, %v7328_v32, %v7331_v31  ;;  %v7349_v15 = vsel %vm7339_vm10, %v7346_v6, %v7348_v29 }
 0x35a   :  { %v9374_v41 = vpop.eup %9373  ;;  %v7094_v62 = vxor.u32 2147483648, %v9372_v58  ;;  %v7351_v0 = vsel %vm7341_vm9, %v7337_v5, 1326507024  ;;  %v7342_v28 = vsel %vm7338_vm12, %v7322_v19, %v7325_v36  ;;  %v7344_v14 = vsel %vm7340_vm13, %v7328_v32, %v7343_v9 }
 0x35b   :  { %v7091_v48 = vxor.u32 2147483648, %v9374_v41  ;;  %vm7792_vm11 = vcmp.lt.s32.totalorder %v7791_v24, 0  ;;  %v7352_v60 = vsel %vm7340_vm13, %v7334_v43, %v7351_v0  ;;  %v7296_v22 = vand.u32 3, %v7295_v1 }
 0x35c   :  { %v7095_v56 = vsel %vm7093_vm4, %v7094_v62, %v9374_v41  ;;  %v7169_v37 = vsel %vm7792_vm11, 0, %v7791_v24  ;;  %v7353_v47 = vsel %vm7339_vm10, %v7350_v51, %v7352_v60  ;;  %v7345_v43 = vsel %vm7339_vm10, %v7342_v28, %v7344_v14 }
 0x35d   :  { %v7092_v46 = vsel %vm7090_vm7, %v9372_v58, %v7091_v48  ;;  %v7170_v16 = vsub.s32 32, %v7169_v37  ;;  %v7174_v18 = vsub.s32 4294967266, %v7169_v37  ;;  %v7171_v26 = vshll.u32 %v13473_v25, %v7169_v37 }
 0x35e   :  { %v7096_v63 = vsel %vm7089_vm6, %v7092_v46, %v7095_v56  ;;  %v13511_v44 = vmul.u32.u64.low %v7354_v30, %v7353_v47  ;;  %v13512_v2 = vmul.u32.u64.high %v7354_v30, %v7353_v47, %v13511_v44  ;;  %vm7301_vm15 = vcmp.eq.s32.totalorder %v7296_v22, 2 }
 0x35f   :  { %v7097_v4 = vsel %vm7086_vm8, nan, %v7096_v63  ;;  %v13514_v49 = vmul.u32.u64.low %v7354_v30, %v7349_v15  ;;  %v13515_v42 = vmul.u32.u64.high %v7354_v30, %v7349_v15, %v13514_v49  ;;  %v7172_v34 = vshrl.u32 %v7154_v10, %v7170_v16 }
 0x360   :  { %7730 = vst [vmem:[#allocation8 + $0x40] sm:$0xff] %v7097_v4  ;;  %v7175_v33 = vadd.s32 127, %v7174_v18  ;;  %v7361_v55 = vmul.u32 %v7354_v30, %v7345_v43  ;;  %vm7297_vm1 = vcmp.lt.s32.totalorder %v7296_v22, 2  ;;  %vm7298_vm3 = vcmp.eq.s32.totalorder %v7296_v22, 0 }
 0x361   :  { %v9376_v35 = vpop.eup %9375  ;;  %v7173_v53 = vor.u32 %v7172_v34, %v7171_v26  ;;  %vm7363_vm14 = vc.u32 %v13512_v2, %v13514_v49  ;;  %v7364_v31 = vadd.s32 1, %v13515_v42  ;;  %vm7294_vm2 = vweird.f32 %v13262_v13 }
 0x362   :  { %v7176_v39 = vshll.u32 %v7175_v33, 23  ;;  %v9378_v36 = vpop.eup %9377  ;;  %v7302_v32 = vxor.u32 2147483648, %v9376_v35  ;;  %v7184_v41 = vsub.s32 4, %v13459_v17  ;;  %vm7100_vm5 = vcmp.lt.s32.totalorder %v13256_v27, 0 }
 0x363   :  { %v7299_v54 = vxor.u32 2147483648, %v9378_v36  ;;  %v7365_v1 = vsel %vm7363_vm14, %v7364_v31, %v13515_v42  ;;  %v7180_v58 = vcvt.s32.f32 %v7173_v53  ;;  %vm7099_vm0 = vcmp.le.f32.partialorder %v7098_v52, 0.7853982 }
 0x364   :  { %v7177_v40 = vor.u32 4788187, %v7176_v39  ;;  %v7303_v25 = vsel %vm7301_vm15, %v7302_v32, %v9378_v36  ;;  %v7366_v21 = vadd.s32 %v7365_v1, %v7361_v55  ;;  %v7185_v6 = vsel %vm7100_vm5, %v7184_v41, %v13459_v17 }
 0x365   :  { %v7300_v20 = vsel %vm7298_vm3, %v9376_v35, %v7299_v54  ;;  %v7187_v19 = vsel %vm7099_vm0, 0, %v7185_v6  ;;  %v7362_v60 = vadd.s32 %v13514_v49, %v13512_v2  ;;  %vm7190_vm9 = vweird.f32 %v13256_v27 }
 0x366   :  { %v7178_v10 = vand.u32 2147483647, %v7177_v40  ;;  %v7304_v7 = vsel %vm7297_vm1, %v7300_v20, %v7303_v25  ;;  %v7367_v5 = vadd.s32 536870912, %v7366_v21  ;;  %v7191_v9 = vadd.s32 3, %v7187_v19 }
 0x367   :  { %v7305_v62 = vsel %vm7294_vm2, nan, %v7304_v7  ;;  %vm7308_vm12 = vcmp.lt.s32.totalorder %v13359_v59, 0  ;;  %vm7307_vm13 = vcmp.le.f32.partialorder %v7306_v8, 0.7853982  ;;  %vm7398_vm15 = vweird.f32 %v13359_v59 }
 0x368   :  { %v7181_v38 = vmul.f32 %v7180_v58, %v7178_v10  ;;  %7732 = vst [vmem:[#allocation8 + $0x50] sm:$0xff] %v7305_v62  ;;  %v7368_v48 = vshrl.u32 %v7367_v5, 30  ;;  %v7192_v15 = vand.u32 3, %v7191_v9  ;;  %v15235_v41 = vsub.s32 4, %v15226_v12 }
 0x36a   :  { %v7182_v30 = vxor.u32 2147483648, %v7181_v38  ;;  %v7369_v24 = vshll.u32 %v7368_v48, 30  ;;  %vm7197_vm7 = vcmp.eq.s32.totalorder %v7192_v15, 2  ;;  %vm7193_vm6 = vcmp.lt.s32.totalorder %v7192_v15, 2 }
 0x36b   :  { %vm7194_vm8 = vcmp.eq.s32.totalorder %v7192_v15, 0  ;;  %v7392_v49 = vsub.s32 4, %v7368_v48  ;;  %v288_v62 = vrot.slane %v13235_v3, %v15235_v41 }
 0x36c   :  { %v7183_v56 = vsel %vm7100_vm5, %v7182_v30, %v7181_v38  ;;  %v7370_v29 = vsub.s32 %v7366_v21, %v7369_v24  ;;  %v15236_v38 = vsub.s32 5, %v15226_v12 }
 0x36d   :  { %v7186_v13 = vsel %vm7099_vm0, %v13256_v27, %v7183_v56  ;;  %v7393_v31 = vsel %vm7308_vm12, %v7392_v49, %v7368_v48  ;;  %v15237_v48 = vsub.s32 6, %v15226_v12 }
 0x36e   :  { %9379 = vcosq.f32 %v7186_v13  ;;  %v7372_v46 = vsub.s32 0, %v7370_v29  ;;  %v7395_v54 = vsel %vm7307_vm13, 0, %v7393_v31  ;;  %v292_v5 = vrot.slane %v13235_v3, %v15236_v38 }
 0x36f   :  { %9381 = vsinq.f32 %v7186_v13  ;;  %v7399_v40 = vadd.s32 3, %v7395_v54  ;;  %v296_v6 = vrot.slane %v13235_v3, %v15237_v48 }
 0x370   :  { %v7798_v51 = vmin.u32 %v7372_v46, %v7370_v29 }
 0x371   :  { %v7400_v55 = vand.u32 3, %v7399_v40 }
 0x372   :  { %v7374_v63 = vclz %v7798_v51 }
 0x373   :  { %vm7405_vm10 = vcmp.eq.s32.totalorder %v7400_v55, 2  ;;  %vm7402_vm11 = vcmp.eq.s32.totalorder %v7400_v55, 0  ;;  %vm7401_vm14 = vcmp.lt.s32.totalorder %v7400_v55, 2 }
 0x374   :  { %v7799_v0 = vadd.s32 4294967294, %v7374_v63 }
 0x376   :  { %vm7800_vm4 = vcmp.lt.s32.totalorder %v7799_v0, 0 }
 0x377   :  { %v7377_v52 = vsel %vm7800_vm4, 0, %v7799_v0 }
 0x378   :  { %v9380_v4 = vpop.eup %9379  ;;  %v7378_v16 = vsub.s32 32, %v7377_v52  ;;  %v7382_v18 = vsub.s32 4294967266, %v7377_v52  ;;  %v7379_v44 = vshll.u32 %v7370_v29, %v7377_v52 }
 0x379   :  { %v9382_v17 = vpop.eup %9381  ;;  %v7198_v37 = vxor.u32 2147483648, %v9380_v4 }
 0x37a   :  { %v7195_v28 = vxor.u32 2147483648, %v9382_v17  ;;  %v7380_v42 = vshrl.u32 %v7362_v60, %v7378_v16  ;;  %v7383_v22 = vadd.s32 127, %v7382_v18 }
 0x37b   :  { %v7199_v14 = vsel %vm7197_vm7, %v7198_v37, %v9382_v17 }
 0x37c   :  { %v7196_v47 = vsel %vm7194_vm8, %v9380_v4, %v7195_v28  ;;  %v7381_v33 = vor.u32 %v7380_v42, %v7379_v44  ;;  %v7384_v43 = vshll.u32 %v7383_v22, 23 }
 0x37d   :  { %v7200_v26 = vsel %vm7193_vm6, %v7196_v47, %v7199_v14 }
 0x37e   :  { %v7201_v34 = vsel %vm7190_vm9, nan, %v7200_v26  ;;  %v7385_v35 = vor.u32 4788187, %v7384_v43  ;;  %v7388_v39 = vcvt.s32.f32 %v7381_v33 }
 0x37f   :  { %7731 = vst [vmem:[#allocation8 + $0x48] sm:$0xff] %v7201_v34 }
 0x380   :  { %v7386_v53 = vand.u32 2147483647, %v7385_v35 }
 0x382   :  { %v7389_v2 = vmul.f32 %v7388_v39, %v7386_v53 }
 0x384   :  { %v7390_v36 = vxor.u32 2147483648, %v7389_v2 }
 0x386   :  { %v7391_v32 = vsel %vm7308_vm12, %v7390_v36, %v7389_v2 }
 0x387   :  { %v7394_v27 = vsel %vm7307_vm13, %v13359_v59, %v7391_v32 }
 0x388   :  { %9383 = vcosq.f32 %v7394_v27 }
 0x389   :  { %9385 = vsinq.f32 %v7394_v27 }
 0x392   :  { %v9384_v25 = vpop.eup %9383 }
 0x393   :  { %v9386_v1 = vpop.eup %9385  ;;  %v7406_v20 = vxor.u32 2147483648, %v9384_v25 }
 0x394   :  { %v7403_v10 = vxor.u32 2147483648, %v9386_v1 }
 0x395   :  { %v7407_v58 = vsel %vm7405_vm10, %v7406_v20, %v9386_v1 }
 0x396   :  { %v7404_v21 = vsel %vm7402_vm11, %v9384_v25, %v7403_v10 }
 0x397   :  { %v7408_v8 = vsel %vm7401_vm14, %v7404_v21, %v7407_v58 }
 0x398   :  { %v7409_v7 = vsel %vm7398_vm15, nan, %v7408_v8 }
 0x399   :  { %7733 = vst [vmem:[#allocation8 + $0x58] sm:$0xff] %v7409_v7 }
 0x3e6   :  { %v5568_v30 = vpop.f32.mrb[6].mxu0 }
 0x3e7   :  { %v13545_v56 = vadd.f32 %v5568_v30, %v288_v62  ;;  %v5570_v24 = vpop.f32.mrb[7].mxu0 }
 0x3e8   :  { %v6158_v59 = vpop.f32.mrb[6].mxu1  ;;  %v13547_v13 = vadd.f32 %v5570_v24, %v292_v5 }
 0x3e9   :  { %v7410_v19 = vand.u32 2147483647, %v13545_v56  ;;  %v7413_v29 = vand.u32 2139095040, %v13545_v56  ;;  %v8052_v46 = vpop.f32.mrb[7].mxu1  ;;  %v13551_v9 = vadd.f32 %v6158_v59, %v296_v6 }
 0x3ea   :  { %v7517_v51 = vand.u32 2139095040, %v13547_v13  ;;  %v7514_v33 = vand.u32 2147483647, %v13547_v13 }
 0x3eb   :  { %v7414_v63 = vshrl.u32 %v7413_v29, 23  ;;  %v7417_v12 = vand.u32 8388607, %v7410_v19  ;;  %v7618_v3 = vand.u32 2147483647, %v13551_v9  ;;  %v7621_v15 = vand.u32 2139095040, %v13551_v9 }
 0x3ec   :  { %v7518_v4 = vshrl.u32 %v7517_v51, 23 }
 0x3ed   :  { %v7801_v0 = vadd.s32 4294967169, %v7414_v63  ;;  %v7622_v17 = vshrl.u32 %v7621_v15, 23  ;;  %v7625_v37 = vand.u32 8388607, %v7618_v3  ;;  %v7418_v60 = vor.u32 8388608, %v7417_v12 }
 0x3ee   :  { %v7805_v28 = vadd.s32 4294967169, %v7518_v4 }
 0x3ef   :  { %v7420_v52 = vadd.s32 1, %v7801_v0  ;;  %v7809_v16 = vadd.s32 4294967169, %v7622_v17  ;;  %v7626_v18 = vor.u32 8388608, %v7625_v37  ;;  %v13560_v26 = vshll.u32 %v7418_v60, 8 }
 0x3f0   :  { %v7524_v14 = vadd.s32 1, %v7805_v28 }
 0x3f1   :  { %vm7421_vm1 = vcmp.gt.s32.totalorder %v7420_v52, 0  ;;  %v7628_v44 = vadd.s32 1, %v7809_v16  ;;  %v13562_v34 = vshll.u32 %v7626_v18, 8 }
 0x3f2   :  { %v7422_v47 = vsel %vm7421_vm1, %v7420_v52, 0  ;;  %vm7525_vm2 = vcmp.gt.s32.totalorder %v7524_v14, 0 }
 0x3f3   :  { %v7423_v42 = vshrl.u32 %v7422_v47, 5  ;;  %v7424_v22 = vand.u32 31, %v7422_v47  ;;  %vm7629_vm3 = vcmp.gt.s32.totalorder %v7628_v44, 0  ;;  %v13584_v59 = vsel %vm7525_vm2, %v7524_v14, 0 }
 0x3f4   :  { %v7630_v20 = vsel %vm7629_vm3, %v7628_v44, 0 }
 0x3f5   :  { %v7425_v43 = vsub.s32 32, %v7424_v22  ;;  %v7427_v35 = vshll.u32 %v15028_v11, %v7424_v22  ;;  %v7430_v53 = vshll.u32 %v15037_v23, %v7424_v22  ;;  %v7433_v39 = vshll.u32 %v15130_v61, %v7424_v22 }
 0x3f6   :  { %v7436_v2 = vshll.u32 %v15131_v45, %v7424_v22  ;;  %v7439_v49 = vshll.u32 %v15132_v50, %v7424_v22  ;;  %vm7442_vm5 = vcmp.lt.s32.totalorder %v7423_v42, 1  ;;  %vm7444_vm0 = vcmp.lt.s32.totalorder %v7423_v42, 3 }
 0x3f7   :  { %v7428_v36 = vshrl.u32 %v15037_v23, %v7425_v43  ;;  %v7431_v32 = vshrl.u32 %v15130_v61, %v7425_v43  ;;  %v7434_v31 = vshrl.u32 %v15131_v45, %v7425_v43  ;;  %v7426_v27 = vshrl.u32 %v15028_v11, %v7425_v43 }
 0x3f8   :  { %v7437_v54 = vshrl.u32 %v15132_v50, %v7425_v43  ;;  %v7440_v40 = vshrl.u32 %v15133_v57, %v7425_v43  ;;  %vm7445_vm4 = vcmp.lt.s32.totalorder %v7423_v42, 4  ;;  %v7632_v21 = vand.u32 31, %v7630_v20 }
 0x3f9   :  { %v7429_v55 = vor.u32 %v7428_v36, %v7427_v35  ;;  %v7432_v25 = vor.u32 %v7431_v32, %v7430_v53  ;;  %v7435_v1 = vor.u32 %v7434_v31, %v7433_v39  ;;  %vm7443_vm7 = vcmp.lt.s32.totalorder %v7423_v42, 2 }
 0x3fa   :  { %v7438_v10 = vor.u32 %v7437_v54, %v7436_v2  ;;  %v7441_v58 = vor.u32 %v7440_v40, %v7439_v49  ;;  %v7633_v48 = vsub.s32 32, %v7632_v21  ;;  %v7631_v63 = vshrl.u32 %v7630_v20, 5 }
 0x3fb   :  { %v7446_v8 = vsel %vm7442_vm5, %v7426_v27, %v7429_v55  ;;  %v7447_v7 = vsel %vm7445_vm4, %v7435_v1, 2102212464  ;;  %v7450_v41 = vsel %vm7442_vm5, %v7429_v55, %v7432_v25  ;;  %v7454_v62 = vsel %vm7442_vm5, %v7432_v25, %v7435_v1 }
 0x3fc   :  { %v7448_v38 = vsel %vm7444_vm0, %v7432_v25, %v7447_v7  ;;  %v7451_v5 = vsel %vm7445_vm4, %v7438_v10, 920167782  ;;  %v7455_v30 = vsel %vm7445_vm4, %v7441_v58, 1326507024  ;;  %v7635_v17 = vshll.u32 %v15028_v11, %v7632_v21 }
 0x3fd   :  { %v7452_v6 = vsel %vm7444_vm0, %v7435_v1, %v7451_v5  ;;  %v7456_v24 = vsel %vm7444_vm0, %v7438_v10, %v7455_v30  ;;  %v7449_v29 = vsel %vm7443_vm7, %v7446_v8, %v7448_v38  ;;  %v7636_v37 = vshrl.u32 %v15037_v23, %v7633_v48 }
 0x3fe   :  { %v7453_v46 = vsel %vm7443_vm7, %v7450_v41, %v7452_v6  ;;  %v7457_v51 = vsel %vm7443_vm7, %v7454_v62, %v7456_v24  ;;  %v7638_v52 = vshll.u32 %v15037_v23, %v7632_v21  ;;  %v7639_v28 = vshrl.u32 %v15130_v61, %v7633_v48 }
 0x3ff   :  { %v13587_v12 = vmul.u32.u64.low %v13560_v26, %v7457_v51  ;;  %v13588_v15 = vmul.u32.u64.high %v13560_v26, %v7457_v51, %v13587_v12  ;;  %v13591_v0 = vmul.u32.u64.low %v13560_v26, %v7453_v46  ;;  %v13592_v4 = vmul.u32.u64.high %v13560_v26, %v7453_v46, %v13591_v0 }
 0x400   :  { %v7641_v60 = vshll.u32 %v15130_v61, %v7632_v21  ;;  %v7642_v16 = vshrl.u32 %v15131_v45, %v7633_v48  ;;  %v7644_v18 = vshll.u32 %v15131_v45, %v7632_v21  ;;  %v7645_v14 = vshrl.u32 %v15132_v50, %v7633_v48 }
 0x401   :  { %v7637_v47 = vor.u32 %v7636_v37, %v7635_v17  ;;  %v7640_v44 = vor.u32 %v7639_v28, %v7638_v52  ;;  %v7647_v42 = vshll.u32 %v15132_v50, %v7632_v21  ;;  %v7648_v22 = vshrl.u32 %v15133_v57, %v7633_v48 }
 0x402   :  { %v7465_v43 = vmul.u32 %v13560_v26, %v7449_v29  ;;  %vm7467_vm6 = vc.u32 %v13588_v15, %v13591_v0  ;;  %v7468_v35 = vadd.s32 1, %v13592_v4  ;;  %v7643_v53 = vor.u32 %v7642_v16, %v7641_v60 }
 0x403   :  { %v7634_v39 = vshrl.u32 %v15028_v11, %v7633_v48  ;;  %v7646_v2 = vor.u32 %v7645_v14, %v7644_v18  ;;  %v7649_v49 = vor.u32 %v7648_v22, %v7647_v42  ;;  %vm7650_vm8 = vcmp.lt.s32.totalorder %v7631_v63, 1 }
 0x404   :  { %v7469_v36 = vsel %vm7467_vm6, %v7468_v35, %v13592_v4  ;;  %vm7652_vm9 = vcmp.lt.s32.totalorder %v7631_v63, 3  ;;  %vm7653_vm12 = vcmp.lt.s32.totalorder %v7631_v63, 4  ;;  %v7658_v32 = vsel %vm7650_vm8, %v7637_v47, %v7640_v44 }
 0x405   :  { %v7470_v31 = vadd.s32 %v7469_v36, %v7465_v43  ;;  %v7655_v27 = vsel %vm7653_vm12, %v7643_v53, 2102212464  ;;  %v7659_v54 = vsel %vm7653_vm12, %v7646_v2, 920167782  ;;  %v7662_v26 = vsel %vm7650_vm8, %v7640_v44, %v7643_v53 }
 0x406   :  { %vm7651_vm13 = vcmp.lt.s32.totalorder %v7631_v63, 2  ;;  %v7654_v40 = vsel %vm7650_vm8, %v7634_v39, %v7637_v47  ;;  %v7660_v55 = vsel %vm7652_vm9, %v7643_v53, %v7659_v54  ;;  %v7663_v25 = vsel %vm7653_vm12, %v7649_v49, 1326507024 }
 0x407   :  { %v7471_v1 = vadd.s32 536870912, %v7470_v31  ;;  %v7656_v20 = vsel %vm7652_vm9, %v7640_v44, %v7655_v27  ;;  %v7661_v10 = vsel %vm7651_vm13, %v7658_v32, %v7660_v55  ;;  %v7664_v58 = vsel %vm7652_vm9, %v7646_v2, %v7663_v25 }
 0x408   :  { %v7665_v21 = vsel %vm7651_vm13, %v7662_v26, %v7664_v58  ;;  %v13612_v8 = vmul.u32.u64.low %v13562_v34, %v7661_v10  ;;  %v13613_v7 = vmul.u32.u64.high %v13562_v34, %v7661_v10, %v13612_v8  ;;  %v7521_v41 = vand.u32 8388607, %v7514_v33 }
 0x409   :  { %v13618_v62 = vshrl.u32 %v7471_v1, 30  ;;  %v13621_v38 = vmul.u32.u64.low %v13562_v34, %v7665_v21  ;;  %v13622_v5 = vmul.u32.u64.high %v13562_v34, %v7665_v21, %v13621_v38  ;;  %v7528_v30 = vand.u32 31, %v13584_v59 }
 0x40a   :  { %v7657_v48 = vsel %vm7651_vm13, %v7654_v40, %v7656_v20  ;;  %v7676_v29 = vadd.s32 1, %v13613_v7  ;;  %v7522_v63 = vor.u32 8388608, %v7521_v41  ;;  %v7527_v4 = vshrl.u32 %v13584_v59, 5 }
 0x40b   :  { %v7473_v6 = vshll.u32 %v13618_v62, 30  ;;  %v7529_v24 = vsub.s32 32, %v7528_v30  ;;  %v7673_v51 = vmul.u32 %v13562_v34, %v7657_v48  ;;  %vm7675_vm10 = vc.u32 %v13622_v5, %v13612_v8 }
 0x40c   :  { %v7677_v12 = vsel %vm7675_vm10, %v7676_v29, %v13613_v7  ;;  %v7531_v17 = vshll.u32 %v15028_v11, %v7528_v30  ;;  %v7534_v60 = vshll.u32 %v15037_v23, %v7528_v30  ;;  %v7537_v34 = vshll.u32 %v15130_v61, %v7528_v30 }
 0x40d   :  { %v7474_v46 = vsub.s32 %v7470_v31, %v7473_v6  ;;  %v7532_v37 = vshrl.u32 %v15037_v23, %v7529_v24  ;;  %v7678_v28 = vadd.s32 %v7677_v12, %v7673_v51  ;;  %v7535_v16 = vshrl.u32 %v15130_v61, %v7529_v24 }
 0x40e   :  { %v7538_v18 = vshrl.u32 %v15131_v45, %v7529_v24  ;;  %v7540_v14 = vshll.u32 %v15131_v45, %v7528_v30  ;;  %v7541_v47 = vshrl.u32 %v15132_v50, %v7529_v24  ;;  %v7543_v22 = vshll.u32 %v15132_v50, %v7528_v30 }
 0x40f   :  { %v7476_v52 = vsub.s32 0, %v7474_v46  ;;  %v7679_v59 = vadd.s32 536870912, %v7678_v28  ;;  %v7533_v42 = vor.u32 %v7532_v37, %v7531_v17  ;;  %v7536_v43 = vor.u32 %v7535_v16, %v7534_v60 }
 0x410   :  { %v7539_v35 = vor.u32 %v7538_v18, %v7537_v34  ;;  %v7542_v53 = vor.u32 %v7541_v47, %v7540_v14  ;;  %v7544_v23 = vshrl.u32 %v15133_v57, %v7529_v24  ;;  %v7562_v2 = vshll.u32 %v7522_v63, 8 }
 0x411   :  { %v7802_v44 = vmin.u32 %v7476_v52, %v7474_v46  ;;  %v7466_v61 = vadd.s32 %v13591_v0, %v13588_v15  ;;  %v13644_v49 = vshrl.u32 %v7679_v59, 30  ;;  %vm7549_vm11 = vcmp.lt.s32.totalorder %v7527_v4, 4 }
 0x412   :  { %v7545_v45 = vor.u32 %v7544_v23, %v7543_v22  ;;  %vm7546_vm14 = vcmp.lt.s32.totalorder %v7527_v4, 1  ;;  %vm7548_vm15 = vcmp.lt.s32.totalorder %v7527_v4, 3  ;;  %v7555_v32 = vsel %vm7549_vm11, %v7542_v53, 920167782 }
 0x413   :  { %v7478_v39 = vclz %v7802_v44  ;;  %v7681_v50 = vshll.u32 %v13644_v49, 30  ;;  %v7530_v31 = vshrl.u32 %v15028_v11, %v7529_v24  ;;  %v7554_v27 = vsel %vm7546_vm14, %v7533_v42, %v7536_v43 }
 0x414   :  { %v7556_v57 = vsel %vm7548_vm15, %v7539_v35, %v7555_v32  ;;  %v7551_v54 = vsel %vm7549_vm11, %v7539_v35, 2102212464  ;;  %v7558_v15 = vsel %vm7546_vm14, %v7536_v43, %v7539_v35  ;;  %v7559_v0 = vsel %vm7549_vm11, %v7545_v45, 1326507024 }
 0x415   :  { %v7803_v36 = vadd.s32 4294967294, %v7478_v39  ;;  %v7682_v40 = vsub.s32 %v7678_v28, %v7681_v50  ;;  %vm7547_vm3 = vcmp.lt.s32.totalorder %v7527_v4, 2  ;;  %v7560_v55 = vsel %vm7548_vm15, %v7542_v53, %v7559_v0 }
 0x416   :  { %v7550_v20 = vsel %vm7546_vm14, %v7530_v31, %v7533_v42  ;;  %v7557_v11 = vsel %vm7547_vm3, %v7554_v27, %v7556_v57  ;;  %v7552_v21 = vsel %vm7548_vm15, %v7536_v43, %v7551_v54  ;;  %v7561_v7 = vsel %vm7547_vm3, %v7558_v15, %v7560_v55 }
 0x417   :  { %vm7804_vm1 = vcmp.lt.s32.totalorder %v7803_v36, 0  ;;  %v7684_v58 = vsub.s32 0, %v7682_v40  ;;  %v13656_v30 = vmul.u32.u64.low %v7562_v2, %v7561_v7  ;;  %v13657_v48 = vmul.u32.u64.high %v7562_v2, %v7561_v7, %v13656_v30 }
 0x418   :  { %v7481_v26 = vsel %vm7804_vm1, 0, %v7803_v36  ;;  %v13659_v24 = vmul.u32.u64.low %v7562_v2, %v7557_v11  ;;  %v13660_v29 = vmul.u32.u64.high %v7562_v2, %v7557_v11, %v13659_v24  ;;  %v7496_v34 = vsub.s32 4, %v13618_v62 }
 0x419   :  { %v7482_v25 = vsub.s32 32, %v7481_v26  ;;  %v7486_v1 = vsub.s32 4294967266, %v7481_v26  ;;  %v7483_v10 = vshll.u32 %v7474_v46, %v7481_v26  ;;  %v7810_v6 = vmin.u32 %v7684_v58, %v7682_v40 }
 0x41a   :  { %v7553_v46 = vsel %vm7547_vm3, %v7550_v20, %v7552_v21  ;;  %vm7571_vm2 = vc.u32 %v13657_v48, %v13659_v24  ;;  %v7572_v52 = vadd.s32 1, %v13660_v29  ;;  %v7674_v4 = vadd.s32 %v13612_v8, %v13622_v5 }
 0x41b   :  { %v7484_v41 = vshrl.u32 %v7466_v61, %v7482_v25  ;;  %v7487_v38 = vadd.s32 127, %v7486_v1  ;;  %v7686_v12 = vclz %v7810_v6  ;;  %v7569_v16 = vmul.u32 %v7562_v2, %v7553_v46 }
 0x41c   :  { %v7573_v18 = vsel %vm7571_vm2, %v7572_v52, %v13660_v29  ;;  %vm7412_vm0 = vcmp.lt.s32.totalorder %v13545_v56, 0  ;;  %vm7411_vm4 = vcmp.le.f32.partialorder %v7410_v19, 0.7853982  ;;  %v7704_v19 = vsub.s32 4, %v13644_v49 }
 0x41d   :  { %v7485_v51 = vor.u32 %v7484_v41, %v7483_v10  ;;  %v7488_v63 = vshll.u32 %v7487_v38, 23  ;;  %v7811_v37 = vadd.s32 4294967294, %v7686_v12  ;;  %v7574_v44 = vadd.s32 %v7573_v18, %v7569_v16 }
 0x41e   :  { %v7497_v35 = vsel %vm7412_vm0, %v7496_v34, %v13618_v62  ;;  %vm7620_vm7 = vcmp.lt.s32.totalorder %v13551_v9, 0  ;;  %vm13683_vm6 = vcmp.le.f32.partialorder %v7618_v3, 0.7853982  ;;  %v7570_v6 = vadd.s32 %v13659_v24, %v13657_v48 }
 0x41f   :  { %v7489_v17 = vor.u32 4788187, %v7488_v63  ;;  %v7492_v60 = vcvt.s32.f32 %v7485_v51  ;;  %vm7812_vm5 = vcmp.lt.s32.totalorder %v7811_v37, 0  ;;  %v7575_v43 = vadd.s32 536870912, %v7574_v44 }
 0x420   :  { %v7689_v47 = vsel %vm7812_vm5, 0, %v7811_v37  ;;  %v7499_v36 = vsel %vm7411_vm4, 0, %v7497_v35  ;;  %v7705_v20 = vsel %vm7620_vm7, %v7704_v19, %v13644_v49  ;;  %vm7502_vm10 = vweird.f32 %v13545_v56 }
 0x421   :  { %v7490_v28 = vand.u32 2147483647, %v7489_v17  ;;  %v7690_v59 = vsub.s32 32, %v7689_v47  ;;  %v7694_v42 = vsub.s32 4294967266, %v7689_v47  ;;  %v7691_v53 = vshll.u32 %v7682_v40, %v7689_v47 }
 0x422   :  { %v13675_v61 = vshrl.u32 %v7575_v43, 30  ;;  %v7503_v31 = vadd.s32 3, %v7499_v36  ;;  %v7707_v3 = vsel %vm13683_vm6, 0, %v7705_v20  ;;  %vm7710_vm1 = vweird.f32 %v13551_v9 }
 0x423   :  { %v7493_v14 = vmul.f32 %v7492_v60, %v7490_v28  ;;  %v7692_v23 = vshrl.u32 %v7674_v4, %v7690_v59  ;;  %v7695_v39 = vadd.s32 127, %v7694_v42  ;;  %v7711_v12 = vadd.s32 3, %v7707_v3 }
 0x424   :  { %v7577_v32 = vshll.u32 %v13675_v61, 30  ;;  %v7504_v26 = vand.u32 3, %v7503_v31  ;;  %v7600_v59 = vsub.s32 4, %v13675_v61  ;;  %vm7516_vm3 = vcmp.lt.s32.totalorder %v13547_v13, 0 }
 0x425   :  { %v7494_v22 = vxor.u32 2147483648, %v7493_v14  ;;  %v7693_v8 = vor.u32 %v7692_v23, %v7691_v53  ;;  %v7696_v5 = vshll.u32 %v7695_v39, 23  ;;  %v7712_v16 = vand.u32 3, %v7711_v12 }
 0x426   :  { %v7578_v62 = vsub.s32 %v7574_v44, %v7577_v32  ;;  %vm7509_vm8 = vcmp.eq.s32.totalorder %v7504_v26, 2  ;;  %vm7505_vm12 = vcmp.lt.s32.totalorder %v7504_v26, 2  ;;  %vm7506_vm13 = vcmp.eq.s32.totalorder %v7504_v26, 0 }
 0x427   :  { %v7495_v2 = vsel %vm7412_vm0, %v7494_v22, %v7493_v14  ;;  %v7697_v50 = vor.u32 4788187, %v7696_v5  ;;  %v7700_v57 = vcvt.s32.f32 %v7693_v8  ;;  %vm7717_vm11 = vcmp.eq.s32.totalorder %v7712_v16, 2 }
 0x428   :  { %v7498_v45 = vsel %vm7411_vm4, %v13545_v56, %v7495_v2  ;;  %v7580_v54 = vsub.s32 0, %v7578_v62  ;;  %vm7714_vm14 = vcmp.eq.s32.totalorder %v7712_v16, 0  ;;  %vm7713_vm15 = vcmp.lt.s32.totalorder %v7712_v16, 2 }
 0x429   :  { %9387 = vcosq.f32 %v7498_v45  ;;  %v7698_v27 = vand.u32 2147483647, %v7697_v50  ;;  %vm7515_vm2 = vcmp.le.f32.partialorder %v7514_v33, 0.7853982  ;;  %v7601_v23 = vsel %vm7516_vm3, %v7600_v59, %v13675_v61 }
 0x42a   :  { %9389 = vsinq.f32 %v7498_v45  ;;  %v7806_v0 = vmin.u32 %v7580_v54, %v7578_v62  ;;  %v7603_v2 = vsel %vm7515_vm2, 0, %v7601_v23 }
 0x42b   :  { %v7701_v15 = vmul.f32 %v7700_v57, %v7698_v27  ;;  %v7607_v45 = vadd.s32 3, %v7603_v2 }
 0x42c   :  { %v7582_v55 = vclz %v7806_v0 }
 0x42d   :  { %v7702_v40 = vxor.u32 2147483648, %v7701_v15  ;;  %v7608_v8 = vand.u32 3, %v7607_v45 }
 0x42e   :  { %v7807_v58 = vadd.s32 4294967294, %v7582_v55 }
 0x42f   :  { %v7703_v1 = vsel %vm7620_vm7, %v7702_v40, %v7701_v15  ;;  %vm7613_vm5 = vcmp.eq.s32.totalorder %v7608_v8, 2  ;;  %vm7610_vm0 = vcmp.eq.s32.totalorder %v7608_v8, 0  ;;  %vm7609_vm4 = vcmp.lt.s32.totalorder %v7608_v8, 2 }
 0x430   :  { %v7706_v10 = vsel %vm13683_vm6, %v13551_v9, %v7703_v1  ;;  %vm7808_vm9 = vcmp.lt.s32.totalorder %v7807_v58, 0  ;;  %vm7606_vm7 = vweird.f32 %v13547_v13 }
 0x431   :  { %9391 = vcosq.f32 %v7706_v10  ;;  %v7585_v49 = vsel %vm7808_vm9, 0, %v7807_v58 }
 0x432   :  { %9393 = vsinq.f32 %v7706_v10  ;;  %v7586_v29 = vsub.s32 32, %v7585_v49  ;;  %v7590_v51 = vsub.s32 4294967266, %v7585_v49  ;;  %v7587_v17 = vshll.u32 %v7578_v62, %v7585_v49 }
 0x433   :  { %v9388_v11 = vpop.eup %9387 }
 0x434   :  { %v9390_v21 = vpop.eup %9389  ;;  %v7510_v7 = vxor.u32 2147483648, %v9388_v11  ;;  %v7588_v37 = vshrl.u32 %v7570_v6, %v7586_v29  ;;  %v7591_v52 = vadd.s32 127, %v7590_v51 }
 0x435   :  { %v7507_v41 = vxor.u32 2147483648, %v9390_v21 }
 0x436   :  { %v7511_v38 = vsel %vm7509_vm8, %v7510_v7, %v9390_v21  ;;  %v7589_v28 = vor.u32 %v7588_v37, %v7587_v17  ;;  %v7592_v60 = vshll.u32 %v7591_v52, 23 }
 0x437   :  { %v7508_v30 = vsel %vm7506_vm13, %v9388_v11, %v7507_v41 }
 0x438   :  { %v7512_v63 = vsel %vm7505_vm12, %v7508_v30, %v7511_v38  ;;  %v7593_v34 = vor.u32 4788187, %v7592_v60  ;;  %v7596_v48 = vcvt.s32.f32 %v7589_v28 }
 0x439   :  { %v7513_v46 = vsel %vm7502_vm10, nan, %v7512_v63 }
 0x43a   :  { %7734 = vst [vmem:[#allocation8 + $0x60] sm:$0xff] %v7513_v46  ;;  %v7594_v44 = vand.u32 2147483647, %v7593_v34 }
 0x43b   :  { %v9392_v18 = vpop.eup %9391 }
 0x43c   :  { %v9394_v14 = vpop.eup %9393  ;;  %v7718_v47 = vxor.u32 2147483648, %v9392_v18  ;;  %v7597_v4 = vmul.f32 %v7596_v48, %v7594_v44 }
 0x43d   :  { %v7715_v24 = vxor.u32 2147483648, %v9394_v14 }
 0x43e   :  { %v7719_v56 = vsel %vm7717_vm11, %v7718_v47, %v9394_v14  ;;  %v7598_v43 = vxor.u32 2147483648, %v7597_v4 }
 0x43f   :  { %v7716_v42 = vsel %vm7714_vm14, %v9392_v18, %v7715_v24 }
 0x440   :  { %v7720_v22 = vsel %vm7713_vm15, %v7716_v42, %v7719_v56  ;;  %v7599_v53 = vsel %vm7516_vm3, %v7598_v43, %v7597_v4 }
 0x441   :  { %v7721_v35 = vsel %vm7710_vm1, nan, %v7720_v22  ;;  %v7602_v39 = vsel %vm7515_vm2, %v13547_v13, %v7599_v53 }
 0x442   :  { %7736 = vst [vmem:[#allocation8 + $0x70] sm:$0xff] %v7721_v35  ;;  %9395 = vcosq.f32 %v7602_v39 }
 0x443   :  { %9397 = vsinq.f32 %v7602_v39 }
 0x44c   :  { %v9396_v9 = vpop.eup %9395 }
 0x44d   :  { %v9398_v5 = vpop.eup %9397  ;;  %v7614_v36 = vxor.u32 2147483648, %v9396_v9 }
 0x44e   :  { %v7611_v32 = vxor.u32 2147483648, %v9398_v5 }
 0x44f   :  { %v7615_v50 = vsel %vm7613_vm5, %v7614_v36, %v9398_v5 }
 0x450   :  { %v7612_v33 = vsel %vm7610_vm0, %v9396_v9, %v7611_v32 }
 0x451   :  { %v7616_v61 = vsel %vm7609_vm4, %v7612_v33, %v7615_v50 }
 0x452   :  { %v7617_v62 = vsel %vm7606_vm7, nan, %v7616_v61 }
 0x453   :  { %7735 = vst [vmem:[#allocation8 + $0x68] sm:$0xff] %v7617_v62 }
 0x454   :  { %9477 = shalt.err (!%p9474_p0)
}
 0x455   :  { %s9478_s26 = scalar_lea.hbm %s13719_s3, 1920 }
 0x456   :  { %p9479_p1 = scmp.ne.s32.totalorder %s13719_s3, %s9478_s26  ;;  %p9482_p2 = scmp.lt.u32.totalorder %s9478_s26, %s13719_s3 }
 0x458   :  { %p9484_p3 = pnand %p9482_p2, %p9479_p1 }
 0x45a   :  { %9487 = shalt.err (!%p9484_p3)
}
 0x45b   :  { %7746 = dma.vmem_to_hbm [thread:$0]  %s7744_s22, 1920, %s13719_s3, [#allocation4]  }
 0x45c   :  { %9492 = dma.done.wait [#allocation4], 1920  }
 0x45d   :  { %9493 = vsyncadd [#allocation4], 4294965376 }
 0x45e   :  { %7750 = vsyncpa [#allocation3], 1 }
 0x45f   :  { %7751 = vsyncpa [#allocation6], 1 }
 0x460   :  { %7752 = vsyncpa [#allocation4], 1 }

</bundles_post_ra>
